<compile_context>
chip_gen: v7x
topology: tpu7x:2x2x1
jax: 0.10.0
libtpu: 0.0.40
codegen_flags: <defaults>
</compile_context>

<pallas_src>
import jax
import jax.numpy as jnp
from jax.experimental import pallas as pl
from jax.experimental.pallas import tpu as pltpu


_DILATIONS = (1, 1, 1, 2, 2, 4, 4)
_N_ADJ = 4
_K = 2 * _N_ADJ + 1          # 9 taps
_FUSION_DIM = 256            # fusion_state_dim in the PyTorch module
_BN_EPS = 1e-5


def _leaky(v):
    # LeakyReLU(negative_slope=0.01), f32 element-wise math on the VPU.
    return jnp.where(v >= 0, v, 0.01 * v)


def _conv_bn_lrelu(x, w2d, b, gamma, beta, dilation):
    """Circular dilated Conv1d + BatchNorm1d (training-mode batch stats) + LeakyReLU.

    x:     (B, Cin, N) channel-major (NCW), N on lanes.
    w2d:   (Cout, 9*Cin), column index k*Cin + ci  (tap-major, matches taps below).
    b, gamma, beta: (Cout, 1).
    """
    B, Cin, N = x.shape
    pad = _N_ADJ * dilation

    # Circular padding along the point (lane) axis — exactly the PyTorch torch.cat.
    xp = jnp.concatenate([x[:, :, N - pad:], x, x[:, :, :pad]], axis=-1)

    # im2col: 9 taps stacked along the channel (sublane) axis -> (B, 9*Cin, N).
    # Each tap is a static lane slice of the padded ring; the sublane concat is
    # tile-aligned because Cin is a multiple of 8.
    taps = jnp.concatenate(
        [xp[:, :, k * dilation:k * dilation + N] for k in range(_K)], axis=1)

    # One MXU matmul per (tiny, static) batch element: (Cout, 9Cin) @ (9Cin, N).
    acc = jnp.stack(
        [jnp.dot(w2d, taps[bi], preferred_element_type=jnp.float32)
         for bi in range(B)], axis=0) + b[None]                    # (B, Cout, N)

    # BatchNorm1d batch statistics over (batch, points): lane reduce then batch
    # reduce; var = E[x^2] - mean^2 clamped at 0 to avoid f32 cancellation.
    cnt = B * N
    s1 = jnp.sum(jnp.sum(acc, axis=-1, keepdims=True), axis=0, keepdims=True)
    s2 = jnp.sum(jnp.sum(acc * acc, axis=-1, keepdims=True), axis=0, keepdims=True)
    mean = s1 / cnt
    var = jnp.maximum(s2 / cnt - mean * mean, 0.0)
    y = (acc - mean) * (gamma[None] * jax.lax.rsqrt(var + _BN_EPS)) + beta[None]
    return _leaky(y)


def _snake_fused_kernel(x_ref,
                        head_w_ref, head_b_ref, head_g_ref, head_be_ref,
                        res_w_ref, res_b_ref, res_g_ref, res_be_ref,
                        w_fs_ref, b_fs_ref, w1g_ref,
                        w2_ref, b2_ref, w3_ref, b3_ref,
                        o_ref, state_ref):
    x = x_ref[...]                       # (B, feature_dim, N)
    B = x.shape[0]
    N = x.shape[-1]
    sd = head_b_ref.shape[0]             # state_dim

    # head block
    cur = _conv_bn_lrelu(x, head_w_ref[...], head_b_ref[...],
                         head_g_ref[...], head_be_ref[...], dilation=1)
    state_ref[:, 0:sd, :] = cur          # write-through to VMEM state scratch

    # 7 residual blocks: x = res_i(x) + x, each state written into its scratch slice
    for i, d in enumerate(_DILATIONS):
        y = _conv_bn_lrelu(cur, res_w_ref[i], res_b_ref[i],
                           res_g_ref[i], res_be_ref[i], dilation=d)
        cur = y + cur
        state_ref[:, (i + 1) * sd:(i + 2) * sd, :] = cur

    # Fusion 1x1 conv and the state half of prediction conv1 share the same LHS,
    # so they are merged into one (2*256, 8*sd) bf16 weight (biases folded in).
    w_fs = w_fs_ref[...]                 # (512, 8*sd) bf16
    both = jnp.stack(
        [jnp.dot(w_fs, state_ref[bi].astype(w_fs.dtype),
                 preferred_element_type=jnp.float32) for bi in range(B)],
        axis=0) + b_fs_ref[...][None]                              # (B, 512, N) f32
    fused = both[:, :_FUSION_DIM, :]     # fusion conv output
    sp = both[:, _FUSION_DIM:, :]        # prediction conv1, state part (incl. b1)

    # global max over points (lane reduction), then the global half of conv1.
    g = jnp.max(fused, axis=-1, keepdims=True)                     # (B, 256, 1)
    w1g = w1g_ref[...]                   # (256, 256) bf16
    gb = jnp.broadcast_to(g, (B, _FUSION_DIM, N)).astype(w1g.dtype)
    gp = jnp.stack(
        [jnp.dot(w1g, gb[bi], preferred_element_type=jnp.float32)
         for bi in range(B)], axis=0)                              # (B, 256, N)

    # prediction head (need_fea=False path)
    h1 = _leaky(sp + gp)                                           # (B, 256, N) f32
    w2 = w2_ref[...]                     # (64, 256) bf16
    h2 = _leaky(jnp.stack(
        [jnp.dot(w2, h1[bi].astype(w2.dtype),
                 preferred_element_type=jnp.float32) for bi in range(B)],
        axis=0) + b2_ref[...][None])                               # (B, 64, N)
    w3 = w3_ref[...]                     # (2, 64) f32 (final head kept f32)
    out = jnp.stack(
        [jnp.dot(w3, h2[bi], preferred_element_type=jnp.float32)
         for bi in range(B)], axis=0) + b3_ref[...][None]          # (B, 2, N)
    o_ref[...] = out


# ---------------------------------------------------------------------------
# Wrapper
# ---------------------------------------------------------------------------
def _full_spec(shape):
    nd = len(shape)
    return pl.BlockSpec(shape, lambda i, _nd=nd: (0,) * _nd)


def snake_forward(x, p):
    """x: (B, feature_dim, N) channel-major (PyTorch NCW); returns (B, 2, N)."""
    B, F, N = x.shape
    sd = p['head_b'].shape[0]
    inputs = [x,
              p['head_w'], p['head_b'], p['head_g'], p['head_be'],
              p['res_w'], p['res_b'], p['res_g'], p['res_be'],
              p['w_fs'], p['b_fs'], p['w1g'],
              p['w2'], p['b2'], p['w3'], p['b3']]

    flops = (2 * B * N * sd * (_K * F)
             + len(_DILATIONS) * 2 * B * N * sd * (_K * sd)
             + 2 * B * N * (2 * _FUSION_DIM) * (8 * sd)
             + 2 * B * N * _FUSION_DIM * _FUSION_DIM
             + 2 * B * N * 64 * _FUSION_DIM
             + 2 * B * N * 2 * 64)
    bytes_accessed = (sum(int(a.size) * a.dtype.itemsize for a in inputs)
                      + B * 2 * N * 4)
    cost = pl.CostEstimate(flops=int(flops),
                           transcendentals=(len(_DILATIONS) + 1) * sd,
                           bytes_accessed=int(bytes_accessed))

    out = pl.pallas_call(
        _snake_fused_kernel,
        grid=(1,),
        in_specs=[_full_spec(a.shape) for a in inputs],
        out_specs=_full_spec((B, 2, N)),
        out_shape=jax.ShapeDtypeStruct((B, 2, N), jnp.float32),
        scratch_shapes=[pltpu.VMEM((B, 8 * sd, N), jnp.float32)],
        compiler_params=pltpu.CompilerParams(
            dimension_semantics=("arbitrary",),
            vmem_limit_bytes=32 * 1024 * 1024),
        cost_estimate=cost,
    )(*inputs)
    return out


# ---------------------------------------------------------------------------
# Deterministic synthetic parameters (PyTorch-structured) + kernel packing
# ---------------------------------------------------------------------------
def init_params(key, state_dim, feature_dim):
    keys = iter(jax.random.split(key, 32))

    def rand(shape, scale=0.1):
        return scale * jax.random.normal(next(keys), shape, jnp.float32)

    def block(cin, cout):
        return dict(w=rand((cout, cin, _K)),             # Conv1d weight (Cout, Cin, K)
                    b=rand((cout,), 0.05),               # conv bias
                    gamma=jnp.ones((cout,), jnp.float32),
                    beta=jnp.zeros((cout,), jnp.float32))

    params = {'head': block(feature_dim, state_dim)}
    for i in range(7):
        params[f'res{i}'] = block(state_dim, state_dim)

    cs = state_dim * 8
    params['fusion'] = dict(w=rand((_FUSION_DIM, cs)), b=rand((_FUSION_DIM,), 0.05))
    params['pred'] = dict(
        w1=rand((256, _FUSION_DIM + cs)), b1=rand((256,), 0.05),   # conv1 (in=[global|state])
        w2=rand((64, 256)), b2=rand((64,), 0.05),
        w3=rand((2, 64)), b3=rand((2,), 0.05))
    return params


def pack_params(params):
    """Reshape / merge module params into the fused channel-major kernel layout."""
    def pack_block(p):
        cout, cin, K = p['w'].shape
        # column index k*Cin + ci (tap-major) to match the in-kernel tap concat
        w2d = p['w'].transpose(0, 2, 1).reshape(cout, K * cin)
        return (w2d, p['b'].reshape(cout, 1),
                p['gamma'].reshape(cout, 1), p['beta'].reshape(cout, 1))

    hw, hb, hg, hbe = pack_block(params['head'])
    rw, rb, rg, rbe = zip(*[pack_block(params[f'res{i}']) for i in range(7)])

    pred = params['pred']
    w1g = pred['w1'][:, :_FUSION_DIM]     # acts on global_state (first 256 channels)
    w1s = pred['w1'][:, _FUSION_DIM:]     # acts on the 8*state_dim state channels

    return dict(
        head_w=hw, head_b=hb, head_g=hg, head_be=hbe,
        res_w=jnp.stack(rw), res_b=jnp.stack(rb),
        res_g=jnp.stack(rg), res_be=jnp.stack(rbe),
        # fusion conv + state half of prediction conv1 merged; bf16 MXU operands
        w_fs=jnp.concatenate([params['fusion']['w'], w1s],
                             axis=0).astype(jnp.bfloat16),          # (512, 8*sd)
        b_fs=jnp.concatenate([params['fusion']['b'],
                              pred['b1']]).reshape(-1, 1),           # (512, 1) f32
        w1g=w1g.astype(jnp.bfloat16),                                # (256, 256)
        w2=pred['w2'].astype(jnp.bfloat16), b2=pred['b2'].reshape(-1, 1),
        w3=pred['w3'], b3=pred['b3'].reshape(-1, 1),                 # final head f32
    )


if __name__ == "__main__":
    B, N, feature_dim, state_dim = 2, 40, 16, 8
    key = jax.random.PRNGKey(0)
    kx, kp = jax.random.split(key)

    # PyTorch NCW input layout: (batch, feature_dim, n_points)
    x = jax.random.normal(kx, (B, feature_dim, N), jnp.float32)
    params = pack_params(init_params(kp, state_dim, feature_dim))

    out = jax.jit(lambda inp: snake_forward(inp, params))(x)
    out = jax.block_until_ready(out)
    assert out.shape == (B, 2, N), out.shape
    assert bool(jnp.all(jnp.isfinite(out)))
    print("KERNEL_OK")
</pallas_src>

<mosaic_0001>
module attributes {stable_mosaic.version = 11 : i64} {
  func.func @_snake_fused_kernel(%arg0: i32, %arg1: memref<2x16x40xf32, #tpu.memory_space<vmem>>, %arg2: memref<8x144xf32, #tpu.memory_space<vmem>>, %arg3: memref<8x1xf32, #tpu.memory_space<vmem>>, %arg4: memref<8x1xf32, #tpu.memory_space<vmem>>, %arg5: memref<8x1xf32, #tpu.memory_space<vmem>>, %arg6: memref<7x8x72xf32, #tpu.memory_space<vmem>>, %arg7: memref<7x8x1xf32, #tpu.memory_space<vmem>>, %arg8: memref<7x8x1xf32, #tpu.memory_space<vmem>>, %arg9: memref<7x8x1xf32, #tpu.memory_space<vmem>>, %arg10: memref<512x64xbf16, #tpu.memory_space<vmem>>, %arg11: memref<512x1xf32, #tpu.memory_space<vmem>>, %arg12: memref<256x256xbf16, #tpu.memory_space<vmem>>, %arg13: memref<64x256xbf16, #tpu.memory_space<vmem>>, %arg14: memref<64x1xf32, #tpu.memory_space<vmem>>, %arg15: memref<2x64xf32, #tpu.memory_space<vmem>>, %arg16: memref<2x1xf32, #tpu.memory_space<vmem>>, %arg17: memref<2x2x40xf32, #tpu.memory_space<vmem>>, %arg18: memref<2x64x40xf32, #tpu.memory_space<vmem>>) attributes {dimension_semantics = [#tpu.dimension_semantics<arbitrary>], iteration_bounds = array<i64: 1>, scalar_prefetch = 0 : i64, scratch_operands = 1 : i64, tpu.core_type = #tpu.core_type<tc>, window_params = [{pipeline_mode = #tpu.pipeline_mode<synchronous>, transform_indices = @transform_0, window_bounds = array<i64: 2, 16, 40>}, {pipeline_mode = #tpu.pipeline_mode<synchronous>, transform_indices = @transform_1, window_bounds = array<i64: 8, 144>}, {pipeline_mode = #tpu.pipeline_mode<synchronous>, transform_indices = @transform_2, window_bounds = array<i64: 8, 1>}, {pipeline_mode = #tpu.pipeline_mode<synchronous>, transform_indices = @transform_3, window_bounds = array<i64: 8, 1>}, {pipeline_mode = #tpu.pipeline_mode<synchronous>, transform_indices = @transform_4, window_bounds = array<i64: 8, 1>}, {pipeline_mode = #tpu.pipeline_mode<synchronous>, transform_indices = @transform_5, window_bounds = array<i64: 7, 8, 72>}, {pipeline_mode = #tpu.pipeline_mode<synchronous>, transform_indices = @transform_6, window_bounds = array<i64: 7, 8, 1>}, {pipeline_mode = #tpu.pipeline_mode<synchronous>, transform_indices = @transform_7, window_bounds = array<i64: 7, 8, 1>}, {pipeline_mode = #tpu.pipeline_mode<synchronous>, transform_indices = @transform_8, window_bounds = array<i64: 7, 8, 1>}, {pipeline_mode = #tpu.pipeline_mode<synchronous>, transform_indices = @transform_9, window_bounds = array<i64: 512, 64>}, {pipeline_mode = #tpu.pipeline_mode<synchronous>, transform_indices = @transform_10, window_bounds = array<i64: 512, 1>}, {pipeline_mode = #tpu.pipeline_mode<synchronous>, transform_indices = @transform_11, window_bounds = array<i64: 256, 256>}, {pipeline_mode = #tpu.pipeline_mode<synchronous>, transform_indices = @transform_12, window_bounds = array<i64: 64, 256>}, {pipeline_mode = #tpu.pipeline_mode<synchronous>, transform_indices = @transform_13, window_bounds = array<i64: 64, 1>}, {pipeline_mode = #tpu.pipeline_mode<synchronous>, transform_indices = @transform_14, window_bounds = array<i64: 2, 64>}, {pipeline_mode = #tpu.pipeline_mode<synchronous>, transform_indices = @transform_15, window_bounds = array<i64: 2, 1>}, {pipeline_mode = #tpu.pipeline_mode<synchronous>, transform_indices = @transform_16, window_bounds = array<i64: 2, 2, 40>}]} {
    %c0 = arith.constant 0 : index
    %c0_0 = arith.constant 0 : index
    %c0_1 = arith.constant 0 : index
    %0 = vector.load %arg1[%c0, %c0_0, %c0_1] : memref<2x16x40xf32, #tpu.memory_space<vmem>>, vector<2x16x40xf32>
    %c0_2 = arith.constant 0 : index
    %c0_3 = arith.constant 0 : index
    %1 = vector.load %arg2[%c0_2, %c0_3] : memref<8x144xf32, #tpu.memory_space<vmem>>, vector<8x144xf32>
    %c0_4 = arith.constant 0 : index
    %c0_5 = arith.constant 0 : index
    %2 = vector.load %arg3[%c0_4, %c0_5] : memref<8x1xf32, #tpu.memory_space<vmem>>, vector<8x1xf32>
    %c0_6 = arith.constant 0 : index
    %c0_7 = arith.constant 0 : index
    %3 = vector.load %arg4[%c0_6, %c0_7] : memref<8x1xf32, #tpu.memory_space<vmem>>, vector<8x1xf32>
    %c0_8 = arith.constant 0 : index
    %c0_9 = arith.constant 0 : index
    %4 = vector.load %arg5[%c0_8, %c0_9] : memref<8x1xf32, #tpu.memory_space<vmem>>, vector<8x1xf32>
    %5 = vector.extract_strided_slice %0 {offsets = [0, 0, 36], sizes = [2, 16, 4], strides = [1, 1, 1]} : vector<2x16x40xf32> to vector<2x16x4xf32>
    %6 = vector.extract_strided_slice %0 {offsets = [0, 0, 0], sizes = [2, 16, 4], strides = [1, 1, 1]} : vector<2x16x40xf32> to vector<2x16x4xf32>
    %7 = tpu.concatenate %5, %0, %6 in 2 : vector<2x16x4xf32>, vector<2x16x40xf32>, vector<2x16x4xf32> -> vector<2x16x48xf32>
    %8 = vector.extract_strided_slice %7 {offsets = [0, 0, 0], sizes = [2, 16, 40], strides = [1, 1, 1]} : vector<2x16x48xf32> to vector<2x16x40xf32>
    %9 = vector.extract_strided_slice %7 {offsets = [0, 0, 1], sizes = [2, 16, 40], strides = [1, 1, 1]} : vector<2x16x48xf32> to vector<2x16x40xf32>
    %10 = vector.extract_strided_slice %7 {offsets = [0, 0, 2], sizes = [2, 16, 40], strides = [1, 1, 1]} : vector<2x16x48xf32> to vector<2x16x40xf32>
    %11 = vector.extract_strided_slice %7 {offsets = [0, 0, 3], sizes = [2, 16, 40], strides = [1, 1, 1]} : vector<2x16x48xf32> to vector<2x16x40xf32>
    %12 = vector.extract_strided_slice %7 {offsets = [0, 0, 4], sizes = [2, 16, 40], strides = [1, 1, 1]} : vector<2x16x48xf32> to vector<2x16x40xf32>
    %13 = vector.extract_strided_slice %7 {offsets = [0, 0, 5], sizes = [2, 16, 40], strides = [1, 1, 1]} : vector<2x16x48xf32> to vector<2x16x40xf32>
    %14 = vector.extract_strided_slice %7 {offsets = [0, 0, 6], sizes = [2, 16, 40], strides = [1, 1, 1]} : vector<2x16x48xf32> to vector<2x16x40xf32>
    %15 = vector.extract_strided_slice %7 {offsets = [0, 0, 7], sizes = [2, 16, 40], strides = [1, 1, 1]} : vector<2x16x48xf32> to vector<2x16x40xf32>
    %16 = vector.extract_strided_slice %7 {offsets = [0, 0, 8], sizes = [2, 16, 40], strides = [1, 1, 1]} : vector<2x16x48xf32> to vector<2x16x40xf32>
    %17 = tpu.concatenate %8, %9, %10, %11, %12, %13, %14, %15, %16 in 1 : vector<2x16x40xf32>, vector<2x16x40xf32>, vector<2x16x40xf32>, vector<2x16x40xf32>, vector<2x16x40xf32>, vector<2x16x40xf32>, vector<2x16x40xf32>, vector<2x16x40xf32>, vector<2x16x40xf32> -> vector<2x144x40xf32>
    %18 = vector.extract_strided_slice %17 {offsets = [0, 0, 0], sizes = [1, 144, 40], strides = [1, 1, 1]} : vector<2x144x40xf32> to vector<1x144x40xf32>
    %19 = vector.shape_cast %18 : vector<1x144x40xf32> to vector<144x40xf32>
    %cst = arith.constant dense<0.000000e+00> : vector<8x40xf32>
    %20 = tpu.matmul %1, %19, %cst {dimension_numbers = #tpu.dot_dimension_numbers<[1], [0], [0], [1], [0, 0, 1, 1], [], []>} : vector<8x144xf32>, vector<144x40xf32>, vector<8x40xf32> -> vector<8x40xf32>
    %21 = vector.extract_strided_slice %17 {offsets = [1, 0, 0], sizes = [1, 144, 40], strides = [1, 1, 1]} : vector<2x144x40xf32> to vector<1x144x40xf32>
    %22 = vector.shape_cast %21 : vector<1x144x40xf32> to vector<144x40xf32>
    %cst_10 = arith.constant dense<0.000000e+00> : vector<8x40xf32>
    %23 = tpu.matmul %1, %22, %cst_10 {dimension_numbers = #tpu.dot_dimension_numbers<[1], [0], [0], [1], [0, 0, 1, 1], [], []>} : vector<8x144xf32>, vector<144x40xf32>, vector<8x40xf32> -> vector<8x40xf32>
    %24 = vector.shape_cast %20 : vector<8x40xf32> to vector<1x8x40xf32>
    %25 = vector.shape_cast %23 : vector<8x40xf32> to vector<1x8x40xf32>
    %26 = tpu.concatenate %24, %25 in 0 : vector<1x8x40xf32>, vector<1x8x40xf32> -> vector<2x8x40xf32>
    %27 = vector.shape_cast %2 : vector<8x1xf32> to vector<1x8x1xf32>
    %28 = vector.broadcast %27 : vector<1x8x1xf32> to vector<2x8x40xf32>
    %29 = arith.addf %26, %28 : vector<2x8x40xf32>
    %cst_11 = arith.constant dense<0.000000e+00> : vector<2x8xf32>
    %30 = vector.multi_reduction <add>, %29, %cst_11 [2] : vector<2x8x40xf32> to vector<2x8xf32>
    %31 = vector.shape_cast %30 : vector<2x8xf32> to vector<2x8x1xf32>
    %cst_12 = arith.constant dense<0.000000e+00> : vector<8x1xf32>
    %32 = vector.multi_reduction <add>, %31, %cst_12 [0] : vector<2x8x1xf32> to vector<8x1xf32>
    %33 = vector.shape_cast %32 : vector<8x1xf32> to vector<1x8x1xf32>
    %34 = arith.mulf %29, %29 : vector<2x8x40xf32>
    %cst_13 = arith.constant dense<0.000000e+00> : vector<2x8xf32>
    %35 = vector.multi_reduction <add>, %34, %cst_13 [2] : vector<2x8x40xf32> to vector<2x8xf32>
    %36 = vector.shape_cast %35 : vector<2x8xf32> to vector<2x8x1xf32>
    %cst_14 = arith.constant dense<0.000000e+00> : vector<8x1xf32>
    %37 = vector.multi_reduction <add>, %36, %cst_14 [0] : vector<2x8x1xf32> to vector<8x1xf32>
    %38 = vector.shape_cast %37 : vector<8x1xf32> to vector<1x8x1xf32>
    %cst_15 = arith.constant 8.000000e+01 : f32
    %39 = vector.broadcast %cst_15 : f32 to vector<1x8x1xf32>
    %40 = arith.divf %33, %39 : vector<1x8x1xf32>
    %cst_16 = arith.constant 8.000000e+01 : f32
    %41 = vector.broadcast %cst_16 : f32 to vector<1x8x1xf32>
    %42 = arith.divf %38, %41 : vector<1x8x1xf32>
    %43 = arith.mulf %40, %40 : vector<1x8x1xf32>
    %44 = arith.subf %42, %43 : vector<1x8x1xf32>
    %cst_17 = arith.constant 0.000000e+00 : f32
    %45 = vector.broadcast %cst_17 : f32 to vector<1x8x1xf32>
    %46 = arith.maximumf %44, %45 : vector<1x8x1xf32>
    %47 = vector.broadcast %40 : vector<1x8x1xf32> to vector<2x8x40xf32>
    %48 = arith.subf %29, %47 : vector<2x8x40xf32>
    %49 = vector.shape_cast %3 : vector<8x1xf32> to vector<1x8x1xf32>
    %cst_18 = arith.constant 9.99999974E-6 : f32
    %50 = vector.broadcast %cst_18 : f32 to vector<1x8x1xf32>
    %51 = arith.addf %46, %50 : vector<1x8x1xf32>
    %52 = math.rsqrt %51 : vector<1x8x1xf32>
    %53 = arith.mulf %49, %52 : vector<1x8x1xf32>
    %54 = vector.broadcast %53 : vector<1x8x1xf32> to vector<2x8x40xf32>
    %55 = arith.mulf %48, %54 : vector<2x8x40xf32>
    %56 = vector.shape_cast %4 : vector<8x1xf32> to vector<1x8x1xf32>
    %57 = vector.broadcast %56 : vector<1x8x1xf32> to vector<2x8x40xf32>
    %58 = arith.addf %55, %57 : vector<2x8x40xf32>
    %cst_19 = arith.constant 0.000000e+00 : f32
    %59 = vector.broadcast %cst_19 : f32 to vector<2x8x40xf32>
    %60 = arith.cmpf oge, %58, %59 : vector<2x8x40xf32>
    %cst_20 = arith.constant 0.00999999977 : f32
    %61 = vector.broadcast %cst_20 : f32 to vector<2x8x40xf32>
    %62 = arith.mulf %61, %58 : vector<2x8x40xf32>
    %63 = arith.select %60, %58, %62 : vector<2x8x40xi1>, vector<2x8x40xf32>
    %c0_21 = arith.constant 0 : index
    %c0_22 = arith.constant 0 : index
    %c0_23 = arith.constant 0 : index
    %64 = vector.load %arg18[%c0_21, %c0_22, %c0_23] : memref<2x64x40xf32, #tpu.memory_space<vmem>>, vector<2x8x40xf32>
    tpu.vector_store %arg18[%c0_21, %c0_22, %c0_23], %63 {strides = array<i32>} : memref<2x64x40xf32, #tpu.memory_space<vmem>>, vector<2x8x40xf32>,
    %c0_24 = arith.constant 0 : index
    %c0_25 = arith.constant 0 : index
    %c0_26 = arith.constant 0 : index
    %65 = vector.load %arg6[%c0_24, %c0_25, %c0_26] : memref<7x8x72xf32, #tpu.memory_space<vmem>>, vector<1x8x72xf32>
    %66 = vector.shape_cast %65 : vector<1x8x72xf32> to vector<8x72xf32>
    %c0_27 = arith.constant 0 : index
    %c0_28 = arith.constant 0 : index
    %c0_29 = arith.constant 0 : index
    %67 = vector.load %arg7[%c0_27, %c0_28, %c0_29] : memref<7x8x1xf32, #tpu.memory_space<vmem>>, vector<1x8x1xf32>
    %68 = vector.shape_cast %67 : vector<1x8x1xf32> to vector<8x1xf32>
    %c0_30 = arith.constant 0 : index
    %c0_31 = arith.constant 0 : index
    %c0_32 = arith.constant 0 : index
    %69 = vector.load %arg8[%c0_30, %c0_31, %c0_32] : memref<7x8x1xf32, #tpu.memory_space<vmem>>, vector<1x8x1xf32>
    %70 = vector.shape_cast %69 : vector<1x8x1xf32> to vector<8x1xf32>
    %c0_33 = arith.constant 0 : index
    %c0_34 = arith.constant 0 : index
    %c0_35 = arith.constant 0 : index
    %71 = vector.load %arg9[%c0_33, %c0_34, %c0_35] : memref<7x8x1xf32, #tpu.memory_space<vmem>>, vector<1x8x1xf32>
    %72 = vector.shape_cast %71 : vector<1x8x1xf32> to vector<8x1xf32>
    %73 = vector.extract_strided_slice %63 {offsets = [0, 0, 36], sizes = [2, 8, 4], strides = [1, 1, 1]} : vector<2x8x40xf32> to vector<2x8x4xf32>
    %74 = vector.extract_strided_slice %63 {offsets = [0, 0, 0], sizes = [2, 8, 4], strides = [1, 1, 1]} : vector<2x8x40xf32> to vector<2x8x4xf32>
    %75 = tpu.concatenate %73, %63, %74 in 2 : vector<2x8x4xf32>, vector<2x8x40xf32>, vector<2x8x4xf32> -> vector<2x8x48xf32>
    %76 = vector.extract_strided_slice %75 {offsets = [0, 0, 0], sizes = [2, 8, 40], strides = [1, 1, 1]} : vector<2x8x48xf32> to vector<2x8x40xf32>
    %77 = vector.extract_strided_slice %75 {offsets = [0, 0, 1], sizes = [2, 8, 40], strides = [1, 1, 1]} : vector<2x8x48xf32> to vector<2x8x40xf32>
    %78 = vector.extract_strided_slice %75 {offsets = [0, 0, 2], sizes = [2, 8, 40], strides = [1, 1, 1]} : vector<2x8x48xf32> to vector<2x8x40xf32>
    %79 = vector.extract_strided_slice %75 {offsets = [0, 0, 3], sizes = [2, 8, 40], strides = [1, 1, 1]} : vector<2x8x48xf32> to vector<2x8x40xf32>
    %80 = vector.extract_strided_slice %75 {offsets = [0, 0, 4], sizes = [2, 8, 40], strides = [1, 1, 1]} : vector<2x8x48xf32> to vector<2x8x40xf32>
    %81 = vector.extract_strided_slice %75 {offsets = [0, 0, 5], sizes = [2, 8, 40], strides = [1, 1, 1]} : vector<2x8x48xf32> to vector<2x8x40xf32>
    %82 = vector.extract_strided_slice %75 {offsets = [0, 0, 6], sizes = [2, 8, 40], strides = [1, 1, 1]} : vector<2x8x48xf32> to vector<2x8x40xf32>
    %83 = vector.extract_strided_slice %75 {offsets = [0, 0, 7], sizes = [2, 8, 40], strides = [1, 1, 1]} : vector<2x8x48xf32> to vector<2x8x40xf32>
    %84 = vector.extract_strided_slice %75 {offsets = [0, 0, 8], sizes = [2, 8, 40], strides = [1, 1, 1]} : vector<2x8x48xf32> to vector<2x8x40xf32>
    %85 = tpu.concatenate %76, %77, %78, %79, %80, %81, %82, %83, %84 in 1 : vector<2x8x40xf32>, vector<2x8x40xf32>, vector<2x8x40xf32>, vector<2x8x40xf32>, vector<2x8x40xf32>, vector<2x8x40xf32>, vector<2x8x40xf32>, vector<2x8x40xf32>, vector<2x8x40xf32> -> vector<2x72x40xf32>
    %86 = vector.extract_strided_slice %85 {offsets = [0, 0, 0], sizes = [1, 72, 40], strides = [1, 1, 1]} : vector<2x72x40xf32> to vector<1x72x40xf32>
    %87 = vector.shape_cast %86 : vector<1x72x40xf32> to vector<72x40xf32>
    %cst_36 = arith.constant dense<0.000000e+00> : vector<8x40xf32>
    %88 = tpu.matmul %66, %87, %cst_36 {dimension_numbers = #tpu.dot_dimension_numbers<[1], [0], [0], [1], [0, 0, 1, 1], [], []>} : vector<8x72xf32>, vector<72x40xf32>, vector<8x40xf32> -> vector<8x40xf32>
    %89 = vector.extract_strided_slice %85 {offsets = [1, 0, 0], sizes = [1, 72, 40], strides = [1, 1, 1]} : vector<2x72x40xf32> to vector<1x72x40xf32>
    %90 = vector.shape_cast %89 : vector<1x72x40xf32> to vector<72x40xf32>
    %cst_37 = arith.constant dense<0.000000e+00> : vector<8x40xf32>
    %91 = tpu.matmul %66, %90, %cst_37 {dimension_numbers = #tpu.dot_dimension_numbers<[1], [0], [0], [1], [0, 0, 1, 1], [], []>} : vector<8x72xf32>, vector<72x40xf32>, vector<8x40xf32> -> vector<8x40xf32>
    %92 = vector.shape_cast %88 : vector<8x40xf32> to vector<1x8x40xf32>
    %93 = vector.shape_cast %91 : vector<8x40xf32> to vector<1x8x40xf32>
    %94 = tpu.concatenate %92, %93 in 0 : vector<1x8x40xf32>, vector<1x8x40xf32> -> vector<2x8x40xf32>
    %95 = vector.shape_cast %68 : vector<8x1xf32> to vector<1x8x1xf32>
    %96 = vector.broadcast %95 : vector<1x8x1xf32> to vector<2x8x40xf32>
    %97 = arith.addf %94, %96 : vector<2x8x40xf32>
    %cst_38 = arith.constant dense<0.000000e+00> : vector<2x8xf32>
    %98 = vector.multi_reduction <add>, %97, %cst_38 [2] : vector<2x8x40xf32> to vector<2x8xf32>
    %99 = vector.shape_cast %98 : vector<2x8xf32> to vector<2x8x1xf32>
    %cst_39 = arith.constant dense<0.000000e+00> : vector<8x1xf32>
    %100 = vector.multi_reduction <add>, %99, %cst_39 [0] : vector<2x8x1xf32> to vector<8x1xf32>
    %101 = vector.shape_cast %100 : vector<8x1xf32> to vector<1x8x1xf32>
    %102 = arith.mulf %97, %97 : vector<2x8x40xf32>
    %cst_40 = arith.constant dense<0.000000e+00> : vector<2x8xf32>
    %103 = vector.multi_reduction <add>, %102, %cst_40 [2] : vector<2x8x40xf32> to vector<2x8xf32>
    %104 = vector.shape_cast %103 : vector<2x8xf32> to vector<2x8x1xf32>
    %cst_41 = arith.constant dense<0.000000e+00> : vector<8x1xf32>
    %105 = vector.multi_reduction <add>, %104, %cst_41 [0] : vector<2x8x1xf32> to vector<8x1xf32>
    %106 = vector.shape_cast %105 : vector<8x1xf32> to vector<1x8x1xf32>
    %cst_42 = arith.constant 8.000000e+01 : f32
    %107 = vector.broadcast %cst_42 : f32 to vector<1x8x1xf32>
    %108 = arith.divf %101, %107 : vector<1x8x1xf32>
    %cst_43 = arith.constant 8.000000e+01 : f32
    %109 = vector.broadcast %cst_43 : f32 to vector<1x8x1xf32>
    %110 = arith.divf %106, %109 : vector<1x8x1xf32>
    %111 = arith.mulf %108, %108 : vector<1x8x1xf32>
    %112 = arith.subf %110, %111 : vector<1x8x1xf32>
    %cst_44 = arith.constant 0.000000e+00 : f32
    %113 = vector.broadcast %cst_44 : f32 to vector<1x8x1xf32>
    %114 = arith.maximumf %112, %113 : vector<1x8x1xf32>
    %115 = vector.broadcast %108 : vector<1x8x1xf32> to vector<2x8x40xf32>
    %116 = arith.subf %97, %115 : vector<2x8x40xf32>
    %117 = vector.shape_cast %70 : vector<8x1xf32> to vector<1x8x1xf32>
    %cst_45 = arith.constant 9.99999974E-6 : f32
    %118 = vector.broadcast %cst_45 : f32 to vector<1x8x1xf32>
    %119 = arith.addf %114, %118 : vector<1x8x1xf32>
    %120 = math.rsqrt %119 : vector<1x8x1xf32>
    %121 = arith.mulf %117, %120 : vector<1x8x1xf32>
    %122 = vector.broadcast %121 : vector<1x8x1xf32> to vector<2x8x40xf32>
    %123 = arith.mulf %116, %122 : vector<2x8x40xf32>
    %124 = vector.shape_cast %72 : vector<8x1xf32> to vector<1x8x1xf32>
    %125 = vector.broadcast %124 : vector<1x8x1xf32> to vector<2x8x40xf32>
    %126 = arith.addf %123, %125 : vector<2x8x40xf32>
    %cst_46 = arith.constant 0.000000e+00 : f32
    %127 = vector.broadcast %cst_46 : f32 to vector<2x8x40xf32>
    %128 = arith.cmpf oge, %126, %127 : vector<2x8x40xf32>
    %cst_47 = arith.constant 0.00999999977 : f32
    %129 = vector.broadcast %cst_47 : f32 to vector<2x8x40xf32>
    %130 = arith.mulf %129, %126 : vector<2x8x40xf32>
    %131 = arith.select %128, %126, %130 : vector<2x8x40xi1>, vector<2x8x40xf32>
    %132 = arith.addf %131, %63 : vector<2x8x40xf32>
    %c0_48 = arith.constant 0 : index
    %c8 = arith.constant 8 : index
    %c0_49 = arith.constant 0 : index
    %133 = vector.load %arg18[%c0_48, %c8, %c0_49] : memref<2x64x40xf32, #tpu.memory_space<vmem>>, vector<2x8x40xf32>
    tpu.vector_store %arg18[%c0_48, %c8, %c0_49], %132 {strides = array<i32>} : memref<2x64x40xf32, #tpu.memory_space<vmem>>, vector<2x8x40xf32>,
    %c1 = arith.constant 1 : index
    %c0_50 = arith.constant 0 : index
    %c0_51 = arith.constant 0 : index
    %134 = vector.load %arg6[%c1, %c0_50, %c0_51] : memref<7x8x72xf32, #tpu.memory_space<vmem>>, vector<1x8x72xf32>
    %135 = vector.shape_cast %134 : vector<1x8x72xf32> to vector<8x72xf32>
    %c1_52 = arith.constant 1 : index
    %c0_53 = arith.constant 0 : index
    %c0_54 = arith.constant 0 : index
    %136 = vector.load %arg7[%c1_52, %c0_53, %c0_54] : memref<7x8x1xf32, #tpu.memory_space<vmem>>, vector<1x8x1xf32>
    %137 = vector.shape_cast %136 : vector<1x8x1xf32> to vector<8x1xf32>
    %c1_55 = arith.constant 1 : index
    %c0_56 = arith.constant 0 : index
    %c0_57 = arith.constant 0 : index
    %138 = vector.load %arg8[%c1_55, %c0_56, %c0_57] : memref<7x8x1xf32, #tpu.memory_space<vmem>>, vector<1x8x1xf32>
    %139 = vector.shape_cast %138 : vector<1x8x1xf32> to vector<8x1xf32>
    %c1_58 = arith.constant 1 : index
    %c0_59 = arith.constant 0 : index
    %c0_60 = arith.constant 0 : index
    %140 = vector.load %arg9[%c1_58, %c0_59, %c0_60] : memref<7x8x1xf32, #tpu.memory_space<vmem>>, vector<1x8x1xf32>
    %141 = vector.shape_cast %140 : vector<1x8x1xf32> to vector<8x1xf32>
    %142 = vector.extract_strided_slice %132 {offsets = [0, 0, 36], sizes = [2, 8, 4], strides = [1, 1, 1]} : vector<2x8x40xf32> to vector<2x8x4xf32>
    %143 = vector.extract_strided_slice %132 {offsets = [0, 0, 0], sizes = [2, 8, 4], strides = [1, 1, 1]} : vector<2x8x40xf32> to vector<2x8x4xf32>
    %144 = tpu.concatenate %142, %132, %143 in 2 : vector<2x8x4xf32>, vector<2x8x40xf32>, vector<2x8x4xf32> -> vector<2x8x48xf32>
    %145 = vector.extract_strided_slice %144 {offsets = [0, 0, 0], sizes = [2, 8, 40], strides = [1, 1, 1]} : vector<2x8x48xf32> to vector<2x8x40xf32>
    %146 = vector.extract_strided_slice %144 {offsets = [0, 0, 1], sizes = [2, 8, 40], strides = [1, 1, 1]} : vector<2x8x48xf32> to vector<2x8x40xf32>
    %147 = vector.extract_strided_slice %144 {offsets = [0, 0, 2], sizes = [2, 8, 40], strides = [1, 1, 1]} : vector<2x8x48xf32> to vector<2x8x40xf32>
    %148 = vector.extract_strided_slice %144 {offsets = [0, 0, 3], sizes = [2, 8, 40], strides = [1, 1, 1]} : vector<2x8x48xf32> to vector<2x8x40xf32>
    %149 = vector.extract_strided_slice %144 {offsets = [0, 0, 4], sizes = [2, 8, 40], strides = [1, 1, 1]} : vector<2x8x48xf32> to vector<2x8x40xf32>
    %150 = vector.extract_strided_slice %144 {offsets = [0, 0, 5], sizes = [2, 8, 40], strides = [1, 1, 1]} : vector<2x8x48xf32> to vector<2x8x40xf32>
    %151 = vector.extract_strided_slice %144 {offsets = [0, 0, 6], sizes = [2, 8, 40], strides = [1, 1, 1]} : vector<2x8x48xf32> to vector<2x8x40xf32>
    %152 = vector.extract_strided_slice %144 {offsets = [0, 0, 7], sizes = [2, 8, 40], strides = [1, 1, 1]} : vector<2x8x48xf32> to vector<2x8x40xf32>
    %153 = vector.extract_strided_slice %144 {offsets = [0, 0, 8], sizes = [2, 8, 40], strides = [1, 1, 1]} : vector<2x8x48xf32> to vector<2x8x40xf32>
    %154 = tpu.concatenate %145, %146, %147, %148, %149, %150, %151, %152, %153 in 1 : vector<2x8x40xf32>, vector<2x8x40xf32>, vector<2x8x40xf32>, vector<2x8x40xf32>, vector<2x8x40xf32>, vector<2x8x40xf32>, vector<2x8x40xf32>, vector<2x8x40xf32>, vector<2x8x40xf32> -> vector<2x72x40xf32>
    %155 = vector.extract_strided_slice %154 {offsets = [0, 0, 0], sizes = [1, 72, 40], strides = [1, 1, 1]} : vector<2x72x40xf32> to vector<1x72x40xf32>
    %156 = vector.shape_cast %155 : vector<1x72x40xf32> to vector<72x40xf32>
    %cst_61 = arith.constant dense<0.000000e+00> : vector<8x40xf32>
    %157 = tpu.matmul %135, %156, %cst_61 {dimension_numbers = #tpu.dot_dimension_numbers<[1], [0], [0], [1], [0, 0, 1, 1], [], []>} : vector<8x72xf32>, vector<72x40xf32>, vector<8x40xf32> -> vector<8x40xf32>
    %158 = vector.extract_strided_slice %154 {offsets = [1, 0, 0], sizes = [1, 72, 40], strides = [1, 1, 1]} : vector<2x72x40xf32> to vector<1x72x40xf32>
    %159 = vector.shape_cast %158 : vector<1x72x40xf32> to vector<72x40xf32>
    %cst_62 = arith.constant dense<0.000000e+00> : vector<8x40xf32>
    %160 = tpu.matmul %135, %159, %cst_62 {dimension_numbers = #tpu.dot_dimension_numbers<[1], [0], [0], [1], [0, 0, 1, 1], [], []>} : vector<8x72xf32>, vector<72x40xf32>, vector<8x40xf32> -> vector<8x40xf32>
    %161 = vector.shape_cast %157 : vector<8x40xf32> to vector<1x8x40xf32>
    %162 = vector.shape_cast %160 : vector<8x40xf32> to vector<1x8x40xf32>
    %163 = tpu.concatenate %161, %162 in 0 : vector<1x8x40xf32>, vector<1x8x40xf32> -> vector<2x8x40xf32>
    %164 = vector.shape_cast %137 : vector<8x1xf32> to vector<1x8x1xf32>
    %165 = vector.broadcast %164 : vector<1x8x1xf32> to vector<2x8x40xf32>
    %166 = arith.addf %163, %165 : vector<2x8x40xf32>
    %cst_63 = arith.constant dense<0.000000e+00> : vector<2x8xf32>
    %167 = vector.multi_reduction <add>, %166, %cst_63 [2] : vector<2x8x40xf32> to vector<2x8xf32>
    %168 = vector.shape_cast %167 : vector<2x8xf32> to vector<2x8x1xf32>
    %cst_64 = arith.constant dense<0.000000e+00> : vector<8x1xf32>
    %169 = vector.multi_reduction <add>, %168, %cst_64 [0] : vector<2x8x1xf32> to vector<8x1xf32>
    %170 = vector.shape_cast %169 : vector<8x1xf32> to vector<1x8x1xf32>
    %171 = arith.mulf %166, %166 : vector<2x8x40xf32>
    %cst_65 = arith.constant dense<0.000000e+00> : vector<2x8xf32>
    %172 = vector.multi_reduction <add>, %171, %cst_65 [2] : vector<2x8x40xf32> to vector<2x8xf32>
    %173 = vector.shape_cast %172 : vector<2x8xf32> to vector<2x8x1xf32>
    %cst_66 = arith.constant dense<0.000000e+00> : vector<8x1xf32>
    %174 = vector.multi_reduction <add>, %173, %cst_66 [0] : vector<2x8x1xf32> to vector<8x1xf32>
    %175 = vector.shape_cast %174 : vector<8x1xf32> to vector<1x8x1xf32>
    %cst_67 = arith.constant 8.000000e+01 : f32
    %176 = vector.broadcast %cst_67 : f32 to vector<1x8x1xf32>
    %177 = arith.divf %170, %176 : vector<1x8x1xf32>
    %cst_68 = arith.constant 8.000000e+01 : f32
    %178 = vector.broadcast %cst_68 : f32 to vector<1x8x1xf32>
    %179 = arith.divf %175, %178 : vector<1x8x1xf32>
    %180 = arith.mulf %177, %177 : vector<1x8x1xf32>
    %181 = arith.subf %179, %180 : vector<1x8x1xf32>
    %cst_69 = arith.constant 0.000000e+00 : f32
    %182 = vector.broadcast %cst_69 : f32 to vector<1x8x1xf32>
    %183 = arith.maximumf %181, %182 : vector<1x8x1xf32>
    %184 = vector.broadcast %177 : vector<1x8x1xf32> to vector<2x8x40xf32>
    %185 = arith.subf %166, %184 : vector<2x8x40xf32>
    %186 = vector.shape_cast %139 : vector<8x1xf32> to vector<1x8x1xf32>
    %cst_70 = arith.constant 9.99999974E-6 : f32
    %187 = vector.broadcast %cst_70 : f32 to vector<1x8x1xf32>
    %188 = arith.addf %183, %187 : vector<1x8x1xf32>
    %189 = math.rsqrt %188 : vector<1x8x1xf32>
    %190 = arith.mulf %186, %189 : vector<1x8x1xf32>
    %191 = vector.broadcast %190 : vector<1x8x1xf32> to vector<2x8x40xf32>
    %192 = arith.mulf %185, %191 : vector<2x8x40xf32>
    %193 = vector.shape_cast %141 : vector<8x1xf32> to vector<1x8x1xf32>
    %194 = vector.broadcast %193 : vector<1x8x1xf32> to vector<2x8x40xf32>
    %195 = arith.addf %192, %194 : vector<2x8x40xf32>
    %cst_71 = arith.constant 0.000000e+00 : f32
    %196 = vector.broadcast %cst_71 : f32 to vector<2x8x40xf32>
    %197 = arith.cmpf oge, %195, %196 : vector<2x8x40xf32>
    %cst_72 = arith.constant 0.00999999977 : f32
    %198 = vector.broadcast %cst_72 : f32 to vector<2x8x40xf32>
    %199 = arith.mulf %198, %195 : vector<2x8x40xf32>
    %200 = arith.select %197, %195, %199 : vector<2x8x40xi1>, vector<2x8x40xf32>
    %201 = arith.addf %200, %132 : vector<2x8x40xf32>
    %c0_73 = arith.constant 0 : index
    %c16 = arith.constant 16 : index
    %c0_74 = arith.constant 0 : index
    %202 = vector.load %arg18[%c0_73, %c16, %c0_74] : memref<2x64x40xf32, #tpu.memory_space<vmem>>, vector<2x8x40xf32>
    tpu.vector_store %arg18[%c0_73, %c16, %c0_74], %201 {strides = array<i32>} : memref<2x64x40xf32, #tpu.memory_space<vmem>>, vector<2x8x40xf32>,
    %c2 = arith.constant 2 : index
    %c0_75 = arith.constant 0 : index
    %c0_76 = arith.constant 0 : index
    %203 = vector.load %arg6[%c2, %c0_75, %c0_76] : memref<7x8x72xf32, #tpu.memory_space<vmem>>, vector<1x8x72xf32>
    %204 = vector.shape_cast %203 : vector<1x8x72xf32> to vector<8x72xf32>
    %c2_77 = arith.constant 2 : index
    %c0_78 = arith.constant 0 : index
    %c0_79 = arith.constant 0 : index
    %205 = vector.load %arg7[%c2_77, %c0_78, %c0_79] : memref<7x8x1xf32, #tpu.memory_space<vmem>>, vector<1x8x1xf32>
    %206 = vector.shape_cast %205 : vector<1x8x1xf32> to vector<8x1xf32>
    %c2_80 = arith.constant 2 : index
    %c0_81 = arith.constant 0 : index
    %c0_82 = arith.constant 0 : index
    %207 = vector.load %arg8[%c2_80, %c0_81, %c0_82] : memref<7x8x1xf32, #tpu.memory_space<vmem>>, vector<1x8x1xf32>
    %208 = vector.shape_cast %207 : vector<1x8x1xf32> to vector<8x1xf32>
    %c2_83 = arith.constant 2 : index
    %c0_84 = arith.constant 0 : index
    %c0_85 = arith.constant 0 : index
    %209 = vector.load %arg9[%c2_83, %c0_84, %c0_85] : memref<7x8x1xf32, #tpu.memory_space<vmem>>, vector<1x8x1xf32>
    %210 = vector.shape_cast %209 : vector<1x8x1xf32> to vector<8x1xf32>
    %211 = vector.extract_strided_slice %201 {offsets = [0, 0, 36], sizes = [2, 8, 4], strides = [1, 1, 1]} : vector<2x8x40xf32> to vector<2x8x4xf32>
    %212 = vector.extract_strided_slice %201 {offsets = [0, 0, 0], sizes = [2, 8, 4], strides = [1, 1, 1]} : vector<2x8x40xf32> to vector<2x8x4xf32>
    %213 = tpu.concatenate %211, %201, %212 in 2 : vector<2x8x4xf32>, vector<2x8x40xf32>, vector<2x8x4xf32> -> vector<2x8x48xf32>
    %214 = vector.extract_strided_slice %213 {offsets = [0, 0, 0], sizes = [2, 8, 40], strides = [1, 1, 1]} : vector<2x8x48xf32> to vector<2x8x40xf32>
    %215 = vector.extract_strided_slice %213 {offsets = [0, 0, 1], sizes = [2, 8, 40], strides = [1, 1, 1]} : vector<2x8x48xf32> to vector<2x8x40xf32>
    %216 = vector.extract_strided_slice %213 {offsets = [0, 0, 2], sizes = [2, 8, 40], strides = [1, 1, 1]} : vector<2x8x48xf32> to vector<2x8x40xf32>
    %217 = vector.extract_strided_slice %213 {offsets = [0, 0, 3], sizes = [2, 8, 40], strides = [1, 1, 1]} : vector<2x8x48xf32> to vector<2x8x40xf32>
    %218 = vector.extract_strided_slice %213 {offsets = [0, 0, 4], sizes = [2, 8, 40], strides = [1, 1, 1]} : vector<2x8x48xf32> to vector<2x8x40xf32>
    %219 = vector.extract_strided_slice %213 {offsets = [0, 0, 5], sizes = [2, 8, 40], strides = [1, 1, 1]} : vector<2x8x48xf32> to vector<2x8x40xf32>
    %220 = vector.extract_strided_slice %213 {offsets = [0, 0, 6], sizes = [2, 8, 40], strides = [1, 1, 1]} : vector<2x8x48xf32> to vector<2x8x40xf32>
    %221 = vector.extract_strided_slice %213 {offsets = [0, 0, 7], sizes = [2, 8, 40], strides = [1, 1, 1]} : vector<2x8x48xf32> to vector<2x8x40xf32>
    %222 = vector.extract_strided_slice %213 {offsets = [0, 0, 8], sizes = [2, 8, 40], strides = [1, 1, 1]} : vector<2x8x48xf32> to vector<2x8x40xf32>
    %223 = tpu.concatenate %214, %215, %216, %217, %218, %219, %220, %221, %222 in 1 : vector<2x8x40xf32>, vector<2x8x40xf32>, vector<2x8x40xf32>, vector<2x8x40xf32>, vector<2x8x40xf32>, vector<2x8x40xf32>, vector<2x8x40xf32>, vector<2x8x40xf32>, vector<2x8x40xf32> -> vector<2x72x40xf32>
    %224 = vector.extract_strided_slice %223 {offsets = [0, 0, 0], sizes = [1, 72, 40], strides = [1, 1, 1]} : vector<2x72x40xf32> to vector<1x72x40xf32>
    %225 = vector.shape_cast %224 : vector<1x72x40xf32> to vector<72x40xf32>
    %cst_86 = arith.constant dense<0.000000e+00> : vector<8x40xf32>
    %226 = tpu.matmul %204, %225, %cst_86 {dimension_numbers = #tpu.dot_dimension_numbers<[1], [0], [0], [1], [0, 0, 1, 1], [], []>} : vector<8x72xf32>, vector<72x40xf32>, vector<8x40xf32> -> vector<8x40xf32>
    %227 = vector.extract_strided_slice %223 {offsets = [1, 0, 0], sizes = [1, 72, 40], strides = [1, 1, 1]} : vector<2x72x40xf32> to vector<1x72x40xf32>
    %228 = vector.shape_cast %227 : vector<1x72x40xf32> to vector<72x40xf32>
    %cst_87 = arith.constant dense<0.000000e+00> : vector<8x40xf32>
    %229 = tpu.matmul %204, %228, %cst_87 {dimension_numbers = #tpu.dot_dimension_numbers<[1], [0], [0], [1], [0, 0, 1, 1], [], []>} : vector<8x72xf32>, vector<72x40xf32>, vector<8x40xf32> -> vector<8x40xf32>
    %230 = vector.shape_cast %226 : vector<8x40xf32> to vector<1x8x40xf32>
    %231 = vector.shape_cast %229 : vector<8x40xf32> to vector<1x8x40xf32>
    %232 = tpu.concatenate %230, %231 in 0 : vector<1x8x40xf32>, vector<1x8x40xf32> -> vector<2x8x40xf32>
    %233 = vector.shape_cast %206 : vector<8x1xf32> to vector<1x8x1xf32>
    %234 = vector.broadcast %233 : vector<1x8x1xf32> to vector<2x8x40xf32>
    %235 = arith.addf %232, %234 : vector<2x8x40xf32>
    %cst_88 = arith.constant dense<0.000000e+00> : vector<2x8xf32>
    %236 = vector.multi_reduction <add>, %235, %cst_88 [2] : vector<2x8x40xf32> to vector<2x8xf32>
    %237 = vector.shape_cast %236 : vector<2x8xf32> to vector<2x8x1xf32>
    %cst_89 = arith.constant dense<0.000000e+00> : vector<8x1xf32>
    %238 = vector.multi_reduction <add>, %237, %cst_89 [0] : vector<2x8x1xf32> to vector<8x1xf32>
    %239 = vector.shape_cast %238 : vector<8x1xf32> to vector<1x8x1xf32>
    %240 = arith.mulf %235, %235 : vector<2x8x40xf32>
    %cst_90 = arith.constant dense<0.000000e+00> : vector<2x8xf32>
    %241 = vector.multi_reduction <add>, %240, %cst_90 [2] : vector<2x8x40xf32> to vector<2x8xf32>
    %242 = vector.shape_cast %241 : vector<2x8xf32> to vector<2x8x1xf32>
    %cst_91 = arith.constant dense<0.000000e+00> : vector<8x1xf32>
    %243 = vector.multi_reduction <add>, %242, %cst_91 [0] : vector<2x8x1xf32> to vector<8x1xf32>
    %244 = vector.shape_cast %243 : vector<8x1xf32> to vector<1x8x1xf32>
    %cst_92 = arith.constant 8.000000e+01 : f32
    %245 = vector.broadcast %cst_92 : f32 to vector<1x8x1xf32>
    %246 = arith.divf %239, %245 : vector<1x8x1xf32>
    %cst_93 = arith.constant 8.000000e+01 : f32
    %247 = vector.broadcast %cst_93 : f32 to vector<1x8x1xf32>
    %248 = arith.divf %244, %247 : vector<1x8x1xf32>
    %249 = arith.mulf %246, %246 : vector<1x8x1xf32>
    %250 = arith.subf %248, %249 : vector<1x8x1xf32>
    %cst_94 = arith.constant 0.000000e+00 : f32
    %251 = vector.broadcast %cst_94 : f32 to vector<1x8x1xf32>
    %252 = arith.maximumf %250, %251 : vector<1x8x1xf32>
    %253 = vector.broadcast %246 : vector<1x8x1xf32> to vector<2x8x40xf32>
    %254 = arith.subf %235, %253 : vector<2x8x40xf32>
    %255 = vector.shape_cast %208 : vector<8x1xf32> to vector<1x8x1xf32>
    %cst_95 = arith.constant 9.99999974E-6 : f32
    %256 = vector.broadcast %cst_95 : f32 to vector<1x8x1xf32>
    %257 = arith.addf %252, %256 : vector<1x8x1xf32>
    %258 = math.rsqrt %257 : vector<1x8x1xf32>
    %259 = arith.mulf %255, %258 : vector<1x8x1xf32>
    %260 = vector.broadcast %259 : vector<1x8x1xf32> to vector<2x8x40xf32>
    %261 = arith.mulf %254, %260 : vector<2x8x40xf32>
    %262 = vector.shape_cast %210 : vector<8x1xf32> to vector<1x8x1xf32>
    %263 = vector.broadcast %262 : vector<1x8x1xf32> to vector<2x8x40xf32>
    %264 = arith.addf %261, %263 : vector<2x8x40xf32>
    %cst_96 = arith.constant 0.000000e+00 : f32
    %265 = vector.broadcast %cst_96 : f32 to vector<2x8x40xf32>
    %266 = arith.cmpf oge, %264, %265 : vector<2x8x40xf32>
    %cst_97 = arith.constant 0.00999999977 : f32
    %267 = vector.broadcast %cst_97 : f32 to vector<2x8x40xf32>
    %268 = arith.mulf %267, %264 : vector<2x8x40xf32>
    %269 = arith.select %266, %264, %268 : vector<2x8x40xi1>, vector<2x8x40xf32>
    %270 = arith.addf %269, %201 : vector<2x8x40xf32>
    %c0_98 = arith.constant 0 : index
    %c24 = arith.constant 24 : index
    %c0_99 = arith.constant 0 : index
    %271 = vector.load %arg18[%c0_98, %c24, %c0_99] : memref<2x64x40xf32, #tpu.memory_space<vmem>>, vector<2x8x40xf32>
    tpu.vector_store %arg18[%c0_98, %c24, %c0_99], %270 {strides = array<i32>} : memref<2x64x40xf32, #tpu.memory_space<vmem>>, vector<2x8x40xf32>,
    %c3 = arith.constant 3 : index
    %c0_100 = arith.constant 0 : index
    %c0_101 = arith.constant 0 : index
    %272 = vector.load %arg6[%c3, %c0_100, %c0_101] : memref<7x8x72xf32, #tpu.memory_space<vmem>>, vector<1x8x72xf32>
    %273 = vector.shape_cast %272 : vector<1x8x72xf32> to vector<8x72xf32>
    %c3_102 = arith.constant 3 : index
    %c0_103 = arith.constant 0 : index
    %c0_104 = arith.constant 0 : index
    %274 = vector.load %arg7[%c3_102, %c0_103, %c0_104] : memref<7x8x1xf32, #tpu.memory_space<vmem>>, vector<1x8x1xf32>
    %275 = vector.shape_cast %274 : vector<1x8x1xf32> to vector<8x1xf32>
    %c3_105 = arith.constant 3 : index
    %c0_106 = arith.constant 0 : index
    %c0_107 = arith.constant 0 : index
    %276 = vector.load %arg8[%c3_105, %c0_106, %c0_107] : memref<7x8x1xf32, #tpu.memory_space<vmem>>, vector<1x8x1xf32>
    %277 = vector.shape_cast %276 : vector<1x8x1xf32> to vector<8x1xf32>
    %c3_108 = arith.constant 3 : index
    %c0_109 = arith.constant 0 : index
    %c0_110 = arith.constant 0 : index
    %278 = vector.load %arg9[%c3_108, %c0_109, %c0_110] : memref<7x8x1xf32, #tpu.memory_space<vmem>>, vector<1x8x1xf32>
    %279 = vector.shape_cast %278 : vector<1x8x1xf32> to vector<8x1xf32>
    %280 = vector.extract_strided_slice %270 {offsets = [0, 0, 32], sizes = [2, 8, 8], strides = [1, 1, 1]} : vector<2x8x40xf32> to vector<2x8x8xf32>
    %281 = vector.extract_strided_slice %270 {offsets = [0, 0, 0], sizes = [2, 8, 8], strides = [1, 1, 1]} : vector<2x8x40xf32> to vector<2x8x8xf32>
    %282 = tpu.concatenate %280, %270, %281 in 2 : vector<2x8x8xf32>, vector<2x8x40xf32>, vector<2x8x8xf32> -> vector<2x8x56xf32>
    %283 = vector.extract_strided_slice %282 {offsets = [0, 0, 0], sizes = [2, 8, 40], strides = [1, 1, 1]} : vector<2x8x56xf32> to vector<2x8x40xf32>
    %284 = vector.extract_strided_slice %282 {offsets = [0, 0, 2], sizes = [2, 8, 40], strides = [1, 1, 1]} : vector<2x8x56xf32> to vector<2x8x40xf32>
    %285 = vector.extract_strided_slice %282 {offsets = [0, 0, 4], sizes = [2, 8, 40], strides = [1, 1, 1]} : vector<2x8x56xf32> to vector<2x8x40xf32>
    %286 = vector.extract_strided_slice %282 {offsets = [0, 0, 6], sizes = [2, 8, 40], strides = [1, 1, 1]} : vector<2x8x56xf32> to vector<2x8x40xf32>
    %287 = vector.extract_strided_slice %282 {offsets = [0, 0, 8], sizes = [2, 8, 40], strides = [1, 1, 1]} : vector<2x8x56xf32> to vector<2x8x40xf32>
    %288 = vector.extract_strided_slice %282 {offsets = [0, 0, 10], sizes = [2, 8, 40], strides = [1, 1, 1]} : vector<2x8x56xf32> to vector<2x8x40xf32>
    %289 = vector.extract_strided_slice %282 {offsets = [0, 0, 12], sizes = [2, 8, 40], strides = [1, 1, 1]} : vector<2x8x56xf32> to vector<2x8x40xf32>
    %290 = vector.extract_strided_slice %282 {offsets = [0, 0, 14], sizes = [2, 8, 40], strides = [1, 1, 1]} : vector<2x8x56xf32> to vector<2x8x40xf32>
    %291 = vector.extract_strided_slice %282 {offsets = [0, 0, 16], sizes = [2, 8, 40], strides = [1, 1, 1]} : vector<2x8x56xf32> to vector<2x8x40xf32>
    %292 = tpu.concatenate %283, %284, %285, %286, %287, %288, %289, %290, %291 in 1 : vector<2x8x40xf32>, vector<2x8x40xf32>, vector<2x8x40xf32>, vector<2x8x40xf32>, vector<2x8x40xf32>, vector<2x8x40xf32>, vector<2x8x40xf32>, vector<2x8x40xf32>, vector<2x8x40xf32> -> vector<2x72x40xf32>
    %293 = vector.extract_strided_slice %292 {offsets = [0, 0, 0], sizes = [1, 72, 40], strides = [1, 1, 1]} : vector<2x72x40xf32> to vector<1x72x40xf32>
    %294 = vector.shape_cast %293 : vector<1x72x40xf32> to vector<72x40xf32>
    %cst_111 = arith.constant dense<0.000000e+00> : vector<8x40xf32>
    %295 = tpu.matmul %273, %294, %cst_111 {dimension_numbers = #tpu.dot_dimension_numbers<[1], [0], [0], [1], [0, 0, 1, 1], [], []>} : vector<8x72xf32>, vector<72x40xf32>, vector<8x40xf32> -> vector<8x40xf32>
    %296 = vector.extract_strided_slice %292 {offsets = [1, 0, 0], sizes = [1, 72, 40], strides = [1, 1, 1]} : vector<2x72x40xf32> to vector<1x72x40xf32>
    %297 = vector.shape_cast %296 : vector<1x72x40xf32> to vector<72x40xf32>
    %cst_112 = arith.constant dense<0.000000e+00> : vector<8x40xf32>
    %298 = tpu.matmul %273, %297, %cst_112 {dimension_numbers = #tpu.dot_dimension_numbers<[1], [0], [0], [1], [0, 0, 1, 1], [], []>} : vector<8x72xf32>, vector<72x40xf32>, vector<8x40xf32> -> vector<8x40xf32>
    %299 = vector.shape_cast %295 : vector<8x40xf32> to vector<1x8x40xf32>
    %300 = vector.shape_cast %298 : vector<8x40xf32> to vector<1x8x40xf32>
    %301 = tpu.concatenate %299, %300 in 0 : vector<1x8x40xf32>, vector<1x8x40xf32> -> vector<2x8x40xf32>
    %302 = vector.shape_cast %275 : vector<8x1xf32> to vector<1x8x1xf32>
    %303 = vector.broadcast %302 : vector<1x8x1xf32> to vector<2x8x40xf32>
    %304 = arith.addf %301, %303 : vector<2x8x40xf32>
    %cst_113 = arith.constant dense<0.000000e+00> : vector<2x8xf32>
    %305 = vector.multi_reduction <add>, %304, %cst_113 [2] : vector<2x8x40xf32> to vector<2x8xf32>
    %306 = vector.shape_cast %305 : vector<2x8xf32> to vector<2x8x1xf32>
    %cst_114 = arith.constant dense<0.000000e+00> : vector<8x1xf32>
    %307 = vector.multi_reduction <add>, %306, %cst_114 [0] : vector<2x8x1xf32> to vector<8x1xf32>
    %308 = vector.shape_cast %307 : vector<8x1xf32> to vector<1x8x1xf32>
    %309 = arith.mulf %304, %304 : vector<2x8x40xf32>
    %cst_115 = arith.constant dense<0.000000e+00> : vector<2x8xf32>
    %310 = vector.multi_reduction <add>, %309, %cst_115 [2] : vector<2x8x40xf32> to vector<2x8xf32>
    %311 = vector.shape_cast %310 : vector<2x8xf32> to vector<2x8x1xf32>
    %cst_116 = arith.constant dense<0.000000e+00> : vector<8x1xf32>
    %312 = vector.multi_reduction <add>, %311, %cst_116 [0] : vector<2x8x1xf32> to vector<8x1xf32>
    %313 = vector.shape_cast %312 : vector<8x1xf32> to vector<1x8x1xf32>
    %cst_117 = arith.constant 8.000000e+01 : f32
    %314 = vector.broadcast %cst_117 : f32 to vector<1x8x1xf32>
    %315 = arith.divf %308, %314 : vector<1x8x1xf32>
    %cst_118 = arith.constant 8.000000e+01 : f32
    %316 = vector.broadcast %cst_118 : f32 to vector<1x8x1xf32>
    %317 = arith.divf %313, %316 : vector<1x8x1xf32>
    %318 = arith.mulf %315, %315 : vector<1x8x1xf32>
    %319 = arith.subf %317, %318 : vector<1x8x1xf32>
    %cst_119 = arith.constant 0.000000e+00 : f32
    %320 = vector.broadcast %cst_119 : f32 to vector<1x8x1xf32>
    %321 = arith.maximumf %319, %320 : vector<1x8x1xf32>
    %322 = vector.broadcast %315 : vector<1x8x1xf32> to vector<2x8x40xf32>
    %323 = arith.subf %304, %322 : vector<2x8x40xf32>
    %324 = vector.shape_cast %277 : vector<8x1xf32> to vector<1x8x1xf32>
    %cst_120 = arith.constant 9.99999974E-6 : f32
    %325 = vector.broadcast %cst_120 : f32 to vector<1x8x1xf32>
    %326 = arith.addf %321, %325 : vector<1x8x1xf32>
    %327 = math.rsqrt %326 : vector<1x8x1xf32>
    %328 = arith.mulf %324, %327 : vector<1x8x1xf32>
    %329 = vector.broadcast %328 : vector<1x8x1xf32> to vector<2x8x40xf32>
    %330 = arith.mulf %323, %329 : vector<2x8x40xf32>
    %331 = vector.shape_cast %279 : vector<8x1xf32> to vector<1x8x1xf32>
    %332 = vector.broadcast %331 : vector<1x8x1xf32> to vector<2x8x40xf32>
    %333 = arith.addf %330, %332 : vector<2x8x40xf32>
    %cst_121 = arith.constant 0.000000e+00 : f32
    %334 = vector.broadcast %cst_121 : f32 to vector<2x8x40xf32>
    %335 = arith.cmpf oge, %333, %334 : vector<2x8x40xf32>
    %cst_122 = arith.constant 0.00999999977 : f32
    %336 = vector.broadcast %cst_122 : f32 to vector<2x8x40xf32>
    %337 = arith.mulf %336, %333 : vector<2x8x40xf32>
    %338 = arith.select %335, %333, %337 : vector<2x8x40xi1>, vector<2x8x40xf32>
    %339 = arith.addf %338, %270 : vector<2x8x40xf32>
    %c0_123 = arith.constant 0 : index
    %c32 = arith.constant 32 : index
    %c0_124 = arith.constant 0 : index
    %340 = vector.load %arg18[%c0_123, %c32, %c0_124] : memref<2x64x40xf32, #tpu.memory_space<vmem>>, vector<2x8x40xf32>
    tpu.vector_store %arg18[%c0_123, %c32, %c0_124], %339 {strides = array<i32>} : memref<2x64x40xf32, #tpu.memory_space<vmem>>, vector<2x8x40xf32>,
    %c4 = arith.constant 4 : index
    %c0_125 = arith.constant 0 : index
    %c0_126 = arith.constant 0 : index
    %341 = vector.load %arg6[%c4, %c0_125, %c0_126] : memref<7x8x72xf32, #tpu.memory_space<vmem>>, vector<1x8x72xf32>
    %342 = vector.shape_cast %341 : vector<1x8x72xf32> to vector<8x72xf32>
    %c4_127 = arith.constant 4 : index
    %c0_128 = arith.constant 0 : index
    %c0_129 = arith.constant 0 : index
    %343 = vector.load %arg7[%c4_127, %c0_128, %c0_129] : memref<7x8x1xf32, #tpu.memory_space<vmem>>, vector<1x8x1xf32>
    %344 = vector.shape_cast %343 : vector<1x8x1xf32> to vector<8x1xf32>
    %c4_130 = arith.constant 4 : index
    %c0_131 = arith.constant 0 : index
    %c0_132 = arith.constant 0 : index
    %345 = vector.load %arg8[%c4_130, %c0_131, %c0_132] : memref<7x8x1xf32, #tpu.memory_space<vmem>>, vector<1x8x1xf32>
    %346 = vector.shape_cast %345 : vector<1x8x1xf32> to vector<8x1xf32>
    %c4_133 = arith.constant 4 : index
    %c0_134 = arith.constant 0 : index
    %c0_135 = arith.constant 0 : index
    %347 = vector.load %arg9[%c4_133, %c0_134, %c0_135] : memref<7x8x1xf32, #tpu.memory_space<vmem>>, vector<1x8x1xf32>
    %348 = vector.shape_cast %347 : vector<1x8x1xf32> to vector<8x1xf32>
    %349 = vector.extract_strided_slice %339 {offsets = [0, 0, 32], sizes = [2, 8, 8], strides = [1, 1, 1]} : vector<2x8x40xf32> to vector<2x8x8xf32>
    %350 = vector.extract_strided_slice %339 {offsets = [0, 0, 0], sizes = [2, 8, 8], strides = [1, 1, 1]} : vector<2x8x40xf32> to vector<2x8x8xf32>
    %351 = tpu.concatenate %349, %339, %350 in 2 : vector<2x8x8xf32>, vector<2x8x40xf32>, vector<2x8x8xf32> -> vector<2x8x56xf32>
    %352 = vector.extract_strided_slice %351 {offsets = [0, 0, 0], sizes = [2, 8, 40], strides = [1, 1, 1]} : vector<2x8x56xf32> to vector<2x8x40xf32>
    %353 = vector.extract_strided_slice %351 {offsets = [0, 0, 2], sizes = [2, 8, 40], strides = [1, 1, 1]} : vector<2x8x56xf32> to vector<2x8x40xf32>
    %354 = vector.extract_strided_slice %351 {offsets = [0, 0, 4], sizes = [2, 8, 40], strides = [1, 1, 1]} : vector<2x8x56xf32> to vector<2x8x40xf32>
    %355 = vector.extract_strided_slice %351 {offsets = [0, 0, 6], sizes = [2, 8, 40], strides = [1, 1, 1]} : vector<2x8x56xf32> to vector<2x8x40xf32>
    %356 = vector.extract_strided_slice %351 {offsets = [0, 0, 8], sizes = [2, 8, 40], strides = [1, 1, 1]} : vector<2x8x56xf32> to vector<2x8x40xf32>
    %357 = vector.extract_strided_slice %351 {offsets = [0, 0, 10], sizes = [2, 8, 40], strides = [1, 1, 1]} : vector<2x8x56xf32> to vector<2x8x40xf32>
    %358 = vector.extract_strided_slice %351 {offsets = [0, 0, 12], sizes = [2, 8, 40], strides = [1, 1, 1]} : vector<2x8x56xf32> to vector<2x8x40xf32>
    %359 = vector.extract_strided_slice %351 {offsets = [0, 0, 14], sizes = [2, 8, 40], strides = [1, 1, 1]} : vector<2x8x56xf32> to vector<2x8x40xf32>
    %360 = vector.extract_strided_slice %351 {offsets = [0, 0, 16], sizes = [2, 8, 40], strides = [1, 1, 1]} : vector<2x8x56xf32> to vector<2x8x40xf32>
    %361 = tpu.concatenate %352, %353, %354, %355, %356, %357, %358, %359, %360 in 1 : vector<2x8x40xf32>, vector<2x8x40xf32>, vector<2x8x40xf32>, vector<2x8x40xf32>, vector<2x8x40xf32>, vector<2x8x40xf32>, vector<2x8x40xf32>, vector<2x8x40xf32>, vector<2x8x40xf32> -> vector<2x72x40xf32>
    %362 = vector.extract_strided_slice %361 {offsets = [0, 0, 0], sizes = [1, 72, 40], strides = [1, 1, 1]} : vector<2x72x40xf32> to vector<1x72x40xf32>
    %363 = vector.shape_cast %362 : vector<1x72x40xf32> to vector<72x40xf32>
    %cst_136 = arith.constant dense<0.000000e+00> : vector<8x40xf32>
    %364 = tpu.matmul %342, %363, %cst_136 {dimension_numbers = #tpu.dot_dimension_numbers<[1], [0], [0], [1], [0, 0, 1, 1], [], []>} : vector<8x72xf32>, vector<72x40xf32>, vector<8x40xf32> -> vector<8x40xf32>
    %365 = vector.extract_strided_slice %361 {offsets = [1, 0, 0], sizes = [1, 72, 40], strides = [1, 1, 1]} : vector<2x72x40xf32> to vector<1x72x40xf32>
    %366 = vector.shape_cast %365 : vector<1x72x40xf32> to vector<72x40xf32>
    %cst_137 = arith.constant dense<0.000000e+00> : vector<8x40xf32>
    %367 = tpu.matmul %342, %366, %cst_137 {dimension_numbers = #tpu.dot_dimension_numbers<[1], [0], [0], [1], [0, 0, 1, 1], [], []>} : vector<8x72xf32>, vector<72x40xf32>, vector<8x40xf32> -> vector<8x40xf32>
    %368 = vector.shape_cast %364 : vector<8x40xf32> to vector<1x8x40xf32>
    %369 = vector.shape_cast %367 : vector<8x40xf32> to vector<1x8x40xf32>
    %370 = tpu.concatenate %368, %369 in 0 : vector<1x8x40xf32>, vector<1x8x40xf32> -> vector<2x8x40xf32>
    %371 = vector.shape_cast %344 : vector<8x1xf32> to vector<1x8x1xf32>
    %372 = vector.broadcast %371 : vector<1x8x1xf32> to vector<2x8x40xf32>
    %373 = arith.addf %370, %372 : vector<2x8x40xf32>
    %cst_138 = arith.constant dense<0.000000e+00> : vector<2x8xf32>
    %374 = vector.multi_reduction <add>, %373, %cst_138 [2] : vector<2x8x40xf32> to vector<2x8xf32>
    %375 = vector.shape_cast %374 : vector<2x8xf32> to vector<2x8x1xf32>
    %cst_139 = arith.constant dense<0.000000e+00> : vector<8x1xf32>
    %376 = vector.multi_reduction <add>, %375, %cst_139 [0] : vector<2x8x1xf32> to vector<8x1xf32>
    %377 = vector.shape_cast %376 : vector<8x1xf32> to vector<1x8x1xf32>
    %378 = arith.mulf %373, %373 : vector<2x8x40xf32>
    %cst_140 = arith.constant dense<0.000000e+00> : vector<2x8xf32>
    %379 = vector.multi_reduction <add>, %378, %cst_140 [2] : vector<2x8x40xf32> to vector<2x8xf32>
    %380 = vector.shape_cast %379 : vector<2x8xf32> to vector<2x8x1xf32>
    %cst_141 = arith.constant dense<0.000000e+00> : vector<8x1xf32>
    %381 = vector.multi_reduction <add>, %380, %cst_141 [0] : vector<2x8x1xf32> to vector<8x1xf32>
    %382 = vector.shape_cast %381 : vector<8x1xf32> to vector<1x8x1xf32>
    %cst_142 = arith.constant 8.000000e+01 : f32
    %383 = vector.broadcast %cst_142 : f32 to vector<1x8x1xf32>
    %384 = arith.divf %377, %383 : vector<1x8x1xf32>
    %cst_143 = arith.constant 8.000000e+01 : f32
    %385 = vector.broadcast %cst_143 : f32 to vector<1x8x1xf32>
    %386 = arith.divf %382, %385 : vector<1x8x1xf32>
    %387 = arith.mulf %384, %384 : vector<1x8x1xf32>
    %388 = arith.subf %386, %387 : vector<1x8x1xf32>
    %cst_144 = arith.constant 0.000000e+00 : f32
    %389 = vector.broadcast %cst_144 : f32 to vector<1x8x1xf32>
    %390 = arith.maximumf %388, %389 : vector<1x8x1xf32>
    %391 = vector.broadcast %384 : vector<1x8x1xf32> to vector<2x8x40xf32>
    %392 = arith.subf %373, %391 : vector<2x8x40xf32>
    %393 = vector.shape_cast %346 : vector<8x1xf32> to vector<1x8x1xf32>
    %cst_145 = arith.constant 9.99999974E-6 : f32
    %394 = vector.broadcast %cst_145 : f32 to vector<1x8x1xf32>
    %395 = arith.addf %390, %394 : vector<1x8x1xf32>
    %396 = math.rsqrt %395 : vector<1x8x1xf32>
    %397 = arith.mulf %393, %396 : vector<1x8x1xf32>
    %398 = vector.broadcast %397 : vector<1x8x1xf32> to vector<2x8x40xf32>
    %399 = arith.mulf %392, %398 : vector<2x8x40xf32>
    %400 = vector.shape_cast %348 : vector<8x1xf32> to vector<1x8x1xf32>
    %401 = vector.broadcast %400 : vector<1x8x1xf32> to vector<2x8x40xf32>
    %402 = arith.addf %399, %401 : vector<2x8x40xf32>
    %cst_146 = arith.constant 0.000000e+00 : f32
    %403 = vector.broadcast %cst_146 : f32 to vector<2x8x40xf32>
    %404 = arith.cmpf oge, %402, %403 : vector<2x8x40xf32>
    %cst_147 = arith.constant 0.00999999977 : f32
    %405 = vector.broadcast %cst_147 : f32 to vector<2x8x40xf32>
    %406 = arith.mulf %405, %402 : vector<2x8x40xf32>
    %407 = arith.select %404, %402, %406 : vector<2x8x40xi1>, vector<2x8x40xf32>
    %408 = arith.addf %407, %339 : vector<2x8x40xf32>
    %c0_148 = arith.constant 0 : index
    %c40 = arith.constant 40 : index
    %c0_149 = arith.constant 0 : index
    %409 = vector.load %arg18[%c0_148, %c40, %c0_149] : memref<2x64x40xf32, #tpu.memory_space<vmem>>, vector<2x8x40xf32>
    tpu.vector_store %arg18[%c0_148, %c40, %c0_149], %408 {strides = array<i32>} : memref<2x64x40xf32, #tpu.memory_space<vmem>>, vector<2x8x40xf32>,
    %c5 = arith.constant 5 : index
    %c0_150 = arith.constant 0 : index
    %c0_151 = arith.constant 0 : index
    %410 = vector.load %arg6[%c5, %c0_150, %c0_151] : memref<7x8x72xf32, #tpu.memory_space<vmem>>, vector<1x8x72xf32>
    %411 = vector.shape_cast %410 : vector<1x8x72xf32> to vector<8x72xf32>
    %c5_152 = arith.constant 5 : index
    %c0_153 = arith.constant 0 : index
    %c0_154 = arith.constant 0 : index
    %412 = vector.load %arg7[%c5_152, %c0_153, %c0_154] : memref<7x8x1xf32, #tpu.memory_space<vmem>>, vector<1x8x1xf32>
    %413 = vector.shape_cast %412 : vector<1x8x1xf32> to vector<8x1xf32>
    %c5_155 = arith.constant 5 : index
    %c0_156 = arith.constant 0 : index
    %c0_157 = arith.constant 0 : index
    %414 = vector.load %arg8[%c5_155, %c0_156, %c0_157] : memref<7x8x1xf32, #tpu.memory_space<vmem>>, vector<1x8x1xf32>
    %415 = vector.shape_cast %414 : vector<1x8x1xf32> to vector<8x1xf32>
    %c5_158 = arith.constant 5 : index
    %c0_159 = arith.constant 0 : index
    %c0_160 = arith.constant 0 : index
    %416 = vector.load %arg9[%c5_158, %c0_159, %c0_160] : memref<7x8x1xf32, #tpu.memory_space<vmem>>, vector<1x8x1xf32>
    %417 = vector.shape_cast %416 : vector<1x8x1xf32> to vector<8x1xf32>
    %418 = vector.extract_strided_slice %408 {offsets = [0, 0, 24], sizes = [2, 8, 16], strides = [1, 1, 1]} : vector<2x8x40xf32> to vector<2x8x16xf32>
    %419 = vector.extract_strided_slice %408 {offsets = [0, 0, 0], sizes = [2, 8, 16], strides = [1, 1, 1]} : vector<2x8x40xf32> to vector<2x8x16xf32>
    %420 = tpu.concatenate %418, %408, %419 in 2 : vector<2x8x16xf32>, vector<2x8x40xf32>, vector<2x8x16xf32> -> vector<2x8x72xf32>
    %421 = vector.extract_strided_slice %420 {offsets = [0, 0, 0], sizes = [2, 8, 40], strides = [1, 1, 1]} : vector<2x8x72xf32> to vector<2x8x40xf32>
    %422 = vector.extract_strided_slice %420 {offsets = [0, 0, 4], sizes = [2, 8, 40], strides = [1, 1, 1]} : vector<2x8x72xf32> to vector<2x8x40xf32>
    %423 = vector.extract_strided_slice %420 {offsets = [0, 0, 8], sizes = [2, 8, 40], strides = [1, 1, 1]} : vector<2x8x72xf32> to vector<2x8x40xf32>
    %424 = vector.extract_strided_slice %420 {offsets = [0, 0, 12], sizes = [2, 8, 40], strides = [1, 1, 1]} : vector<2x8x72xf32> to vector<2x8x40xf32>
    %425 = vector.extract_strided_slice %420 {offsets = [0, 0, 16], sizes = [2, 8, 40], strides = [1, 1, 1]} : vector<2x8x72xf32> to vector<2x8x40xf32>
    %426 = vector.extract_strided_slice %420 {offsets = [0, 0, 20], sizes = [2, 8, 40], strides = [1, 1, 1]} : vector<2x8x72xf32> to vector<2x8x40xf32>
    %427 = vector.extract_strided_slice %420 {offsets = [0, 0, 24], sizes = [2, 8, 40], strides = [1, 1, 1]} : vector<2x8x72xf32> to vector<2x8x40xf32>
    %428 = vector.extract_strided_slice %420 {offsets = [0, 0, 28], sizes = [2, 8, 40], strides = [1, 1, 1]} : vector<2x8x72xf32> to vector<2x8x40xf32>
    %429 = vector.extract_strided_slice %420 {offsets = [0, 0, 32], sizes = [2, 8, 40], strides = [1, 1, 1]} : vector<2x8x72xf32> to vector<2x8x40xf32>
    %430 = tpu.concatenate %421, %422, %423, %424, %425, %426, %427, %428, %429 in 1 : vector<2x8x40xf32>, vector<2x8x40xf32>, vector<2x8x40xf32>, vector<2x8x40xf32>, vector<2x8x40xf32>, vector<2x8x40xf32>, vector<2x8x40xf32>, vector<2x8x40xf32>, vector<2x8x40xf32> -> vector<2x72x40xf32>
    %431 = vector.extract_strided_slice %430 {offsets = [0, 0, 0], sizes = [1, 72, 40], strides = [1, 1, 1]} : vector<2x72x40xf32> to vector<1x72x40xf32>
    %432 = vector.shape_cast %431 : vector<1x72x40xf32> to vector<72x40xf32>
    %cst_161 = arith.constant dense<0.000000e+00> : vector<8x40xf32>
    %433 = tpu.matmul %411, %432, %cst_161 {dimension_numbers = #tpu.dot_dimension_numbers<[1], [0], [0], [1], [0, 0, 1, 1], [], []>} : vector<8x72xf32>, vector<72x40xf32>, vector<8x40xf32> -> vector<8x40xf32>
    %434 = vector.extract_strided_slice %430 {offsets = [1, 0, 0], sizes = [1, 72, 40], strides = [1, 1, 1]} : vector<2x72x40xf32> to vector<1x72x40xf32>
    %435 = vector.shape_cast %434 : vector<1x72x40xf32> to vector<72x40xf32>
    %cst_162 = arith.constant dense<0.000000e+00> : vector<8x40xf32>
    %436 = tpu.matmul %411, %435, %cst_162 {dimension_numbers = #tpu.dot_dimension_numbers<[1], [0], [0], [1], [0, 0, 1, 1], [], []>} : vector<8x72xf32>, vector<72x40xf32>, vector<8x40xf32> -> vector<8x40xf32>
    %437 = vector.shape_cast %433 : vector<8x40xf32> to vector<1x8x40xf32>
    %438 = vector.shape_cast %436 : vector<8x40xf32> to vector<1x8x40xf32>
    %439 = tpu.concatenate %437, %438 in 0 : vector<1x8x40xf32>, vector<1x8x40xf32> -> vector<2x8x40xf32>
    %440 = vector.shape_cast %413 : vector<8x1xf32> to vector<1x8x1xf32>
    %441 = vector.broadcast %440 : vector<1x8x1xf32> to vector<2x8x40xf32>
    %442 = arith.addf %439, %441 : vector<2x8x40xf32>
    %cst_163 = arith.constant dense<0.000000e+00> : vector<2x8xf32>
    %443 = vector.multi_reduction <add>, %442, %cst_163 [2] : vector<2x8x40xf32> to vector<2x8xf32>
    %444 = vector.shape_cast %443 : vector<2x8xf32> to vector<2x8x1xf32>
    %cst_164 = arith.constant dense<0.000000e+00> : vector<8x1xf32>
    %445 = vector.multi_reduction <add>, %444, %cst_164 [0] : vector<2x8x1xf32> to vector<8x1xf32>
    %446 = vector.shape_cast %445 : vector<8x1xf32> to vector<1x8x1xf32>
    %447 = arith.mulf %442, %442 : vector<2x8x40xf32>
    %cst_165 = arith.constant dense<0.000000e+00> : vector<2x8xf32>
    %448 = vector.multi_reduction <add>, %447, %cst_165 [2] : vector<2x8x40xf32> to vector<2x8xf32>
    %449 = vector.shape_cast %448 : vector<2x8xf32> to vector<2x8x1xf32>
    %cst_166 = arith.constant dense<0.000000e+00> : vector<8x1xf32>
    %450 = vector.multi_reduction <add>, %449, %cst_166 [0] : vector<2x8x1xf32> to vector<8x1xf32>
    %451 = vector.shape_cast %450 : vector<8x1xf32> to vector<1x8x1xf32>
    %cst_167 = arith.constant 8.000000e+01 : f32
    %452 = vector.broadcast %cst_167 : f32 to vector<1x8x1xf32>
    %453 = arith.divf %446, %452 : vector<1x8x1xf32>
    %cst_168 = arith.constant 8.000000e+01 : f32
    %454 = vector.broadcast %cst_168 : f32 to vector<1x8x1xf32>
    %455 = arith.divf %451, %454 : vector<1x8x1xf32>
    %456 = arith.mulf %453, %453 : vector<1x8x1xf32>
    %457 = arith.subf %455, %456 : vector<1x8x1xf32>
    %cst_169 = arith.constant 0.000000e+00 : f32
    %458 = vector.broadcast %cst_169 : f32 to vector<1x8x1xf32>
    %459 = arith.maximumf %457, %458 : vector<1x8x1xf32>
    %460 = vector.broadcast %453 : vector<1x8x1xf32> to vector<2x8x40xf32>
    %461 = arith.subf %442, %460 : vector<2x8x40xf32>
    %462 = vector.shape_cast %415 : vector<8x1xf32> to vector<1x8x1xf32>
    %cst_170 = arith.constant 9.99999974E-6 : f32
    %463 = vector.broadcast %cst_170 : f32 to vector<1x8x1xf32>
    %464 = arith.addf %459, %463 : vector<1x8x1xf32>
    %465 = math.rsqrt %464 : vector<1x8x1xf32>
    %466 = arith.mulf %462, %465 : vector<1x8x1xf32>
    %467 = vector.broadcast %466 : vector<1x8x1xf32> to vector<2x8x40xf32>
    %468 = arith.mulf %461, %467 : vector<2x8x40xf32>
    %469 = vector.shape_cast %417 : vector<8x1xf32> to vector<1x8x1xf32>
    %470 = vector.broadcast %469 : vector<1x8x1xf32> to vector<2x8x40xf32>
    %471 = arith.addf %468, %470 : vector<2x8x40xf32>
    %cst_171 = arith.constant 0.000000e+00 : f32
    %472 = vector.broadcast %cst_171 : f32 to vector<2x8x40xf32>
    %473 = arith.cmpf oge, %471, %472 : vector<2x8x40xf32>
    %cst_172 = arith.constant 0.00999999977 : f32
    %474 = vector.broadcast %cst_172 : f32 to vector<2x8x40xf32>
    %475 = arith.mulf %474, %471 : vector<2x8x40xf32>
    %476 = arith.select %473, %471, %475 : vector<2x8x40xi1>, vector<2x8x40xf32>
    %477 = arith.addf %476, %408 : vector<2x8x40xf32>
    %c0_173 = arith.constant 0 : index
    %c48 = arith.constant 48 : index
    %c0_174 = arith.constant 0 : index
    %478 = vector.load %arg18[%c0_173, %c48, %c0_174] : memref<2x64x40xf32, #tpu.memory_space<vmem>>, vector<2x8x40xf32>
    tpu.vector_store %arg18[%c0_173, %c48, %c0_174], %477 {strides = array<i32>} : memref<2x64x40xf32, #tpu.memory_space<vmem>>, vector<2x8x40xf32>,
    %c6 = arith.constant 6 : index
    %c0_175 = arith.constant 0 : index
    %c0_176 = arith.constant 0 : index
    %479 = vector.load %arg6[%c6, %c0_175, %c0_176] : memref<7x8x72xf32, #tpu.memory_space<vmem>>, vector<1x8x72xf32>
    %480 = vector.shape_cast %479 : vector<1x8x72xf32> to vector<8x72xf32>
    %c6_177 = arith.constant 6 : index
    %c0_178 = arith.constant 0 : index
    %c0_179 = arith.constant 0 : index
    %481 = vector.load %arg7[%c6_177, %c0_178, %c0_179] : memref<7x8x1xf32, #tpu.memory_space<vmem>>, vector<1x8x1xf32>
    %482 = vector.shape_cast %481 : vector<1x8x1xf32> to vector<8x1xf32>
    %c6_180 = arith.constant 6 : index
    %c0_181 = arith.constant 0 : index
    %c0_182 = arith.constant 0 : index
    %483 = vector.load %arg8[%c6_180, %c0_181, %c0_182] : memref<7x8x1xf32, #tpu.memory_space<vmem>>, vector<1x8x1xf32>
    %484 = vector.shape_cast %483 : vector<1x8x1xf32> to vector<8x1xf32>
    %c6_183 = arith.constant 6 : index
    %c0_184 = arith.constant 0 : index
    %c0_185 = arith.constant 0 : index
    %485 = vector.load %arg9[%c6_183, %c0_184, %c0_185] : memref<7x8x1xf32, #tpu.memory_space<vmem>>, vector<1x8x1xf32>
    %486 = vector.shape_cast %485 : vector<1x8x1xf32> to vector<8x1xf32>
    %487 = vector.extract_strided_slice %477 {offsets = [0, 0, 24], sizes = [2, 8, 16], strides = [1, 1, 1]} : vector<2x8x40xf32> to vector<2x8x16xf32>
    %488 = vector.extract_strided_slice %477 {offsets = [0, 0, 0], sizes = [2, 8, 16], strides = [1, 1, 1]} : vector<2x8x40xf32> to vector<2x8x16xf32>
    %489 = tpu.concatenate %487, %477, %488 in 2 : vector<2x8x16xf32>, vector<2x8x40xf32>, vector<2x8x16xf32> -> vector<2x8x72xf32>
    %490 = vector.extract_strided_slice %489 {offsets = [0, 0, 0], sizes = [2, 8, 40], strides = [1, 1, 1]} : vector<2x8x72xf32> to vector<2x8x40xf32>
    %491 = vector.extract_strided_slice %489 {offsets = [0, 0, 4], sizes = [2, 8, 40], strides = [1, 1, 1]} : vector<2x8x72xf32> to vector<2x8x40xf32>
    %492 = vector.extract_strided_slice %489 {offsets = [0, 0, 8], sizes = [2, 8, 40], strides = [1, 1, 1]} : vector<2x8x72xf32> to vector<2x8x40xf32>
    %493 = vector.extract_strided_slice %489 {offsets = [0, 0, 12], sizes = [2, 8, 40], strides = [1, 1, 1]} : vector<2x8x72xf32> to vector<2x8x40xf32>
    %494 = vector.extract_strided_slice %489 {offsets = [0, 0, 16], sizes = [2, 8, 40], strides = [1, 1, 1]} : vector<2x8x72xf32> to vector<2x8x40xf32>
    %495 = vector.extract_strided_slice %489 {offsets = [0, 0, 20], sizes = [2, 8, 40], strides = [1, 1, 1]} : vector<2x8x72xf32> to vector<2x8x40xf32>
    %496 = vector.extract_strided_slice %489 {offsets = [0, 0, 24], sizes = [2, 8, 40], strides = [1, 1, 1]} : vector<2x8x72xf32> to vector<2x8x40xf32>
    %497 = vector.extract_strided_slice %489 {offsets = [0, 0, 28], sizes = [2, 8, 40], strides = [1, 1, 1]} : vector<2x8x72xf32> to vector<2x8x40xf32>
    %498 = vector.extract_strided_slice %489 {offsets = [0, 0, 32], sizes = [2, 8, 40], strides = [1, 1, 1]} : vector<2x8x72xf32> to vector<2x8x40xf32>
    %499 = tpu.concatenate %490, %491, %492, %493, %494, %495, %496, %497, %498 in 1 : vector<2x8x40xf32>, vector<2x8x40xf32>, vector<2x8x40xf32>, vector<2x8x40xf32>, vector<2x8x40xf32>, vector<2x8x40xf32>, vector<2x8x40xf32>, vector<2x8x40xf32>, vector<2x8x40xf32> -> vector<2x72x40xf32>
    %500 = vector.extract_strided_slice %499 {offsets = [0, 0, 0], sizes = [1, 72, 40], strides = [1, 1, 1]} : vector<2x72x40xf32> to vector<1x72x40xf32>
    %501 = vector.shape_cast %500 : vector<1x72x40xf32> to vector<72x40xf32>
    %cst_186 = arith.constant dense<0.000000e+00> : vector<8x40xf32>
    %502 = tpu.matmul %480, %501, %cst_186 {dimension_numbers = #tpu.dot_dimension_numbers<[1], [0], [0], [1], [0, 0, 1, 1], [], []>} : vector<8x72xf32>, vector<72x40xf32>, vector<8x40xf32> -> vector<8x40xf32>
    %503 = vector.extract_strided_slice %499 {offsets = [1, 0, 0], sizes = [1, 72, 40], strides = [1, 1, 1]} : vector<2x72x40xf32> to vector<1x72x40xf32>
    %504 = vector.shape_cast %503 : vector<1x72x40xf32> to vector<72x40xf32>
    %cst_187 = arith.constant dense<0.000000e+00> : vector<8x40xf32>
    %505 = tpu.matmul %480, %504, %cst_187 {dimension_numbers = #tpu.dot_dimension_numbers<[1], [0], [0], [1], [0, 0, 1, 1], [], []>} : vector<8x72xf32>, vector<72x40xf32>, vector<8x40xf32> -> vector<8x40xf32>
    %506 = vector.shape_cast %502 : vector<8x40xf32> to vector<1x8x40xf32>
    %507 = vector.shape_cast %505 : vector<8x40xf32> to vector<1x8x40xf32>
    %508 = tpu.concatenate %506, %507 in 0 : vector<1x8x40xf32>, vector<1x8x40xf32> -> vector<2x8x40xf32>
    %509 = vector.shape_cast %482 : vector<8x1xf32> to vector<1x8x1xf32>
    %510 = vector.broadcast %509 : vector<1x8x1xf32> to vector<2x8x40xf32>
    %511 = arith.addf %508, %510 : vector<2x8x40xf32>
    %cst_188 = arith.constant dense<0.000000e+00> : vector<2x8xf32>
    %512 = vector.multi_reduction <add>, %511, %cst_188 [2] : vector<2x8x40xf32> to vector<2x8xf32>
    %513 = vector.shape_cast %512 : vector<2x8xf32> to vector<2x8x1xf32>
    %cst_189 = arith.constant dense<0.000000e+00> : vector<8x1xf32>
    %514 = vector.multi_reduction <add>, %513, %cst_189 [0] : vector<2x8x1xf32> to vector<8x1xf32>
    %515 = vector.shape_cast %514 : vector<8x1xf32> to vector<1x8x1xf32>
    %516 = arith.mulf %511, %511 : vector<2x8x40xf32>
    %cst_190 = arith.constant dense<0.000000e+00> : vector<2x8xf32>
    %517 = vector.multi_reduction <add>, %516, %cst_190 [2] : vector<2x8x40xf32> to vector<2x8xf32>
    %518 = vector.shape_cast %517 : vector<2x8xf32> to vector<2x8x1xf32>
    %cst_191 = arith.constant dense<0.000000e+00> : vector<8x1xf32>
    %519 = vector.multi_reduction <add>, %518, %cst_191 [0] : vector<2x8x1xf32> to vector<8x1xf32>
    %520 = vector.shape_cast %519 : vector<8x1xf32> to vector<1x8x1xf32>
    %cst_192 = arith.constant 8.000000e+01 : f32
    %521 = vector.broadcast %cst_192 : f32 to vector<1x8x1xf32>
    %522 = arith.divf %515, %521 : vector<1x8x1xf32>
    %cst_193 = arith.constant 8.000000e+01 : f32
    %523 = vector.broadcast %cst_193 : f32 to vector<1x8x1xf32>
    %524 = arith.divf %520, %523 : vector<1x8x1xf32>
    %525 = arith.mulf %522, %522 : vector<1x8x1xf32>
    %526 = arith.subf %524, %525 : vector<1x8x1xf32>
    %cst_194 = arith.constant 0.000000e+00 : f32
    %527 = vector.broadcast %cst_194 : f32 to vector<1x8x1xf32>
    %528 = arith.maximumf %526, %527 : vector<1x8x1xf32>
    %529 = vector.broadcast %522 : vector<1x8x1xf32> to vector<2x8x40xf32>
    %530 = arith.subf %511, %529 : vector<2x8x40xf32>
    %531 = vector.shape_cast %484 : vector<8x1xf32> to vector<1x8x1xf32>
    %cst_195 = arith.constant 9.99999974E-6 : f32
    %532 = vector.broadcast %cst_195 : f32 to vector<1x8x1xf32>
    %533 = arith.addf %528, %532 : vector<1x8x1xf32>
    %534 = math.rsqrt %533 : vector<1x8x1xf32>
    %535 = arith.mulf %531, %534 : vector<1x8x1xf32>
    %536 = vector.broadcast %535 : vector<1x8x1xf32> to vector<2x8x40xf32>
    %537 = arith.mulf %530, %536 : vector<2x8x40xf32>
    %538 = vector.shape_cast %486 : vector<8x1xf32> to vector<1x8x1xf32>
    %539 = vector.broadcast %538 : vector<1x8x1xf32> to vector<2x8x40xf32>
    %540 = arith.addf %537, %539 : vector<2x8x40xf32>
    %cst_196 = arith.constant 0.000000e+00 : f32
    %541 = vector.broadcast %cst_196 : f32 to vector<2x8x40xf32>
    %542 = arith.cmpf oge, %540, %541 : vector<2x8x40xf32>
    %cst_197 = arith.constant 0.00999999977 : f32
    %543 = vector.broadcast %cst_197 : f32 to vector<2x8x40xf32>
    %544 = arith.mulf %543, %540 : vector<2x8x40xf32>
    %545 = arith.select %542, %540, %544 : vector<2x8x40xi1>, vector<2x8x40xf32>
    %546 = arith.addf %545, %477 : vector<2x8x40xf32>
    %c0_198 = arith.constant 0 : index
    %c56 = arith.constant 56 : index
    %c0_199 = arith.constant 0 : index
    %547 = vector.load %arg18[%c0_198, %c56, %c0_199] : memref<2x64x40xf32, #tpu.memory_space<vmem>>, vector<2x8x40xf32>
    tpu.vector_store %arg18[%c0_198, %c56, %c0_199], %546 {strides = array<i32>} : memref<2x64x40xf32, #tpu.memory_space<vmem>>, vector<2x8x40xf32>,
    %c0_200 = arith.constant 0 : index
    %c0_201 = arith.constant 0 : index
    %548 = vector.load %arg10[%c0_200, %c0_201] : memref<512x64xbf16, #tpu.memory_space<vmem>>, vector<512x64xbf16>
    %c0_202 = arith.constant 0 : index
    %c0_203 = arith.constant 0 : index
    %c0_204 = arith.constant 0 : index
    %549 = vector.load %arg18[%c0_202, %c0_203, %c0_204] : memref<2x64x40xf32, #tpu.memory_space<vmem>>, vector<1x64x40xf32>
    %550 = vector.shape_cast %549 : vector<1x64x40xf32> to vector<64x40xf32>
    %551 = arith.truncf %550 : vector<64x40xf32> to vector<64x40xbf16>
    %cst_205 = arith.constant dense<0.000000e+00> : vector<512x40xf32>
    %552 = tpu.matmul %548, %551, %cst_205 {dimension_numbers = #tpu.dot_dimension_numbers<[1], [0], [0], [1], [0, 0, 1, 1], [], []>} : vector<512x64xbf16>, vector<64x40xbf16>, vector<512x40xf32> -> vector<512x40xf32>
    %c1_206 = arith.constant 1 : index
    %c0_207 = arith.constant 0 : index
    %c0_208 = arith.constant 0 : index
    %553 = vector.load %arg18[%c1_206, %c0_207, %c0_208] : memref<2x64x40xf32, #tpu.memory_space<vmem>>, vector<1x64x40xf32>
    %554 = vector.shape_cast %553 : vector<1x64x40xf32> to vector<64x40xf32>
    %555 = arith.truncf %554 : vector<64x40xf32> to vector<64x40xbf16>
    %cst_209 = arith.constant dense<0.000000e+00> : vector<512x40xf32>
    %556 = tpu.matmul %548, %555, %cst_209 {dimension_numbers = #tpu.dot_dimension_numbers<[1], [0], [0], [1], [0, 0, 1, 1], [], []>} : vector<512x64xbf16>, vector<64x40xbf16>, vector<512x40xf32> -> vector<512x40xf32>
    %557 = vector.shape_cast %552 : vector<512x40xf32> to vector<1x512x40xf32>
    %558 = vector.shape_cast %556 : vector<512x40xf32> to vector<1x512x40xf32>
    %559 = tpu.concatenate %557, %558 in 0 : vector<1x512x40xf32>, vector<1x512x40xf32> -> vector<2x512x40xf32>
    %c0_210 = arith.constant 0 : index
    %c0_211 = arith.constant 0 : index
    %560 = vector.load %arg11[%c0_210, %c0_211] : memref<512x1xf32, #tpu.memory_space<vmem>>, vector<512x1xf32>
    %561 = vector.shape_cast %560 : vector<512x1xf32> to vector<1x512x1xf32>
    %562 = vector.broadcast %561 : vector<1x512x1xf32> to vector<2x512x40xf32>
    %563 = arith.addf %559, %562 : vector<2x512x40xf32>
    %564 = vector.extract_strided_slice %563 {offsets = [0, 0, 0], sizes = [2, 256, 40], strides = [1, 1, 1]} : vector<2x512x40xf32> to vector<2x256x40xf32>
    %565 = vector.extract_strided_slice %563 {offsets = [0, 256, 0], sizes = [2, 256, 40], strides = [1, 1, 1]} : vector<2x512x40xf32> to vector<2x256x40xf32>
    %cst_212 = arith.constant dense<0xFF800000> : vector<2x256xf32>
    %566 = vector.multi_reduction <maximumf>, %564, %cst_212 [2] : vector<2x256x40xf32> to vector<2x256xf32>
    %567 = vector.shape_cast %566 : vector<2x256xf32> to vector<2x256x1xf32>
    %c0_213 = arith.constant 0 : index
    %c0_214 = arith.constant 0 : index
    %568 = vector.load %arg12[%c0_213, %c0_214] : memref<256x256xbf16, #tpu.memory_space<vmem>>, vector<256x256xbf16>
    %569 = vector.shape_cast %567 : vector<2x256x1xf32> to vector<2x256x1xf32>
    %570 = vector.broadcast %569 : vector<2x256x1xf32> to vector<2x256x40xf32>
    %571 = arith.truncf %570 : vector<2x256x40xf32> to vector<2x256x40xbf16>
    %572 = vector.extract_strided_slice %571 {offsets = [0, 0, 0], sizes = [1, 256, 40], strides = [1, 1, 1]} : vector<2x256x40xbf16> to vector<1x256x40xbf16>
    %573 = vector.shape_cast %572 : vector<1x256x40xbf16> to vector<256x40xbf16>
    %cst_215 = arith.constant dense<0.000000e+00> : vector<256x40xf32>
    %574 = tpu.matmul %568, %573, %cst_215 {dimension_numbers = #tpu.dot_dimension_numbers<[1], [0], [0], [1], [0, 0, 1, 1], [], []>} : vector<256x256xbf16>, vector<256x40xbf16>, vector<256x40xf32> -> vector<256x40xf32>
    %575 = vector.extract_strided_slice %571 {offsets = [1, 0, 0], sizes = [1, 256, 40], strides = [1, 1, 1]} : vector<2x256x40xbf16> to vector<1x256x40xbf16>
    %576 = vector.shape_cast %575 : vector<1x256x40xbf16> to vector<256x40xbf16>
    %cst_216 = arith.constant dense<0.000000e+00> : vector<256x40xf32>
    %577 = tpu.matmul %568, %576, %cst_216 {dimension_numbers = #tpu.dot_dimension_numbers<[1], [0], [0], [1], [0, 0, 1, 1], [], []>} : vector<256x256xbf16>, vector<256x40xbf16>, vector<256x40xf32> -> vector<256x40xf32>
    %578 = vector.shape_cast %574 : vector<256x40xf32> to vector<1x256x40xf32>
    %579 = vector.shape_cast %577 : vector<256x40xf32> to vector<1x256x40xf32>
    %580 = tpu.concatenate %578, %579 in 0 : vector<1x256x40xf32>, vector<1x256x40xf32> -> vector<2x256x40xf32>
    %581 = arith.addf %565, %580 : vector<2x256x40xf32>
    %cst_217 = arith.constant 0.000000e+00 : f32
    %582 = vector.broadcast %cst_217 : f32 to vector<2x256x40xf32>
    %583 = arith.cmpf oge, %581, %582 : vector<2x256x40xf32>
    %cst_218 = arith.constant 0.00999999977 : f32
    %584 = vector.broadcast %cst_218 : f32 to vector<2x256x40xf32>
    %585 = arith.mulf %584, %581 : vector<2x256x40xf32>
    %586 = arith.select %583, %581, %585 : vector<2x256x40xi1>, vector<2x256x40xf32>
    %c0_219 = arith.constant 0 : index
    %c0_220 = arith.constant 0 : index
    %587 = vector.load %arg13[%c0_219, %c0_220] : memref<64x256xbf16, #tpu.memory_space<vmem>>, vector<64x256xbf16>
    %588 = vector.extract_strided_slice %586 {offsets = [0, 0, 0], sizes = [1, 256, 40], strides = [1, 1, 1]} : vector<2x256x40xf32> to vector<1x256x40xf32>
    %589 = vector.shape_cast %588 : vector<1x256x40xf32> to vector<256x40xf32>
    %590 = arith.truncf %589 : vector<256x40xf32> to vector<256x40xbf16>
    %cst_221 = arith.constant dense<0.000000e+00> : vector<64x40xf32>
    %591 = tpu.matmul %587, %590, %cst_221 {dimension_numbers = #tpu.dot_dimension_numbers<[1], [0], [0], [1], [0, 0, 1, 1], [], []>} : vector<64x256xbf16>, vector<256x40xbf16>, vector<64x40xf32> -> vector<64x40xf32>
    %592 = vector.extract_strided_slice %586 {offsets = [1, 0, 0], sizes = [1, 256, 40], strides = [1, 1, 1]} : vector<2x256x40xf32> to vector<1x256x40xf32>
    %593 = vector.shape_cast %592 : vector<1x256x40xf32> to vector<256x40xf32>
    %594 = arith.truncf %593 : vector<256x40xf32> to vector<256x40xbf16>
    %cst_222 = arith.constant dense<0.000000e+00> : vector<64x40xf32>
    %595 = tpu.matmul %587, %594, %cst_222 {dimension_numbers = #tpu.dot_dimension_numbers<[1], [0], [0], [1], [0, 0, 1, 1], [], []>} : vector<64x256xbf16>, vector<256x40xbf16>, vector<64x40xf32> -> vector<64x40xf32>
    %596 = vector.shape_cast %591 : vector<64x40xf32> to vector<1x64x40xf32>
    %597 = vector.shape_cast %595 : vector<64x40xf32> to vector<1x64x40xf32>
    %598 = tpu.concatenate %596, %597 in 0 : vector<1x64x40xf32>, vector<1x64x40xf32> -> vector<2x64x40xf32>
    %c0_223 = arith.constant 0 : index
    %c0_224 = arith.constant 0 : index
    %599 = vector.load %arg14[%c0_223, %c0_224] : memref<64x1xf32, #tpu.memory_space<vmem>>, vector<64x1xf32>
    %600 = vector.shape_cast %599 : vector<64x1xf32> to vector<1x64x1xf32>
    %601 = vector.broadcast %600 : vector<1x64x1xf32> to vector<2x64x40xf32>
    %602 = arith.addf %598, %601 : vector<2x64x40xf32>
    %cst_225 = arith.constant 0.000000e+00 : f32
    %603 = vector.broadcast %cst_225 : f32 to vector<2x64x40xf32>
    %604 = arith.cmpf oge, %602, %603 : vector<2x64x40xf32>
    %cst_226 = arith.constant 0.00999999977 : f32
    %605 = vector.broadcast %cst_226 : f32 to vector<2x64x40xf32>
    %606 = arith.mulf %605, %602 : vector<2x64x40xf32>
    %607 = arith.select %604, %602, %606 : vector<2x64x40xi1>, vector<2x64x40xf32>
    %c0_227 = arith.constant 0 : index
    %c0_228 = arith.constant 0 : index
    %608 = vector.load %arg15[%c0_227, %c0_228] : memref<2x64xf32, #tpu.memory_space<vmem>>, vector<2x64xf32>
    %609 = vector.extract_strided_slice %607 {offsets = [0, 0, 0], sizes = [1, 64, 40], strides = [1, 1, 1]} : vector<2x64x40xf32> to vector<1x64x40xf32>
    %610 = vector.shape_cast %609 : vector<1x64x40xf32> to vector<64x40xf32>
    %cst_229 = arith.constant dense<0.000000e+00> : vector<2x40xf32>
    %611 = tpu.matmul %608, %610, %cst_229 {dimension_numbers = #tpu.dot_dimension_numbers<[1], [0], [0], [1], [0, 0, 1, 1], [], []>} : vector<2x64xf32>, vector<64x40xf32>, vector<2x40xf32> -> vector<2x40xf32>
    %612 = vector.extract_strided_slice %607 {offsets = [1, 0, 0], sizes = [1, 64, 40], strides = [1, 1, 1]} : vector<2x64x40xf32> to vector<1x64x40xf32>
    %613 = vector.shape_cast %612 : vector<1x64x40xf32> to vector<64x40xf32>
    %cst_230 = arith.constant dense<0.000000e+00> : vector<2x40xf32>
    %614 = tpu.matmul %608, %613, %cst_230 {dimension_numbers = #tpu.dot_dimension_numbers<[1], [0], [0], [1], [0, 0, 1, 1], [], []>} : vector<2x64xf32>, vector<64x40xf32>, vector<2x40xf32> -> vector<2x40xf32>
    %615 = vector.shape_cast %611 : vector<2x40xf32> to vector<1x2x40xf32>
    %616 = vector.shape_cast %614 : vector<2x40xf32> to vector<1x2x40xf32>
    %617 = tpu.concatenate %615, %616 in 0 : vector<1x2x40xf32>, vector<1x2x40xf32> -> vector<2x2x40xf32>
    %c0_231 = arith.constant 0 : index
    %c0_232 = arith.constant 0 : index
    %618 = vector.load %arg16[%c0_231, %c0_232] : memref<2x1xf32, #tpu.memory_space<vmem>>, vector<2x1xf32>
    %619 = vector.shape_cast %618 : vector<2x1xf32> to vector<1x2x1xf32>
    %620 = vector.broadcast %619 : vector<1x2x1xf32> to vector<2x2x40xf32>
    %621 = arith.addf %617, %620 : vector<2x2x40xf32>
    %c0_233 = arith.constant 0 : index
    %c0_234 = arith.constant 0 : index
    %c0_235 = arith.constant 0 : index
    %622 = vector.load %arg17[%c0_233, %c0_234, %c0_235] : memref<2x2x40xf32, #tpu.memory_space<vmem>>, vector<2x2x40xf32>
    tpu.vector_store %arg17[%c0_233, %c0_234, %c0_235], %621 {strides = array<i32>} : memref<2x2x40xf32, #tpu.memory_space<vmem>>, vector<2x2x40xf32>,
    return
  }
  func.func @transform_0(%arg0: i32) -> (i32, i32, i32) {
    %c0_i32 = arith.constant 0 : i32
    %c0_i32_0 = arith.constant 0 : i32
    %c0_i32_1 = arith.constant 0 : i32
    %c0_i32_2 = arith.constant 0 : i32
    return %c0_i32, %c0_i32_0, %c0_i32_1 : i32, i32, i32
  }
  func.func @transform_1(%arg0: i32) -> (i32, i32) {
    %c0_i32 = arith.constant 0 : i32
    %c0_i32_0 = arith.constant 0 : i32
    %c0_i32_1 = arith.constant 0 : i32
    return %c0_i32, %c0_i32_0 : i32, i32
  }
  func.func @transform_2(%arg0: i32) -> (i32, i32) {
    %c0_i32 = arith.constant 0 : i32
    %c0_i32_0 = arith.constant 0 : i32
    %c0_i32_1 = arith.constant 0 : i32
    return %c0_i32, %c0_i32_0 : i32, i32
  }
  func.func @transform_3(%arg0: i32) -> (i32, i32) {
    %c0_i32 = arith.constant 0 : i32
    %c0_i32_0 = arith.constant 0 : i32
    %c0_i32_1 = arith.constant 0 : i32
    return %c0_i32, %c0_i32_0 : i32, i32
  }
  func.func @transform_4(%arg0: i32) -> (i32, i32) {
    %c0_i32 = arith.constant 0 : i32
    %c0_i32_0 = arith.constant 0 : i32
    %c0_i32_1 = arith.constant 0 : i32
    return %c0_i32, %c0_i32_0 : i32, i32
  }
  func.func @transform_5(%arg0: i32) -> (i32, i32, i32) {
    %c0_i32 = arith.constant 0 : i32
    %c0_i32_0 = arith.constant 0 : i32
    %c0_i32_1 = arith.constant 0 : i32
    %c0_i32_2 = arith.constant 0 : i32
    return %c0_i32, %c0_i32_0, %c0_i32_1 : i32, i32, i32
  }
  func.func @transform_6(%arg0: i32) -> (i32, i32, i32) {
    %c0_i32 = arith.constant 0 : i32
    %c0_i32_0 = arith.constant 0 : i32
    %c0_i32_1 = arith.constant 0 : i32
    %c0_i32_2 = arith.constant 0 : i32
    return %c0_i32, %c0_i32_0, %c0_i32_1 : i32, i32, i32
  }
  func.func @transform_7(%arg0: i32) -> (i32, i32, i32) {
    %c0_i32 = arith.constant 0 : i32
    %c0_i32_0 = arith.constant 0 : i32
    %c0_i32_1 = arith.constant 0 : i32
    %c0_i32_2 = arith.constant 0 : i32
    return %c0_i32, %c0_i32_0, %c0_i32_1 : i32, i32, i32
  }
  func.func @transform_8(%arg0: i32) -> (i32, i32, i32) {
    %c0_i32 = arith.constant 0 : i32
    %c0_i32_0 = arith.constant 0 : i32
    %c0_i32_1 = arith.constant 0 : i32
    %c0_i32_2 = arith.constant 0 : i32
    return %c0_i32, %c0_i32_0, %c0_i32_1 : i32, i32, i32
  }
  func.func @transform_9(%arg0: i32) -> (i32, i32) {
    %c0_i32 = arith.constant 0 : i32
    %c0_i32_0 = arith.constant 0 : i32
    %c0_i32_1 = arith.constant 0 : i32
    return %c0_i32, %c0_i32_0 : i32, i32
  }
  func.func @transform_10(%arg0: i32) -> (i32, i32) {
    %c0_i32 = arith.constant 0 : i32
    %c0_i32_0 = arith.constant 0 : i32
    %c0_i32_1 = arith.constant 0 : i32
    return %c0_i32, %c0_i32_0 : i32, i32
  }
  func.func @transform_11(%arg0: i32) -> (i32, i32) {
    %c0_i32 = arith.constant 0 : i32
    %c0_i32_0 = arith.constant 0 : i32
    %c0_i32_1 = arith.constant 0 : i32
    return %c0_i32, %c0_i32_0 : i32, i32
  }
  func.func @transform_12(%arg0: i32) -> (i32, i32) {
    %c0_i32 = arith.constant 0 : i32
    %c0_i32_0 = arith.constant 0 : i32
    %c0_i32_1 = arith.constant 0 : i32
    return %c0_i32, %c0_i32_0 : i32, i32
  }
  func.func @transform_13(%arg0: i32) -> (i32, i32) {
    %c0_i32 = arith.constant 0 : i32
    %c0_i32_0 = arith.constant 0 : i32
    %c0_i32_1 = arith.constant 0 : i32
    return %c0_i32, %c0_i32_0 : i32, i32
  }
  func.func @transform_14(%arg0: i32) -> (i32, i32) {
    %c0_i32 = arith.constant 0 : i32
    %c0_i32_0 = arith.constant 0 : i32
    %c0_i32_1 = arith.constant 0 : i32
    return %c0_i32, %c0_i32_0 : i32, i32
  }
  func.func @transform_15(%arg0: i32) -> (i32, i32) {
    %c0_i32 = arith.constant 0 : i32
    %c0_i32_0 = arith.constant 0 : i32
    %c0_i32_1 = arith.constant 0 : i32
    return %c0_i32, %c0_i32_0 : i32, i32
  }
  func.func @transform_16(%arg0: i32) -> (i32, i32, i32) {
    %c0_i32 = arith.constant 0 : i32
    %c0_i32_0 = arith.constant 0 : i32
    %c0_i32_1 = arith.constant 0 : i32
    %c0_i32_2 = arith.constant 0 : i32
    return %c0_i32, %c0_i32_0, %c0_i32_1 : i32, i32, i32
  }
}

</mosaic_0001>

<bundles_post_ra>
// kernel: _lambda_.1
= control target key start
LH: loop header
LB: loop body
LE: loop exit
PB: predicated region body
PF: predicated region fallthrough
CT: control target
= control target key end

     0   :  { %s9468_s0 = inlined_call_operand.vmem [shape: f32[2,16,40], index: 0, kind: input, shape index: {}]   ;;  %s9469_s1 = inlined_call_operand.hbm [shape: f32[8,144], index: 1, kind: input, shape index: {}]   ;;  %s9470_s2 = inlined_call_operand.hbm [shape: f32[8,1], index: 2, kind: input, shape index: {}]   ;;  %s9471_s3 = inlined_call_operand.vmem [shape: f32[8,1], index: 3, kind: input, shape index: {}]   ;;  %s9472_s4 = inlined_call_operand.vmem [shape: f32[8,1], index: 4, kind: input, shape index: {}]   ;;  %s9473_s5 = inlined_call_operand.hbm [shape: f32[7,8,72], index: 5, kind: input, shape index: {}]   ;;  %s9474_s6 = inlined_call_operand.hbm [shape: f32[7,8,1], index: 6, kind: input, shape index: {}]   ;;  %s9475_s7 = inlined_call_operand.vmem [shape: f32[7,8,1], index: 7, kind: input, shape index: {}]   ;;  %s9476_s8 = inlined_call_operand.vmem [shape: f32[7,8,1], index: 8, kind: input, shape index: {}]   ;;  %s9477_s9 = inlined_call_operand.vmem [shape: bf16[512,64], index: 9, kind: input, shape index: {}]   ;;  %s9478_s10 = inlined_call_operand.vmem [shape: f32[512,1], index: 10, kind: input, shape index: {}]   ;;  %s9479_s11 = inlined_call_operand.vmem [shape: bf16[256,256], index: 11, kind: input, shape index: {}]   ;;  %s9480_s12 = inlined_call_operand.vmem [shape: bf16[64,256], index: 12, kind: input, shape index: {}]   ;;  %s9481_s13 = inlined_call_operand.hbm [shape: f32[64,1], index: 13, kind: input, shape index: {}]   ;;  %s9482_s14 = inlined_call_operand.vmem [shape: f32[2,64], index: 14, kind: input, shape index: {}]   ;;  %s9483_s15 = inlined_call_operand.vmem [shape: f32[2,1], index: 15, kind: input, shape index: {}]   ;;  %s9484_s16 = inlined_call_operand.hbm [shape: f32[2,2,40], index: 16, kind: output, shape index: {}]  }
   0x1   :  { %9499 = sst [smem:[#allocation61_spill]] %s9468_s0 }
   0x2   :  { %21 = vsyncpa [#allocation4], 0 }
   0x3   :  { %22 = vsyncpa [#allocation7], 0 }
   0x4   :  { %23 = vsyncpa [#allocation10], 0 }
   0x5   :  { %24 = vsyncpa [#allocation5], 0  ;;  %s7442_s21 = smov [#allocation6]   ;;  %s7302_s25 = scalar_lea.hbm %s9470_s2, 128 }
   0x6   :  { %s43_s22 = sshll.u32 %s7442_s21, 4  ;;  %p7303_p0 = scmp.ne.s32.totalorder %s9470_s2, %s7302_s25  ;;  %s44_s22 = int_to_ptr.vmem [resolvable:$true] %s43_s22 }
   0x7   :  { %p7306_p1 = scmp.lt.u32.totalorder %s7302_s25, %s9470_s2 }
   0x9   :  { %p7308_p2 = pnand %p7306_p1, %p7303_p0 }
   0xb   :  { %7311 = shalt.err (!%p7308_p2)
}
   0xc   :  { %s7312_s30 = scalar_lea.vmem %s44_s22, 128  ;;  %p7317_p4 = scmp.lt.s32.totalorder %s44_s22, %s44_s22 }
   0xd   :  { %p7313_p3 = scmp.ne.s32.totalorder %s44_s22, %s7312_s30  ;;  %p7318_p5 = scmp.lt.s32.totalorder %s7312_s30, %s7312_s30 }
   0xf   :  { %p7319_p6 = por %p7318_p5, %p7317_p4 }
  0x11   :  { %p7320_p7 = pnand %p7319_p6, %p7313_p3 }
  0x13   :  { %7323 = shalt.err (!%p7320_p7)
}
  0x14   :  { %46 = dma.hbm_to_vmem [thread:$0]  %s9470_s2, 128, %s44_s22, [#allocation7]  }
  0x15   :  { %s7443_s18 = smov [#allocation9]   ;;  %s7444_s20 = smov [#allocation3]  }
  0x16   :  { %s68_s19 = sshll.u32 %s7443_s18, 4  ;;  %s33_s21 = sshll.u32 %s7444_s20, 4  ;;  %s69_s19 = int_to_ptr.vmem [resolvable:$true] %s68_s19  ;;  %s34_s21 = int_to_ptr.vmem [resolvable:$true] %s33_s21 }
  0x17   :  { %s7324_s25 = scalar_lea.hbm %s9474_s6, 896 }
  0x18   :  { %p7325_p8 = scmp.ne.s32.totalorder %s9474_s6, %s7324_s25  ;;  %p7328_p9 = scmp.lt.u32.totalorder %s7324_s25, %s9474_s6 }
  0x1a   :  { %p7330_p10 = pnand %p7328_p9, %p7325_p8 }
  0x1c   :  { %7333 = shalt.err (!%p7330_p10)
}
  0x1d   :  { %s7334_s2 = scalar_lea.vmem %s69_s19, 896  ;;  %p7339_p12 = scmp.lt.s32.totalorder %s69_s19, %s69_s19 }
  0x1e   :  { %p7335_p11 = scmp.ne.s32.totalorder %s69_s19, %s7334_s2  ;;  %p7340_p13 = scmp.lt.s32.totalorder %s7334_s2, %s7334_s2 }
  0x20   :  { %p7341_p0 = por %p7340_p13, %p7339_p12 }
  0x22   :  { %p7342_p1 = pnand %p7341_p0, %p7335_p11 }
  0x24   :  { %7345 = shalt.err (!%p7342_p1)
}
  0x25   :  { %s7445_s22 = smov 128   ;;  %s7446_s30 = smov 8  }
  0x26   :  { %74 = dma.hbm_to_vmem [thread:$0]  %s9474_s6, 896, %s69_s19, [#allocation10], %s7445_s22, %s7445_s22, %s7446_s30  }
  0x27   :  { %s7346_s23 = scalar_lea.hbm %s9469_s1, 256 }
  0x28   :  { %p7347_p2 = scmp.ne.s32.totalorder %s9469_s1, %s7346_s23  ;;  %p7350_p3 = scmp.lt.u32.totalorder %s7346_s23, %s9469_s1 }
  0x2a   :  { %p7352_p4 = pnand %p7350_p3, %p7347_p2 }
  0x2c   :  { %7355 = shalt.err (!%p7352_p4)
}
  0x2d   :  { %s7356_s28 = scalar_lea.vmem %s34_s21, 256  ;;  %p7361_p6 = scmp.lt.s32.totalorder %s34_s21, %s34_s21 }
  0x2e   :  { %p7357_p5 = scmp.ne.s32.totalorder %s34_s21, %s7356_s28  ;;  %p7362_p7 = scmp.lt.s32.totalorder %s7356_s28, %s7356_s28 }
  0x30   :  { %p7363_p8 = por %p7362_p7, %p7361_p6 }
  0x32   :  { %p7364_p9 = pnand %p7363_p8, %p7357_p5 }
  0x34   :  { %7367 = shalt.err (!%p7364_p9)
}
  0x35   :  { %36 = dma.hbm_to_vmem [thread:$0]  %s9469_s1, 256, %s34_s21, [#allocation4]  }
  0x36   :  { %s7447_s29 = smov [#allocation8]   ;;  %s7448_s0 = smov [#allocation11]  }
  0x37   :  { %s56_s2 = sshll.u32 %s7447_s29, 4  ;;  %s92_s17 = sshll.u32 %s7448_s0, 4  ;;  %s57_s2 = int_to_ptr.vmem [resolvable:$true] %s56_s2  ;;  %s93_s17 = int_to_ptr.vmem [resolvable:$true] %s92_s17 }
  0x38   :  { %s7368_s23 = scalar_lea.hbm %s9473_s5, 896 }
  0x39   :  { %p7369_p10 = scmp.ne.s32.totalorder %s9473_s5, %s7368_s23  ;;  %p7372_p11 = scmp.lt.u32.totalorder %s7368_s23, %s9473_s5 }
  0x3b   :  { %p7374_p12 = pnand %p7372_p11, %p7369_p10 }
  0x3d   :  { %7377 = shalt.err (!%p7374_p12)
}
  0x3e   :  { %s7378_s1 = scalar_lea.vmem %s57_s2, 896  ;;  %p7383_p0 = scmp.lt.s32.totalorder %s57_s2, %s57_s2 }
  0x3f   :  { %p7379_p13 = scmp.ne.s32.totalorder %s57_s2, %s7378_s1  ;;  %p7384_p1 = scmp.lt.s32.totalorder %s7378_s1, %s7378_s1 }
  0x41   :  { %p7385_p2 = por %p7384_p1, %p7383_p0 }
  0x43   :  { %p7386_p3 = pnand %p7385_p2, %p7379_p13 }
  0x45   :  { %7389 = shalt.err (!%p7386_p3)
}
  0x46   :  { %62 = dma.hbm_to_vmem [thread:$0]  %s9473_s5, 896, %s57_s2, [#allocation7], %s7445_s22, %s7445_s22, %s7446_s30  }
  0x47   :  { %s7390_s29 = scalar_lea.hbm %s9481_s13, 1024 }
  0x48   :  { %p7391_p4 = scmp.ne.s32.totalorder %s9481_s13, %s7390_s29  ;;  %p7394_p5 = scmp.lt.u32.totalorder %s7390_s29, %s9481_s13 }
  0x4a   :  { %p7396_p6 = pnand %p7394_p5, %p7391_p4 }
  0x4c   :  { %7399 = shalt.err (!%p7396_p6)
}
  0x4d   :  { %s7400_s24 = scalar_lea.vmem %s93_s17, 1024  ;;  %p7405_p8 = scmp.lt.s32.totalorder %s93_s17, %s93_s17 }
  0x4e   :  { %p7401_p7 = scmp.ne.s32.totalorder %s93_s17, %s7400_s24  ;;  %p7406_p9 = scmp.lt.s32.totalorder %s7400_s24, %s7400_s24 }
  0x50   :  { %p7407_p10 = por %p7406_p9, %p7405_p8 }
  0x52   :  { %p7408_p11 = pnand %p7407_p10, %p7401_p7 }
  0x54   :  { %7411 = shalt.err (!%p7408_p11)
}
  0x55   :  { %98 = dma.hbm_to_vmem [thread:$0]  %s9481_s13, 1024, %s93_s17, [#allocation10], %s7445_s22, %s7445_s22, %s7446_s30  }
  0x56   :  { %7434 = dma.done.wait [#allocation4], 256  }
  0x57   :  { %7435 = vsyncadd [#allocation4], 4294967040 }
  0x58   :  { %7436 = dma.done.wait [#allocation7], 1024  }
  0x59   :  { %7437 = vsyncadd [#allocation7], 4294966272 }
  0x5a   :  { %7438 = dma.done.wait [#allocation10], 1920  }
  0x5b   :  { %7439 = vsyncadd [#allocation10], 4294965376  ;;  %s9500_s27 = sld [smem:[#allocation61_spill]]  ;;  %v9488_v5 = vmov 0.0|0.0   ;;  %s7450_s17 = smov 4   ;;  %vm168_vm0 = vcmask 31744  }
  0x5c   :  { %6555 = vmatprep.subr.bf16.mxu0 %v9488_v5  ;;  %6582 = vmatprep.subr.bf16.mxu1 %v9488_v5  ;;  %s7451_s19 = smov 92   ;;  %s7452_s29 = smov 44   ;;  %vm173_vm1 = vcmask 359424   ;;  %v124_v37 = vld [vmem:[#allocation3 + $0x8] sm:$0xff]  ;;  %vm278_vm2 = vcmask 130048   ;;  %v7460_v38 = vmov 0  }
  0x5d   :  { %s7453_s0 = smov 127   ;;  %s7454_s18 = smov 126   ;;  %5379 = vmatprep.mubr.msk.f32.mxu0 %vm278_vm2, %v124_v37  ;;  %5380 = vmatprep.mubr.msk.f32.mxu1 %vm278_vm2, %v124_v37  ;;  %v125_v39 = vld [vmem:[#allocation6] sm:$0xff]  ;;  %vm429_vm3 = vcmask 326656   ;;  %vm7462_vm6 = vmmov 0   ;;  %vm557_vm7 = vcmask 588800  }
  0x5e   :  { %s7455_s20 = smov 125   ;;  %s7456_s23 = smov 124   ;;  %6947 = vset.pattern.permute.xlu0 %v7460_v38  ;;  %6948 = vset.pattern.permute.xlu1 %v7460_v38  ;;  %vm1350_vm14 = vcmask 64512   ;;  %vm1353_vm15 = vcmask 392192  }
  0x5f   :  { %s7457_s24 = smov 123   ;;  %s7458_s5 = smov 122  }
  0x60   :  { %s7459_s2 = smov 121   ;;  %s7461_s25 = smov 120  }
  0x61   :  { %v119_v0 = vld [vmem:[%s9500_s27] sm:$0xff]  ;;  %v120_v1 = vld [vmem:[%s9500_s27 + $0x8] sm:$0xff]  ;;  %v121_v2 = vld [vmem:[%s9500_s27 + $0x10] sm:$0xff]  ;;  %s7467_s1 = smov 118   ;;  %s7468_s21 = smov 112  }
  0x62   :  { %v6847_v3 = vpack.i.bf16 %v120_v1, %v119_v0  ;;  %v122_v4 = vld [vmem:[%s9500_s27 + $0x18] sm:$0xff]  ;;  %s7470_s26 = smov 16   ;;  %s7471_s27 = smov 104  }
  0x63   :  { %v6852_v6 = vpack.i.bf16 %v122_v4, %v121_v2 }
  0x64   :  { %6848 = vrot.lane.b32.xlu1 %v6847_v3, %s7450_s17  ;;  %6838 = vrot.lane.b32.xlu0 %v6847_v3, %s7451_s19 }
  0x68   :  { %6853 = vrot.lane.b32.xlu1 %v6852_v6, %s7450_s17  ;;  %6843 = vrot.lane.b32.xlu0 %v6852_v6, %s7451_s19 }
  0x6c   :  { %6863 = vrot.lane.b32.xlu1 %v6852_v6, %s7452_s29  ;;  %6858 = vrot.lane.b32.xlu0 %v6847_v3, %s7452_s29 }
  0xd6   :  { %v6849_v7 = vpop.permute.xlu1 %6848  ;;  %v6839_v8 = vpop.permute.xlu0 %6838 }
  0xd7   :  { %v6851_v11 = vunpack.i.h.bf16 %v6849_v7  ;;  %v6850_v12 = vunpack.i.l.bf16 %v6849_v7  ;;  %v6841_v13 = vunpack.i.h.bf16 %v6839_v8  ;;  %v6840_v14 = vunpack.i.l.bf16 %v6839_v8 }
  0xd9   :  { %v170_v25 = vsel %vm168_vm0, %v6841_v13, %v6851_v11  ;;  %v169_v26 = vsel %vm168_vm0, %v6840_v14, %v6850_v12 }
  0xda   :  { %v6854_v9 = vpop.permute.xlu1 %6853  ;;  %v6844_v10 = vpop.permute.xlu0 %6843 }
  0xdb   :  { %v6856_v15 = vunpack.i.h.bf16 %v6854_v9  ;;  %v6855_v16 = vunpack.i.l.bf16 %v6854_v9  ;;  %v6846_v17 = vunpack.i.h.bf16 %v6844_v10  ;;  %v6845_v18 = vunpack.i.l.bf16 %v6844_v10 }
  0xdd   :  { %v172_v27 = vsel %vm168_vm0, %v6846_v17, %v6856_v15  ;;  %v171_v28 = vsel %vm168_vm0, %v6845_v18, %v6855_v16 }
  0xde   :  { %v6864_v19 = vpop.permute.xlu1 %6863  ;;  %v6859_v20 = vpop.permute.xlu0 %6858 }
  0xdf   :  { %v6866_v21 = vunpack.i.h.bf16 %v6864_v19  ;;  %v6865_v22 = vunpack.i.l.bf16 %v6864_v19  ;;  %v6861_v23 = vunpack.i.h.bf16 %v6859_v20  ;;  %v6860_v24 = vunpack.i.l.bf16 %v6859_v20 }
  0xe1   :  { %v176_v29 = vsel %vm173_vm1, %v171_v28, %v6865_v22  ;;  %v177_v30 = vsel %vm173_vm1, %v172_v27, %v6866_v21  ;;  %v174_v31 = vsel %vm173_vm1, %v169_v26, %v6860_v24  ;;  %v175_v32 = vsel %vm173_vm1, %v170_v25, %v6861_v23 }
  0xe2   :  { %v6872_v33 = vpack.i.bf16 %v177_v30, %v176_v29  ;;  %v6583_v34 = vpack.c.bf16 %v177_v30, %v176_v29  ;;  %v6867_v35 = vpack.i.bf16 %v175_v32, %v174_v31  ;;  %v6556_v36 = vpack.c.bf16 %v175_v32, %v174_v31 }
  0xe4   :  { %6873 = vrot.lane.b32.xlu1 %v6872_v33, %s7453_s0  ;;  %6584 = vmatpush1.bf16.msra.mxu1 %v6583_v34 }
  0xe5   :  { %6868 = vrot.lane.b32.xlu0 %v6867_v35, %s7453_s0  ;;  %6557 = vmatpush1.bf16.msra.mxu0 %v6556_v36 }
  0xe6   :  { %6585 = vmatprep.subr.bf16.mxu1 %v9488_v5  ;;  %6558 = vmatprep.subr.bf16.mxu0 %v9488_v5 }
  0xe8   :  { %6883 = vrot.lane.b32.xlu1 %v6872_v33, %s7454_s18 }
  0xe9   :  { %6878 = vrot.lane.b32.xlu0 %v6867_v35, %s7454_s18 }
  0xec   :  { %6893 = vrot.lane.b32.xlu1 %v6872_v33, %s7455_s20 }
  0xed   :  { %6888 = vrot.lane.b32.xlu0 %v6867_v35, %s7455_s20 }
  0xf0   :  { %6903 = vrot.lane.b32.xlu1 %v6872_v33, %s7456_s23 }
  0xf1   :  { %6898 = vrot.lane.b32.xlu0 %v6867_v35, %s7456_s23 }
  0xf4   :  { %6913 = vrot.lane.b32.xlu1 %v6872_v33, %s7457_s24 }
  0xf5   :  { %6908 = vrot.lane.b32.xlu0 %v6867_v35, %s7457_s24 }
  0xf8   :  { %6923 = vrot.lane.b32.xlu1 %v6872_v33, %s7458_s5 }
  0xf9   :  { %6918 = vrot.lane.b32.xlu0 %v6867_v35, %s7458_s5 }
  0xfc   :  { %6933 = vrot.lane.b32.xlu1 %v6872_v33, %s7459_s2 }
  0xfd   :  { %6928 = vrot.lane.b32.xlu0 %v6867_v35, %s7459_s2 }
 0x100   :  { %6943 = vrot.lane.b32.xlu1 %v6872_v33, %s7461_s25 }
 0x101   :  { %6938 = vrot.lane.b32.xlu0 %v6867_v35, %s7461_s25 }
 0x105   :  { %424 = vperm.xlu0 %6947, %v125_v39  }
 0x156   :  { %v6874_v40 = vpop.permute.xlu1 %6873 }
 0x157   :  { %v6876_v41 = vunpack.i.h.bf16 %v6874_v40  ;;  %v6875_v42 = vunpack.i.l.bf16 %v6874_v40  ;;  %v6869_v43 = vpop.permute.xlu0 %6868 }
 0x158   :  { %v6871_v44 = vunpack.i.h.bf16 %v6869_v43  ;;  %v6870_v45 = vunpack.i.l.bf16 %v6869_v43 }
 0x159   :  { %v6586_v46 = vpack.c.bf16 %v6876_v41, %v6875_v42  ;;  %v123_v41 = vld [vmem:[#allocation3] sm:$0xff] }
 0x15a   :  { %v6884_v47 = vpop.permute.xlu1 %6883  ;;  %v6559_v48 = vpack.c.bf16 %v6871_v44, %v6870_v45 }
 0x15b   :  { %v6886_v49 = vunpack.i.h.bf16 %v6884_v47  ;;  %v6885_v50 = vunpack.i.l.bf16 %v6884_v47  ;;  %v6879_v51 = vpop.permute.xlu0 %6878  ;;  %6587 = vmatpush1.bf16.msra.mxu1 %v6586_v46 }
 0x15c   :  { %v6881_v52 = vunpack.i.h.bf16 %v6879_v51  ;;  %v6880_v53 = vunpack.i.l.bf16 %v6879_v51  ;;  %6560 = vmatpush1.bf16.msra.mxu0 %v6559_v48  ;;  %6588 = vmatprep.subr.bf16.mxu1 %v9488_v5 }
 0x15d   :  { %6561 = vmatprep.subr.bf16.mxu0 %v9488_v5  ;;  %v6589_v54 = vpack.c.bf16 %v6886_v49, %v6885_v50 }
 0x15e   :  { %v6894_v55 = vpop.permute.xlu1 %6893  ;;  %v6562_v56 = vpack.c.bf16 %v6881_v52, %v6880_v53 }
 0x15f   :  { %v6896_v57 = vunpack.i.h.bf16 %v6894_v55  ;;  %v6895_v58 = vunpack.i.l.bf16 %v6894_v55  ;;  %v6889_v59 = vpop.permute.xlu0 %6888  ;;  %6590 = vmatpush1.bf16.msra.mxu1 %v6589_v54  ;;  %v127_v55 = vld [vmem:[%s9472_s4] sm:$0xff] }
 0x160   :  { %v6891_v60 = vunpack.i.h.bf16 %v6889_v59  ;;  %v6890_v61 = vunpack.i.l.bf16 %v6889_v59  ;;  %6563 = vmatpush1.bf16.msra.mxu0 %v6562_v56  ;;  %6591 = vmatprep.subr.bf16.mxu1 %v9488_v5 }
 0x161   :  { %6564 = vmatprep.subr.bf16.mxu0 %v9488_v5  ;;  %v6592_v62 = vpack.c.bf16 %v6896_v57, %v6895_v58 }
 0x162   :  { %v6904_v63 = vpop.permute.xlu1 %6903  ;;  %v6565_v0 = vpack.c.bf16 %v6891_v60, %v6890_v61 }
 0x163   :  { %v6906_v1 = vunpack.i.h.bf16 %v6904_v63  ;;  %v6905_v2 = vunpack.i.l.bf16 %v6904_v63  ;;  %v6899_v3 = vpop.permute.xlu0 %6898  ;;  %6593 = vmatpush1.bf16.msra.mxu1 %v6592_v62 }
 0x164   :  { %v6901_v4 = vunpack.i.h.bf16 %v6899_v3  ;;  %v6900_v6 = vunpack.i.l.bf16 %v6899_v3  ;;  %6566 = vmatpush1.bf16.msra.mxu0 %v6565_v0  ;;  %6594 = vmatprep.subr.bf16.mxu1 %v9488_v5 }
 0x165   :  { %6567 = vmatprep.subr.bf16.mxu0 %v9488_v5  ;;  %v6595_v7 = vpack.c.bf16 %v6906_v1, %v6905_v2 }
 0x166   :  { %v6914_v8 = vpop.permute.xlu1 %6913  ;;  %v6568_v9 = vpack.c.bf16 %v6901_v4, %v6900_v6  ;;  %v126_v4 = vld [vmem:[%s9471_s3] sm:$0xff]  ;;  %s7469_s3 = smov 114  }
 0x167   :  { %v6916_v10 = vunpack.i.h.bf16 %v6914_v8  ;;  %v6915_v11 = vunpack.i.l.bf16 %v6914_v8  ;;  %v6909_v12 = vpop.permute.xlu0 %6908  ;;  %6596 = vmatpush1.bf16.msra.mxu1 %v6595_v7 }
 0x168   :  { %v6911_v13 = vunpack.i.h.bf16 %v6909_v12  ;;  %v6910_v14 = vunpack.i.l.bf16 %v6909_v12  ;;  %6569 = vmatpush1.bf16.msra.mxu0 %v6568_v9  ;;  %6597 = vmatprep.subr.bf16.mxu1 %v9488_v5 }
 0x169   :  { %6570 = vmatprep.subr.bf16.mxu0 %v9488_v5  ;;  %v6598_v15 = vpack.c.bf16 %v6916_v10, %v6915_v11 }
 0x16a   :  { %v6924_v16 = vpop.permute.xlu1 %6923  ;;  %v6571_v17 = vpack.c.bf16 %v6911_v13, %v6910_v14 }
 0x16b   :  { %v6926_v18 = vunpack.i.h.bf16 %v6924_v16  ;;  %v6925_v19 = vunpack.i.l.bf16 %v6924_v16  ;;  %v6919_v20 = vpop.permute.xlu0 %6918  ;;  %6599 = vmatpush1.bf16.msra.mxu1 %v6598_v15 }
 0x16c   :  { %v6921_v21 = vunpack.i.h.bf16 %v6919_v20  ;;  %v6920_v22 = vunpack.i.l.bf16 %v6919_v20  ;;  %6572 = vmatpush1.bf16.msra.mxu0 %v6571_v17  ;;  %6600 = vmatprep.subr.bf16.mxu1 %v9488_v5 }
 0x16d   :  { %6573 = vmatprep.subr.bf16.mxu0 %v9488_v5  ;;  %v6601_v23 = vpack.c.bf16 %v6926_v18, %v6925_v19 }
 0x16e   :  { %v6934_v24 = vpop.permute.xlu1 %6933  ;;  %v6574_v25 = vpack.c.bf16 %v6921_v21, %v6920_v22 }
 0x16f   :  { %v6936_v26 = vunpack.i.h.bf16 %v6934_v24  ;;  %v6935_v27 = vunpack.i.l.bf16 %v6934_v24  ;;  %v6929_v28 = vpop.permute.xlu0 %6928  ;;  %6602 = vmatpush1.bf16.msra.mxu1 %v6601_v23 }
 0x170   :  { %v6931_v29 = vunpack.i.h.bf16 %v6929_v28  ;;  %v6930_v30 = vunpack.i.l.bf16 %v6929_v28  ;;  %6575 = vmatpush1.bf16.msra.mxu0 %v6574_v25  ;;  %6603 = vmatprep.subr.bf16.mxu1 %v9488_v5 }
 0x171   :  { %6576 = vmatprep.subr.bf16.mxu0 %v9488_v5  ;;  %v6604_v31 = vpack.c.bf16 %v6936_v26, %v6935_v27 }
 0x172   :  { %v6944_v32 = vpop.permute.xlu1 %6943  ;;  %v6577_v33 = vpack.c.bf16 %v6931_v29, %v6930_v30 }
 0x173   :  { %v6946_v34 = vunpack.i.h.bf16 %v6944_v32  ;;  %v6945_v35 = vunpack.i.l.bf16 %v6944_v32  ;;  %v6939_v36 = vpop.permute.xlu0 %6938  ;;  %6605 = vmatpush1.bf16.msra.mxu1 %v6604_v31  ;;  %v9486_v31 = vmov 0.0   ;;  %v480_v32 = vld [vmem:[#allocation9] sm:$0xff] }
 0x174   :  { %v6941_v37 = vunpack.i.h.bf16 %v6939_v36  ;;  %v6940_v38 = vunpack.i.l.bf16 %v6939_v36  ;;  %6578 = vmatpush1.bf16.msra.mxu0 %v6577_v33  ;;  %6606 = vmatprep.subr.bf16.mxu1 %v9488_v5 }
 0x175   :  { %6579 = vmatprep.subr.bf16.mxu0 %v9488_v5  ;;  %v6607_v39 = vpack.c.bf16 %v6946_v34, %v6945_v35 }
 0x176   :  { %v6580_v40 = vpack.c.bf16 %v6941_v37, %v6940_v38 }
 0x177   :  { %6608 = vmatpush1.bf16.msra.mxu1 %v6607_v39 }
 0x178   :  { %6581 = vmatpush1.bf16.msra.mxu0 %v6580_v40  ;;  %6621 = vmatprep.subr.bf16.mxu1 %v9488_v5 }
 0x179   :  { %6609 = vmatprep.subr.bf16.mxu0 %v9488_v5 }
 0x17a   :  { %417 = vmatmul.mubr.f32.vlgmr.msra.gmra.mrb[0].mxu1 %v123_v41 }
 0x17b   :  { %347 = vmatmul.mubr.f32.vlgmr.msra.gmra.mrb[0].mxu0 %v123_v41  ;;  %6118 = vmatprep.mubr.msk.f32.mxu1 %vm7462_vm6, %v9486_v31 }
 0x17c   :  { %6097 = vmatprep.mubr.msk.f32.mxu0 %vm7462_vm6, %v9486_v31 }
 0x184   :  { %v425_v42 = vpop.permute.xlu0 %424 }
 0x24d   :  { %v418_v43 = vpop.f32.mrb[0].mxu1 }
 0x24e   :  { %v428_v44 = vadd.f32 %v425_v42, %v418_v43  ;;  %v348_v45 = vpop.f32.mrb[0].mxu0  ;;  %v420_v46 = vpop.f32.mrb[1].mxu1 }
 0x24f   :  { %v427_v47 = vadd.f32 %v425_v42, %v348_v45  ;;  %v350_v48 = vpop.f32.mrb[1].mxu0 }
 0x250   :  { %v433_v49 = vsel %vm429_vm3, %v428_v44, 0.0  ;;  %v438_v50 = vmul.f32 %v428_v44, %v428_v44 }
 0x251   :  { %434 = vadd.xlane.f32.xlu0 %v433_v49  ;;  %v430_v51 = vsel %vm429_vm3, %v427_v47, 0.0  ;;  %v437_v52 = vmul.f32 %v427_v47, %v427_v47 }
 0x252   :  { %431 = vadd.xlane.f32.xlu1 %v430_v51  ;;  %v442_v53 = vsel %vm429_vm3, %v438_v50, 0.0 }
 0x253   :  { %v439_v54 = vsel %vm429_vm3, %v437_v52, 0.0 }
 0x255   :  { %443 = vadd.xlane.f32.xlu0 %v442_v53 }
 0x256   :  { %440 = vadd.xlane.f32.xlu1 %v439_v54 }
 0x26b   :  { %466 = vperm.xlu0 %6947, %v127_v55  }
 0x2de   :  { %v435_v56 = vpop.xlane.xlu0 %434 }
 0x2df   :  { %v432_v57 = vpop.xlane.xlu1 %431 }
 0x2e0   :  { %v436_v58 = vadd.f32 %v435_v56, %v432_v57 }
 0x2e2   :  { %v447_v59 = vmul.f32 0.0125, %v436_v58  ;;  %v444_v60 = vpop.xlane.xlu0 %443 }
 0x2e3   :  { %v441_v61 = vpop.xlane.xlu1 %440 }
 0x2e4   :  { %v445_v62 = vadd.f32 %v444_v60, %v441_v61  ;;  %v449_v63 = vmul.f32 %v447_v59, %v447_v59  ;;  %v452_v8 = vsub.f32 %v427_v47, %v447_v59  ;;  %v453_v9 = vsub.f32 %v428_v44, %v447_v59 }
 0x2e6   :  { %v448_v0 = vmul.f32 0.0125, %v445_v62  ;;  %v479_v62 = vld [vmem:[#allocation8] sm:$0xff] }
 0x2e8   :  { %v450_v1 = vsub.f32 %v448_v0, %v449_v63 }
 0x2ea   :  { %v451_v2 = vmax.f32 %v450_v1, 0.0  ;;  %v467_v13 = vpop.permute.xlu0 %466 }
 0x2ec   :  { %v454_v3 = vadd.f32 1e-05, %v451_v2 }
 0x2ee   :  { %7286 = vrsqrt.f32 %v454_v3 }
 0x2f8   :  { %v7287_v6 = vpop.eup %7286 }
 0x2f9   :  { %v456_v7 = vmul.f32 %v7287_v6, %v126_v4 }
 0x2fb   :  { %459 = vperm.xlu1 %6948, %v456_v7  }
 0x37a   :  { %v460_v10 = vpop.permute.xlu1 %459 }
 0x37b   :  { %v462_v11 = vmul.f32 %v460_v10, %v452_v8  ;;  %v463_v12 = vmul.f32 %v460_v10, %v453_v9 }
 0x37d   :  { %v469_v14 = vadd.f32 %v467_v13, %v462_v11  ;;  %v470_v15 = vadd.f32 %v467_v13, %v463_v12 }
 0x37f   :  { %v473_v16 = vmul.f32 0.01, %v469_v14  ;;  %v474_v17 = vmul.f32 0.01, %v470_v15  ;;  %vm471_vm4 = vcmp.ge.f32.partialorder %v469_v14, 0.0  ;;  %vm472_vm5 = vcmp.ge.f32.partialorder %v470_v15, 0.0 }
 0x381   :  { %v7706_v18 = vsel %vm471_vm4, %v469_v14, %v473_v16  ;;  %v7708_v19 = vsel %vm472_vm5, %v470_v15, %v474_v17  ;;  %v482_v15 = vld [vmem:[%s9476_s8] sm:$0xff] }
 0x382   :  { %491 = vrot.lane.b32.xlu0 %v7706_v18, %s7450_s17  ;;  %477 = vst.msk [vmem:[#allocation2] sm:$0xff] %vm429_vm3, %v7706_v18  ;;  %485 = vrot.lane.b32.xlu1 %v7706_v18, %s7451_s19  ;;  %478 = vst.msk [vmem:[#allocation2 + $0x40] sm:$0xff] %vm429_vm3, %v7708_v19 }
 0x386   :  { %497 = vrot.lane.b32.xlu0 %v7706_v18, %s7452_s29  ;;  %487 = vrot.lane.b32.xlu1 %v7708_v19, %s7451_s19 }
 0x38a   :  { %493 = vrot.lane.b32.xlu1 %v7708_v19, %s7450_s17 }
 0x38e   :  { %499 = vrot.lane.b32.xlu1 %v7708_v19, %s7452_s29 }
 0x3f4   :  { %v486_v20 = vpop.permute.xlu1 %485  ;;  %v492_v21 = vpop.permute.xlu0 %491 }
 0x3f5   :  { %v503_v25 = vsel %vm168_vm0, %v486_v20, %v492_v21 }
 0x3f8   :  { %v488_v22 = vpop.permute.xlu1 %487  ;;  %v498_v24 = vpop.permute.xlu0 %497 }
 0x3f9   :  { %v505_v28 = vsel %vm173_vm1, %v503_v25, %v498_v24 }
 0x3fc   :  { %v494_v23 = vpop.permute.xlu1 %493 }
 0x3fd   :  { %v504_v26 = vsel %vm168_vm0, %v488_v22, %v494_v23 }
 0x400   :  { %v500_v27 = vpop.permute.xlu1 %499 }
 0x401   :  { %v506_v29 = vsel %vm173_vm1, %v504_v26, %v500_v27 }
 0x402   :  { %v6954_v30 = vpack.i.bf16 %v506_v29, %v505_v28 }
 0x404   :  { %6955 = vrot.lane.b32.xlu1 %v6954_v30, %s7454_s18  ;;  %6950 = vrot.lane.b32.xlu0 %v6954_v30, %s7453_s0 }
 0x408   :  { %6965 = vrot.lane.b32.xlu1 %v6954_v30, %s7456_s23  ;;  %6960 = vrot.lane.b32.xlu0 %v6954_v30, %s7455_s20 }
 0x40c   :  { %6975 = vrot.lane.b32.xlu1 %v6954_v30, %s7458_s5  ;;  %6970 = vrot.lane.b32.xlu0 %v6954_v30, %s7457_s24 }
 0x410   :  { %551 = vrot.lane.b32.xlu1 %v505_v28, %s7461_s25  ;;  %6980 = vrot.lane.b32.xlu0 %v6954_v30, %s7459_s2  ;;  %v481_v30 = vld [vmem:[%s9475_s7] sm:$0xff] }
 0x414   :  { %703 = vperm.xlu1 %6948, %v480_v32   ;;  %553 = vrot.lane.b32.xlu0 %v506_v29, %s7461_s25 }
 0x476   :  { %v6956_v33 = vpop.permute.xlu1 %6955  ;;  %v6951_v34 = vpop.permute.xlu0 %6950 }
 0x477   :  { %v6953_v35 = vunpack.i.h.bf16 %v6951_v34  ;;  %v6952_v36 = vunpack.i.l.bf16 %v6951_v34  ;;  %v6958_v41 = vunpack.i.h.bf16 %v6956_v33  ;;  %v6957_v42 = vunpack.i.l.bf16 %v6956_v33 }
 0x479   :  { %v6622_v37 = vpack.c.bf16 %v6953_v35, %v506_v29  ;;  %v6610_v38 = vpack.c.bf16 %v6952_v36, %v505_v28 }
 0x47a   :  { %v6966_v39 = vpop.permute.xlu1 %6965  ;;  %v6961_v40 = vpop.permute.xlu0 %6960 }
 0x47b   :  { %v6963_v43 = vunpack.i.h.bf16 %v6961_v40  ;;  %v6962_v44 = vunpack.i.l.bf16 %v6961_v40  ;;  %6611 = vmatpush3.bf16.msra.mxu0 %v6610_v38  ;;  %6623 = vmatpush3.bf16.msra.mxu1 %v6622_v37  ;;  %v6968_v48 = vunpack.i.h.bf16 %v6966_v39  ;;  %v6967_v49 = vunpack.i.l.bf16 %v6966_v39 }
 0x47c   :  { %6612 = vmatprep.subr.bf16.mxu0 %v9488_v5  ;;  %6624 = vmatprep.subr.bf16.mxu1 %v9488_v5 }
 0x47d   :  { %v6625_v45 = vpack.c.bf16 %v6963_v43, %v6958_v41  ;;  %v6613_v46 = vpack.c.bf16 %v6962_v44, %v6957_v42 }
 0x47e   :  { %v6971_v47 = vpop.permute.xlu0 %6970  ;;  %v6976_v52 = vpop.permute.xlu1 %6975 }
 0x47f   :  { %v6973_v50 = vunpack.i.h.bf16 %v6971_v47  ;;  %v6972_v51 = vunpack.i.l.bf16 %v6971_v47  ;;  %6614 = vmatpush3.bf16.msra.mxu0 %v6613_v46  ;;  %6626 = vmatpush3.bf16.msra.mxu1 %v6625_v45  ;;  %v6978_v56 = vunpack.i.h.bf16 %v6976_v52  ;;  %v6977_v57 = vunpack.i.l.bf16 %v6976_v52 }
 0x480   :  { %6615 = vmatprep.subr.bf16.mxu0 %v9488_v5  ;;  %6627 = vmatprep.subr.bf16.mxu1 %v9488_v5 }
 0x481   :  { %v6628_v53 = vpack.c.bf16 %v6973_v50, %v6968_v48  ;;  %v6616_v54 = vpack.c.bf16 %v6972_v51, %v6967_v49 }
 0x482   :  { %v6981_v55 = vpop.permute.xlu0 %6980  ;;  %v552_v63 = vpop.permute.xlu1 %551 }
 0x483   :  { %v6983_v58 = vunpack.i.h.bf16 %v6981_v55  ;;  %v6982_v59 = vunpack.i.l.bf16 %v6981_v55  ;;  %6617 = vmatpush3.bf16.msra.mxu0 %v6616_v54  ;;  %6629 = vmatpush3.bf16.msra.mxu1 %v6628_v53 }
 0x484   :  { %6618 = vmatprep.subr.bf16.mxu0 %v9488_v5  ;;  %6630 = vmatprep.subr.bf16.mxu1 %v9488_v5 }
 0x485   :  { %v6631_v60 = vpack.c.bf16 %v6983_v58, %v6978_v56  ;;  %v6619_v61 = vpack.c.bf16 %v6982_v59, %v6977_v57  ;;  %v761_v57 = vld [vmem:[#allocation9 + $0x8] sm:$0xff] }
 0x486   :  { %v554_v0 = vpop.permute.xlu0 %553 }
 0x487   :  { %6620 = vmatpush3.bf16.msra.mxu0 %v6619_v61  ;;  %6632 = vmatpush3.bf16.msra.mxu1 %v6631_v60 }
 0x488   :  { %6095 = vmatprep.subr.mxu0 %v9486_v31  ;;  %6116 = vmatprep.subr.mxu1 %v9486_v31 }
 0x48b   :  { %6096 = vmatpush3.msra.mxu0 %v552_v63  ;;  %6117 = vmatpush3.msra.mxu1 %v554_v0 }
 0x48c   :  { %6098 = vmatmul.mubr.msk.f32.vlgmr.msra.gmra.mrb[2].mxu0 %vm557_vm7, %v479_v62  ;;  %6119 = vmatmul.mubr.msk.f32.vlgmr.msra.gmra.mrb[2].mxu1 %vm557_vm7, %v479_v62 }
 0x48d   :  { %6633 = vmatprep.subr.bf16.mxu0 %v9488_v5  ;;  %6645 = vmatprep.subr.bf16.mxu1 %v9488_v5 }
 0x48e   :  { %6139 = vmatprep.mubr.msk.f32.mxu0 %vm7462_vm6, %v9486_v31  ;;  %6160 = vmatprep.mubr.msk.f32.mxu1 %vm7462_vm6, %v9486_v31 }
 0x493   :  { %v704_v1 = vpop.permute.xlu1 %703 }
 0x55f   :  { %v627_v2 = vpop.f32.mrb[2].mxu0  ;;  %v697_v3 = vpop.f32.mrb[2].mxu1 }
 0x560   :  { %v706_v4 = vadd.f32 %v704_v1, %v627_v2  ;;  %v707_v6 = vadd.f32 %v704_v1, %v697_v3  ;;  %v6099_v7 = vpop.f32.mrb[3].mxu0  ;;  %v6120_v8 = vpop.f32.mrb[3].mxu1 }
 0x562   :  { %v711_v9 = vsel %vm429_vm3, %v707_v6, 0.0  ;;  %v708_v10 = vsel %vm429_vm3, %v706_v4, 0.0  ;;  %v715_v11 = vmul.f32 %v706_v4, %v706_v4  ;;  %v716_v13 = vmul.f32 %v707_v6, %v707_v6 }
 0x563   :  { %712 = vadd.xlane.f32.xlu1 %v711_v9  ;;  %709 = vadd.xlane.f32.xlu0 %v708_v10 }
 0x564   :  { %v717_v12 = vsel %vm429_vm3, %v715_v11, 0.0  ;;  %v720_v14 = vsel %vm429_vm3, %v716_v13, 0.0 }
 0x567   :  { %718 = vadd.xlane.f32.xlu0 %v717_v12 }
 0x56b   :  { %721 = vadd.xlane.f32.xlu0 %v720_v14 }
 0x581   :  { %743 = vperm.xlu0 %6947, %v482_v15  }
 0x5f0   :  { %v713_v16 = vpop.xlane.xlu1 %712  ;;  %v710_v17 = vpop.xlane.xlu0 %709 }
 0x5f1   :  { %v714_v20 = vadd.f32 %v713_v16, %v710_v17 }
 0x5f3   :  { %v724_v22 = vmul.f32 0.0125, %v714_v20 }
 0x5f4   :  { %v719_v21 = vpop.xlane.xlu0 %718 }
 0x5f5   :  { %v726_v25 = vmul.f32 %v724_v22, %v724_v22  ;;  %v729_v34 = vsub.f32 %v706_v4, %v724_v22  ;;  %v730_v35 = vsub.f32 %v707_v6, %v724_v22 }
 0x5f8   :  { %v722_v23 = vpop.xlane.xlu0 %721 }
 0x5f9   :  { %v723_v24 = vadd.f32 %v722_v23, %v719_v21 }
 0x5fb   :  { %v725_v26 = vmul.f32 0.0125, %v723_v24 }
 0x5fd   :  { %v727_v27 = vsub.f32 %v725_v26, %v726_v25  ;;  %v759_v26 = vld [vmem:[#allocation8 + $0x8] sm:$0xff] }
 0x5ff   :  { %v728_v28 = vmax.f32 %v727_v27, 0.0 }
 0x600   :  { %v744_v39 = vpop.permute.xlu0 %743 }
 0x601   :  { %v731_v29 = vadd.f32 1e-05, %v728_v28 }
 0x603   :  { %7288 = vrsqrt.f32 %v731_v29 }
 0x60d   :  { %v7289_v32 = vpop.eup %7288 }
 0x60e   :  { %v733_v33 = vmul.f32 %v7289_v32, %v481_v30 }
 0x610   :  { %736 = vperm.xlu1 %6948, %v733_v33  }
 0x68f   :  { %v737_v36 = vpop.permute.xlu1 %736 }
 0x690   :  { %v739_v37 = vmul.f32 %v737_v36, %v729_v34  ;;  %v740_v38 = vmul.f32 %v737_v36, %v730_v35 }
 0x692   :  { %v746_v40 = vadd.f32 %v744_v39, %v739_v37  ;;  %v747_v41 = vadd.f32 %v744_v39, %v740_v38 }
 0x694   :  { %vm748_vm8 = vcmp.ge.f32.partialorder %v746_v40, 0.0  ;;  %vm749_vm9 = vcmp.ge.f32.partialorder %v747_v41, 0.0  ;;  %v750_v42 = vmul.f32 0.01, %v746_v40  ;;  %v751_v43 = vmul.f32 0.01, %v747_v41 }
 0x696   :  { %v752_v44 = vsel %vm748_vm8, %v746_v40, %v750_v42  ;;  %v753_v45 = vsel %vm749_vm9, %v747_v41, %v751_v43  ;;  %v5384_v43 = vld [vmem:[%s9476_s8 + $0x8] sm:$0xff]  ;;  %vm1918_vm8 = vcmask 457728  }
 0x697   :  { %v7770_v46 = vadd.f32 %v752_v44, %v7706_v18  ;;  %v7773_v47 = vadd.f32 %v753_v45, %v7708_v19 }
 0x699   :  { %756 = vst.msk [vmem:[#allocation2 + $0x8] sm:$0xff] %vm429_vm3, %v7770_v46  ;;  %757 = vst.msk [vmem:[#allocation2 + $0x48] sm:$0xff] %vm429_vm3, %v7773_v47  ;;  %774 = vrot.lane.b32.xlu0 %v7770_v46, %s7450_s17  ;;  %768 = vrot.lane.b32.xlu1 %v7770_v46, %s7451_s19 }
 0x69d   :  { %780 = vrot.lane.b32.xlu0 %v7770_v46, %s7452_s29  ;;  %770 = vrot.lane.b32.xlu1 %v7773_v47, %s7451_s19 }
 0x6a1   :  { %776 = vrot.lane.b32.xlu1 %v7773_v47, %s7450_s17 }
 0x6a5   :  { %782 = vrot.lane.b32.xlu1 %v7773_v47, %s7452_s29 }
 0x70b   :  { %v769_v18 = vpop.permute.xlu1 %768  ;;  %v775_v19 = vpop.permute.xlu0 %774 }
 0x70c   :  { %v786_v51 = vsel %vm168_vm0, %v769_v18, %v775_v19 }
 0x70f   :  { %v771_v48 = vpop.permute.xlu1 %770  ;;  %v781_v50 = vpop.permute.xlu0 %780 }
 0x710   :  { %v788_v54 = vsel %vm173_vm1, %v786_v51, %v781_v50 }
 0x713   :  { %v777_v49 = vpop.permute.xlu1 %776 }
 0x714   :  { %v787_v52 = vsel %vm168_vm0, %v771_v48, %v777_v49 }
 0x717   :  { %v783_v53 = vpop.permute.xlu1 %782 }
 0x718   :  { %v789_v55 = vsel %vm173_vm1, %v787_v52, %v783_v53 }
 0x719   :  { %v6989_v56 = vpack.i.bf16 %v789_v55, %v788_v54 }
 0x71b   :  { %6990 = vrot.lane.b32.xlu1 %v6989_v56, %s7454_s18  ;;  %6985 = vrot.lane.b32.xlu0 %v6989_v56, %s7453_s0 }
 0x71f   :  { %7000 = vrot.lane.b32.xlu1 %v6989_v56, %s7456_s23  ;;  %6995 = vrot.lane.b32.xlu0 %v6989_v56, %s7455_s20 }
 0x723   :  { %7010 = vrot.lane.b32.xlu1 %v6989_v56, %s7458_s5  ;;  %7005 = vrot.lane.b32.xlu0 %v6989_v56, %s7457_s24 }
 0x727   :  { %834 = vrot.lane.b32.xlu1 %v788_v54, %s7461_s25  ;;  %7015 = vrot.lane.b32.xlu0 %v6989_v56, %s7459_s2  ;;  %v5383_v56 = vld [vmem:[%s9475_s7 + $0x8] sm:$0xff] }
 0x72b   :  { %985 = vperm.xlu1 %6948, %v761_v57   ;;  %836 = vrot.lane.b32.xlu0 %v789_v55, %s7461_s25 }
 0x78d   :  { %v6991_v58 = vpop.permute.xlu1 %6990  ;;  %v6986_v59 = vpop.permute.xlu0 %6985 }
 0x78e   :  { %v6988_v60 = vunpack.i.h.bf16 %v6986_v59  ;;  %v6987_v61 = vunpack.i.l.bf16 %v6986_v59  ;;  %v6993_v2 = vunpack.i.h.bf16 %v6991_v58  ;;  %v6992_v3 = vunpack.i.l.bf16 %v6991_v58 }
 0x790   :  { %v6646_v62 = vpack.c.bf16 %v6988_v60, %v789_v55  ;;  %v6634_v63 = vpack.c.bf16 %v6987_v61, %v788_v54 }
 0x791   :  { %v7001_v0 = vpop.permute.xlu1 %7000  ;;  %v6996_v1 = vpop.permute.xlu0 %6995 }
 0x792   :  { %v6998_v4 = vunpack.i.h.bf16 %v6996_v1  ;;  %v6997_v6 = vunpack.i.l.bf16 %v6996_v1  ;;  %6635 = vmatpush3.bf16.msra.mxu0 %v6634_v63  ;;  %6647 = vmatpush3.bf16.msra.mxu1 %v6646_v62  ;;  %v7003_v10 = vunpack.i.h.bf16 %v7001_v0  ;;  %v7002_v11 = vunpack.i.l.bf16 %v7001_v0 }
 0x793   :  { %6636 = vmatprep.subr.bf16.mxu0 %v9488_v5  ;;  %6648 = vmatprep.subr.bf16.mxu1 %v9488_v5 }
 0x794   :  { %v6649_v7 = vpack.c.bf16 %v6998_v4, %v6993_v2  ;;  %v6637_v8 = vpack.c.bf16 %v6997_v6, %v6992_v3 }
 0x795   :  { %v7006_v9 = vpop.permute.xlu0 %7005  ;;  %v7011_v14 = vpop.permute.xlu1 %7010 }
 0x796   :  { %v7008_v12 = vunpack.i.h.bf16 %v7006_v9  ;;  %v7007_v13 = vunpack.i.l.bf16 %v7006_v9  ;;  %6638 = vmatpush3.bf16.msra.mxu0 %v6637_v8  ;;  %6650 = vmatpush3.bf16.msra.mxu1 %v6649_v7  ;;  %v7013_v20 = vunpack.i.h.bf16 %v7011_v14  ;;  %v7012_v21 = vunpack.i.l.bf16 %v7011_v14 }
 0x797   :  { %6639 = vmatprep.subr.bf16.mxu0 %v9488_v5  ;;  %6651 = vmatprep.subr.bf16.mxu1 %v9488_v5 }
 0x798   :  { %v6652_v15 = vpack.c.bf16 %v7008_v12, %v7003_v10  ;;  %v6640_v16 = vpack.c.bf16 %v7007_v13, %v7002_v11 }
 0x799   :  { %v7016_v17 = vpop.permute.xlu0 %7015  ;;  %v835_v27 = vpop.permute.xlu1 %834 }
 0x79a   :  { %v7018_v22 = vunpack.i.h.bf16 %v7016_v17  ;;  %v7017_v23 = vunpack.i.l.bf16 %v7016_v17  ;;  %6641 = vmatpush3.bf16.msra.mxu0 %v6640_v16  ;;  %6653 = vmatpush3.bf16.msra.mxu1 %v6652_v15 }
 0x79b   :  { %6642 = vmatprep.subr.bf16.mxu0 %v9488_v5  ;;  %6654 = vmatprep.subr.bf16.mxu1 %v9488_v5 }
 0x79c   :  { %v6655_v24 = vpack.c.bf16 %v7018_v22, %v7013_v20  ;;  %v6643_v25 = vpack.c.bf16 %v7017_v23, %v7012_v21  ;;  %v1043_v21 = vld [vmem:[#allocation9 + $0x10] sm:$0xff] }
 0x79d   :  { %v837_v28 = vpop.permute.xlu0 %836 }
 0x79e   :  { %6644 = vmatpush3.bf16.msra.mxu0 %v6643_v25  ;;  %6656 = vmatpush3.bf16.msra.mxu1 %v6655_v24 }
 0x79f   :  { %6137 = vmatprep.subr.mxu0 %v9486_v31  ;;  %6158 = vmatprep.subr.mxu1 %v9486_v31 }
 0x7a2   :  { %6138 = vmatpush3.msra.mxu0 %v835_v27  ;;  %6159 = vmatpush3.msra.mxu1 %v837_v28 }
 0x7a3   :  { %6140 = vmatmul.mubr.msk.f32.vlgmr.msra.gmra.mrb[4].mxu0 %vm557_vm7, %v759_v26  ;;  %6161 = vmatmul.mubr.msk.f32.vlgmr.msra.gmra.mrb[4].mxu1 %vm557_vm7, %v759_v26 }
 0x7a4   :  { %6657 = vmatprep.subr.bf16.mxu0 %v9488_v5  ;;  %6669 = vmatprep.subr.bf16.mxu1 %v9488_v5 }
 0x7a5   :  { %6181 = vmatprep.mubr.msk.f32.mxu0 %vm7462_vm6, %v9486_v31  ;;  %6202 = vmatprep.mubr.msk.f32.mxu1 %vm7462_vm6, %v9486_v31 }
 0x7aa   :  { %v986_v29 = vpop.permute.xlu1 %985 }
 0x876   :  { %v909_v30 = vpop.f32.mrb[4].mxu0  ;;  %v979_v32 = vpop.f32.mrb[4].mxu1 }
 0x877   :  { %v988_v33 = vadd.f32 %v986_v29, %v909_v30  ;;  %v989_v34 = vadd.f32 %v986_v29, %v979_v32  ;;  %v6141_v35 = vpop.f32.mrb[5].mxu0  ;;  %v6162_v36 = vpop.f32.mrb[5].mxu1 }
 0x879   :  { %v993_v37 = vsel %vm429_vm3, %v989_v34, 0.0  ;;  %v990_v38 = vsel %vm429_vm3, %v988_v33, 0.0  ;;  %v997_v39 = vmul.f32 %v988_v33, %v988_v33  ;;  %v998_v41 = vmul.f32 %v989_v34, %v989_v34 }
 0x87a   :  { %994 = vadd.xlane.f32.xlu1 %v993_v37  ;;  %991 = vadd.xlane.f32.xlu0 %v990_v38 }
 0x87b   :  { %v999_v40 = vsel %vm429_vm3, %v997_v39, 0.0  ;;  %v1002_v42 = vsel %vm429_vm3, %v998_v41, 0.0 }
 0x87e   :  { %1000 = vadd.xlane.f32.xlu0 %v999_v40 }
 0x882   :  { %1003 = vadd.xlane.f32.xlu0 %v1002_v42 }
 0x898   :  { %1025 = vperm.xlu0 %6947, %v5384_v43  }
 0x907   :  { %v995_v44 = vpop.xlane.xlu1 %994  ;;  %v992_v45 = vpop.xlane.xlu0 %991 }
 0x908   :  { %v996_v18 = vadd.f32 %v995_v44, %v992_v45 }
 0x90a   :  { %v1006_v48 = vmul.f32 0.0125, %v996_v18 }
 0x90b   :  { %v1001_v19 = vpop.xlane.xlu0 %1000 }
 0x90c   :  { %v1008_v51 = vmul.f32 %v1006_v48, %v1006_v48  ;;  %v1011_v59 = vsub.f32 %v988_v33, %v1006_v48  ;;  %v1012_v60 = vsub.f32 %v989_v34, %v1006_v48 }
 0x90f   :  { %v1004_v49 = vpop.xlane.xlu0 %1003 }
 0x910   :  { %v1005_v50 = vadd.f32 %v1004_v49, %v1001_v19 }
 0x912   :  { %v1007_v52 = vmul.f32 0.0125, %v1005_v50 }
 0x914   :  { %v1009_v53 = vsub.f32 %v1007_v52, %v1008_v51  ;;  %v1041_v52 = vld [vmem:[#allocation8 + $0x10] sm:$0xff] }
 0x916   :  { %v1010_v54 = vmax.f32 %v1009_v53, 0.0 }
 0x917   :  { %v1026_v0 = vpop.permute.xlu0 %1025 }
 0x918   :  { %v1013_v55 = vadd.f32 1e-05, %v1010_v54 }
 0x91a   :  { %7290 = vrsqrt.f32 %v1013_v55 }
 0x924   :  { %v7291_v57 = vpop.eup %7290 }
 0x925   :  { %v1015_v58 = vmul.f32 %v7291_v57, %v5383_v56 }
 0x927   :  { %1018 = vperm.xlu1 %6948, %v1015_v58  }
 0x9a6   :  { %v1019_v61 = vpop.permute.xlu1 %1018 }
 0x9a7   :  { %v1021_v62 = vmul.f32 %v1019_v61, %v1011_v59  ;;  %v1022_v63 = vmul.f32 %v1019_v61, %v1012_v60 }
 0x9a9   :  { %v1028_v1 = vadd.f32 %v1026_v0, %v1021_v62  ;;  %v1029_v2 = vadd.f32 %v1026_v0, %v1022_v63 }
 0x9ab   :  { %vm1030_vm10 = vcmp.ge.f32.partialorder %v1028_v1, 0.0  ;;  %vm1031_vm11 = vcmp.ge.f32.partialorder %v1029_v2, 0.0  ;;  %v1032_v3 = vmul.f32 0.01, %v1028_v1  ;;  %v1033_v4 = vmul.f32 0.01, %v1029_v2 }
 0x9ad   :  { %v1034_v6 = vsel %vm1030_vm10, %v1028_v1, %v1032_v3  ;;  %v1035_v7 = vsel %vm1031_vm11, %v1029_v2, %v1033_v4  ;;  %v5388_v4 = vld [vmem:[%s9476_s8 + $0x10] sm:$0xff] }
 0x9ae   :  { %v7831_v8 = vadd.f32 %v1034_v6, %v7770_v46  ;;  %v7834_v9 = vadd.f32 %v1035_v7, %v7773_v47 }
 0x9b0   :  { %1038 = vst.msk [vmem:[#allocation2 + $0x10] sm:$0xff] %vm429_vm3, %v7831_v8  ;;  %1039 = vst.msk [vmem:[#allocation2 + $0x50] sm:$0xff] %vm429_vm3, %v7834_v9  ;;  %1056 = vrot.lane.b32.xlu0 %v7831_v8, %s7450_s17  ;;  %1050 = vrot.lane.b32.xlu1 %v7831_v8, %s7451_s19 }
 0x9b4   :  { %1062 = vrot.lane.b32.xlu0 %v7831_v8, %s7452_s29  ;;  %1052 = vrot.lane.b32.xlu1 %v7834_v9, %s7451_s19  ;;  %s7473_s19 = smov 108  }
 0x9b8   :  { %1058 = vrot.lane.b32.xlu1 %v7834_v9, %s7450_s17  ;;  %s7472_s17 = smov 56  }
 0x9bc   :  { %1064 = vrot.lane.b32.xlu1 %v7834_v9, %s7452_s29  ;;  %s7474_s29 = smov 100  }
 0xa22   :  { %v1051_v46 = vpop.permute.xlu1 %1050  ;;  %v1057_v47 = vpop.permute.xlu0 %1056 }
 0xa23   :  { %v1068_v13 = vsel %vm168_vm0, %v1051_v46, %v1057_v47 }
 0xa26   :  { %v1053_v10 = vpop.permute.xlu1 %1052  ;;  %v1063_v12 = vpop.permute.xlu0 %1062 }
 0xa27   :  { %v1070_v16 = vsel %vm173_vm1, %v1068_v13, %v1063_v12 }
 0xa2a   :  { %v1059_v11 = vpop.permute.xlu1 %1058 }
 0xa2b   :  { %v1069_v14 = vsel %vm168_vm0, %v1053_v10, %v1059_v11 }
 0xa2e   :  { %v1065_v15 = vpop.permute.xlu1 %1064 }
 0xa2f   :  { %v1071_v17 = vsel %vm173_vm1, %v1069_v14, %v1065_v15 }
 0xa30   :  { %v7024_v20 = vpack.i.bf16 %v1071_v17, %v1070_v16 }
 0xa32   :  { %7025 = vrot.lane.b32.xlu1 %v7024_v20, %s7454_s18  ;;  %7020 = vrot.lane.b32.xlu0 %v7024_v20, %s7453_s0 }
 0xa36   :  { %7035 = vrot.lane.b32.xlu1 %v7024_v20, %s7456_s23  ;;  %7030 = vrot.lane.b32.xlu0 %v7024_v20, %s7455_s20  ;;  %s7464_s20 = smov 96  }
 0xa3a   :  { %7045 = vrot.lane.b32.xlu1 %v7024_v20, %s7458_s5  ;;  %7040 = vrot.lane.b32.xlu0 %v7024_v20, %s7457_s24  ;;  %s7465_s24 = smov 48  }
 0xa3e   :  { %1116 = vrot.lane.b32.xlu1 %v1070_v16, %s7461_s25  ;;  %7050 = vrot.lane.b32.xlu0 %v7024_v20, %s7459_s2  ;;  %v5387_v20 = vld [vmem:[%s9475_s7 + $0x10] sm:$0xff]  ;;  %s7466_s2 = smov 116  }
 0xa42   :  { %1267 = vperm.xlu1 %6948, %v1043_v21   ;;  %1118 = vrot.lane.b32.xlu0 %v1071_v17, %s7461_s25 }
 0xaa4   :  { %v7026_v22 = vpop.permute.xlu1 %7025  ;;  %v7021_v23 = vpop.permute.xlu0 %7020 }
 0xaa5   :  { %v7023_v24 = vunpack.i.h.bf16 %v7021_v23  ;;  %v7022_v25 = vunpack.i.l.bf16 %v7021_v23  ;;  %v7028_v30 = vunpack.i.h.bf16 %v7026_v22  ;;  %v7027_v32 = vunpack.i.l.bf16 %v7026_v22 }
 0xaa7   :  { %v6670_v26 = vpack.c.bf16 %v7023_v24, %v1071_v17  ;;  %v6658_v27 = vpack.c.bf16 %v7022_v25, %v1070_v16 }
 0xaa8   :  { %v7036_v28 = vpop.permute.xlu1 %7035  ;;  %v7031_v29 = vpop.permute.xlu0 %7030 }
 0xaa9   :  { %v7033_v33 = vunpack.i.h.bf16 %v7031_v29  ;;  %v7032_v34 = vunpack.i.l.bf16 %v7031_v29  ;;  %6659 = vmatpush3.bf16.msra.mxu0 %v6658_v27  ;;  %6671 = vmatpush3.bf16.msra.mxu1 %v6670_v26  ;;  %v7038_v38 = vunpack.i.h.bf16 %v7036_v28  ;;  %v7037_v39 = vunpack.i.l.bf16 %v7036_v28 }
 0xaaa   :  { %6660 = vmatprep.subr.bf16.mxu0 %v9488_v5  ;;  %6672 = vmatprep.subr.bf16.mxu1 %v9488_v5 }
 0xaab   :  { %v6673_v35 = vpack.c.bf16 %v7033_v33, %v7028_v30  ;;  %v6661_v36 = vpack.c.bf16 %v7032_v34, %v7027_v32 }
 0xaac   :  { %v7041_v37 = vpop.permute.xlu0 %7040  ;;  %v7046_v42 = vpop.permute.xlu1 %7045 }
 0xaad   :  { %v7043_v40 = vunpack.i.h.bf16 %v7041_v37  ;;  %v7042_v41 = vunpack.i.l.bf16 %v7041_v37  ;;  %6662 = vmatpush3.bf16.msra.mxu0 %v6661_v36  ;;  %6674 = vmatpush3.bf16.msra.mxu1 %v6673_v35  ;;  %v7048_v18 = vunpack.i.h.bf16 %v7046_v42  ;;  %v7047_v19 = vunpack.i.l.bf16 %v7046_v42 }
 0xaae   :  { %6663 = vmatprep.subr.bf16.mxu0 %v9488_v5  ;;  %6675 = vmatprep.subr.bf16.mxu1 %v9488_v5 }
 0xaaf   :  { %v6676_v43 = vpack.c.bf16 %v7043_v40, %v7038_v38  ;;  %v6664_v44 = vpack.c.bf16 %v7042_v41, %v7037_v39 }
 0xab0   :  { %v7051_v45 = vpop.permute.xlu0 %7050  ;;  %v1117_v53 = vpop.permute.xlu1 %1116 }
 0xab1   :  { %v7053_v48 = vunpack.i.h.bf16 %v7051_v45  ;;  %v7052_v49 = vunpack.i.l.bf16 %v7051_v45  ;;  %6665 = vmatpush3.bf16.msra.mxu0 %v6664_v44  ;;  %6677 = vmatpush3.bf16.msra.mxu1 %v6676_v43 }
 0xab2   :  { %6666 = vmatprep.subr.bf16.mxu0 %v9488_v5  ;;  %6678 = vmatprep.subr.bf16.mxu1 %v9488_v5 }
 0xab3   :  { %v6679_v50 = vpack.c.bf16 %v7053_v48, %v7048_v18  ;;  %v6667_v51 = vpack.c.bf16 %v7052_v49, %v7047_v19  ;;  %v1325_v19 = vld [vmem:[#allocation9 + $0x18] sm:$0xff] }
 0xab4   :  { %v1119_v54 = vpop.permute.xlu0 %1118 }
 0xab5   :  { %6668 = vmatpush3.bf16.msra.mxu0 %v6667_v51  ;;  %6680 = vmatpush3.bf16.msra.mxu1 %v6679_v50 }
 0xab6   :  { %6179 = vmatprep.subr.mxu0 %v9486_v31  ;;  %6200 = vmatprep.subr.mxu1 %v9486_v31 }
 0xab9   :  { %6180 = vmatpush3.msra.mxu0 %v1117_v53  ;;  %6201 = vmatpush3.msra.mxu1 %v1119_v54 }
 0xaba   :  { %6182 = vmatmul.mubr.msk.f32.vlgmr.msra.gmra.mrb[6].mxu0 %vm557_vm7, %v1041_v52  ;;  %6203 = vmatmul.mubr.msk.f32.vlgmr.msra.gmra.mrb[6].mxu1 %vm557_vm7, %v1041_v52 }
 0xabb   :  { %6681 = vmatprep.subr.bf16.mxu0 %v9488_v5  ;;  %6693 = vmatprep.subr.bf16.mxu1 %v9488_v5 }
 0xabc   :  { %6223 = vmatprep.mubr.msk.f32.mxu0 %vm7462_vm6, %v9486_v31  ;;  %6244 = vmatprep.mubr.msk.f32.mxu1 %vm7462_vm6, %v9486_v31 }
 0xac1   :  { %v1268_v55 = vpop.permute.xlu1 %1267 }
 0xb8d   :  { %v1191_v56 = vpop.f32.mrb[6].mxu0  ;;  %v1261_v57 = vpop.f32.mrb[6].mxu1 }
 0xb8e   :  { %v1270_v58 = vadd.f32 %v1268_v55, %v1191_v56  ;;  %v1271_v59 = vadd.f32 %v1268_v55, %v1261_v57  ;;  %v6183_v60 = vpop.f32.mrb[7].mxu0  ;;  %v6204_v61 = vpop.f32.mrb[7].mxu1 }
 0xb90   :  { %v1275_v62 = vsel %vm429_vm3, %v1271_v59, 0.0  ;;  %v1272_v63 = vsel %vm429_vm3, %v1270_v58, 0.0  ;;  %v1279_v0 = vmul.f32 %v1270_v58, %v1270_v58  ;;  %v1280_v2 = vmul.f32 %v1271_v59, %v1271_v59 }
 0xb91   :  { %1276 = vadd.xlane.f32.xlu1 %v1275_v62  ;;  %1273 = vadd.xlane.f32.xlu0 %v1272_v63 }
 0xb92   :  { %v1281_v1 = vsel %vm429_vm3, %v1279_v0, 0.0  ;;  %v1284_v3 = vsel %vm429_vm3, %v1280_v2, 0.0 }
 0xb95   :  { %1282 = vadd.xlane.f32.xlu0 %v1281_v1 }
 0xb99   :  { %1285 = vadd.xlane.f32.xlu0 %v1284_v3 }
 0xbaf   :  { %1307 = vperm.xlu0 %6947, %v5388_v4  }
 0xc1e   :  { %v1277_v6 = vpop.xlane.xlu1 %1276  ;;  %v1274_v7 = vpop.xlane.xlu0 %1273 }
 0xc1f   :  { %v1278_v46 = vadd.f32 %v1277_v6, %v1274_v7 }
 0xc21   :  { %v1288_v10 = vmul.f32 0.0125, %v1278_v46 }
 0xc22   :  { %v1283_v47 = vpop.xlane.xlu0 %1282 }
 0xc23   :  { %v1290_v13 = vmul.f32 %v1288_v10, %v1288_v10  ;;  %v1293_v23 = vsub.f32 %v1270_v58, %v1288_v10  ;;  %v1294_v24 = vsub.f32 %v1271_v59, %v1288_v10 }
 0xc26   :  { %v1286_v11 = vpop.xlane.xlu0 %1285 }
 0xc27   :  { %v1287_v12 = vadd.f32 %v1286_v11, %v1283_v47 }
 0xc29   :  { %v1289_v14 = vmul.f32 0.0125, %v1287_v12 }
 0xc2b   :  { %v1291_v15 = vsub.f32 %v1289_v14, %v1290_v13  ;;  %v1323_v14 = vld [vmem:[#allocation8 + $0x18] sm:$0xff] }
 0xc2d   :  { %v1292_v16 = vmax.f32 %v1291_v15, 0.0 }
 0xc2e   :  { %v1308_v28 = vpop.permute.xlu0 %1307 }
 0xc2f   :  { %v1295_v17 = vadd.f32 1e-05, %v1292_v16 }
 0xc31   :  { %7292 = vrsqrt.f32 %v1295_v17 }
 0xc3b   :  { %v7293_v21 = vpop.eup %7292 }
 0xc3c   :  { %v1297_v22 = vmul.f32 %v7293_v21, %v5387_v20 }
 0xc3e   :  { %1300 = vperm.xlu1 %6948, %v1297_v22  }
 0xcbd   :  { %v1301_v25 = vpop.permute.xlu1 %1300 }
 0xcbe   :  { %v1303_v26 = vmul.f32 %v1301_v25, %v1293_v23  ;;  %v1304_v27 = vmul.f32 %v1301_v25, %v1294_v24 }
 0xcc0   :  { %v1310_v29 = vadd.f32 %v1308_v28, %v1303_v26  ;;  %v1311_v30 = vadd.f32 %v1308_v28, %v1304_v27 }
 0xcc2   :  { %vm1312_vm12 = vcmp.ge.f32.partialorder %v1310_v29, 0.0  ;;  %vm1313_vm13 = vcmp.ge.f32.partialorder %v1311_v30, 0.0  ;;  %v1314_v32 = vmul.f32 0.01, %v1310_v29  ;;  %v1315_v33 = vmul.f32 0.01, %v1311_v30 }
 0xcc4   :  { %v1316_v34 = vsel %vm1312_vm12, %v1310_v29, %v1314_v32  ;;  %v1317_v35 = vsel %vm1313_vm13, %v1311_v30, %v1315_v33  ;;  %v5392_v33 = vld [vmem:[%s9476_s8 + $0x18] sm:$0xff] }
 0xcc5   :  { %v7892_v36 = vadd.f32 %v1316_v34, %v7831_v8  ;;  %v7895_v37 = vadd.f32 %v1317_v35, %v7834_v9 }
 0xcc7   :  { %1320 = vst.msk [vmem:[#allocation2 + $0x18] sm:$0xff] %vm429_vm3, %v7892_v36  ;;  %1321 = vst.msk [vmem:[#allocation2 + $0x58] sm:$0xff] %vm429_vm3, %v7895_v37  ;;  %1338 = vrot.lane.b32.xlu0 %v7892_v36, %s7446_s30  ;;  %1332 = vrot.lane.b32.xlu1 %v7892_v36, %s7464_s20 }
 0xccb   :  { %1344 = vrot.lane.b32.xlu0 %v7892_v36, %s7465_s24  ;;  %1334 = vrot.lane.b32.xlu1 %v7895_v37, %s7464_s20 }
 0xccf   :  { %1340 = vrot.lane.b32.xlu1 %v7895_v37, %s7446_s30 }
 0xcd3   :  { %1346 = vrot.lane.b32.xlu1 %v7895_v37, %s7465_s24 }
 0xd39   :  { %v1333_v8 = vpop.permute.xlu1 %1332  ;;  %v1339_v9 = vpop.permute.xlu0 %1338 }
 0xd3a   :  { %v1351_v41 = vsel %vm1350_vm14, %v1333_v8, %v1339_v9 }
 0xd3d   :  { %v1335_v38 = vpop.permute.xlu1 %1334  ;;  %v1345_v40 = vpop.permute.xlu0 %1344 }
 0xd3e   :  { %v1354_v44 = vsel %vm1353_vm15, %v1351_v41, %v1345_v40 }
 0xd41   :  { %v1341_v39 = vpop.permute.xlu1 %1340 }
 0xd42   :  { %v1352_v42 = vsel %vm1350_vm14, %v1335_v38, %v1341_v39 }
 0xd45   :  { %v1347_v43 = vpop.permute.xlu1 %1346 }
 0xd46   :  { %v1355_v45 = vsel %vm1353_vm15, %v1352_v42, %v1347_v43 }
 0xd47   :  { %v7059_v18 = vpack.i.bf16 %v1355_v45, %v1354_v44 }
 0xd49   :  { %7060 = vrot.lane.b32.xlu1 %v7059_v18, %s7456_s23  ;;  %7055 = vrot.lane.b32.xlu0 %v7059_v18, %s7454_s18 }
 0xd4d   :  { %7070 = vrot.lane.b32.xlu1 %v7059_v18, %s7461_s25  ;;  %7065 = vrot.lane.b32.xlu0 %v7059_v18, %s7458_s5 }
 0xd51   :  { %7080 = vrot.lane.b32.xlu1 %v7059_v18, %s7466_s2  ;;  %7075 = vrot.lane.b32.xlu0 %v7059_v18, %s7467_s1 }
 0xd55   :  { %1400 = vrot.lane.b32.xlu1 %v1354_v44, %s7468_s21  ;;  %7085 = vrot.lane.b32.xlu0 %v7059_v18, %s7469_s3  ;;  %v5391_v18 = vld [vmem:[%s9475_s7 + $0x18] sm:$0xff] }
 0xd59   :  { %1551 = vperm.xlu1 %6948, %v1325_v19   ;;  %1402 = vrot.lane.b32.xlu0 %v1355_v45, %s7468_s21 }
 0xdbb   :  { %v7061_v48 = vpop.permute.xlu1 %7060  ;;  %v7056_v49 = vpop.permute.xlu0 %7055 }
 0xdbc   :  { %v7058_v50 = vunpack.i.h.bf16 %v7056_v49  ;;  %v7057_v51 = vunpack.i.l.bf16 %v7056_v49  ;;  %v7063_v56 = vunpack.i.h.bf16 %v7061_v48  ;;  %v7062_v57 = vunpack.i.l.bf16 %v7061_v48 }
 0xdbe   :  { %v6694_v52 = vpack.c.bf16 %v7058_v50, %v1355_v45  ;;  %v6682_v53 = vpack.c.bf16 %v7057_v51, %v1354_v44 }
 0xdbf   :  { %v7071_v54 = vpop.permute.xlu1 %7070  ;;  %v7066_v55 = vpop.permute.xlu0 %7065 }
 0xdc0   :  { %v7068_v58 = vunpack.i.h.bf16 %v7066_v55  ;;  %v7067_v59 = vunpack.i.l.bf16 %v7066_v55  ;;  %6683 = vmatpush3.bf16.msra.mxu0 %v6682_v53  ;;  %6695 = vmatpush3.bf16.msra.mxu1 %v6694_v52  ;;  %v7073_v63 = vunpack.i.h.bf16 %v7071_v54  ;;  %v7072_v0 = vunpack.i.l.bf16 %v7071_v54 }
 0xdc1   :  { %6684 = vmatprep.subr.bf16.mxu0 %v9488_v5  ;;  %6696 = vmatprep.subr.bf16.mxu1 %v9488_v5 }
 0xdc2   :  { %v6697_v60 = vpack.c.bf16 %v7068_v58, %v7063_v56  ;;  %v6685_v61 = vpack.c.bf16 %v7067_v59, %v7062_v57 }
 0xdc3   :  { %v7076_v62 = vpop.permute.xlu0 %7075  ;;  %v7081_v3 = vpop.permute.xlu1 %7080 }
 0xdc4   :  { %v7078_v1 = vunpack.i.h.bf16 %v7076_v62  ;;  %v7077_v2 = vunpack.i.l.bf16 %v7076_v62  ;;  %6686 = vmatpush3.bf16.msra.mxu0 %v6685_v61  ;;  %6698 = vmatpush3.bf16.msra.mxu1 %v6697_v60  ;;  %v7083_v46 = vunpack.i.h.bf16 %v7081_v3  ;;  %v7082_v47 = vunpack.i.l.bf16 %v7081_v3 }
 0xdc5   :  { %6687 = vmatprep.subr.bf16.mxu0 %v9488_v5  ;;  %6699 = vmatprep.subr.bf16.mxu1 %v9488_v5 }
 0xdc6   :  { %v6700_v4 = vpack.c.bf16 %v7078_v1, %v7073_v63  ;;  %v6688_v6 = vpack.c.bf16 %v7077_v2, %v7072_v0 }
 0xdc7   :  { %v7086_v7 = vpop.permute.xlu0 %7085  ;;  %v1401_v15 = vpop.permute.xlu1 %1400 }
 0xdc8   :  { %v7088_v10 = vunpack.i.h.bf16 %v7086_v7  ;;  %v7087_v11 = vunpack.i.l.bf16 %v7086_v7  ;;  %6689 = vmatpush3.bf16.msra.mxu0 %v6688_v6  ;;  %6701 = vmatpush3.bf16.msra.mxu1 %v6700_v4 }
 0xdc9   :  { %6690 = vmatprep.subr.bf16.mxu0 %v9488_v5  ;;  %6702 = vmatprep.subr.bf16.mxu1 %v9488_v5 }
 0xdca   :  { %v6703_v12 = vpack.c.bf16 %v7088_v10, %v7083_v46  ;;  %v6691_v13 = vpack.c.bf16 %v7087_v11, %v7082_v47  ;;  %v1609_v47 = vld [vmem:[#allocation9 + $0x20] sm:$0xff] }
 0xdcb   :  { %v1403_v16 = vpop.permute.xlu0 %1402 }
 0xdcc   :  { %6692 = vmatpush3.bf16.msra.mxu0 %v6691_v13  ;;  %6704 = vmatpush3.bf16.msra.mxu1 %v6703_v12 }
 0xdcd   :  { %6221 = vmatprep.subr.mxu0 %v9486_v31  ;;  %6242 = vmatprep.subr.mxu1 %v9486_v31 }
 0xdd0   :  { %6222 = vmatpush3.msra.mxu0 %v1401_v15  ;;  %6243 = vmatpush3.msra.mxu1 %v1403_v16 }
 0xdd1   :  { %6224 = vmatmul.mubr.msk.f32.vlgmr.msra.gmra.mrb[8].mxu0 %vm557_vm7, %v1323_v14  ;;  %6245 = vmatmul.mubr.msk.f32.vlgmr.msra.gmra.mrb[8].mxu1 %vm557_vm7, %v1323_v14 }
 0xdd2   :  { %6705 = vmatprep.subr.bf16.mxu0 %v9488_v5  ;;  %6717 = vmatprep.subr.bf16.mxu1 %v9488_v5 }
 0xdd3   :  { %6265 = vmatprep.mubr.msk.f32.mxu0 %vm7462_vm6, %v9486_v31  ;;  %6286 = vmatprep.mubr.msk.f32.mxu1 %vm7462_vm6, %v9486_v31 }
 0xdd8   :  { %v1552_v17 = vpop.permute.xlu1 %1551 }
 0xea4   :  { %v1475_v20 = vpop.f32.mrb[8].mxu0  ;;  %v1545_v21 = vpop.f32.mrb[8].mxu1 }
 0xea5   :  { %v1554_v22 = vadd.f32 %v1552_v17, %v1475_v20  ;;  %v1555_v23 = vadd.f32 %v1552_v17, %v1545_v21  ;;  %v6225_v24 = vpop.f32.mrb[9].mxu0  ;;  %v6246_v25 = vpop.f32.mrb[9].mxu1 }
 0xea7   :  { %v1559_v26 = vsel %vm429_vm3, %v1555_v23, 0.0  ;;  %v1556_v27 = vsel %vm429_vm3, %v1554_v22, 0.0  ;;  %v1563_v28 = vmul.f32 %v1554_v22, %v1554_v22  ;;  %v1564_v30 = vmul.f32 %v1555_v23, %v1555_v23 }
 0xea8   :  { %1560 = vadd.xlane.f32.xlu1 %v1559_v26  ;;  %1557 = vadd.xlane.f32.xlu0 %v1556_v27 }
 0xea9   :  { %v1565_v29 = vsel %vm429_vm3, %v1563_v28, 0.0  ;;  %v1568_v32 = vsel %vm429_vm3, %v1564_v30, 0.0 }
 0xeac   :  { %1566 = vadd.xlane.f32.xlu0 %v1565_v29 }
 0xeb0   :  { %1569 = vadd.xlane.f32.xlu0 %v1568_v32 }
 0xec6   :  { %1591 = vperm.xlu0 %6947, %v5392_v33  }
 0xf35   :  { %v1561_v34 = vpop.xlane.xlu1 %1560  ;;  %v1558_v35 = vpop.xlane.xlu0 %1557 }
 0xf36   :  { %v1562_v8 = vadd.f32 %v1561_v34, %v1558_v35 }
 0xf38   :  { %v1572_v38 = vmul.f32 0.0125, %v1562_v8 }
 0xf39   :  { %v1567_v9 = vpop.xlane.xlu0 %1566 }
 0xf3a   :  { %v1574_v41 = vmul.f32 %v1572_v38, %v1572_v38  ;;  %v1577_v49 = vsub.f32 %v1554_v22, %v1572_v38  ;;  %v1578_v50 = vsub.f32 %v1555_v23, %v1572_v38 }
 0xf3d   :  { %v1570_v39 = vpop.xlane.xlu0 %1569 }
 0xf3e   :  { %v1571_v40 = vadd.f32 %v1570_v39, %v1567_v9 }
 0xf40   :  { %v1573_v42 = vmul.f32 0.0125, %v1571_v40 }
 0xf42   :  { %v1575_v43 = vsub.f32 %v1573_v42, %v1574_v41  ;;  %v1607_v42 = vld [vmem:[#allocation8 + $0x20] sm:$0xff] }
 0xf44   :  { %v1576_v44 = vmax.f32 %v1575_v43, 0.0 }
 0xf45   :  { %v1592_v54 = vpop.permute.xlu0 %1591 }
 0xf46   :  { %v1579_v45 = vadd.f32 1e-05, %v1576_v44 }
 0xf48   :  { %7294 = vrsqrt.f32 %v1579_v45 }
 0xf52   :  { %v7295_v19 = vpop.eup %7294 }
 0xf53   :  { %v1581_v48 = vmul.f32 %v7295_v19, %v5391_v18 }
 0xf55   :  { %1584 = vperm.xlu1 %6948, %v1581_v48  }
 0xfd4   :  { %v1585_v51 = vpop.permute.xlu1 %1584 }
 0xfd5   :  { %v1587_v52 = vmul.f32 %v1585_v51, %v1577_v49  ;;  %v1588_v53 = vmul.f32 %v1585_v51, %v1578_v50 }
 0xfd7   :  { %v1594_v55 = vadd.f32 %v1592_v54, %v1587_v52  ;;  %v1595_v56 = vadd.f32 %v1592_v54, %v1588_v53 }
 0xfd9   :  { %vm1596_vm0 = vcmp.ge.f32.partialorder %v1594_v55, 0.0  ;;  %vm1597_vm1 = vcmp.ge.f32.partialorder %v1595_v56, 0.0  ;;  %v1598_v57 = vmul.f32 0.01, %v1594_v55  ;;  %v1599_v58 = vmul.f32 0.01, %v1595_v56 }
 0xfdb   :  { %v1600_v59 = vsel %vm1596_vm0, %v1594_v55, %v1598_v57  ;;  %v1601_v60 = vsel %vm1597_vm1, %v1595_v56, %v1599_v58  ;;  %v5396_v58 = vld [vmem:[%s9476_s8 + $0x20] sm:$0xff] }
 0xfdc   :  { %v7953_v61 = vadd.f32 %v1600_v59, %v7892_v36  ;;  %v7956_v62 = vadd.f32 %v1601_v60, %v7895_v37 }
 0xfde   :  { %1604 = vst.msk [vmem:[#allocation2 + $0x20] sm:$0xff] %vm429_vm3, %v7953_v61  ;;  %1605 = vst.msk [vmem:[#allocation2 + $0x60] sm:$0xff] %vm429_vm3, %v7956_v62  ;;  %1622 = vrot.lane.b32.xlu0 %v7953_v61, %s7446_s30  ;;  %1616 = vrot.lane.b32.xlu1 %v7953_v61, %s7464_s20 }
 0xfe2   :  { %1628 = vrot.lane.b32.xlu0 %v7953_v61, %s7465_s24  ;;  %1618 = vrot.lane.b32.xlu1 %v7956_v62, %s7464_s20 }
 0xfe6   :  { %1624 = vrot.lane.b32.xlu1 %v7956_v62, %s7446_s30 }
 0xfea   :  { %1630 = vrot.lane.b32.xlu1 %v7956_v62, %s7465_s24 }
0x1050   :  { %v1617_v36 = vpop.permute.xlu1 %1616  ;;  %v1623_v37 = vpop.permute.xlu0 %1622 }
0x1051   :  { %v1634_v2 = vsel %vm1350_vm14, %v1617_v36, %v1623_v37 }
0x1054   :  { %v1619_v63 = vpop.permute.xlu1 %1618  ;;  %v1629_v1 = vpop.permute.xlu0 %1628 }
0x1055   :  { %v1636_v6 = vsel %vm1353_vm15, %v1634_v2, %v1629_v1 }
0x1058   :  { %v1625_v0 = vpop.permute.xlu1 %1624 }
0x1059   :  { %v1635_v3 = vsel %vm1350_vm14, %v1619_v63, %v1625_v0 }
0x105c   :  { %v1631_v4 = vpop.permute.xlu1 %1630 }
0x105d   :  { %v1637_v7 = vsel %vm1353_vm15, %v1635_v3, %v1631_v4 }
0x105e   :  { %v7094_v46 = vpack.i.bf16 %v1637_v7, %v1636_v6 }
0x1060   :  { %7095 = vrot.lane.b32.xlu1 %v7094_v46, %s7456_s23  ;;  %7090 = vrot.lane.b32.xlu0 %v7094_v46, %s7454_s18 }
0x1064   :  { %7105 = vrot.lane.b32.xlu1 %v7094_v46, %s7461_s25  ;;  %7100 = vrot.lane.b32.xlu0 %v7094_v46, %s7458_s5 }
0x1068   :  { %7115 = vrot.lane.b32.xlu1 %v7094_v46, %s7466_s2  ;;  %7110 = vrot.lane.b32.xlu0 %v7094_v46, %s7467_s1 }
0x106c   :  { %1682 = vrot.lane.b32.xlu1 %v1636_v6, %s7468_s21  ;;  %7120 = vrot.lane.b32.xlu0 %v7094_v46, %s7469_s3  ;;  %v5395_v46 = vld [vmem:[%s9475_s7 + $0x20] sm:$0xff] }
0x1070   :  { %1833 = vperm.xlu1 %6948, %v1609_v47   ;;  %1684 = vrot.lane.b32.xlu0 %v1637_v7, %s7468_s21 }
0x10d2   :  { %v7096_v10 = vpop.permute.xlu1 %7095  ;;  %v7091_v11 = vpop.permute.xlu0 %7090 }
0x10d3   :  { %v7093_v12 = vunpack.i.h.bf16 %v7091_v11  ;;  %v7092_v13 = vunpack.i.l.bf16 %v7091_v11  ;;  %v7098_v20 = vunpack.i.h.bf16 %v7096_v10  ;;  %v7097_v21 = vunpack.i.l.bf16 %v7096_v10 }
0x10d5   :  { %v6718_v14 = vpack.c.bf16 %v7093_v12, %v1637_v7  ;;  %v6706_v15 = vpack.c.bf16 %v7092_v13, %v1636_v6 }
0x10d6   :  { %v7106_v16 = vpop.permute.xlu1 %7105  ;;  %v7101_v17 = vpop.permute.xlu0 %7100 }
0x10d7   :  { %v7103_v22 = vunpack.i.h.bf16 %v7101_v17  ;;  %v7102_v23 = vunpack.i.l.bf16 %v7101_v17  ;;  %6707 = vmatpush3.bf16.msra.mxu0 %v6706_v15  ;;  %6719 = vmatpush3.bf16.msra.mxu1 %v6718_v14  ;;  %v7108_v27 = vunpack.i.h.bf16 %v7106_v16  ;;  %v7107_v28 = vunpack.i.l.bf16 %v7106_v16 }
0x10d8   :  { %6708 = vmatprep.subr.bf16.mxu0 %v9488_v5  ;;  %6720 = vmatprep.subr.bf16.mxu1 %v9488_v5 }
0x10d9   :  { %v6721_v24 = vpack.c.bf16 %v7103_v22, %v7098_v20  ;;  %v6709_v25 = vpack.c.bf16 %v7102_v23, %v7097_v21 }
0x10da   :  { %v7111_v26 = vpop.permute.xlu0 %7110  ;;  %v7116_v32 = vpop.permute.xlu1 %7115 }
0x10db   :  { %v7113_v29 = vunpack.i.h.bf16 %v7111_v26  ;;  %v7112_v30 = vunpack.i.l.bf16 %v7111_v26  ;;  %6710 = vmatpush3.bf16.msra.mxu0 %v6709_v25  ;;  %6722 = vmatpush3.bf16.msra.mxu1 %v6721_v24  ;;  %v7118_v8 = vunpack.i.h.bf16 %v7116_v32  ;;  %v7117_v9 = vunpack.i.l.bf16 %v7116_v32 }
0x10dc   :  { %6711 = vmatprep.subr.bf16.mxu0 %v9488_v5  ;;  %6723 = vmatprep.subr.bf16.mxu1 %v9488_v5 }
0x10dd   :  { %v6724_v33 = vpack.c.bf16 %v7113_v29, %v7108_v27  ;;  %v6712_v34 = vpack.c.bf16 %v7112_v30, %v7107_v28 }
0x10de   :  { %v7121_v35 = vpop.permute.xlu0 %7120  ;;  %v1683_v43 = vpop.permute.xlu1 %1682 }
0x10df   :  { %v7123_v38 = vunpack.i.h.bf16 %v7121_v35  ;;  %v7122_v39 = vunpack.i.l.bf16 %v7121_v35  ;;  %6713 = vmatpush3.bf16.msra.mxu0 %v6712_v34  ;;  %6725 = vmatpush3.bf16.msra.mxu1 %v6724_v33 }
0x10e0   :  { %6714 = vmatprep.subr.bf16.mxu0 %v9488_v5  ;;  %6726 = vmatprep.subr.bf16.mxu1 %v9488_v5 }
0x10e1   :  { %v6727_v40 = vpack.c.bf16 %v7123_v38, %v7118_v8  ;;  %v6715_v41 = vpack.c.bf16 %v7122_v39, %v7117_v9  ;;  %v1891_v9 = vld [vmem:[#allocation9 + $0x28] sm:$0xff] }
0x10e2   :  { %v1685_v44 = vpop.permute.xlu0 %1684 }
0x10e3   :  { %6716 = vmatpush3.bf16.msra.mxu0 %v6715_v41  ;;  %6728 = vmatpush3.bf16.msra.mxu1 %v6727_v40 }
0x10e4   :  { %6263 = vmatprep.subr.mxu0 %v9486_v31  ;;  %6284 = vmatprep.subr.mxu1 %v9486_v31 }
0x10e7   :  { %6264 = vmatpush3.msra.mxu0 %v1683_v43  ;;  %6285 = vmatpush3.msra.mxu1 %v1685_v44 }
0x10e8   :  { %6266 = vmatmul.mubr.msk.f32.vlgmr.msra.gmra.mrb[10].mxu0 %vm557_vm7, %v1607_v42  ;;  %6287 = vmatmul.mubr.msk.f32.vlgmr.msra.gmra.mrb[10].mxu1 %vm557_vm7, %v1607_v42 }
0x10e9   :  { %6729 = vmatprep.subr.bf16.mxu0 %v9488_v5  ;;  %6741 = vmatprep.subr.bf16.mxu1 %v9488_v5 }
0x10ea   :  { %6307 = vmatprep.mubr.msk.f32.mxu0 %vm7462_vm6, %v9486_v31  ;;  %6328 = vmatprep.mubr.msk.f32.mxu1 %vm7462_vm6, %v9486_v31 }
0x10ef   :  { %v1834_v45 = vpop.permute.xlu1 %1833 }
0x11bb   :  { %v1757_v18 = vpop.f32.mrb[10].mxu0  ;;  %v1827_v19 = vpop.f32.mrb[10].mxu1 }
0x11bc   :  { %v1836_v48 = vadd.f32 %v1834_v45, %v1757_v18  ;;  %v1837_v49 = vadd.f32 %v1834_v45, %v1827_v19  ;;  %v6267_v50 = vpop.f32.mrb[11].mxu0  ;;  %v6288_v51 = vpop.f32.mrb[11].mxu1 }
0x11be   :  { %v1841_v52 = vsel %vm429_vm3, %v1837_v49, 0.0  ;;  %v1838_v53 = vsel %vm429_vm3, %v1836_v48, 0.0  ;;  %v1845_v54 = vmul.f32 %v1836_v48, %v1836_v48  ;;  %v1846_v56 = vmul.f32 %v1837_v49, %v1837_v49 }
0x11bf   :  { %1842 = vadd.xlane.f32.xlu1 %v1841_v52  ;;  %1839 = vadd.xlane.f32.xlu0 %v1838_v53 }
0x11c0   :  { %v1847_v55 = vsel %vm429_vm3, %v1845_v54, 0.0  ;;  %v1850_v57 = vsel %vm429_vm3, %v1846_v56, 0.0 }
0x11c3   :  { %1848 = vadd.xlane.f32.xlu0 %v1847_v55 }
0x11c7   :  { %1851 = vadd.xlane.f32.xlu0 %v1850_v57 }
0x11dd   :  { %1873 = vperm.xlu0 %6947, %v5396_v58  }
0x124c   :  { %v1843_v59 = vpop.xlane.xlu1 %1842  ;;  %v1840_v60 = vpop.xlane.xlu0 %1839 }
0x124d   :  { %v1844_v36 = vadd.f32 %v1843_v59, %v1840_v60 }
0x124f   :  { %v1854_v63 = vmul.f32 0.0125, %v1844_v36 }
0x1250   :  { %v1849_v37 = vpop.xlane.xlu0 %1848 }
0x1251   :  { %v1856_v2 = vmul.f32 %v1854_v63, %v1854_v63  ;;  %v1859_v11 = vsub.f32 %v1836_v48, %v1854_v63  ;;  %v1860_v12 = vsub.f32 %v1837_v49, %v1854_v63 }
0x1254   :  { %v1852_v0 = vpop.xlane.xlu0 %1851 }
0x1255   :  { %v1853_v1 = vadd.f32 %v1852_v0, %v1849_v37 }
0x1257   :  { %v1855_v3 = vmul.f32 0.0125, %v1853_v1 }
0x1259   :  { %v1857_v4 = vsub.f32 %v1855_v3, %v1856_v2  ;;  %v1889_v3 = vld [vmem:[#allocation8 + $0x28] sm:$0xff] }
0x125b   :  { %v1858_v6 = vmax.f32 %v1857_v4, 0.0 }
0x125c   :  { %v1874_v16 = vpop.permute.xlu0 %1873 }
0x125d   :  { %v1861_v7 = vadd.f32 1e-05, %v1858_v6 }
0x125f   :  { %7296 = vrsqrt.f32 %v1861_v7 }
0x1269   :  { %v7297_v47 = vpop.eup %7296 }
0x126a   :  { %v1863_v10 = vmul.f32 %v7297_v47, %v5395_v46 }
0x126c   :  { %1866 = vperm.xlu1 %6948, %v1863_v10  }
0x12eb   :  { %v1867_v13 = vpop.permute.xlu1 %1866 }
0x12ec   :  { %v1869_v14 = vmul.f32 %v1867_v13, %v1859_v11  ;;  %v1870_v15 = vmul.f32 %v1867_v13, %v1860_v12 }
0x12ee   :  { %v1876_v17 = vadd.f32 %v1874_v16, %v1869_v14  ;;  %v1877_v20 = vadd.f32 %v1874_v16, %v1870_v15 }
0x12f0   :  { %vm1878_vm4 = vcmp.ge.f32.partialorder %v1876_v17, 0.0  ;;  %vm1879_vm5 = vcmp.ge.f32.partialorder %v1877_v20, 0.0  ;;  %v1880_v21 = vmul.f32 0.01, %v1876_v17  ;;  %v1881_v22 = vmul.f32 0.01, %v1877_v20 }
0x12f2   :  { %v1882_v23 = vsel %vm1878_vm4, %v1876_v17, %v1880_v21  ;;  %v1883_v24 = vsel %vm1879_vm5, %v1877_v20, %v1881_v22  ;;  %v5400_v22 = vld [vmem:[%s9476_s8 + $0x28] sm:$0xff] }
0x12f3   :  { %v8014_v25 = vadd.f32 %v1882_v23, %v7953_v61  ;;  %v8017_v26 = vadd.f32 %v1883_v24, %v7956_v62 }
0x12f5   :  { %1886 = vst.msk [vmem:[#allocation2 + $0x28] sm:$0xff] %vm429_vm3, %v8014_v25  ;;  %1887 = vst.msk [vmem:[#allocation2 + $0x68] sm:$0xff] %vm429_vm3, %v8017_v26  ;;  %1904 = vrot.lane.b32.xlu0 %v8014_v25, %s7470_s26  ;;  %1898 = vrot.lane.b32.xlu1 %v8014_v25, %s7471_s27 }
0x12f9   :  { %1910 = vrot.lane.b32.xlu0 %v8014_v25, %s7472_s17  ;;  %1900 = vrot.lane.b32.xlu1 %v8017_v26, %s7471_s27 }
0x12fd   :  { %1906 = vrot.lane.b32.xlu1 %v8017_v26, %s7470_s26 }
0x1301   :  { %1912 = vrot.lane.b32.xlu1 %v8017_v26, %s7472_s17 }
0x1367   :  { %v1899_v61 = vpop.permute.xlu1 %1898  ;;  %v1905_v62 = vpop.permute.xlu0 %1904 }
0x1368   :  { %v1916_v30 = vsel %vm278_vm2, %v1899_v61, %v1905_v62 }
0x136b   :  { %v1901_v27 = vpop.permute.xlu1 %1900  ;;  %v1911_v29 = vpop.permute.xlu0 %1910 }
0x136c   :  { %v1919_v34 = vsel %vm1918_vm8, %v1916_v30, %v1911_v29 }
0x136f   :  { %v1907_v28 = vpop.permute.xlu1 %1906 }
0x1370   :  { %v1917_v32 = vsel %vm278_vm2, %v1901_v27, %v1907_v28 }
0x1373   :  { %v1913_v33 = vpop.permute.xlu1 %1912 }
0x1374   :  { %v1920_v35 = vsel %vm1918_vm8, %v1917_v32, %v1913_v33 }
0x1375   :  { %v7129_v8 = vpack.i.bf16 %v1920_v35, %v1919_v34 }
0x1377   :  { %7130 = vrot.lane.b32.xlu1 %v7129_v8, %s7461_s25  ;;  %7125 = vrot.lane.b32.xlu0 %v7129_v8, %s7456_s23 }
0x137b   :  { %7140 = vrot.lane.b32.xlu1 %v7129_v8, %s7468_s21  ;;  %7135 = vrot.lane.b32.xlu0 %v7129_v8, %s7466_s2 }
0x137f   :  { %7150 = vrot.lane.b32.xlu1 %v7129_v8, %s7471_s27  ;;  %7145 = vrot.lane.b32.xlu0 %v7129_v8, %s7473_s19 }
0x1383   :  { %1965 = vrot.lane.b32.xlu1 %v1919_v34, %s7464_s20  ;;  %7155 = vrot.lane.b32.xlu0 %v7129_v8, %s7474_s29  ;;  %v5399_v8 = vld [vmem:[%s9475_s7 + $0x28] sm:$0xff] }
0x1387   :  { %2116 = vperm.xlu1 %6948, %v1891_v9   ;;  %1967 = vrot.lane.b32.xlu0 %v1920_v35, %s7464_s20 }
0x13e9   :  { %v7131_v38 = vpop.permute.xlu1 %7130  ;;  %v7126_v39 = vpop.permute.xlu0 %7125 }
0x13ea   :  { %v7128_v40 = vunpack.i.h.bf16 %v7126_v39  ;;  %v7127_v41 = vunpack.i.l.bf16 %v7126_v39  ;;  %v7133_v18 = vunpack.i.h.bf16 %v7131_v38  ;;  %v7132_v19 = vunpack.i.l.bf16 %v7131_v38 }
0x13ec   :  { %v6742_v42 = vpack.c.bf16 %v7128_v40, %v1920_v35  ;;  %v6730_v43 = vpack.c.bf16 %v7127_v41, %v1919_v34 }
0x13ed   :  { %v7141_v44 = vpop.permute.xlu1 %7140  ;;  %v7136_v45 = vpop.permute.xlu0 %7135 }
0x13ee   :  { %v7138_v48 = vunpack.i.h.bf16 %v7136_v45  ;;  %v7137_v49 = vunpack.i.l.bf16 %v7136_v45  ;;  %6731 = vmatpush3.bf16.msra.mxu0 %v6730_v43  ;;  %6743 = vmatpush3.bf16.msra.mxu1 %v6742_v42  ;;  %v7143_v53 = vunpack.i.h.bf16 %v7141_v44  ;;  %v7142_v54 = vunpack.i.l.bf16 %v7141_v44 }
0x13ef   :  { %6732 = vmatprep.subr.bf16.mxu0 %v9488_v5  ;;  %6744 = vmatprep.subr.bf16.mxu1 %v9488_v5 }
0x13f0   :  { %v6745_v50 = vpack.c.bf16 %v7138_v48, %v7133_v18  ;;  %v6733_v51 = vpack.c.bf16 %v7137_v49, %v7132_v19 }
0x13f1   :  { %v7146_v52 = vpop.permute.xlu0 %7145  ;;  %v7151_v57 = vpop.permute.xlu1 %7150 }
0x13f2   :  { %v7148_v55 = vunpack.i.h.bf16 %v7146_v52  ;;  %v7147_v56 = vunpack.i.l.bf16 %v7146_v52  ;;  %6734 = vmatpush3.bf16.msra.mxu0 %v6733_v51  ;;  %6746 = vmatpush3.bf16.msra.mxu1 %v6745_v50  ;;  %v7153_v36 = vunpack.i.h.bf16 %v7151_v57  ;;  %v7152_v37 = vunpack.i.l.bf16 %v7151_v57 }
0x13f3   :  { %6735 = vmatprep.subr.bf16.mxu0 %v9488_v5  ;;  %6747 = vmatprep.subr.bf16.mxu1 %v9488_v5 }
0x13f4   :  { %v6748_v58 = vpack.c.bf16 %v7148_v55, %v7143_v53  ;;  %v6736_v59 = vpack.c.bf16 %v7147_v56, %v7142_v54 }
0x13f5   :  { %v7156_v60 = vpop.permute.xlu0 %7155  ;;  %v1966_v4 = vpop.permute.xlu1 %1965 }
0x13f6   :  { %v7158_v63 = vunpack.i.h.bf16 %v7156_v60  ;;  %v7157_v0 = vunpack.i.l.bf16 %v7156_v60  ;;  %6737 = vmatpush3.bf16.msra.mxu0 %v6736_v59  ;;  %6749 = vmatpush3.bf16.msra.mxu1 %v6748_v58 }
0x13f7   :  { %6738 = vmatprep.subr.bf16.mxu0 %v9488_v5  ;;  %6750 = vmatprep.subr.bf16.mxu1 %v9488_v5 }
0x13f8   :  { %v6751_v1 = vpack.c.bf16 %v7158_v63, %v7153_v36  ;;  %v6739_v2 = vpack.c.bf16 %v7157_v0, %v7152_v37  ;;  %v2174_v37 = vld [vmem:[#allocation9 + $0x30] sm:$0xff] }
0x13f9   :  { %v1968_v6 = vpop.permute.xlu0 %1967 }
0x13fa   :  { %6740 = vmatpush3.bf16.msra.mxu0 %v6739_v2  ;;  %6752 = vmatpush3.bf16.msra.mxu1 %v6751_v1 }
0x13fb   :  { %6305 = vmatprep.subr.mxu0 %v9486_v31  ;;  %6326 = vmatprep.subr.mxu1 %v9486_v31 }
0x13fe   :  { %6306 = vmatpush3.msra.mxu0 %v1966_v4  ;;  %6327 = vmatpush3.msra.mxu1 %v1968_v6 }
0x13ff   :  { %6308 = vmatmul.mubr.msk.f32.vlgmr.msra.gmra.mrb[12].mxu0 %vm557_vm7, %v1889_v3  ;;  %6329 = vmatmul.mubr.msk.f32.vlgmr.msra.gmra.mrb[12].mxu1 %vm557_vm7, %v1889_v3 }
0x1400   :  { %6753 = vmatprep.subr.bf16.mxu0 %v9488_v5  ;;  %6765 = vmatprep.subr.bf16.mxu1 %v9488_v5 }
0x1401   :  { %6349 = vmatprep.mubr.msk.f32.mxu0 %vm7462_vm6, %v9486_v31  ;;  %6370 = vmatprep.mubr.msk.f32.mxu1 %vm7462_vm6, %v9486_v31 }
0x1406   :  { %v2117_v7 = vpop.permute.xlu1 %2116 }
0x14d2   :  { %v2040_v46 = vpop.f32.mrb[12].mxu0  ;;  %v2110_v47 = vpop.f32.mrb[12].mxu1 }
0x14d3   :  { %v2119_v10 = vadd.f32 %v2117_v7, %v2040_v46  ;;  %v2120_v11 = vadd.f32 %v2117_v7, %v2110_v47  ;;  %v6309_v12 = vpop.f32.mrb[13].mxu0  ;;  %v6330_v13 = vpop.f32.mrb[13].mxu1 }
0x14d5   :  { %v2124_v14 = vsel %vm429_vm3, %v2120_v11, 0.0  ;;  %v2121_v15 = vsel %vm429_vm3, %v2119_v10, 0.0  ;;  %v2128_v16 = vmul.f32 %v2119_v10, %v2119_v10  ;;  %v2129_v20 = vmul.f32 %v2120_v11, %v2120_v11 }
0x14d6   :  { %2125 = vadd.xlane.f32.xlu1 %v2124_v14  ;;  %2122 = vadd.xlane.f32.xlu0 %v2121_v15 }
0x14d7   :  { %v2130_v17 = vsel %vm429_vm3, %v2128_v16, 0.0  ;;  %v2133_v21 = vsel %vm429_vm3, %v2129_v20, 0.0 }
0x14da   :  { %2131 = vadd.xlane.f32.xlu0 %v2130_v17 }
0x14de   :  { %2134 = vadd.xlane.f32.xlu0 %v2133_v21 }
0x14f4   :  { %2156 = vperm.xlu0 %6947, %v5400_v22  }
0x1563   :  { %v2126_v23 = vpop.xlane.xlu1 %2125  ;;  %v2123_v24 = vpop.xlane.xlu0 %2122 }
0x1564   :  { %v2127_v61 = vadd.f32 %v2126_v23, %v2123_v24 }
0x1566   :  { %v2137_v27 = vmul.f32 0.0125, %v2127_v61 }
0x1567   :  { %v2132_v62 = vpop.xlane.xlu0 %2131 }
0x1568   :  { %v2139_v30 = vmul.f32 %v2137_v27, %v2137_v27  ;;  %v2142_v39 = vsub.f32 %v2119_v10, %v2137_v27  ;;  %v2143_v40 = vsub.f32 %v2120_v11, %v2137_v27 }
0x156b   :  { %v2135_v28 = vpop.xlane.xlu0 %2134 }
0x156c   :  { %v2136_v29 = vadd.f32 %v2135_v28, %v2132_v62 }
0x156e   :  { %v2138_v32 = vmul.f32 0.0125, %v2136_v29 }
0x1570   :  { %v2140_v33 = vsub.f32 %v2138_v32, %v2139_v30  ;;  %v2518_v32 = vld [vmem:[#allocation2 + $0x8] sm:$0xff] }
0x1572   :  { %v2141_v34 = vmax.f32 %v2140_v33, 0.0  ;;  %v3077_v33 = vld [vmem:[#allocation2 + $0x48] sm:$0xff] }
0x1573   :  { %v2157_v44 = vpop.permute.xlu0 %2156 }
0x1574   :  { %v2144_v35 = vadd.f32 1e-05, %v2141_v34  ;;  %v2172_v34 = vld [vmem:[#allocation8 + $0x30] sm:$0xff] }
0x1576   :  { %7298 = vrsqrt.f32 %v2144_v35  ;;  %v2517_v35 = vld [vmem:[#allocation2] sm:$0xff] }
0x1580   :  { %v7299_v9 = vpop.eup %7298 }
0x1581   :  { %v2146_v38 = vmul.f32 %v7299_v9, %v5399_v8 }
0x1583   :  { %2149 = vperm.xlu1 %6948, %v2146_v38   ;;  %v3076_v38 = vld [vmem:[#allocation2 + $0x40] sm:$0xff] }
0x1602   :  { %v2150_v41 = vpop.permute.xlu1 %2149 }
0x1603   :  { %v2152_v42 = vmul.f32 %v2150_v41, %v2142_v39  ;;  %v2153_v43 = vmul.f32 %v2150_v41, %v2143_v40  ;;  %v2520_v39 = vld [vmem:[#allocation2 + $0x18] sm:$0xff]  ;;  %v2525_v41 = vpack.c.bf16 %v2518_v32, %v2517_v35 }
0x1604   :  { %v3079_v40 = vld [vmem:[#allocation2 + $0x58] sm:$0xff] }
0x1605   :  { %v2159_v45 = vadd.f32 %v2157_v44, %v2152_v42  ;;  %v2160_v18 = vadd.f32 %v2157_v44, %v2153_v43  ;;  %v3084_v42 = vpack.c.bf16 %v3077_v33, %v3076_v38  ;;  %v2519_v43 = vld [vmem:[#allocation2 + $0x10] sm:$0xff]  ;;  %v3394_v38 = vld [vmem:[%s9478_s10 + $0x88] sm:$0xff] }
0x1606   :  { %v3078_v44 = vld [vmem:[#allocation2 + $0x50] sm:$0xff] }
0x1607   :  { %vm2161_vm9 = vcmp.ge.f32.partialorder %v2159_v45, 0.0  ;;  %vm2162_vm10 = vcmp.ge.f32.partialorder %v2160_v18, 0.0  ;;  %v2163_v19 = vmul.f32 0.01, %v2159_v45  ;;  %v2164_v48 = vmul.f32 0.01, %v2160_v18 }
0x1609   :  { %v2165_v49 = vsel %vm2161_vm9, %v2159_v45, %v2163_v19  ;;  %v2166_v50 = vsel %vm2162_vm10, %v2160_v18, %v2164_v48  ;;  %v2526_v45 = vpack.c.bf16 %v2520_v39, %v2519_v43  ;;  %v3085_v18 = vpack.c.bf16 %v3079_v40, %v3078_v44  ;;  %v2522_v19 = vld [vmem:[#allocation2 + $0x28] sm:$0xff]  ;;  %v3396_v40 = vld [vmem:[%s9478_s10 + $0x98] sm:$0xff] }
0x160a   :  { %v8075_v51 = vadd.f32 %v2165_v49, %v8014_v25  ;;  %v8078_v52 = vadd.f32 %v2166_v50, %v8017_v26  ;;  %v3081_v48 = vld [vmem:[#allocation2 + $0x68] sm:$0xff]  ;;  %v2521_v49 = vld [vmem:[#allocation2 + $0x20] sm:$0xff] }
0x160b   :  { %v3080_v50 = vld [vmem:[#allocation2 + $0x60] sm:$0xff]  ;;  %v3378_v39 = vld [vmem:[%s9478_s10 + $0x8] sm:$0xff] }
0x160c   :  { %2169 = vst.msk [vmem:[#allocation2 + $0x30] sm:$0xff] %vm429_vm3, %v8075_v51  ;;  %2170 = vst.msk [vmem:[#allocation2 + $0x70] sm:$0xff] %vm429_vm3, %v8078_v52  ;;  %2187 = vrot.lane.b32.xlu0 %v8075_v51, %s7470_s26  ;;  %2181 = vrot.lane.b32.xlu1 %v8075_v51, %s7471_s27  ;;  %v3398_v43 = vld [vmem:[%s9478_s10 + $0xa8] sm:$0xff] }
0x160d   :  { %v3382_v44 = vld [vmem:[%s9478_s10 + $0x28] sm:$0xff] }
0x1610   :  { %2193 = vrot.lane.b32.xlu0 %v8075_v51, %s7472_s17  ;;  %2183 = vrot.lane.b32.xlu1 %v8078_v52, %s7471_s27 }
0x1614   :  { %2189 = vrot.lane.b32.xlu1 %v8078_v52, %s7470_s26 }
0x1618   :  { %2195 = vrot.lane.b32.xlu1 %v8078_v52, %s7472_s17 }
0x167e   :  { %v2182_v25 = vpop.permute.xlu1 %2181  ;;  %v2188_v26 = vpop.permute.xlu0 %2187 }
0x167f   :  { %v2199_v56 = vsel %vm278_vm2, %v2182_v25, %v2188_v26  ;;  %v2527_v25 = vpack.c.bf16 %v2522_v19, %v2521_v49  ;;  %v3086_v26 = vpack.c.bf16 %v3081_v48, %v3080_v50  ;;  %v3402_v19 = vld [vmem:[%s9478_s10 + $0xc8] sm:$0xff]  ;;  %v3404_v49 = vld [vmem:[%s9478_s10 + $0xd8] sm:$0xff] }
0x1680   :  { %v3386_v48 = vld [vmem:[%s9478_s10 + $0x48] sm:$0xff]  ;;  %v3388_v50 = vld [vmem:[%s9478_s10 + $0x58] sm:$0xff] }
0x1682   :  { %v2184_v53 = vpop.permute.xlu1 %2183  ;;  %v2194_v55 = vpop.permute.xlu0 %2193 }
0x1683   :  { %v2201_v59 = vsel %vm1918_vm8, %v2199_v56, %v2194_v55 }
0x1686   :  { %v2190_v54 = vpop.permute.xlu1 %2189 }
0x1687   :  { %v2200_v57 = vsel %vm278_vm2, %v2184_v53, %v2190_v54  ;;  %vm2689_vm2 = vcmask 523264  }
0x168a   :  { %v2196_v58 = vpop.permute.xlu1 %2195 }
0x168b   :  { %v2202_v60 = vsel %vm1918_vm8, %v2200_v57, %v2196_v58 }
0x168c   :  { %v7164_v36 = vpack.i.bf16 %v2202_v60, %v2201_v59 }
0x168e   :  { %7165 = vrot.lane.b32.xlu1 %v7164_v36, %s7461_s25  ;;  %7160 = vrot.lane.b32.xlu0 %v7164_v36, %s7456_s23 }
0x1692   :  { %7175 = vrot.lane.b32.xlu1 %v7164_v36, %s7468_s21  ;;  %7170 = vrot.lane.b32.xlu0 %v7164_v36, %s7466_s2  ;;  %s7475_s2 = smov [#allocation12]  }
0x1696   :  { %7185 = vrot.lane.b32.xlu1 %v7164_v36, %s7471_s27  ;;  %7180 = vrot.lane.b32.xlu0 %v7164_v36, %s7473_s19 }
0x169a   :  { %2247 = vrot.lane.b32.xlu1 %v2201_v59, %s7464_s20  ;;  %7190 = vrot.lane.b32.xlu0 %v7164_v36, %s7474_s29 }
0x169e   :  { %2398 = vperm.xlu1 %6948, %v2174_v37   ;;  %2249 = vrot.lane.b32.xlu0 %v2202_v60, %s7464_s20 }
0x1700   :  { %v7166_v63 = vpop.permute.xlu1 %7165  ;;  %v7161_v0 = vpop.permute.xlu0 %7160 }
0x1701   :  { %v7163_v1 = vunpack.i.h.bf16 %v7161_v0  ;;  %v7162_v2 = vunpack.i.l.bf16 %v7161_v0  ;;  %v7168_v46 = vunpack.i.h.bf16 %v7166_v63  ;;  %v7167_v47 = vunpack.i.l.bf16 %v7166_v63 }
0x1703   :  { %v6766_v3 = vpack.c.bf16 %v7163_v1, %v2202_v60  ;;  %v6754_v4 = vpack.c.bf16 %v7162_v2, %v2201_v59  ;;  %v5404_v2 = vld [vmem:[%s9476_s8 + $0x30] sm:$0xff] }
0x1704   :  { %v7176_v6 = vpop.permute.xlu1 %7175  ;;  %v7171_v7 = vpop.permute.xlu0 %7170 }
0x1705   :  { %v7173_v10 = vunpack.i.h.bf16 %v7171_v7  ;;  %v7172_v11 = vunpack.i.l.bf16 %v7171_v7  ;;  %6755 = vmatpush3.bf16.msra.mxu0 %v6754_v4  ;;  %6767 = vmatpush3.bf16.msra.mxu1 %v6766_v3  ;;  %v7178_v15 = vunpack.i.h.bf16 %v7176_v6  ;;  %v7177_v16 = vunpack.i.l.bf16 %v7176_v6  ;;  %v3377_v3 = vld [vmem:[%s9478_s10] sm:$0xff]  ;;  %v3395_v4 = vld [vmem:[%s9478_s10 + $0x90] sm:$0xff] }
0x1706   :  { %6756 = vmatprep.subr.bf16.mxu0 %v9488_v5  ;;  %6768 = vmatprep.subr.bf16.mxu1 %v9488_v5  ;;  %v3379_v6 = vld [vmem:[%s9478_s10 + $0x10] sm:$0xff]  ;;  %v3397_v7 = vld [vmem:[%s9478_s10 + $0xa0] sm:$0xff] }
0x1707   :  { %v6769_v12 = vpack.c.bf16 %v7173_v10, %v7168_v46  ;;  %v6757_v13 = vpack.c.bf16 %v7172_v11, %v7167_v47  ;;  %v3381_v46 = vld [vmem:[%s9478_s10 + $0x20] sm:$0xff]  ;;  %v3399_v47 = vld [vmem:[%s9478_s10 + $0xb0] sm:$0xff] }
0x1708   :  { %v7181_v14 = vpop.permute.xlu0 %7180  ;;  %v7186_v21 = vpop.permute.xlu1 %7185  ;;  %v3383_v10 = vld [vmem:[%s9478_s10 + $0x30] sm:$0xff]  ;;  %v3401_v11 = vld [vmem:[%s9478_s10 + $0xc0] sm:$0xff] }
0x1709   :  { %v7183_v17 = vunpack.i.h.bf16 %v7181_v14  ;;  %v7182_v20 = vunpack.i.l.bf16 %v7181_v14  ;;  %6758 = vmatpush3.bf16.msra.mxu0 %v6757_v13  ;;  %6770 = vmatpush3.bf16.msra.mxu1 %v6769_v12  ;;  %v7188_v61 = vunpack.i.h.bf16 %v7186_v21  ;;  %v7187_v62 = vunpack.i.l.bf16 %v7186_v21  ;;  %v3385_v12 = vld [vmem:[%s9478_s10 + $0x40] sm:$0xff]  ;;  %v3403_v13 = vld [vmem:[%s9478_s10 + $0xd0] sm:$0xff] }
0x170a   :  { %6759 = vmatprep.subr.bf16.mxu0 %v9488_v5  ;;  %6771 = vmatprep.subr.bf16.mxu1 %v9488_v5  ;;  %v3387_v14 = vld [vmem:[%s9478_s10 + $0x50] sm:$0xff] }
0x170b   :  { %v6772_v22 = vpack.c.bf16 %v7183_v17, %v7178_v15  ;;  %v6760_v23 = vpack.c.bf16 %v7182_v20, %v7177_v16  ;;  %v3405_v15 = vld [vmem:[%s9478_s10 + $0xe0] sm:$0xff]  ;;  %v3407_v17 = vld [vmem:[%s9478_s10 + $0xf0] sm:$0xff] }
0x170c   :  { %v7191_v24 = vpop.permute.xlu0 %7190  ;;  %v2248_v8 = vpop.permute.xlu1 %2247  ;;  %v3389_v16 = vld [vmem:[%s9478_s10 + $0x60] sm:$0xff]  ;;  %v3391_v20 = vld [vmem:[%s9478_s10 + $0x70] sm:$0xff] }
0x170d   :  { %v7193_v27 = vunpack.i.h.bf16 %v7191_v24  ;;  %v7192_v28 = vunpack.i.l.bf16 %v7191_v24  ;;  %6761 = vmatpush3.bf16.msra.mxu0 %v6760_v23  ;;  %6773 = vmatpush3.bf16.msra.mxu1 %v6772_v22 }
0x170e   :  { %6762 = vmatprep.subr.bf16.mxu0 %v9488_v5  ;;  %6774 = vmatprep.subr.bf16.mxu1 %v9488_v5  ;;  %v3432_v5 = vld [vmem:[%s9478_s10 + $0x1b8] sm:$0xff] }
0x170f   :  { %v6775_v29 = vpack.c.bf16 %v7193_v27, %v7188_v61  ;;  %v6763_v30 = vpack.c.bf16 %v7192_v28, %v7187_v62 }
0x1710   :  { %v2250_v9 = vpop.permute.xlu0 %2249 }
0x1711   :  { %6764 = vmatpush3.bf16.msra.mxu0 %v6763_v30  ;;  %6776 = vmatpush3.bf16.msra.mxu1 %v6775_v29 }
0x1712   :  { %6347 = vmatprep.subr.mxu0 %v9486_v31  ;;  %6368 = vmatprep.subr.mxu1 %v9486_v31  ;;  %v3429_v31 = vld [vmem:[%s9478_s10 + $0x1a0] sm:$0xff] }
0x1715   :  { %6348 = vmatpush3.msra.mxu0 %v2248_v8  ;;  %6369 = vmatpush3.msra.mxu1 %v2250_v9  ;;  %v3393_v9 = vld [vmem:[%s9478_s10 + $0x80] sm:$0xff] }
0x1716   :  { %6350 = vmatmul.mubr.msk.f32.vlgmr.msra.gmra.mrb[14].mxu0 %vm557_vm7, %v2172_v34  ;;  %6371 = vmatmul.mubr.msk.f32.vlgmr.msra.gmra.mrb[14].mxu1 %vm557_vm7, %v2172_v34  ;;  %v5403_v34 = vld [vmem:[%s9475_s7 + $0x30] sm:$0xff] }
0x1717   :  { %6373 = vmatprep.subr.bf16.mxu0 %v2525_v41  ;;  %6445 = vmatprep.subr.bf16.mxu1 %v3084_v42 }
0x1718   :  { %6374 = vmatpush3.bf16.msra.mxu0 %v2525_v41  ;;  %6446 = vmatpush3.bf16.msra.mxu1 %v3084_v42  ;;  %v3380_v41 = vld [vmem:[%s9478_s10 + $0x18] sm:$0xff]  ;;  %v7194_v42 = vld [vmem:[%s9477_s9] sm:$0xff]  }
0x1719   :  { %6375 = vmatprep.subr.bf16.mxu0 %v2526_v45  ;;  %6447 = vmatprep.subr.bf16.mxu1 %v3085_v18 }
0x171a   :  { %6381 = vmatprep.mubr.msk.bf16.mxu0 %vm2689_vm2, %v7194_v42  ;;  %6453 = vmatprep.mubr.msk.bf16.mxu1 %vm2689_vm2, %v7194_v42  ;;  %v7222_v42 = vld [vmem:[%s9477_s9 + $0xe0] sm:$0xff]  }
0x171c   :  { %6376 = vmatpush3.bf16.msra.mxu0 %v2526_v45  ;;  %6448 = vmatpush3.bf16.msra.mxu1 %v3085_v18  ;;  %v3400_v45 = vld [vmem:[%s9478_s10 + $0xb8] sm:$0xff] }
0x171d   :  { %6377 = vmatprep.subr.bf16.mxu0 %v2527_v25  ;;  %6449 = vmatprep.subr.bf16.mxu1 %v3086_v26  ;;  %v2399_v53 = vpop.permute.xlu1 %2398  ;;  %v3384_v18 = vld [vmem:[%s9478_s10 + $0x38] sm:$0xff] }
0x1720   :  { %6378 = vmatpush3.bf16.msra.mxu0 %v2527_v25  ;;  %6450 = vmatpush3.bf16.msra.mxu1 %v3086_v26  ;;  %v3406_v25 = vld [vmem:[%s9478_s10 + $0xe8] sm:$0xff] }
0x1721   :  { %v3390_v26 = vld [vmem:[%s9478_s10 + $0x68] sm:$0xff] }
0x17e9   :  { %v2322_v54 = vpop.f32.mrb[14].mxu0  ;;  %v2392_v55 = vpop.f32.mrb[14].mxu1 }
0x17ea   :  { %v8119_v56 = vadd.f32 %v2399_v53, %v2322_v54  ;;  %v8121_v57 = vadd.f32 %v2399_v53, %v2392_v55  ;;  %v6351_v58 = vpop.f32.mrb[15].mxu0  ;;  %v6372_v59 = vpop.f32.mrb[15].mxu1  ;;  %v3408_v53 = vld [vmem:[%s9478_s10 + $0xf8] sm:$0xff] }
0x17eb   :  { %v3392_v54 = vld [vmem:[%s9478_s10 + $0x78] sm:$0xff] }
0x17ec   :  { %v2406_v60 = vsel %vm429_vm3, %v8121_v57, 0.0  ;;  %v2403_v36 = vsel %vm429_vm3, %v8119_v56, 0.0  ;;  %v2410_v37 = vmul.f32 %v8119_v56, %v8119_v56  ;;  %v2411_v0 = vmul.f32 %v8121_v57, %v8121_v57 }
0x17ed   :  { %2407 = vadd.xlane.f32.xlu1 %v2406_v60  ;;  %2404 = vadd.xlane.f32.xlu0 %v2403_v36 }
0x17ee   :  { %v2412_v63 = vsel %vm429_vm3, %v2410_v37, 0.0  ;;  %v2415_v1 = vsel %vm429_vm3, %v2411_v0, 0.0 }
0x17f1   :  { %2413 = vadd.xlane.f32.xlu0 %v2412_v63 }
0x17f5   :  { %2416 = vadd.xlane.f32.xlu0 %v2415_v1 }
0x180b   :  { %2438 = vperm.xlu0 %6947, %v5404_v2  }
0x180f   :  { %3443 = vperm.xlu0 %6947, %v3377_v3  }
0x1813   :  { %3533 = vperm.xlu0 %6947, %v3395_v4  }
0x1817   :  { %3453 = vperm.xlu0 %6947, %v3379_v6  }
0x181b   :  { %3543 = vperm.xlu0 %6947, %v3397_v7  }
0x181f   :  { %3463 = vperm.xlu0 %6947, %v3381_v46   ;;  %v3082_v46 = vld [vmem:[#allocation2 + $0x70] sm:$0xff] }
0x1823   :  { %3553 = vperm.xlu0 %6947, %v3399_v47  }
0x1827   :  { %3473 = vperm.xlu0 %6947, %v3383_v10  }
0x182b   :  { %3563 = vperm.xlu0 %6947, %v3401_v11  }
0x182f   :  { %3483 = vperm.xlu0 %6947, %v3385_v12   ;;  %v7195_v12 = vld [vmem:[%s9477_s9 + $0x8] sm:$0xff]  }
0x1833   :  { %3573 = vperm.xlu0 %6947, %v3403_v13   ;;  %v7198_v13 = vld [vmem:[%s9477_s9 + $0x20] sm:$0xff]  }
0x1837   :  { %3493 = vperm.xlu0 %6947, %v3387_v14   ;;  %v7199_v14 = vld [vmem:[%s9477_s9 + $0x28] sm:$0xff]  }
0x183b   :  { %3583 = vperm.xlu0 %6947, %v3405_v15   ;;  %v7200_v15 = vld [vmem:[%s9477_s9 + $0x30] sm:$0xff]  }
0x183f   :  { %3503 = vperm.xlu0 %6947, %v3389_v16   ;;  %v7201_v16 = vld [vmem:[%s9477_s9 + $0x38] sm:$0xff]  }
0x1843   :  { %3593 = vperm.xlu0 %6947, %v3407_v17   ;;  %v7202_v17 = vld [vmem:[%s9477_s9 + $0x40] sm:$0xff]  }
0x1847   :  { %3513 = vperm.xlu0 %6947, %v3391_v20   ;;  %v7203_v20 = vld [vmem:[%s9477_s9 + $0x48] sm:$0xff]  }
0x187a   :  { %v2408_v21 = vpop.xlane.xlu1 %2407  ;;  %v2405_v22 = vpop.xlane.xlu0 %2404 }
0x187b   :  { %v2409_v23 = vadd.f32 %v2408_v21, %v2405_v22  ;;  %v7204_v21 = vld [vmem:[%s9477_s9 + $0x50] sm:$0xff]   ;;  %v7205_v22 = vld [vmem:[%s9477_s9 + $0x58] sm:$0xff]  }
0x187d   :  { %v2419_v61 = vmul.f32 0.0125, %v2409_v23  ;;  %v7206_v23 = vld [vmem:[%s9477_s9 + $0x60] sm:$0xff]  }
0x187e   :  { %v2414_v24 = vpop.xlane.xlu0 %2413 }
0x187f   :  { %v2421_v28 = vmul.f32 %v2419_v61, %v2419_v61  ;;  %v2424_v55 = vsub.f32 %v8119_v56, %v2419_v61  ;;  %v2425_v58 = vsub.f32 %v8121_v57, %v2419_v61  ;;  %v2523_v56 = vld [vmem:[#allocation2 + $0x30] sm:$0xff] }
0x1880   :  { %v7208_v61 = vld [vmem:[%s9477_s9 + $0x70] sm:$0xff]  }
0x1882   :  { %v2417_v62 = vpop.xlane.xlu0 %2416 }
0x1883   :  { %v2418_v27 = vadd.f32 %v2417_v62, %v2414_v24  ;;  %v7207_v24 = vld [vmem:[%s9477_s9 + $0x68] sm:$0xff]   ;;  %v7209_v62 = vld [vmem:[%s9477_s9 + $0x78] sm:$0xff]  }
0x1885   :  { %v2420_v29 = vmul.f32 0.0125, %v2418_v27  ;;  %v7210_v27 = vld [vmem:[%s9477_s9 + $0x80] sm:$0xff]  }
0x1887   :  { %v2422_v30 = vsub.f32 %v2420_v29, %v2421_v28  ;;  %v7211_v28 = vld [vmem:[%s9477_s9 + $0x88] sm:$0xff]   ;;  %v7212_v29 = vld [vmem:[%s9477_s9 + $0x90] sm:$0xff]  }
0x1889   :  { %v2423_v32 = vmax.f32 %v2422_v30, 0.0  ;;  %v7213_v30 = vld [vmem:[%s9477_s9 + $0x98] sm:$0xff]  }
0x188a   :  { %v2439_v37 = vpop.permute.xlu0 %2438 }
0x188b   :  { %v2426_v33 = vadd.f32 1e-05, %v2423_v32  ;;  %v7214_v32 = vld [vmem:[%s9477_s9 + $0xa0] sm:$0xff]  }
0x188d   :  { %7300 = vrsqrt.f32 %v2426_v33  ;;  %v7215_v33 = vld [vmem:[%s9477_s9 + $0xa8] sm:$0xff]  }
0x1897   :  { %v7301_v35 = vpop.eup %7300 }
0x1898   :  { %v2428_v8 = vmul.f32 %v7301_v35, %v5403_v34  ;;  %v7216_v34 = vld [vmem:[%s9477_s9 + $0xb0] sm:$0xff]   ;;  %v7217_v35 = vld [vmem:[%s9477_s9 + $0xb8] sm:$0xff]  }
0x189a   :  { %2431 = vperm.xlu1 %6948, %v2428_v8   ;;  %v7218_v8 = vld [vmem:[%s9477_s9 + $0xc0] sm:$0xff]  }
0x189e   :  { %3523 = vperm.xlu1 %6948, %v3393_v9   ;;  %v7219_v9 = vld [vmem:[%s9477_s9 + $0xc8] sm:$0xff]  }
0x18a2   :  { %3528 = vperm.xlu1 %6948, %v3394_v38   ;;  %v7220_v38 = vld [vmem:[%s9477_s9 + $0xd0] sm:$0xff]  }
0x18a6   :  { %3448 = vperm.xlu1 %6948, %v3378_v39   ;;  %v7221_v39 = vld [vmem:[%s9477_s9 + $0xd8] sm:$0xff]  }
0x18aa   :  { %3538 = vperm.xlu1 %6948, %v3396_v40  }
0x18ae   :  { %3458 = vperm.xlu1 %6948, %v3380_v41  }
0x18b2   :  { %3548 = vperm.xlu1 %6948, %v3398_v43   ;;  %v7223_v43 = vld [vmem:[%s9477_s9 + $0xe8] sm:$0xff]  }
0x18b6   :  { %3468 = vperm.xlu1 %6948, %v3382_v44   ;;  %v3444_v44 = vpop.permute.xlu0 %3443 }
0x18ba   :  { %3558 = vperm.xlu1 %6948, %v3400_v45  }
0x18be   :  { %3478 = vperm.xlu1 %6948, %v3384_v18   ;;  %v8395_v18 = vpop.permute.xlu0 %3533 }
0x18c2   :  { %3568 = vperm.xlu1 %6948, %v3402_v19  }
0x18c6   :  { %3488 = vperm.xlu1 %6948, %v3386_v48   ;;  %v3454_v48 = vpop.permute.xlu0 %3453 }
0x18ca   :  { %3578 = vperm.xlu1 %6948, %v3404_v49  }
0x18ce   :  { %3498 = vperm.xlu1 %6948, %v3388_v50   ;;  %v7224_v50 = vld [vmem:[%s9477_s9 + $0xf0] sm:$0xff]  }
0x18d2   :  { %3588 = vperm.xlu1 %6948, %v3406_v25   ;;  %v7225_v25 = vld [vmem:[%s9477_s9 + $0xf8] sm:$0xff]  }
0x18d6   :  { %3508 = vperm.xlu1 %6948, %v3390_v26   ;;  %v8409_v26 = vpop.permute.xlu0 %3543 }
0x18da   :  { %3598 = vperm.xlu1 %6948, %v3408_v53  }
0x18de   :  { %3518 = vperm.xlu1 %6948, %v3392_v54   ;;  %v8413_v54 = vpop.permute.xlu0 %3463 }
0x1919   :  { %v2432_v59 = vpop.permute.xlu1 %2431 }
0x191a   :  { %v2434_v60 = vmul.f32 %v2432_v59, %v2424_v55  ;;  %v2435_v36 = vmul.f32 %v2432_v59, %v2425_v58  ;;  %v8417_v58 = vpop.permute.xlu0 %3553 }
0x191c   :  { %v2441_v63 = vadd.f32 %v2439_v37, %v2434_v60  ;;  %v2442_v0 = vadd.f32 %v2439_v37, %v2435_v36 }
0x191d   :  { %v8381_v40 = vpop.permute.xlu1 %3523 }
0x191e   :  { %vm2443_vm7 = vcmp.ge.f32.partialorder %v2441_v63, 0.0  ;;  %vm2444_vm11 = vcmp.ge.f32.partialorder %v2442_v0, 0.0  ;;  %v2445_v1 = vmul.f32 0.01, %v2441_v63  ;;  %v2446_v2 = vmul.f32 0.01, %v2442_v0  ;;  %v3474_v60 = vpop.permute.xlu0 %3473 }
0x1920   :  { %v2447_v3 = vsel %vm2443_vm7, %v2441_v63, %v2445_v1  ;;  %v2448_v4 = vsel %vm2444_vm11, %v2442_v0, %v2446_v2 }
0x1921   :  { %v2449_v6 = vadd.f32 %v2447_v3, %v8075_v51  ;;  %v2450_v7 = vadd.f32 %v2448_v4, %v8078_v52  ;;  %v7196_v51 = vld [vmem:[%s9477_s9 + $0x10] sm:$0xff]   ;;  %v7197_v52 = vld [vmem:[%s9477_s9 + $0x18] sm:$0xff]   ;;  %v8383_v41 = vpop.permute.xlu1 %3528 }
0x1923   :  { %2451 = vst.msk [vmem:[#allocation2 + $0x38] sm:$0xff] %vm429_vm3, %v2449_v6  ;;  %2452 = vst.msk [vmem:[#allocation2 + $0x78] sm:$0xff] %vm429_vm3, %v2450_v7 }
0x1925   :  { %v3449_v45 = vpop.permute.xlu1 %3448 }
0x1929   :  { %v8397_v19 = vpop.permute.xlu1 %3538 }
0x192a   :  { %v2524_v57 = vld [vmem:[#allocation2 + $0x38] sm:$0xff] }
0x192b   :  { %v3083_v47 = vld [vmem:[#allocation2 + $0x78] sm:$0xff]  ;;  %v2528_v10 = vpack.c.bf16 %v2524_v57, %v2523_v56 }
0x192c   :  { %v3087_v11 = vpack.c.bf16 %v3083_v47, %v3082_v46 }
0x192d   :  { %6379 = vmatprep.subr.bf16.mxu0 %v2528_v10  ;;  %v3459_v49 = vpop.permute.xlu1 %3458 }
0x192e   :  { %6451 = vmatprep.subr.bf16.mxu1 %v3087_v11  ;;  %6380 = vmatpush3.bf16.msra.mxu0 %v2528_v10 }
0x192f   :  { %6452 = vmatpush3.bf16.msra.mxu1 %v3087_v11  ;;  %v8423_v11 = vpop.permute.xlu0 %3563 }
0x1931   :  { %6382 = vmatmul.mubr.msk.bf16.vlgmr.msra.gmra.mrb[16].mxu0 %vm2689_vm2, %v7195_v12  ;;  %v8411_v53 = vpop.permute.xlu1 %3548 }
0x1932   :  { %6454 = vmatmul.mubr.msk.bf16.vlgmr.msra.gmra.mrb[16].mxu1 %vm2689_vm2, %v7195_v12  ;;  %6385 = vmatprep.mubr.msk.bf16.mxu0 %vm2689_vm2, %v7196_v51 }
0x1933   :  { %6457 = vmatprep.mubr.msk.bf16.mxu1 %vm2689_vm2, %v7196_v51 }
0x1935   :  { %v8415_v55 = vpop.permute.xlu1 %3468 }
0x1939   :  { %6386 = vmatmul.mubr.msk.bf16.gmra.mrb[20].mxu0 %vm2689_vm2, %v7197_v52  ;;  %v8419_v59 = vpop.permute.xlu1 %3558 }
0x193a   :  { %6458 = vmatmul.mubr.msk.bf16.gmra.mrb[20].mxu1 %vm2689_vm2, %v7197_v52  ;;  %6389 = vmatprep.mubr.msk.bf16.mxu0 %vm2689_vm2, %v7198_v13 }
0x193b   :  { %6461 = vmatprep.mubr.msk.bf16.mxu1 %vm2689_vm2, %v7198_v13 }
0x193d   :  { %v3479_v36 = vpop.permute.xlu1 %3478 }
0x1941   :  { %6390 = vmatmul.mubr.msk.bf16.gmra.mrb[24].mxu0 %vm2689_vm2, %v7199_v14  ;;  %v8425_v12 = vpop.permute.xlu1 %3568 }
0x1942   :  { %6462 = vmatmul.mubr.msk.bf16.gmra.mrb[24].mxu1 %vm2689_vm2, %v7199_v14  ;;  %6393 = vmatprep.mubr.msk.bf16.mxu0 %vm2689_vm2, %v7200_v15 }
0x1943   :  { %6465 = vmatprep.mubr.msk.bf16.mxu1 %vm2689_vm2, %v7200_v15 }
0x1949   :  { %6394 = vmatmul.mubr.msk.bf16.gmra.mrb[28].mxu0 %vm2689_vm2, %v7201_v16 }
0x194a   :  { %6466 = vmatmul.mubr.msk.bf16.gmra.mrb[28].mxu1 %vm2689_vm2, %v7201_v16  ;;  %6397 = vmatprep.mubr.msk.bf16.mxu0 %vm2689_vm2, %v7202_v17 }
0x194b   :  { %6469 = vmatprep.mubr.msk.bf16.mxu1 %vm2689_vm2, %v7202_v17 }
0x1951   :  { %6398 = vmatmul.mubr.msk.bf16.gmra.mrb[32].mxu0 %vm2689_vm2, %v7203_v20 }
0x1952   :  { %6470 = vmatmul.mubr.msk.bf16.gmra.mrb[32].mxu1 %vm2689_vm2, %v7203_v20  ;;  %6401 = vmatprep.mubr.msk.bf16.mxu0 %vm2689_vm2, %v7204_v21 }
0x1953   :  { %6473 = vmatprep.mubr.msk.bf16.mxu1 %vm2689_vm2, %v7204_v21 }
0x1959   :  { %6402 = vmatmul.mubr.msk.bf16.gmra.mrb[36].mxu0 %vm2689_vm2, %v7205_v22 }
0x195a   :  { %6474 = vmatmul.mubr.msk.bf16.gmra.mrb[36].mxu1 %vm2689_vm2, %v7205_v22  ;;  %6405 = vmatprep.mubr.msk.bf16.mxu0 %vm2689_vm2, %v7206_v23 }
0x195b   :  { %6477 = vmatprep.mubr.msk.bf16.mxu1 %vm2689_vm2, %v7206_v23 }
0x1961   :  { %6406 = vmatmul.mubr.msk.bf16.gmra.mrb[40].mxu0 %vm2689_vm2, %v7207_v24 }
0x1962   :  { %6478 = vmatmul.mubr.msk.bf16.gmra.mrb[40].mxu1 %vm2689_vm2, %v7207_v24  ;;  %6409 = vmatprep.mubr.msk.bf16.mxu0 %vm2689_vm2, %v7208_v61 }
0x1963   :  { %6481 = vmatprep.mubr.msk.bf16.mxu1 %vm2689_vm2, %v7208_v61 }
0x1969   :  { %6410 = vmatmul.mubr.msk.bf16.gmra.mrb[44].mxu0 %vm2689_vm2, %v7209_v62 }
0x196a   :  { %6482 = vmatmul.mubr.msk.bf16.gmra.mrb[44].mxu1 %vm2689_vm2, %v7209_v62  ;;  %6413 = vmatprep.mubr.msk.bf16.mxu0 %vm2689_vm2, %v7210_v27 }
0x196b   :  { %6485 = vmatprep.mubr.msk.bf16.mxu1 %vm2689_vm2, %v7210_v27 }
0x1971   :  { %6414 = vmatmul.mubr.msk.bf16.gmra.mrb[48].mxu0 %vm2689_vm2, %v7211_v28 }
0x1972   :  { %6486 = vmatmul.mubr.msk.bf16.gmra.mrb[48].mxu1 %vm2689_vm2, %v7211_v28  ;;  %6417 = vmatprep.mubr.msk.bf16.mxu0 %vm2689_vm2, %v7212_v29 }
0x1973   :  { %6489 = vmatprep.mubr.msk.bf16.mxu1 %vm2689_vm2, %v7212_v29  ;;  %v8431_v29 = vpop.permute.xlu0 %3483 }
0x1979   :  { %6418 = vmatmul.mubr.msk.bf16.gmra.mrb[52].mxu0 %vm2689_vm2, %v7213_v30 }
0x197a   :  { %6490 = vmatmul.mubr.msk.bf16.gmra.mrb[52].mxu1 %vm2689_vm2, %v7213_v30  ;;  %6421 = vmatprep.mubr.msk.bf16.mxu0 %vm2689_vm2, %v7214_v32  ;;  %v8433_v30 = vpop.permute.xlu1 %3488 }
0x197b   :  { %6493 = vmatprep.mubr.msk.bf16.mxu1 %vm2689_vm2, %v7214_v32 }
0x1981   :  { %6422 = vmatmul.mubr.msk.bf16.gmra.mrb[56].mxu0 %vm2689_vm2, %v7215_v33 }
0x1982   :  { %6494 = vmatmul.mubr.msk.bf16.gmra.mrb[56].mxu1 %vm2689_vm2, %v7215_v33  ;;  %6425 = vmatprep.mubr.msk.bf16.mxu0 %vm2689_vm2, %v7216_v34 }
0x1983   :  { %6497 = vmatprep.mubr.msk.bf16.mxu1 %vm2689_vm2, %v7216_v34 }
0x1989   :  { %6426 = vmatmul.mubr.msk.bf16.gmra.mrb[60].mxu0 %vm2689_vm2, %v7217_v35 }
0x198a   :  { %6498 = vmatmul.mubr.msk.bf16.gmra.mrb[60].mxu1 %vm2689_vm2, %v7217_v35  ;;  %6429 = vmatprep.mubr.msk.bf16.mxu0 %vm2689_vm2, %v7218_v8 }
0x198b   :  { %6501 = vmatprep.mubr.msk.bf16.mxu1 %vm2689_vm2, %v7218_v8 }
0x1991   :  { %6430 = vmatmul.mubr.msk.bf16.gmra.mrb[64].mxu0 %vm2689_vm2, %v7219_v9 }
0x1992   :  { %6502 = vmatmul.mubr.msk.bf16.gmra.mrb[64].mxu1 %vm2689_vm2, %v7219_v9  ;;  %6433 = vmatprep.mubr.msk.bf16.mxu0 %vm2689_vm2, %v7220_v38 }
0x1993   :  { %6505 = vmatprep.mubr.msk.bf16.mxu1 %vm2689_vm2, %v7220_v38 }
0x1999   :  { %6434 = vmatmul.mubr.msk.bf16.gmra.mrb[68].mxu0 %vm2689_vm2, %v7221_v39 }
0x199a   :  { %6506 = vmatmul.mubr.msk.bf16.gmra.mrb[68].mxu1 %vm2689_vm2, %v7221_v39  ;;  %6437 = vmatprep.mubr.msk.bf16.mxu0 %vm2689_vm2, %v7222_v42 }
0x199b   :  { %6509 = vmatprep.mubr.msk.bf16.mxu1 %vm2689_vm2, %v7222_v42 }
0x19a1   :  { %6438 = vmatmul.mubr.msk.bf16.gmra.mrb[72].mxu0 %vm2689_vm2, %v7223_v43 }
0x19a2   :  { %6510 = vmatmul.mubr.msk.bf16.gmra.mrb[72].mxu1 %vm2689_vm2, %v7223_v43  ;;  %6441 = vmatprep.mubr.msk.bf16.mxu0 %vm2689_vm2, %v7224_v50 }
0x19a3   :  { %6513 = vmatprep.mubr.msk.bf16.mxu1 %vm2689_vm2, %v7224_v50 }
0x19a9   :  { %6442 = vmatmul.mubr.msk.bf16.gmra.mrb[76].mxu0 %vm2689_vm2, %v7225_v25 }
0x19aa   :  { %6514 = vmatmul.mubr.msk.bf16.gmra.mrb[76].mxu1 %vm2689_vm2, %v7225_v25 }
0x1a04   :  { %v6383_v37 = vpop.f32.mrb[16].mxu0 }
0x1a05   :  { %v6455_v63 = vpop.f32.mrb[16].mxu1  ;;  %v3763_v0 = vadd.f32 %v6383_v37, %v3454_v48  ;;  %v2820_v1 = vpop.f32.mrb[17].mxu0 }
0x1a06   :  { %v3122_v2 = vpop.f32.mrb[17].mxu1  ;;  %v6384_v3 = vpop.f32.mrb[18].mxu0  ;;  %v3827_v6 = vadd.f32 %v6455_v63, %v3454_v48  ;;  %v3761_v51 = vadd.f32 %v3444_v44, %v2820_v1 }
0x1a07   :  { %v6456_v4 = vpop.f32.mrb[18].mxu1  ;;  %v3764_v7 = vadd.f32 %v6384_v3, %v3459_v49  ;;  %v2823_v56 = vpop.f32.mrb[19].mxu0  ;;  %v3895_v46 = vsel %vm429_vm3, %v3763_v0, -inf  ;;  %v3825_v23 = vadd.f32 %v3444_v44, %v3122_v2 }
0x1a08   :  { %v3125_v57 = vpop.f32.mrb[19].mxu1  ;;  %3896 = vmax.xlane.f32.xlu1 %v3895_v46  ;;  %v3828_v47 = vadd.f32 %v6456_v4, %v3459_v49  ;;  %v3991_v52 = vsel %vm429_vm3, %v3827_v6, -inf  ;;  %v3762_v15 = vadd.f32 %v3449_v45, %v2823_v56  ;;  %v3889_v62 = vsel %vm429_vm3, %v3761_v51, -inf  ;;  %v8443_v37 = vpop.permute.xlu0 %3573 }
0x1a09   :  { %v3898_v10 = vsel %vm429_vm3, %v3764_v7, -inf  ;;  %v3826_v27 = vadd.f32 %v3449_v45, %v3125_v57  ;;  %v3985_v33 = vsel %vm429_vm3, %v3825_v23, -inf  ;;  %v8445_v63 = vpop.permute.xlu1 %3578 }
0x1a0a   :  { %3899 = vmax.xlane.f32.xlu0 %v3898_v10  ;;  %v3994_v20 = vsel %vm429_vm3, %v3828_v47, -inf  ;;  %v3892_v28 = vsel %vm429_vm3, %v3762_v15, -inf }
0x1a0b   :  { %v3988_v39 = vsel %vm429_vm3, %v3826_v27, -inf }
0x1a0c   :  { %3992 = vmax.xlane.f32.xlu1 %v3991_v52  ;;  %v6387_v14 = vpop.f32.mrb[20].mxu0 }
0x1a0d   :  { %v6459_v13 = vpop.f32.mrb[20].mxu1  ;;  %v2836_v16 = vpop.f32.mrb[21].mxu0  ;;  %v3767_v32 = vadd.f32 %v6387_v14, %v3474_v60 }
0x1a0e   :  { %v3138_v17 = vpop.f32.mrb[21].mxu1  ;;  %3995 = vmax.xlane.f32.xlu0 %v3994_v20  ;;  %v6388_v22 = vpop.f32.mrb[22].mxu0  ;;  %v3831_v44 = vadd.f32 %v6459_v13, %v3474_v60  ;;  %v3765_v0 = vadd.f32 %v8413_v54, %v2836_v16 }
0x1a0f   :  { %v6460_v21 = vpop.f32.mrb[22].mxu1  ;;  %v2839_v24 = vpop.f32.mrb[23].mxu0  ;;  %v3768_v8 = vadd.f32 %v6388_v22, %v3479_v36  ;;  %v3907_v49 = vsel %vm429_vm3, %v3767_v32, -inf  ;;  %v3829_v57 = vadd.f32 %v8413_v54, %v3138_v17 }
0x1a10   :  { %v3141_v61 = vpop.f32.mrb[23].mxu1  ;;  %3890 = vmax.xlane.f32.xlu1 %v3889_v62  ;;  %v3832_v50 = vadd.f32 %v6460_v21, %v3479_v36  ;;  %v4003_v1 = vsel %vm429_vm3, %v3831_v44, -inf  ;;  %v3766_v3 = vadd.f32 %v8415_v55, %v2839_v24  ;;  %v3901_v10 = vsel %vm429_vm3, %v3765_v0, -inf  ;;  %v3494_v13 = vpop.permute.xlu0 %3493 }
0x1a11   :  { %v3910_v25 = vsel %vm429_vm3, %v3768_v8, -inf  ;;  %v3830_v51 = vadd.f32 %v8415_v55, %v3141_v61  ;;  %v3499_v14 = vpop.permute.xlu1 %3498  ;;  %v3997_v16 = vsel %vm429_vm3, %v3829_v57, -inf }
0x1a12   :  { %3893 = vmax.xlane.f32.xlu0 %v3892_v28  ;;  %v4006_v6 = vsel %vm429_vm3, %v3832_v50, -inf  ;;  %v3904_v52 = vsel %vm429_vm3, %v3766_v3, -inf }
0x1a13   :  { %v4000_v23 = vsel %vm429_vm3, %v3830_v51, -inf }
0x1a14   :  { %3986 = vmax.xlane.f32.xlu1 %v3985_v33  ;;  %v6391_v35 = vpop.f32.mrb[24].mxu0 }
0x1a15   :  { %v6463_v34 = vpop.f32.mrb[24].mxu1  ;;  %v2852_v9 = vpop.f32.mrb[25].mxu0  ;;  %v3771_v15 = vadd.f32 %v6391_v35, %v3494_v13 }
0x1a16   :  { %v8436_v38 = vpop.f32.mrb[25].mxu1  ;;  %3989 = vmax.xlane.f32.xlu0 %v3988_v39  ;;  %v6392_v43 = vpop.f32.mrb[26].mxu0  ;;  %v3835_v61 = vadd.f32 %v6463_v34, %v3494_v13  ;;  %v3769_v39 = vadd.f32 %v8431_v29, %v2852_v9 }
0x1a17   :  { %v6464_v42 = vpop.f32.mrb[26].mxu1  ;;  %v2855_v45 = vpop.f32.mrb[27].mxu0  ;;  %v3772_v17 = vadd.f32 %v6392_v43, %v3499_v14  ;;  %v3919_v28 = vsel %vm429_vm3, %v3771_v15, -inf  ;;  %v3833_v9 = vadd.f32 %v8431_v29, %v8436_v38 }
0x1a18   :  { %v8439_v48 = vpop.f32.mrb[27].mxu1  ;;  %3908 = vmax.xlane.f32.xlu1 %v3907_v49  ;;  %v3836_v32 = vadd.f32 %v6464_v42, %v3499_v14  ;;  %v8485_v35 = vpop.permute.xlu0 %3583  ;;  %v4015_v43 = vsel %vm429_vm3, %v3835_v61, -inf  ;;  %v3770_v49 = vadd.f32 %v8433_v30, %v2855_v45  ;;  %v3913_v45 = vsel %vm429_vm3, %v3769_v39, -inf }
0x1a19   :  { %v3922_v33 = vsel %vm429_vm3, %v3772_v17, -inf  ;;  %v8487_v8 = vpop.permute.xlu1 %3588  ;;  %v3834_v57 = vadd.f32 %v8433_v30, %v8439_v48  ;;  %v4009_v14 = vsel %vm429_vm3, %v3833_v9, -inf }
0x1a1a   :  { %3911 = vmax.xlane.f32.xlu0 %v3910_v25  ;;  %v4018_v25 = vsel %vm429_vm3, %v3836_v32, -inf }
0x1a1b   :  { %v4012_v30 = vsel %vm429_vm3, %v3834_v57, -inf }
0x1a1c   :  { %4004 = vmax.xlane.f32.xlu1 %v4003_v1  ;;  %v8451_v60 = vpop.f32.mrb[28].mxu0  ;;  %v3504_v51 = vpop.permute.xlu0 %3503 }
0x1a1d   :  { %v8449_v2 = vpop.f32.mrb[28].mxu1  ;;  %v2868_v4 = vpop.f32.mrb[29].mxu0 }
0x1a1e   :  { %v8454_v36 = vpop.f32.mrb[29].mxu1  ;;  %4007 = vmax.xlane.f32.xlu0 %v4006_v6  ;;  %v8459_v56 = vpop.f32.mrb[30].mxu0  ;;  %v3773_v13 = vadd.f32 %v3504_v51, %v2868_v4 }
0x1a1f   :  { %v8457_v7 = vpop.f32.mrb[30].mxu1  ;;  %v2871_v46 = vpop.f32.mrb[31].mxu0  ;;  %v3837_v4 = vadd.f32 %v3504_v51, %v8454_v36 }
0x1a20   :  { %v8462_v47 = vpop.f32.mrb[31].mxu1  ;;  %3902 = vmax.xlane.f32.xlu1 %v3901_v10  ;;  %v3916_v10 = vsel %vm429_vm3, %v3770_v49, -inf  ;;  %v3925_v32 = vsel %vm429_vm3, %v3773_v13, -inf }
0x1a22   :  { %3905 = vmax.xlane.f32.xlu0 %v3904_v52  ;;  %v3509_v52 = vpop.permute.xlu1 %3508 }
0x1a23   :  { %v3774_v38 = vadd.f32 %v3509_v52, %v2871_v46  ;;  %v3838_v46 = vadd.f32 %v3509_v52, %v8462_v47 }
0x1a24   :  { %3998 = vmax.xlane.f32.xlu1 %v3997_v16  ;;  %v6399_v54 = vpop.f32.mrb[32].mxu0 }
0x1a25   :  { %v8468_v20 = vpop.f32.mrb[32].mxu1  ;;  %v8470_v21 = vpop.f32.mrb[33].mxu0  ;;  %v3779_v39 = vadd.f32 %v6399_v54, %v8395_v18  ;;  %v4024_v47 = vsel %vm429_vm3, %v3838_v46, -inf }
0x1a26   :  { %v8472_v22 = vpop.f32.mrb[33].mxu1  ;;  %4001 = vmax.xlane.f32.xlu0 %v4000_v23  ;;  %v8477_v24 = vpop.f32.mrb[34].mxu0 }
0x1a27   :  { %v8475_v55 = vpop.f32.mrb[34].mxu1  ;;  %v8479_v62 = vpop.f32.mrb[35].mxu0  ;;  %v3841_v13 = vadd.f32 %v8381_v40, %v8472_v22 }
0x1a28   :  { %v8481_v27 = vpop.f32.mrb[35].mxu1  ;;  %3920 = vmax.xlane.f32.xlu1 %v3919_v28  ;;  %v3844_v22 = vadd.f32 %v8475_v55, %v8397_v19 }
0x1a29   :  { %v3842_v46 = vadd.f32 %v8383_v41, %v8481_v27 }
0x1a2a   :  { %3923 = vmax.xlane.f32.xlu0 %v3922_v33  ;;  %v3928_v33 = vsel %vm429_vm3, %v3774_v38, -inf  ;;  %v3778_v38 = vadd.f32 %v8383_v41, %v8479_v62 }
0x1a2c   :  { %4016 = vmax.xlane.f32.xlu1 %v4015_v43  ;;  %v8493_v44 = vpop.f32.mrb[36].mxu0  ;;  %v4021_v43 = vsel %vm429_vm3, %v3837_v4, -inf }
0x1a2d   :  { %v8491_v34 = vpop.f32.mrb[36].mxu1  ;;  %v8496_v50 = vpop.f32.mrb[37].mxu0  ;;  %v3783_v4 = vadd.f32 %v8493_v44, %v8417_v58  ;;  %v4042_v44 = vsel %vm429_vm3, %v3844_v22, -inf }
0x1a2e   :  { %v8498_v42 = vpop.f32.mrb[37].mxu1  ;;  %4019 = vmax.xlane.f32.xlu0 %v4018_v25  ;;  %v8503_v1 = vpop.f32.mrb[38].mxu0  ;;  %v3777_v25 = vadd.f32 %v8381_v40, %v8470_v21  ;;  %v3943_v21 = vsel %vm429_vm3, %v3779_v39, -inf  ;;  %v3940_v40 = vsel %vm429_vm3, %v3778_v38, -inf }
0x1a2f   :  { %v8501_v0 = vpop.f32.mrb[38].mxu1  ;;  %v8507_v3 = vpop.f32.mrb[39].mxu0  ;;  %v3784_v55 = vadd.f32 %v8503_v1, %v8419_v59 }
0x1a30   :  { %v8509_v6 = vpop.f32.mrb[39].mxu1  ;;  %3914 = vmax.xlane.f32.xlu1 %v3913_v45  ;;  %v3848_v27 = vadd.f32 %v8501_v0, %v8419_v59 }
0x1a31   :  { %v3846_v0 = vadd.f32 %v8411_v53, %v8509_v6 }
0x1a32   :  { %3917 = vmax.xlane.f32.xlu0 %v3916_v10  ;;  %v3843_v10 = vadd.f32 %v8468_v20, %v8395_v18  ;;  %v3780_v18 = vadd.f32 %v8477_v24, %v8397_v19  ;;  %v4033_v20 = vsel %vm429_vm3, %v3841_v13, -inf  ;;  %v3955_v24 = vsel %vm429_vm3, %v3783_v4, -inf }
0x1a34   :  { %4010 = vmax.xlane.f32.xlu1 %v4009_v14  ;;  %v8518_v29 = vpop.f32.mrb[40].mxu0  ;;  %v3937_v14 = vsel %vm429_vm3, %v3777_v25, -inf  ;;  %v3946_v62 = vsel %vm429_vm3, %v3780_v18, -inf }
0x1a35   :  { %v8516_v15 = vpop.f32.mrb[40].mxu1  ;;  %v8520_v16 = vpop.f32.mrb[41].mxu0  ;;  %v3787_v39 = vadd.f32 %v8518_v29, %v8443_v37 }
0x1a36   :  { %v8522_v17 = vpop.f32.mrb[41].mxu1  ;;  %4013 = vmax.xlane.f32.xlu0 %v4012_v30  ;;  %v8527_v23 = vpop.f32.mrb[42].mxu0  ;;  %v4039_v30 = vsel %vm429_vm3, %v3843_v10, -inf  ;;  %v3785_v25 = vadd.f32 %v8423_v11, %v8520_v16 }
0x1a37   :  { %v8525_v48 = vpop.f32.mrb[42].mxu1  ;;  %v8530_v61 = vpop.f32.mrb[43].mxu0  ;;  %v3967_v59 = vsel %vm429_vm3, %v3787_v39, -inf }
0x1a38   :  { %v8532_v28 = vpop.f32.mrb[43].mxu1  ;;  %3926 = vmax.xlane.f32.xlu1 %v3925_v32  ;;  %v3847_v32 = vadd.f32 %v8491_v34, %v8417_v58  ;;  %v4036_v58 = vsel %vm429_vm3, %v3842_v46, -inf  ;;  %v3845_v34 = vadd.f32 %v8409_v26, %v8498_v42  ;;  %v3851_v42 = vadd.f32 %v8516_v15, %v8443_v37  ;;  %v3594_v10 = vpop.permute.xlu0 %3593 }
0x1a39   :  { %v4048_v37 = vsel %vm429_vm3, %v3846_v0, -inf  ;;  %v3849_v15 = vadd.f32 %v8423_v11, %v8522_v17  ;;  %v3852_v6 = vadd.f32 %v8525_v48, %v8445_v63  ;;  %v3786_v13 = vadd.f32 %v8425_v12, %v8530_v61  ;;  %v3599_v61 = vpop.permute.xlu1 %3598 }
0x1a3a   :  { %3929 = vmax.xlane.f32.xlu0 %v3928_v33  ;;  %v3781_v33 = vadd.f32 %v8409_v26, %v8496_v50  ;;  %v4051_v19 = vsel %vm429_vm3, %v3847_v32, -inf  ;;  %v3958_v50 = vsel %vm429_vm3, %v3784_v55, -inf  ;;  %v4045_v1 = vsel %vm429_vm3, %v3845_v34, -inf }
0x1a3b   :  { %v4054_v26 = vsel %vm429_vm3, %v3848_v27, -inf  ;;  %v4066_v11 = vsel %vm429_vm3, %v3852_v6, -inf  ;;  %v3964_v48 = vsel %vm429_vm3, %v3786_v13, -inf }
0x1a3c   :  { %4022 = vmax.xlane.f32.xlu1 %v4021_v43  ;;  %v8541_v36 = vpop.f32.mrb[44].mxu0  ;;  %v3949_v41 = vsel %vm429_vm3, %v3781_v33, -inf  ;;  %v3782_v43 = vadd.f32 %v8411_v53, %v8507_v3  ;;  %v4063_v3 = vsel %vm429_vm3, %v3851_v42, -inf  ;;  %v3961_v53 = vsel %vm429_vm3, %v3785_v25, -inf }
0x1a3d   :  { %v8539_v49 = vpop.f32.mrb[44].mxu1  ;;  %v8545_v9 = vpop.f32.mrb[45].mxu0 }
0x1a3e   :  { %v8547_v45 = vpop.f32.mrb[45].mxu1  ;;  %4025 = vmax.xlane.f32.xlu0 %v4024_v47  ;;  %v8552_v54 = vpop.f32.mrb[46].mxu0  ;;  %v3952_v29 = vsel %vm429_vm3, %v3782_v43, -inf  ;;  %v3788_v47 = vadd.f32 %v8527_v23, %v8445_v63  ;;  %v4057_v23 = vsel %vm429_vm3, %v3849_v15, -inf  ;;  %v3855_v17 = vadd.f32 %v8539_v49, %v3594_v10 }
0x1a3f   :  { %v8550_v57 = vpop.f32.mrb[46].mxu1  ;;  %v8556_v51 = vpop.f32.mrb[47].mxu0  ;;  %v3850_v63 = vadd.f32 %v8425_v12, %v8532_v28  ;;  %v3853_v18 = vadd.f32 %v8485_v35, %v8547_v45 }
0x1a40   :  { %v8558_v52 = vpop.f32.mrb[47].mxu1  ;;  %3944 = vmax.xlane.f32.xlu1 %v3943_v21  ;;  %v3970_v16 = vsel %vm429_vm3, %v3788_v47, -inf  ;;  %v3791_v21 = vadd.f32 %v8541_v36, %v3594_v10  ;;  %v3789_v36 = vadd.f32 %v8485_v35, %v8545_v9  ;;  %v4075_v38 = vsel %vm429_vm3, %v3855_v17, -inf  ;;  %v3514_v9 = vpop.permute.xlu0 %3513  ;;  %v3409_v17 = vld [vmem:[%s9478_s10 + $0x100] sm:$0xff] }
0x1a41   :  { %v4060_v49 = vsel %vm429_vm3, %v3850_v63, -inf  ;;  %v3856_v28 = vadd.f32 %v8550_v57, %v3599_v61  ;;  %v3775_v4 = vadd.f32 %v8451_v60, %v3514_v9  ;;  %v3839_v35 = vadd.f32 %v8449_v2, %v3514_v9  ;;  %v3519_v60 = vpop.permute.xlu1 %3518 }
0x1a42   :  { %3938 = vmax.xlane.f32.xlu0 %v3937_v14  ;;  %v3979_v14 = vsel %vm429_vm3, %v3791_v21, -inf  ;;  %v3973_v12 = vsel %vm429_vm3, %v3789_v36, -inf  ;;  %v3854_v57 = vadd.f32 %v8487_v8, %v8558_v52  ;;  %v3776_v46 = vadd.f32 %v8459_v56, %v3519_v60 }
0x1a43   :  { %v4078_v22 = vsel %vm429_vm3, %v3856_v28, -inf  ;;  %v3931_v45 = vsel %vm429_vm3, %v3775_v4, -inf  ;;  %v4027_v32 = vsel %vm429_vm3, %v3839_v35, -inf  ;;  %v3840_v34 = vadd.f32 %v8457_v7, %v3519_v60  ;;  %v3426_v4 = vld [vmem:[%s9478_s10 + $0x188] sm:$0xff] }
0x1a44   :  { %4040 = vmax.xlane.f32.xlu1 %v4039_v30  ;;  %v3792_v30 = vadd.f32 %v8552_v54, %v3599_v61  ;;  %v3790_v54 = vadd.f32 %v8487_v8, %v8556_v51  ;;  %v4072_v2 = vsel %vm429_vm3, %v3854_v57, -inf  ;;  %v3934_v56 = vsel %vm429_vm3, %v3776_v46, -inf  ;;  %v3410_v61 = vld [vmem:[%s9478_s10 + $0x108] sm:$0xff] }
0x1a45   :  { %v8651_v51 = vpop.f32.mrb[48].mxu1  ;;  %v4030_v7 = vsel %vm429_vm3, %v3840_v34, -inf  ;;  %v3430_v60 = vld [vmem:[%s9478_s10 + $0x1a8] sm:$0xff] }
0x1a46   :  { %4034 = vmax.xlane.f32.xlu0 %v4033_v20  ;;  %v3982_v20 = vsel %vm429_vm3, %v3792_v30, -inf }
0x1a48   :  { %3941 = vmax.xlane.f32.xlu1 %v3940_v40  ;;  %v4069_v40 = vsel %vm429_vm3, %v3853_v18, -inf }
0x1a4a   :  { %3947 = vmax.xlane.f32.xlu0 %v3946_v62  ;;  %v3976_v62 = vsel %vm429_vm3, %v3790_v54, -inf }
0x1a4c   :  { %3956 = vmax.xlane.f32.xlu1 %v3955_v24  ;;  %v8649_v24 = vpop.f32.mrb[48].mxu0 }
0x1a4d   :  { %v8657_v33 = vpop.f32.mrb[49].mxu0 }
0x1a4e   :  { %4043 = vmax.xlane.f32.xlu0 %v4042_v44  ;;  %v8655_v44 = vpop.f32.mrb[49].mxu1  ;;  %v8659_v8 = vpop.f32.mrb[50].mxu0 }
0x1a4f   :  { %v8661_v52 = vpop.f32.mrb[50].mxu1  ;;  %v8665_v55 = vpop.f32.mrb[51].mxu0 }
0x1a50   :  { %4052 = vmax.xlane.f32.xlu1 %v4051_v19  ;;  %v8663_v19 = vpop.f32.mrb[51].mxu1 }
0x1a52   :  { %4037 = vmax.xlane.f32.xlu0 %v4036_v58  ;;  %v8667_v58 = vpop.f32.mrb[52].mxu1 }
0x1a53   :  { %v8673_v27 = vpop.f32.mrb[53].mxu1 }
0x1a54   :  { %3950 = vmax.xlane.f32.xlu1 %v3949_v41  ;;  %v8671_v41 = vpop.f32.mrb[52].mxu0  ;;  %v8677_v39 = vpop.f32.mrb[54].mxu1 }
0x1a55   :  { %v8681_v43 = vpop.f32.mrb[55].mxu1 }
0x1a56   :  { %3959 = vmax.xlane.f32.xlu0 %v3958_v50  ;;  %v8675_v50 = vpop.f32.mrb[53].mxu0  ;;  %v8685_v42 = vpop.f32.mrb[56].mxu1 }
0x1a57   :  { %9501 = vst [vmem:[#allocation17_spill] sm:$0xff] %v8685_v42  ;;  %v8690_v0 = vpop.f32.mrb[57].mxu1 }
0x1a58   :  { %4046 = vmax.xlane.f32.xlu1 %v4045_v1  ;;  %v8679_v1 = vpop.f32.mrb[54].mxu0  ;;  %v8694_v25 = vpop.f32.mrb[58].mxu1 }
0x1a59   :  { %9503 = vst [vmem:[#allocation19_spill] sm:$0xff] %v8694_v25  ;;  %v8698_v47 = vpop.f32.mrb[59].mxu1 }
0x1a5a   :  { %4055 = vmax.xlane.f32.xlu0 %v4054_v26  ;;  %v8683_v26 = vpop.f32.mrb[55].mxu0 }
0x1a5c   :  { %3968 = vmax.xlane.f32.xlu1 %v3967_v59  ;;  %v8688_v59 = vpop.f32.mrb[56].mxu0 }
0x1a5d   :  { %9502 = vst [vmem:[#allocation18_spill] sm:$0xff] %v8688_v59  ;;  %v8702_v15 = vpop.f32.mrb[60].mxu1 }
0x1a5e   :  { %3953 = vmax.xlane.f32.xlu0 %v3952_v29  ;;  %v8692_v29 = vpop.f32.mrb[57].mxu0  ;;  %9505 = vst [vmem:[#allocation21_spill] sm:$0xff] %v8702_v15  ;;  %v8706_v6 = vpop.f32.mrb[61].mxu1 }
0x1a5f   :  { %9507 = vst [vmem:[#allocation23_spill] sm:$0xff] %v8706_v6  ;;  %v8713_v21 = vpop.f32.mrb[62].mxu1  ;;  %v3423_v6 = vld [vmem:[%s9478_s10 + $0x170] sm:$0xff] }
0x1a60   :  { %4064 = vmax.xlane.f32.xlu1 %v4063_v3  ;;  %v8696_v3 = vpop.f32.mrb[58].mxu0  ;;  %9509 = vst [vmem:[#allocation25_spill] sm:$0xff] %v8713_v21  ;;  %v8717_v13 = vpop.f32.mrb[63].mxu1  ;;  %v3422_v21 = vld [vmem:[%s9478_s10 + $0x168] sm:$0xff] }
0x1a61   :  { %9504 = vst [vmem:[#allocation20_spill] sm:$0xff] %v8696_v3  ;;  %9511 = vst [vmem:[#allocation27_spill] sm:$0xff] %v8717_v13  ;;  %v3439_v13 = vld [vmem:[%s9478_s10 + $0x1f0] sm:$0xff]  ;;  %v5093_v3 = vld [vmem:[#allocation11] sm:$0xff] }
0x1a62   :  { %4049 = vmax.xlane.f32.xlu0 %v4048_v37  ;;  %v8700_v37 = vpop.f32.mrb[59].mxu0 }
0x1a64   :  { %3962 = vmax.xlane.f32.xlu1 %v3961_v53  ;;  %v8704_v53 = vpop.f32.mrb[60].mxu0 }
0x1a65   :  { %9506 = vst [vmem:[#allocation22_spill] sm:$0xff] %v8704_v53  ;;  %v8711_v10 = vpop.f32.mrb[61].mxu0  ;;  %v8726_v63 = vpop.f32.mrb[64].mxu1 }
0x1a66   :  { %3971 = vmax.xlane.f32.xlu0 %v3970_v16  ;;  %v3425_v16 = vld [vmem:[%s9478_s10 + $0x180] sm:$0xff]  ;;  %9508 = vst [vmem:[#allocation24_spill] sm:$0xff] %v8711_v10  ;;  %9514 = vst [vmem:[#allocation30_spill] sm:$0xff] %v8726_v63  ;;  %v3418_v63 = vld [vmem:[%s9478_s10 + $0x148] sm:$0xff] }
0x1a67   :  { %v5096_v10 = vld [vmem:[#allocation11 + $0x18] sm:$0xff] }
0x1a68   :  { %4058 = vmax.xlane.f32.xlu1 %v4057_v23  ;;  %v8715_v23 = vpop.f32.mrb[62].mxu0 }
0x1a69   :  { %9510 = vst [vmem:[#allocation26_spill] sm:$0xff] %v8715_v23 }
0x1a6a   :  { %4067 = vmax.xlane.f32.xlu0 %v4066_v11  ;;  %v8719_v11 = vpop.f32.mrb[63].mxu0 }
0x1a6b   :  { %9512 = vst [vmem:[#allocation28_spill] sm:$0xff] %v8719_v11 }
0x1a6c   :  { %3980 = vmax.xlane.f32.xlu1 %v3979_v14  ;;  %v8724_v14 = vpop.f32.mrb[64].mxu0 }
0x1a6d   :  { %9513 = vst [vmem:[#allocation29_spill] sm:$0xff] %v8724_v14  ;;  %v8730_v36 = vpop.f32.mrb[65].mxu0 }
0x1a6e   :  { %3965 = vmax.xlane.f32.xlu0 %v3964_v48  ;;  %v8728_v48 = vpop.f32.mrb[65].mxu1  ;;  %9516 = vst [vmem:[#allocation32_spill] sm:$0xff] %v8730_v36  ;;  %v8759_v54 = vpop.f32.mrb[66].mxu0 }
0x1a6f   :  { %9515 = vst [vmem:[#allocation31_spill] sm:$0xff] %v8728_v48  ;;  %v8747_v28 = vpop.f32.mrb[66].mxu1  ;;  %9518 = vst [vmem:[#allocation34_spill] sm:$0xff] %v8759_v54 }
0x1a70   :  { %4076 = vmax.xlane.f32.xlu1 %v4075_v38  ;;  %9517 = vst [vmem:[#allocation33_spill] sm:$0xff] %v8747_v28 }
0x1a72   :  { %4061 = vmax.xlane.f32.xlu0 %v4060_v49  ;;  %v7228_v49 = vld [vmem:[%s9479_s11 + $0x4] ss:$8 sps:$4 sm:$0xff]  }
0x1a73   :  { %4337 = vmatprep.mubr.bf16.mxu0 %v7228_v49  ;;  %4498 = vmatprep.mubr.bf16.mxu1 %v7228_v49 }
0x1a74   :  { %3974 = vmax.xlane.f32.xlu1 %v3973_v12  ;;  %v3428_v12 = vld [vmem:[%s9478_s10 + $0x198] sm:$0xff] }
0x1a76   :  { %3983 = vmax.xlane.f32.xlu0 %v3982_v20 }
0x1a78   :  { %4070 = vmax.xlane.f32.xlu1 %v4069_v40  ;;  %v3412_v40 = vld [vmem:[%s9478_s10 + $0x118] sm:$0xff] }
0x1a7a   :  { %4079 = vmax.xlane.f32.xlu0 %v4078_v22  ;;  %v8761_v22 = vpop.f32.mrb[67].mxu1 }
0x1a7b   :  { %9519 = vst [vmem:[#allocation35_spill] sm:$0xff] %v8761_v22 }
0x1a7c   :  { %3932 = vmax.xlane.f32.xlu1 %v3931_v45  ;;  %v8765_v45 = vpop.f32.mrb[67].mxu0 }
0x1a7d   :  { %9520 = vst [vmem:[#allocation36_spill] sm:$0xff] %v8765_v45  ;;  %v8777_v46 = vpop.f32.mrb[68].mxu0 }
0x1a7e   :  { %3977 = vmax.xlane.f32.xlu0 %v3976_v62  ;;  %v3427_v62 = vld [vmem:[%s9478_s10 + $0x190] sm:$0xff]  ;;  %9521 = vst [vmem:[#allocation37_spill] sm:$0xff] %v8777_v46  ;;  %v8781_v34 = vpop.f32.mrb[69].mxu0 }
0x1a7f   :  { %9523 = vst [vmem:[#allocation39_spill] sm:$0xff] %v8781_v34 }
0x1a80   :  { %4028 = vmax.xlane.f32.xlu1 %v4027_v32 }
0x1a82   :  { %4073 = vmax.xlane.f32.xlu0 %v4072_v2  ;;  %v8779_v2 = vpop.f32.mrb[68].mxu1 }
0x1a83   :  { %9522 = vst [vmem:[#allocation38_spill] sm:$0xff] %v8779_v2 }
0x1a86   :  { %3935 = vmax.xlane.f32.xlu0 %v3934_v56 }
0x1a8a   :  { %4031 = vmax.xlane.f32.xlu0 %v4030_v7  ;;  %v3411_v7 = vld [vmem:[%s9478_s10 + $0x110] sm:$0xff] }
0x1a91   :  { %3683 = vperm.xlu1 %6948, %v3425_v16   ;;  %v8788_v16 = vpop.f32.mrb[69].mxu1 }
0x1a92   :  { %9524 = vst [vmem:[#allocation40_spill] sm:$0xff] %v8788_v16  ;;  %v8795_v49 = vpop.f32.mrb[70].mxu1 }
0x1a93   :  { %9526 = vst [vmem:[#allocation42_spill] sm:$0xff] %v8795_v49 }
0x1a95   :  { %v8732_v38 = vpop.xlane.xlu1 %3896  ;;  %3603 = vperm.xlu1 %6948, %v3409_v17   ;;  %v3414_v17 = vld [vmem:[%s9478_s10 + $0x128] sm:$0xff] }
0x1a97   :  { %v8737_v30 = vpop.xlane.xlu0 %3899 }
0x1a99   :  { %v8742_v18 = vpop.xlane.xlu1 %3992  ;;  %3608 = vperm.xlu1 %6948, %v3410_v61   ;;  %v8793_v61 = vpop.f32.mrb[70].mxu0 }
0x1a9a   :  { %9525 = vst [vmem:[#allocation41_spill] sm:$0xff] %v8793_v61 }
0x1a9b   :  { %v8749_v20 = vpop.xlane.xlu0 %3995 }
0x1a9d   :  { %v8751_v9 = vpop.xlane.xlu1 %3890  ;;  %3698 = vperm.xlu1 %6948, %v3428_v12  }
0x1a9f   :  { %v8763_v35 = vpop.xlane.xlu0 %3893 }
0x1aa0   :  { %3688 = vperm.xlu0 %6947, %v3426_v4   ;;  %v8799_v4 = vpop.f32.mrb[71].mxu1 }
0x1aa1   :  { %v8767_v57 = vpop.xlane.xlu1 %3986  ;;  %3618 = vperm.xlu1 %6948, %v3412_v40   ;;  %9527 = vst [vmem:[#allocation43_spill] sm:$0xff] %v8799_v4  ;;  %v3416_v40 = vld [vmem:[%s9478_s10 + $0x138] sm:$0xff]  ;;  %v8839_v4 = vpop.f32.mrb[72].mxu1 }
0x1aa2   :  { %9530 = vst [vmem:[#allocation46_spill] sm:$0xff] %v8839_v4 }
0x1aa3   :  { %v8775_v32 = vpop.xlane.xlu0 %3989 }
0x1aa4   :  { %3693 = vperm.xlu0 %6947, %v3427_v62   ;;  %v8803_v62 = vpop.f32.mrb[71].mxu0 }
0x1aa5   :  { %v8783_v56 = vpop.xlane.xlu1 %3908  ;;  %3708 = vperm.xlu1 %6948, %v3430_v60   ;;  %9528 = vst [vmem:[#allocation44_spill] sm:$0xff] %v8803_v62  ;;  %v8837_v16 = vpop.f32.mrb[72].mxu0 }
0x1aa6   :  { %9529 = vst [vmem:[#allocation45_spill] sm:$0xff] %v8837_v16  ;;  %v8841_v34 = vpop.f32.mrb[73].mxu0  ;;  %v8848_v62 = vpop.f32.mrb[73].mxu1 }
0x1aa7   :  { %v8797_v12 = vpop.xlane.xlu0 %3911  ;;  %9531 = vst [vmem:[#allocation47_spill] sm:$0xff] %v8841_v34  ;;  %9532 = vst [vmem:[#allocation48_spill] sm:$0xff] %v8848_v62  ;;  %v8853_v28 = vpop.f32.mrb[74].mxu0  ;;  %v3433_v62 = vld [vmem:[%s9478_s10 + $0x1c0] sm:$0xff] }
0x1aa8   :  { %3613 = vperm.xlu0 %6947, %v3411_v7   ;;  %9533 = vst [vmem:[#allocation49_spill] sm:$0xff] %v8853_v28  ;;  %v8863_v34 = vpop.f32.mrb[75].mxu0 }
0x1aa9   :  { %v8805_v60 = vpop.xlane.xlu1 %4004  ;;  %3628 = vperm.xlu1 %6948, %v3414_v17   ;;  %v3413_v17 = vld [vmem:[%s9478_s10 + $0x120] sm:$0xff]  ;;  %9536 = vst [vmem:[#allocation52_spill] sm:$0xff] %v8863_v34  ;;  %v8897_v22 = vpop.f32.mrb[76].mxu0 }
0x1aaa   :  { %9537 = vst [vmem:[#allocation53_spill] sm:$0xff] %v8897_v22  ;;  %v8901_v45 = vpop.f32.mrb[77].mxu0 }
0x1aab   :  { %v8813_v2 = vpop.xlane.xlu0 %4007  ;;  %9539 = vst [vmem:[#allocation55_spill] sm:$0xff] %v8901_v45  ;;  %v8913_v15 = vpop.f32.mrb[78].mxu0 }
0x1aac   :  { %3703 = vperm.xlu0 %6947, %v3429_v31   ;;  %v3431_v31 = vld [vmem:[%s9478_s10 + $0x1b0] sm:$0xff]  ;;  %9541 = vst [vmem:[#allocation57_spill] sm:$0xff] %v8913_v15  ;;  %v8923_v45 = vpop.f32.mrb[79].mxu0 }
0x1aad   :  { %v8817_v7 = vpop.xlane.xlu1 %3902  ;;  %3718 = vperm.xlu1 %6948, %v3432_v5   ;;  %v3434_v5 = vld [vmem:[%s9478_s10 + $0x1c8] sm:$0xff]  ;;  %9544 = vst [vmem:[#allocation60_spill] sm:$0xff] %v8923_v45 }
0x1aaf   :  { %v8825_v46 = vpop.xlane.xlu0 %3905 }
0x1ab0   :  { %3623 = vperm.xlu0 %6947, %v3413_v17  }
0x1ab1   :  { %v8827_v61 = vpop.xlane.xlu1 %3998  ;;  %3638 = vperm.xlu1 %6948, %v3416_v40   ;;  %v3415_v40 = vld [vmem:[%s9478_s10 + $0x130] sm:$0xff] }
0x1ab3   :  { %v8835_v49 = vpop.xlane.xlu0 %4001 }
0x1ab4   :  { %3713 = vperm.xlu0 %6947, %v3431_v31   ;;  %v8855_v31 = vpop.f32.mrb[74].mxu1 }
0x1ab5   :  { %v8843_v17 = vpop.xlane.xlu1 %3920  ;;  %3728 = vperm.xlu1 %6948, %v3434_v5   ;;  %9534 = vst [vmem:[#allocation50_spill] sm:$0xff] %v8855_v31  ;;  %v8859_v16 = vpop.f32.mrb[75].mxu1  ;;  %v3436_v31 = vld [vmem:[%s9478_s10 + $0x1d8] sm:$0xff] }
0x1ab6   :  { %9535 = vst [vmem:[#allocation51_spill] sm:$0xff] %v8859_v16  ;;  %v3420_v5 = vld [vmem:[%s9478_s10 + $0x158] sm:$0xff]  ;;  %v8899_v48 = vpop.f32.mrb[76].mxu1 }
0x1ab7   :  { %v8857_v4 = vpop.xlane.xlu0 %3923  ;;  %9538 = vst [vmem:[#allocation54_spill] sm:$0xff] %v8899_v48  ;;  %v8908_v36 = vpop.f32.mrb[77].mxu1 }
0x1ab8   :  { %3633 = vperm.xlu0 %6947, %v3415_v40   ;;  %9540 = vst [vmem:[#allocation56_spill] sm:$0xff] %v8908_v36  ;;  %v3437_v36 = vld [vmem:[%s9478_s10 + $0x1e0] sm:$0xff] }
0x1ab9   :  { %v8865_v14 = vpop.xlane.xlu1 %4016  ;;  %3648 = vperm.xlu1 %6948, %v3418_v63   ;;  %v3417_v63 = vld [vmem:[%s9478_s10 + $0x140] sm:$0xff] }
0x1abb   :  { %v8873_v28 = vpop.xlane.xlu0 %4019 }
0x1abc   :  { %3723 = vperm.xlu0 %6947, %v3433_v62   ;;  %v3435_v62 = vld [vmem:[%s9478_s10 + $0x1d0] sm:$0xff] }
0x1abd   :  { %v8877_v40 = vpop.xlane.xlu1 %3914  ;;  %3738 = vperm.xlu1 %6948, %v3436_v31   ;;  %v3438_v31 = vld [vmem:[%s9478_s10 + $0x1e8] sm:$0xff] }
0x1abf   :  { %v8885_v34 = vpop.xlane.xlu0 %3917 }
0x1ac0   :  { %3643 = vperm.xlu0 %6947, %v3417_v63  }
0x1ac1   :  { %v8887_v54 = vpop.xlane.xlu1 %4010  ;;  %3658 = vperm.xlu1 %6948, %v3420_v5   ;;  %v3419_v5 = vld [vmem:[%s9478_s10 + $0x150] sm:$0xff] }
0x1ac3   :  { %v8895_v16 = vpop.xlane.xlu0 %4013 }
0x1ac4   :  { %3733 = vperm.xlu0 %6947, %v3435_v62   ;;  %v8915_v62 = vpop.f32.mrb[78].mxu1 }
0x1ac5   :  { %v8903_v63 = vpop.xlane.xlu1 %3926  ;;  %3748 = vperm.xlu1 %6948, %v3438_v31   ;;  %9542 = vst [vmem:[#allocation58_spill] sm:$0xff] %v8915_v62  ;;  %v8919_v22 = vpop.f32.mrb[79].mxu1  ;;  %v3440_v62 = vld [vmem:[%s9478_s10 + $0x1f8] sm:$0xff] }
0x1ac6   :  { %9543 = vst [vmem:[#allocation59_spill] sm:$0xff] %v8919_v22  ;;  %v3424_v31 = vld [vmem:[%s9478_s10 + $0x178] sm:$0xff]  ;;  %v5094_v22 = vld [vmem:[#allocation11 + $0x8] sm:$0xff] }
0x1ac7   :  { %v8917_v48 = vpop.xlane.xlu0 %3929 }
0x1ac8   :  { %3653 = vperm.xlu0 %6947, %v3419_v5  }
0x1ac9   :  { %v8925_v23 = vpop.xlane.xlu1 %4022  ;;  %3668 = vperm.xlu1 %6948, %v3422_v21   ;;  %v3421_v21 = vld [vmem:[%s9478_s10 + $0x160] sm:$0xff]  ;;  %s5365_s10 = sshll.u32 %s7475_s2, 4  ;;  %s5366_s10 = int_to_ptr.vmem [resolvable:$true] %s5365_s10 }
0x1aca   :  { %p7417_p13 = scmp.lt.s32.totalorder %s5366_s10, %s5366_s10 }
0x1acb   :  { %v8933_v15 = vpop.xlane.xlu0 %4025 }
0x1acc   :  { %3743 = vperm.xlu0 %6947, %v3437_v36  }
0x1acd   :  { %v3945_v5 = vpop.xlane.xlu1 %3944  ;;  %3758 = vperm.xlu1 %6948, %v3440_v62  }
0x1acf   :  { %v3939_v45 = vpop.xlane.xlu0 %3938 }
0x1ad0   :  { %3663 = vperm.xlu0 %6947, %v3421_v21   ;;  %v4113_v21 = vpack.c.bf16 %v8763_v35, %v8751_v9  ;;  %v5100_v9 = vld [vmem:[#allocation11 + $0x38] sm:$0xff] }
0x1ad1   :  { %v4041_v53 = vpop.xlane.xlu1 %4040  ;;  %3678 = vperm.xlu1 %6948, %v3424_v31  }
0x1ad3   :  { %v4035_v36 = vpop.xlane.xlu0 %4034 }
0x1ad4   :  { %3753 = vperm.xlu0 %6947, %v3439_v13   ;;  %v5098_v13 = vld [vmem:[#allocation11 + $0x28] sm:$0xff] }
0x1ad5   :  { %v3942_v62 = vpop.xlane.xlu1 %3941  ;;  %5108 = vperm.xlu1 %6948, %v5094_v22   ;;  %v4114_v22 = vpack.c.bf16 %v8737_v30, %v8732_v38 }
0x1ad6   :  { %v4121_v11 = vpack.c.bf16 %v3942_v62, %v3939_v45  ;;  %v5095_v62 = vld [vmem:[#allocation11 + $0x10] sm:$0xff] }
0x1ad7   :  { %v3948_v25 = vpop.xlane.xlu0 %3947 }
0x1ad8   :  { %v4122_v31 = vpack.c.bf16 %v3948_v25, %v3945_v5  ;;  %5757 = vmatprep.subr.bf16.mxu0 %v4121_v11  ;;  %3673 = vperm.xlu0 %6947, %v3423_v6   ;;  %v4129_v6 = vpack.c.bf16 %v8775_v32, %v8767_v57  ;;  %v5097_v11 = vld [vmem:[#allocation11 + $0x20] sm:$0xff]  ;;  %v5349_v57 = vld [vmem:[%s9483_s15] sm:$0x3] }
0x1ad9   :  { %5758 = vmatpush3.bf16.msra.mxu0 %v4113_v21  ;;  %v3957_v42 = vpop.xlane.xlu1 %3956  ;;  %5118 = vperm.xlu1 %6948, %v5096_v10   ;;  %v5099_v21 = vld [vmem:[#allocation11 + $0x30] sm:$0xff] }
0x1ada   :  { %5759 = vmatprep.subr.bf16.mxu0 %v4122_v31 }
0x1adb   :  { %v4044_v59 = vpop.xlane.xlu0 %4043 }
0x1adc   :  { %5103 = vperm.xlu0 %6947, %v5093_v3   ;;  %v4138_v5 = vpack.c.bf16 %v4044_v59, %v4041_v53  ;;  %v4130_v3 = vpack.c.bf16 %v8749_v20, %v8742_v18  ;;  %v4115_v53 = vpack.c.bf16 %v8825_v46, %v8817_v7 }
0x1add   :  { %5760 = vmatpush3.bf16.msra.mxu0 %v4114_v22  ;;  %v4053_v45 = vpop.xlane.xlu1 %4052  ;;  %5128 = vperm.xlu1 %6948, %v5098_v13  }
0x1adf   :  { %v4038_v35 = vpop.xlane.xlu0 %4037 }
0x1ae0   :  { %v4137_v25 = vpack.c.bf16 %v4038_v35, %v4035_v36  ;;  %5113 = vperm.xlu0 %6947, %v5095_v62   ;;  %v4131_v62 = vpack.c.bf16 %v8835_v49, %v8827_v61  ;;  %v4117_v61 = vpack.c.bf16 %v8885_v34, %v8877_v40  ;;  %v9548_v40 = vpack.c.bf16 %v8873_v28, %v8865_v14 }
0x1ae1   :  { %v3951_v10 = vpop.xlane.xlu1 %3950  ;;  %5138 = vperm.xlu1 %6948, %v5100_v9   ;;  %v9550_v14 = vpack.c.bf16 %v8933_v15, %v8925_v23  ;;  %v7231_v15 = vld [vmem:[%s9479_s11 + $0x10] ss:$8 sps:$4 sm:$0xff]   ;;  %v7232_v23 = vld [vmem:[%s9479_s11 + $0x24] ss:$8 sps:$4 sm:$0xff]  }
0x1ae2   :  { %5869 = vmatprep.subr.bf16.mxu1 %v4137_v25  ;;  %v9545_v25 = vpack.c.bf16 %v8797_v12, %v8783_v56 }
0x1ae3   :  { %5870 = vmatpush3.bf16.msra.mxu1 %v4129_v6  ;;  %v3960_v38 = vpop.xlane.xlu0 %3959 }
0x1ae4   :  { %5871 = vmatprep.subr.bf16.mxu1 %v4138_v5  ;;  %5123 = vperm.xlu0 %6947, %v5097_v11   ;;  %v4124_v22 = vpack.c.bf16 %v3960_v38, %v3957_v42  ;;  %v9546_v42 = vpack.c.bf16 %v8813_v2, %v8805_v60  ;;  %v4133_v38 = vpack.c.bf16 %v8895_v16, %v8887_v54 }
0x1ae5   :  { %v4047_v30 = vpop.xlane.xlu1 %4046  ;;  %v9547_v2 = vpack.c.bf16 %v8857_v4, %v8843_v17  ;;  %v9549_v54 = vpack.c.bf16 %v8917_v48, %v8903_v63  ;;  %v7229_v48 = vld [vmem:[%s9479_s11 + $0x14] ss:$8 sps:$4 sm:$0xff]  }
0x1ae7   :  { %5872 = vmatpush3.bf16.msra.mxu1 %v4130_v3  ;;  %v4056_v36 = vpop.xlane.xlu0 %4055 }
0x1ae8   :  { %5133 = vperm.xlu0 %6947, %v5099_v21   ;;  %v4140_v35 = vpack.c.bf16 %v4056_v36, %v4053_v45 }
0x1ae9   :  { %v3969_v31 = vpop.xlane.xlu1 %3968 }
0x1aeb   :  { %v3954_v32 = vpop.xlane.xlu0 %3953 }
0x1aec   :  { %v4123_v59 = vpack.c.bf16 %v3954_v32, %v3951_v10  ;;  %5352 = vperm.xlu0 %6947, %v5349_v57  }
0x1aed   :  { %v4065_v13 = vpop.xlane.xlu1 %4064 }
0x1aee   :  { %5761 = vmatprep.subr.bf16.mxu0 %v4123_v59 }
0x1aef   :  { %5762 = vmatpush3.bf16.msra.mxu0 %v4115_v53  ;;  %v4050_v18 = vpop.xlane.xlu0 %4049  ;;  %v7226_v53 = vld [vmem:[%s9479_s11] ss:$8 sps:$4 sm:$0xff]  }
0x1af0   :  { %v4139_v20 = vpack.c.bf16 %v4050_v18, %v4047_v30  ;;  %5763 = vmatprep.subr.bf16.mxu0 %v4124_v22  ;;  %v7234_v18 = vld [vmem:[%s9479_s11 + $0x20] ss:$8 sps:$4 sm:$0xff]  }
0x1af1   :  { %v3963_v9 = vpop.xlane.xlu1 %3962 }
0x1af2   :  { %5873 = vmatprep.subr.bf16.mxu1 %v4139_v20  ;;  %v7235_v20 = vld [vmem:[%s9479_s11 + $0x34] ss:$8 sps:$4 sm:$0xff]  }
0x1af3   :  { %5764 = vmatpush3.bf16.msra.mxu0 %v9545_v25  ;;  %5874 = vmatpush3.bf16.msra.mxu1 %v4131_v62  ;;  %v3972_v6 = vpop.xlane.xlu0 %3971  ;;  %v7237_v62 = vld [vmem:[%s9479_s11 + $0x30] ss:$8 sps:$4 sm:$0xff]   ;;  %v7241_v25 = vld [vmem:[%s9479_s11 + $0x54] ss:$8 sps:$4 sm:$0xff]  }
0x1af4   :  { %5875 = vmatprep.subr.bf16.mxu1 %v4140_v35  ;;  %v4126_v49 = vpack.c.bf16 %v3972_v6, %v3969_v31  ;;  %v7240_v35 = vld [vmem:[%s9479_s11 + $0x40] ss:$8 sps:$4 sm:$0xff]   ;;  %v7243_v6 = vld [vmem:[%s9479_s11 + $0x50] ss:$8 sps:$4 sm:$0xff]  }
0x1af5   :  { %v4059_v46 = vpop.xlane.xlu1 %4058 }
0x1af7   :  { %5876 = vmatpush3.bf16.msra.mxu1 %v9546_v42  ;;  %v4068_v7 = vpop.xlane.xlu0 %4067  ;;  %v7246_v42 = vld [vmem:[%s9479_s11 + $0x60] ss:$8 sps:$4 sm:$0xff]  }
0x1af8   :  { %v4142_v3 = vpack.c.bf16 %v4068_v7, %v4065_v13  ;;  %v7247_v7 = vld [vmem:[%s9479_s11 + $0x74] ss:$8 sps:$4 sm:$0xff]  }
0x1af9   :  { %v3981_v10 = vpop.xlane.xlu1 %3980 }
0x1afb   :  { %v3966_v11 = vpop.xlane.xlu0 %3965 }
0x1afc   :  { %v4125_v5 = vpack.c.bf16 %v3966_v11, %v3963_v9  ;;  %v7238_v9 = vld [vmem:[%s9479_s11 + $0x44] ss:$8 sps:$4 sm:$0xff]  }
0x1afd   :  { %v4077_v45 = vpop.xlane.xlu1 %4076  ;;  %v7250_v11 = vld [vmem:[%s9479_s11 + $0x84] ss:$8 sps:$4 sm:$0xff]  }
0x1afe   :  { %5765 = vmatprep.subr.bf16.mxu0 %v4125_v5  ;;  %v7252_v5 = vld [vmem:[%s9479_s11 + $0x80] ss:$8 sps:$4 sm:$0xff]  }
0x1aff   :  { %5766 = vmatpush3.bf16.msra.mxu0 %v4117_v61  ;;  %v4062_v56 = vpop.xlane.xlu0 %4061  ;;  %v7253_v61 = vld [vmem:[%s9479_s11 + $0x94] ss:$8 sps:$4 sm:$0xff]  }
0x1b00   :  { %v4141_v12 = vpack.c.bf16 %v4062_v56, %v4059_v46  ;;  %5767 = vmatprep.subr.bf16.mxu0 %v4126_v49  ;;  %v7244_v46 = vld [vmem:[%s9479_s11 + $0x64] ss:$8 sps:$4 sm:$0xff]   ;;  %v7255_v49 = vld [vmem:[%s9479_s11 + $0x90] ss:$8 sps:$4 sm:$0xff]   ;;  %v7258_v56 = vld [vmem:[%s9479_s11 + $0xa0] ss:$8 sps:$4 sm:$0xff]  }
0x1b01   :  { %v3975_v34 = vpop.xlane.xlu1 %3974 }
0x1b02   :  { %5877 = vmatprep.subr.bf16.mxu1 %v4141_v12  ;;  %v7259_v12 = vld [vmem:[%s9479_s11 + $0xb4] ss:$8 sps:$4 sm:$0xff]  }
0x1b03   :  { %5768 = vmatpush3.bf16.msra.mxu0 %v9547_v2  ;;  %5878 = vmatpush3.bf16.msra.mxu1 %v4133_v38  ;;  %v3984_v60 = vpop.xlane.xlu0 %3983  ;;  %v7261_v38 = vld [vmem:[%s9479_s11 + $0xb0] ss:$8 sps:$4 sm:$0xff]   ;;  %v7264_v2 = vld [vmem:[%s9479_s11 + $0xc0] ss:$8 sps:$4 sm:$0xff]  }
0x1b04   :  { %5879 = vmatprep.subr.bf16.mxu1 %v4142_v3  ;;  %v4128_v57 = vpack.c.bf16 %v3984_v60, %v3981_v10  ;;  %v7249_v10 = vld [vmem:[%s9479_s11 + $0x70] ss:$8 sps:$4 sm:$0xff]   ;;  %v7262_v3 = vld [vmem:[%s9479_s11 + $0xc4] ss:$8 sps:$4 sm:$0xff]   ;;  %v7265_v60 = vld [vmem:[%s9479_s11 + $0xd4] ss:$8 sps:$4 sm:$0xff]  }
0x1b05   :  { %v4071_v21 = vpop.xlane.xlu1 %4070 }
0x1b07   :  { %5880 = vmatpush3.bf16.msra.mxu1 %v9548_v40  ;;  %v4080_v30 = vpop.xlane.xlu0 %4079  ;;  %v7268_v40 = vld [vmem:[%s9479_s11 + $0xe4] ss:$8 sps:$4 sm:$0xff]  }
0x1b08   :  { %v4144_v32 = vpack.c.bf16 %v4080_v30, %v4077_v45  ;;  %v7256_v45 = vld [vmem:[%s9479_s11 + $0xa4] ss:$8 sps:$4 sm:$0xff]   ;;  %v7270_v30 = vld [vmem:[%s9479_s11 + $0xe0] ss:$8 sps:$4 sm:$0xff]  }
0x1b09   :  { %v3933_v17 = vpop.xlane.xlu1 %3932 }
0x1b0b   :  { %v3978_v36 = vpop.xlane.xlu0 %3977 }
0x1b0c   :  { %v4127_v31 = vpack.c.bf16 %v3978_v36, %v3975_v34  ;;  %v7267_v34 = vld [vmem:[%s9479_s11 + $0xd0] ss:$8 sps:$4 sm:$0xff]  }
0x1b0d   :  { %v4029_v63 = vpop.xlane.xlu1 %4028  ;;  %v7273_v36 = vld [vmem:[%s9479_s11 + $0xf0] ss:$8 sps:$4 sm:$0xff]  }
0x1b0e   :  { %5769 = vmatprep.subr.bf16.mxu0 %v4127_v31 }
0x1b0f   :  { %5770 = vmatpush3.bf16.msra.mxu0 %v9549_v54  ;;  %v4074_v16 = vpop.xlane.xlu0 %4073 }
0x1b10   :  { %v4143_v4 = vpack.c.bf16 %v4074_v16, %v4071_v21  ;;  %5771 = vmatprep.subr.bf16.mxu0 %v4128_v57  ;;  %v7271_v21 = vld [vmem:[%s9479_s11 + $0xf4] ss:$8 sps:$4 sm:$0xff]  }
0x1b11   :  { %v9079_v31 = vpop.permute.xlu1 %3683 }
0x1b12   :  { %5881 = vmatprep.subr.bf16.mxu1 %v4143_v4 }
0x1b13   :  { %5882 = vmatpush3.bf16.msra.mxu1 %v9550_v14  ;;  %v3936_v28 = vpop.xlane.xlu0 %3935 }
0x1b14   :  { %v4120_v59 = vpack.c.bf16 %v3936_v28, %v3933_v17  ;;  %5883 = vmatprep.subr.bf16.mxu1 %v4144_v32 }
0x1b15   :  { %v3604_v57 = vpop.permute.xlu1 %3603 }
0x1b16   :  { %5772 = vmatpush3.bf16.msra.mxu0 %v4120_v59 }
0x1b17   :  { %v4032_v13 = vpop.xlane.xlu0 %4031 }
0x1b18   :  { %v4136_v22 = vpack.c.bf16 %v4032_v13, %v4029_v63 }
0x1b19   :  { %4338 = vmatmul.mubr.bf16.vlgmr.msra.gmra.mrb[80].mxu0 %v7226_v53  ;;  %v3609_v16 = vpop.permute.xlu1 %3608 }
0x1b1a   :  { %5884 = vmatpush3.bf16.msra.mxu1 %v4136_v22  ;;  %4345 = vmatprep.mubr.bf16.mxu0 %v7229_v48 }
0x1b1d   :  { %4499 = vmatmul.mubr.bf16.vlgmr.msra.gmra.mrb[80].mxu1 %v7226_v53  ;;  %v9085_v17 = vpop.permute.xlu1 %3698 }
0x1b1e   :  { %4506 = vmatprep.mubr.bf16.mxu1 %v7229_v48 }
0x1b1f   :  { %v9081_v54 = vpop.permute.xlu0 %3688 }
0x1b21   :  { %4346 = vmatmul.mubr.bf16.gmra.mrb[84].mxu0 %v7231_v15  ;;  %v9087_v14 = vpop.permute.xlu1 %3618 }
0x1b22   :  { %4353 = vmatprep.mubr.bf16.mxu0 %v7232_v23 }
0x1b23   :  { %v9083_v4 = vpop.permute.xlu0 %3693 }
0x1b25   :  { %4507 = vmatmul.mubr.bf16.gmra.mrb[84].mxu1 %v7231_v15  ;;  %v9091_v59 = vpop.permute.xlu1 %3708  ;;  %v3793_v15 = vadd.f32 %v3604_v57, %v8657_v33 }
0x1b26   :  { %4514 = vmatprep.mubr.bf16.mxu1 %v7232_v23 }
0x1b27   :  { %v3614_v32 = vpop.permute.xlu0 %3613 }
0x1b29   :  { %4354 = vmatmul.mubr.bf16.gmra.mrb[88].mxu0 %v7234_v18  ;;  %v9095_v48 = vpop.permute.xlu1 %3628 }
0x1b2a   :  { %4361 = vmatprep.mubr.bf16.mxu0 %v7235_v20 }
0x1b2b   :  { %v9089_v28 = vpop.permute.xlu0 %3703 }
0x1b2d   :  { %4515 = vmatmul.mubr.bf16.gmra.mrb[88].mxu1 %v7234_v18 }
0x1b2e   :  { %4522 = vmatprep.mubr.bf16.mxu1 %v7235_v20  ;;  %v9100_v20 = vpop.permute.xlu1 %3718 }
0x1b2f   :  { %v9093_v53 = vpop.permute.xlu0 %3623 }
0x1b31   :  { %4362 = vmatmul.mubr.bf16.gmra.mrb[92].mxu0 %v7237_v62 }
0x1b32   :  { %4369 = vmatprep.mubr.bf16.mxu0 %v7238_v9 }
0x1b33   :  { %v9097_v13 = vpop.permute.xlu0 %3713 }
0x1b35   :  { %4523 = vmatmul.mubr.bf16.gmra.mrb[92].mxu1 %v7237_v62 }
0x1b36   :  { %4530 = vmatprep.mubr.bf16.mxu1 %v7238_v9  ;;  %v3794_v9 = vadd.f32 %v3609_v16, %v8665_v55 }
0x1b39   :  { %4370 = vmatmul.mubr.bf16.gmra.mrb[96].mxu0 %v7240_v35 }
0x1b3a   :  { %4377 = vmatprep.mubr.bf16.mxu0 %v7241_v25 }
0x1b3d   :  { %4531 = vmatmul.mubr.bf16.gmra.mrb[96].mxu1 %v7240_v35 }
0x1b3e   :  { %4538 = vmatprep.mubr.bf16.mxu1 %v7241_v25 }
0x1b41   :  { %4378 = vmatmul.mubr.bf16.gmra.mrb[100].mxu0 %v7243_v6 }
0x1b42   :  { %4385 = vmatprep.mubr.bf16.mxu0 %v7244_v46 }
0x1b45   :  { %4539 = vmatmul.mubr.bf16.gmra.mrb[100].mxu1 %v7243_v6 }
0x1b46   :  { %4546 = vmatprep.mubr.bf16.mxu1 %v7244_v46 }
0x1b49   :  { %4386 = vmatmul.mubr.bf16.gmra.mrb[104].mxu0 %v7246_v42 }
0x1b4a   :  { %4393 = vmatprep.mubr.bf16.mxu0 %v7247_v7 }
0x1b4d   :  { %4547 = vmatmul.mubr.bf16.gmra.mrb[104].mxu1 %v7246_v42  ;;  %v3857_v42 = vadd.f32 %v3604_v57, %v8655_v44 }
0x1b4e   :  { %4554 = vmatprep.mubr.bf16.mxu1 %v7247_v7 }
0x1b51   :  { %4394 = vmatmul.mubr.bf16.gmra.mrb[108].mxu0 %v7249_v10 }
0x1b52   :  { %4401 = vmatprep.mubr.bf16.mxu0 %v7250_v11 }
0x1b55   :  { %4555 = vmatmul.mubr.bf16.gmra.mrb[108].mxu1 %v7249_v10 }
0x1b56   :  { %4562 = vmatprep.mubr.bf16.mxu1 %v7250_v11 }
0x1b59   :  { %4402 = vmatmul.mubr.bf16.gmra.mrb[112].mxu0 %v7252_v5 }
0x1b5a   :  { %4409 = vmatprep.mubr.bf16.mxu0 %v7253_v61 }
0x1b5d   :  { %4563 = vmatmul.mubr.bf16.gmra.mrb[112].mxu1 %v7252_v5 }
0x1b5e   :  { %4570 = vmatprep.mubr.bf16.mxu1 %v7253_v61  ;;  %v9104_v61 = vpop.permute.xlu0 %3633 }
0x1b61   :  { %4410 = vmatmul.mubr.bf16.gmra.mrb[116].mxu0 %v7255_v49 }
0x1b62   :  { %4417 = vmatprep.mubr.bf16.mxu0 %v7256_v45 }
0x1b65   :  { %4571 = vmatmul.mubr.bf16.gmra.mrb[116].mxu1 %v7255_v49  ;;  %v7276_v49 = vld [vmem:[%s9480_s12 + $0x4] ss:$8 sps:$4 sm:$0xff]  }
0x1b66   :  { %4578 = vmatprep.mubr.bf16.mxu1 %v7256_v45 }
0x1b69   :  { %4418 = vmatmul.mubr.bf16.gmra.mrb[120].mxu0 %v7258_v56 }
0x1b6a   :  { %4425 = vmatprep.mubr.bf16.mxu0 %v7259_v12 }
0x1b6d   :  { %4579 = vmatmul.mubr.bf16.gmra.mrb[120].mxu1 %v7258_v56 }
0x1b6e   :  { %4586 = vmatprep.mubr.bf16.mxu1 %v7259_v12  ;;  %v3858_v12 = vadd.f32 %v3609_v16, %v8663_v19  ;;  %v3796_v19 = vadd.f32 %v8659_v8, %v9087_v14 }
0x1b71   :  { %4426 = vmatmul.mubr.bf16.gmra.mrb[124].mxu0 %v7261_v38 }
0x1b72   :  { %4433 = vmatprep.mubr.bf16.mxu0 %v7262_v3 }
0x1b75   :  { %4587 = vmatmul.mubr.bf16.gmra.mrb[124].mxu1 %v7261_v38  ;;  %v9110_v38 = vpop.permute.xlu1 %3638 }
0x1b76   :  { %4594 = vmatprep.mubr.bf16.mxu1 %v7262_v3 }
0x1b79   :  { %4434 = vmatmul.mubr.bf16.gmra.mrb[128].mxu0 %v7264_v2 }
0x1b7a   :  { %4441 = vmatprep.mubr.bf16.mxu0 %v7265_v60 }
0x1b7d   :  { %4595 = vmatmul.mubr.bf16.gmra.mrb[128].mxu1 %v7264_v2  ;;  %v3795_v2 = vadd.f32 %v8649_v24, %v3614_v32 }
0x1b7e   :  { %4602 = vmatprep.mubr.bf16.mxu1 %v7265_v60 }
0x1b81   :  { %4442 = vmatmul.mubr.bf16.gmra.mrb[132].mxu0 %v7267_v34 }
0x1b82   :  { %4449 = vmatprep.mubr.bf16.mxu0 %v7268_v40 }
0x1b85   :  { %4603 = vmatmul.mubr.bf16.gmra.mrb[132].mxu1 %v7267_v34 }
0x1b86   :  { %4610 = vmatprep.mubr.bf16.mxu1 %v7268_v40 }
0x1b89   :  { %4450 = vmatmul.mubr.bf16.gmra.mrb[136].mxu0 %v7270_v30 }
0x1b8a   :  { %4457 = vmatprep.mubr.bf16.mxu0 %v7271_v21 }
0x1b8d   :  { %4611 = vmatmul.mubr.bf16.gmra.mrb[136].mxu1 %v7270_v30 }
0x1b8e   :  { %4618 = vmatprep.mubr.bf16.mxu1 %v7271_v21 }
0x1b91   :  { %4458 = vmatmul.mubr.bf16.gmra.mrb[140].mxu0 %v7273_v36 }
0x1b92   :  { %4979 = vmatprep.mubr.bf16.mxu0 %v7276_v49 }
0x1b95   :  { %4619 = vmatmul.mubr.bf16.gmra.mrb[140].mxu1 %v7273_v36 }
0x1b96   :  { %5060 = vmatprep.mubr.bf16.mxu1 %v7276_v49 }
0x1bec   :  { %v5773_v63 = vpop.f32.mrb[80].mxu0 }
0x1bed   :  { %v5774_v22 = vpop.f32.mrb[81].mxu0 }
0x1bee   :  { %v5775_v23 = vadd.f32 %v5774_v22, %v5773_v63  ;;  %v5776_v18 = vpop.f32.mrb[82].mxu0 }
0x1bef   :  { %v5777_v62 = vpop.f32.mrb[83].mxu0 }
0x1bf0   :  { %v4627_v35 = vadd.f32 %v5775_v23, %v3793_v15  ;;  %v5778_v25 = vadd.f32 %v5777_v62, %v5776_v18  ;;  %v5885_v6 = vpop.f32.mrb[80].mxu1  ;;  %v9121_v23 = vpop.permute.xlu0 %3723  ;;  %v3859_v62 = vadd.f32 %v8651_v51, %v3614_v32 }
0x1bf1   :  { %v5886_v46 = vpop.f32.mrb[81].mxu1 }
0x1bf2   :  { %v4755_v7 = vmul.f32 0.01, %v4627_v35  ;;  %v4628_v10 = vadd.f32 %v5778_v25, %v3794_v9  ;;  %v5887_v11 = vadd.f32 %v5886_v46, %v5885_v6  ;;  %v5888_v5 = vpop.f32.mrb[82].mxu1  ;;  %vm4691_vm3 = vcmp.ge.f32.partialorder %v4627_v35, 0.0  ;;  %v9124_v46 = vpop.permute.xlu1 %3728 }
0x1bf3   :  { %v5889_v33 = vpop.f32.mrb[83].mxu1 }
0x1bf4   :  { %vm4692_vm12 = vcmp.ge.f32.partialorder %v4628_v10, 0.0  ;;  %v4756_v55 = vmul.f32 0.01, %v4628_v10  ;;  %v4659_v45 = vadd.f32 %v5887_v11, %v3857_v42  ;;  %v5779_v56 = vpop.f32.mrb[84].mxu0  ;;  %v5890_v44 = vadd.f32 %v5889_v33, %v5888_v5 }
0x1bf5   :  { %v5780_v3 = vpop.f32.mrb[85].mxu0  ;;  %v9113_v60 = vsel %vm4691_vm3, %v4627_v35, %v4755_v7  ;;  %v3860_v33 = vadd.f32 %v8661_v52, %v9087_v14  ;;  %v3798_v14 = vadd.f32 %v9095_v48, %v8683_v26 }
0x1bf6   :  { %v9115_v34 = vsel %vm4692_vm12, %v4628_v10, %v4756_v55  ;;  %v5781_v40 = vadd.f32 %v5780_v3, %v5779_v56  ;;  %v5782_v30 = vpop.f32.mrb[86].mxu0  ;;  %v4660_v21 = vadd.f32 %v5890_v44, %v3858_v12  ;;  %v4787_v16 = vmul.f32 0.01, %v4659_v45  ;;  %v9140_v3 = vpop.permute.xlu0 %3643 }
0x1bf7   :  { %v5783_v36 = vpop.f32.mrb[87].mxu0  ;;  %vm4723_vm13 = vcmp.ge.f32.partialorder %v4659_v45, 0.0  ;;  %v3797_v55 = vadd.f32 %v9093_v53, %v8675_v50 }
0x1bf8   :  { %v4629_v63 = vadd.f32 %v5781_v40, %v3795_v2  ;;  %v5784_v22 = vadd.f32 %v5783_v36, %v5782_v30  ;;  %v5891_v15 = vpop.f32.mrb[84].mxu1  ;;  %vm4724_vm14 = vcmp.ge.f32.partialorder %v4660_v21, 0.0  ;;  %v4788_v24 = vmul.f32 0.01, %v4660_v21 }
0x1bf9   :  { %v5892_v18 = vpop.f32.mrb[85].mxu1  ;;  %v9128_v7 = vsel %vm4723_vm13, %v4659_v45, %v4787_v16 }
0x1bfa   :  { %v4757_v9 = vmul.f32 0.01, %v4629_v63  ;;  %v4630_v35 = vadd.f32 %v5784_v22, %v3796_v19  ;;  %v5893_v25 = vadd.f32 %v5892_v18, %v5891_v15  ;;  %v5894_v6 = vpop.f32.mrb[86].mxu1  ;;  %v9126_v42 = vsel %vm4724_vm14, %v4660_v21, %v4788_v24  ;;  %v9146_v19 = vpop.permute.xlu1 %3648 }
0x1bfb   :  { %vm4693_vm15 = vcmp.ge.f32.partialorder %v4629_v63, 0.0  ;;  %v5895_v8 = vpop.f32.mrb[87].mxu1  ;;  %v3861_v22 = vadd.f32 %v9093_v53, %v8673_v27 }
0x1bfc   :  { %vm4694_vm0 = vcmp.ge.f32.partialorder %v4630_v35, 0.0  ;;  %v4758_v10 = vmul.f32 0.01, %v4630_v35  ;;  %v4661_v11 = vadd.f32 %v5893_v25, %v3859_v62  ;;  %v5785_v5 = vpop.f32.mrb[88].mxu0  ;;  %v5896_v51 = vadd.f32 %v5895_v8, %v5894_v6 }
0x1bfd   :  { %v5786_v32 = vpop.f32.mrb[89].mxu0  ;;  %v9136_v56 = vsel %vm4693_vm15, %v4629_v63, %v4757_v9 }
0x1bfe   :  { %v9138_v12 = vsel %vm4694_vm0, %v4630_v35, %v4758_v10  ;;  %v5787_v45 = vadd.f32 %v5786_v32, %v5785_v5  ;;  %v5788_v44 = vpop.f32.mrb[90].mxu0  ;;  %v4662_v2 = vadd.f32 %v5896_v51, %v3860_v33  ;;  %v4789_v30 = vmul.f32 0.01, %v4661_v11  ;;  %v9156_v5 = vpop.permute.xlu0 %3733 }
0x1bff   :  { %v5789_v40 = vpop.f32.mrb[91].mxu0  ;;  %vm4725_vm1 = vcmp.ge.f32.partialorder %v4661_v11, 0.0  ;;  %v3862_v10 = vadd.f32 %v9095_v48, %v8681_v43  ;;  %v3799_v51 = vadd.f32 %v8671_v41, %v9104_v61 }
0x1c00   :  { %v4631_v21 = vadd.f32 %v5787_v45, %v3797_v55  ;;  %v5790_v36 = vadd.f32 %v5789_v40, %v5788_v44  ;;  %v5897_v50 = vpop.f32.mrb[88].mxu1  ;;  %vm4726_vm4 = vcmp.ge.f32.partialorder %v4662_v2, 0.0  ;;  %v4790_v16 = vmul.f32 0.01, %v4662_v2  ;;  %v9166_v44 = vpop.permute.xlu1 %3738 }
0x1c01   :  { %v5898_v63 = vpop.f32.mrb[89].mxu1  ;;  %v9152_v35 = vsel %vm4725_vm1, %v4661_v11, %v4789_v30  ;;  %v3800_v40 = vadd.f32 %v8679_v1, %v9110_v38 }
0x1c02   :  { %v4759_v15 = vmul.f32 0.01, %v4631_v21  ;;  %v4632_v24 = vadd.f32 %v5790_v36, %v3798_v14  ;;  %v5899_v18 = vadd.f32 %v5898_v63, %v5897_v50  ;;  %v5900_v62 = vpop.f32.mrb[90].mxu1  ;;  %v9150_v9 = vsel %vm4726_vm4, %v4662_v2, %v4790_v16 }
0x1c03   :  { %vm4695_vm5 = vcmp.ge.f32.partialorder %v4631_v21, 0.0  ;;  %v5901_v26 = vpop.f32.mrb[91].mxu1  ;;  %v3863_v16 = vadd.f32 %v8667_v58, %v9104_v61 }
0x1c04   :  { %vm4696_vm8 = vcmp.ge.f32.partialorder %v4632_v24, 0.0  ;;  %v4760_v25 = vmul.f32 0.01, %v4632_v24  ;;  %v4663_v6 = vadd.f32 %v5899_v18, %v3861_v22  ;;  %v5791_v8 = vpop.f32.mrb[92].mxu0  ;;  %v5902_v27 = vadd.f32 %v5901_v26, %v5900_v62  ;;  %v9174_v18 = vpop.permute.xlu0 %3653 }
0x1c05   :  { %v5792_v53 = vpop.f32.mrb[93].mxu0  ;;  %v9162_v32 = vsel %vm4695_vm5, %v4631_v21, %v4759_v15  ;;  %v9182_v58 = vpop.permute.xlu1 %3658 }
0x1c06   :  { %v9164_v11 = vsel %vm4696_vm8, %v4632_v24, %v4760_v25  ;;  %v5793_v55 = vadd.f32 %v5792_v53, %v5791_v8  ;;  %v5794_v45 = vpop.f32.mrb[94].mxu0  ;;  %v4664_v2 = vadd.f32 %v5902_v27, %v3862_v10  ;;  %v4791_v14 = vmul.f32 0.01, %v4663_v6 }
0x1c07   :  { %v5795_v43 = vpop.f32.mrb[95].mxu0  ;;  %vm4727_vm9 = vcmp.ge.f32.partialorder %v4663_v6, 0.0  ;;  %v3864_v27 = vadd.f32 %v8677_v39, %v9110_v38  ;;  %v3802_v38 = vadd.f32 %v9146_v19, %v8700_v37 }
0x1c08   :  { %v4633_v30 = vadd.f32 %v5793_v55, %v3799_v51  ;;  %v5796_v36 = vadd.f32 %v5795_v43, %v5794_v45  ;;  %v5903_v41 = vpop.f32.mrb[92].mxu1  ;;  %vm4728_vm10 = vcmp.ge.f32.partialorder %v4664_v2, 0.0  ;;  %v4792_v21 = vmul.f32 0.01, %v4664_v2 }
0x1c09   :  { %v5904_v50 = vpop.f32.mrb[93].mxu1  ;;  %v9178_v26 = vsel %vm4727_vm9, %v4663_v6, %v4791_v14  ;;  %v3801_v55 = vadd.f32 %v9140_v3, %v8692_v29 }
0x1c0a   :  { %v4761_v63 = vmul.f32 0.01, %v4633_v30  ;;  %v4634_v22 = vadd.f32 %v5796_v36, %v3800_v40  ;;  %v5905_v15 = vadd.f32 %v5904_v50, %v5903_v41  ;;  %v5906_v24 = vpop.f32.mrb[94].mxu1  ;;  %v9176_v62 = vsel %vm4728_vm10, %v4664_v2, %v4792_v21 }
0x1c0b   :  { %vm4697_vm7 = vcmp.ge.f32.partialorder %v4633_v30, 0.0  ;;  %v5907_v1 = vpop.f32.mrb[95].mxu1 }
0x1c0c   :  { %vm4698_vm11 = vcmp.ge.f32.partialorder %v4634_v22, 0.0  ;;  %v4762_v25 = vmul.f32 0.01, %v4634_v22  ;;  %v4665_v8 = vadd.f32 %v5905_v15, %v3863_v16  ;;  %v5797_v10 = vpop.f32.mrb[96].mxu0  ;;  %v5908_v61 = vadd.f32 %v5907_v1, %v5906_v24  ;;  %v9196_v16 = vpop.permute.xlu0 %3743 }
0x1c0d   :  { %v5798_v53 = vpop.f32.mrb[97].mxu0  ;;  %v9188_v45 = vsel %vm4697_vm7, %v4633_v30, %v4761_v63  ;;  %v3865_v63 = vadd.f32 %v9140_v3, %v8690_v0 }
0x1c0e   :  { %v9190_v6 = vsel %vm4698_vm11, %v4634_v22, %v4762_v25  ;;  %v5799_v2 = vadd.f32 %v5798_v53, %v5797_v10  ;;  %v5800_v43 = vpop.f32.mrb[98].mxu0  ;;  %v4666_v40 = vadd.f32 %v5908_v61, %v3864_v27  ;;  %v4793_v36 = vmul.f32 0.01, %v4665_v8  ;;  %v9200_v25 = vpop.permute.xlu1 %3748 }
0x1c0f   :  { %v5801_v14 = vpop.f32.mrb[99].mxu0  ;;  %vm4729_vm3 = vcmp.ge.f32.partialorder %v4665_v8, 0.0 }
0x1c10   :  { %v4635_v41 = vadd.f32 %v5799_v2, %v3801_v55  ;;  %v5802_v21 = vadd.f32 %v5801_v14, %v5800_v43  ;;  %v5909_v50 = vpop.f32.mrb[96].mxu1  ;;  %vm4730_vm12 = vcmp.ge.f32.partialorder %v4666_v40, 0.0  ;;  %v4794_v29 = vmul.f32 0.01, %v4666_v40  ;;  %v9551_v14 = vld [vmem:[#allocation18_spill] sm:$0xff] }
0x1c11   :  { %v5910_v30 = vpop.f32.mrb[97].mxu1  ;;  %v9204_v27 = vsel %vm4729_vm3, %v4665_v8, %v4793_v36  ;;  %v3866_v2 = vadd.f32 %v9146_v19, %v8698_v47  ;;  %v9552_v19 = vld [vmem:[#allocation20_spill] sm:$0xff] }
0x1c12   :  { %v4763_v22 = vmul.f32 0.01, %v4635_v41  ;;  %v4636_v15 = vadd.f32 %v5802_v21, %v3802_v38  ;;  %v5911_v24 = vadd.f32 %v5910_v30, %v5909_v50  ;;  %v5912_v1 = vpop.f32.mrb[98].mxu1  ;;  %v9202_v37 = vsel %vm4730_vm12, %v4666_v40, %v4794_v29  ;;  %v3664_v50 = vpop.permute.xlu0 %3663 }
0x1c13   :  { %vm4699_vm13 = vcmp.ge.f32.partialorder %v4635_v41, 0.0  ;;  %v5913_v10 = vpop.f32.mrb[99].mxu1  ;;  %v3803_v40 = vadd.f32 %v9551_v14, %v9174_v18  ;;  %v3669_v14 = vpop.permute.xlu1 %3668 }
0x1c14   :  { %vm4700_vm14 = vcmp.ge.f32.partialorder %v4636_v15, 0.0  ;;  %v4764_v61 = vmul.f32 0.01, %v4636_v15  ;;  %v4667_v53 = vadd.f32 %v5911_v24, %v3865_v63  ;;  %v5803_v55 = vpop.f32.mrb[100].mxu0  ;;  %v5914_v0 = vadd.f32 %v5913_v10, %v5912_v1 }
0x1c15   :  { %v5804_v3 = vpop.f32.mrb[101].mxu0  ;;  %v9212_v38 = vsel %vm4699_vm13, %v4635_v41, %v4763_v22  ;;  %v3804_v63 = vadd.f32 %v9552_v19, %v9182_v58 }
0x1c16   :  { %v9214_v21 = vsel %vm4700_vm14, %v4636_v15, %v4764_v61  ;;  %v5805_v8 = vadd.f32 %v5804_v3, %v5803_v55  ;;  %v5806_v36 = vpop.f32.mrb[102].mxu0  ;;  %v4668_v29 = vadd.f32 %v5914_v0, %v3866_v2  ;;  %v4795_v24 = vmul.f32 0.01, %v4667_v53  ;;  %v9553_v15 = vld [vmem:[#allocation17_spill] sm:$0xff]  ;;  %v9228_v48 = vpop.permute.xlu0 %3753 }
0x1c17   :  { %v5807_v30 = vpop.f32.mrb[103].mxu0  ;;  %vm4731_vm15 = vcmp.ge.f32.partialorder %v4667_v53, 0.0  ;;  %v3867_v61 = vadd.f32 %v9553_v15, %v9174_v18  ;;  %9555 = vst [vmem:[#allocation18_spill] sm:$0xff] %v9228_v48 }
0x1c18   :  { %v4637_v1 = vadd.f32 %v5805_v8, %v3803_v40  ;;  %v5808_v10 = vadd.f32 %v5807_v30, %v5806_v36  ;;  %v5915_v43 = vpop.f32.mrb[100].mxu1  ;;  %vm4732_vm0 = vcmp.ge.f32.partialorder %v4668_v29, 0.0  ;;  %v4796_v41 = vmul.f32 0.01, %v4668_v29  ;;  %v9554_v30 = vld [vmem:[#allocation19_spill] sm:$0xff] }
0x1c19   :  { %v5916_v22 = vpop.f32.mrb[101].mxu1  ;;  %v9224_v39 = vsel %vm4731_vm15, %v4667_v53, %v4795_v24  ;;  %v3868_v51 = vadd.f32 %v9554_v30, %v9182_v58 }
0x1c1a   :  { %v4765_v55 = vmul.f32 0.01, %v4637_v1  ;;  %v4638_v2 = vadd.f32 %v5808_v10, %v3804_v63  ;;  %v5917_v0 = vadd.f32 %v5916_v22, %v5915_v43  ;;  %v5918_v3 = vpop.f32.mrb[102].mxu1  ;;  %v9222_v47 = vsel %vm4732_vm0, %v4668_v29, %v4796_v41  ;;  %v9556_v29 = vld [vmem:[#allocation24_spill] sm:$0xff]  ;;  %v9237_v22 = vpop.permute.xlu1 %3758 }
0x1c1b   :  { %vm4701_vm1 = vcmp.ge.f32.partialorder %v4637_v1, 0.0  ;;  %v5919_v19 = vpop.f32.mrb[103].mxu1  ;;  %v3805_v63 = vadd.f32 %v3664_v50, %v9556_v29  ;;  %9558 = vst [vmem:[#allocation17_spill] sm:$0xff] %v9237_v22 }
0x1c1c   :  { %vm4702_vm4 = vcmp.ge.f32.partialorder %v4638_v2, 0.0  ;;  %v4766_v40 = vmul.f32 0.01, %v4638_v2  ;;  %v4669_v8 = vadd.f32 %v5917_v0, %v3867_v61  ;;  %v5809_v36 = vpop.f32.mrb[104].mxu0  ;;  %v5920_v18 = vadd.f32 %v5919_v19, %v5918_v3  ;;  %v9559_v3 = vld [vmem:[#allocation28_spill] sm:$0xff] }
0x1c1d   :  { %v5810_v15 = vpop.f32.mrb[105].mxu0  ;;  %v9233_v10 = vsel %vm4701_vm1, %v4637_v1, %v4765_v55  ;;  %v3806_v19 = vadd.f32 %v3669_v14, %v9559_v3 }
0x1c1e   :  { %9557 = vst [vmem:[#allocation20_spill] sm:$0xff] %v9233_v10  ;;  %v9235_v53 = vsel %vm4702_vm4, %v4638_v2, %v4766_v40  ;;  %v5811_v24 = vadd.f32 %v5810_v15, %v5809_v36  ;;  %v5812_v41 = vpop.f32.mrb[106].mxu0  ;;  %v4670_v61 = vadd.f32 %v5920_v18, %v3868_v51  ;;  %v4797_v30 = vmul.f32 0.01, %v4669_v8  ;;  %v9560_v2 = vld [vmem:[#allocation23_spill] sm:$0xff]  ;;  %v3674_v18 = vpop.permute.xlu0 %3673 }
0x1c1f   :  { %v5813_v0 = vpop.f32.mrb[107].mxu0  ;;  %vm4733_vm5 = vcmp.ge.f32.partialorder %v4669_v8, 0.0  ;;  %v3869_v40 = vadd.f32 %v3664_v50, %v9560_v2  ;;  %v3679_v48 = vpop.permute.xlu1 %3678 }
0x1c20   :  { %v4639_v33 = vadd.f32 %v5811_v24, %v3805_v63  ;;  %v5814_v43 = vadd.f32 %v5813_v0, %v5812_v41  ;;  %v5921_v52 = vpop.f32.mrb[104].mxu1  ;;  %vm4734_vm8 = vcmp.ge.f32.partialorder %v4670_v61, 0.0  ;;  %v4798_v1 = vmul.f32 0.01, %v4670_v61  ;;  %v9561_v0 = vld [vmem:[#allocation27_spill] sm:$0xff] }
0x1c21   :  { %v5922_v55 = vpop.f32.mrb[105].mxu1  ;;  %v9245_v3 = vsel %vm4733_vm5, %v4669_v8, %v4797_v30  ;;  %v3870_v57 = vadd.f32 %v3669_v14, %v9561_v0  ;;  %v9565_v14 = vld [vmem:[#allocation26_spill] sm:$0xff] }
0x1c22   :  { %v4767_v36 = vmul.f32 0.01, %v4639_v33  ;;  %v4640_v15 = vadd.f32 %v5814_v43, %v3806_v19  ;;  %v5923_v29 = vadd.f32 %v5922_v55, %v5921_v52  ;;  %v5924_v51 = vpop.f32.mrb[106].mxu1  ;;  %v9243_v49 = vsel %vm4734_vm8, %v4670_v61, %v4798_v1  ;;  %v9562_v43 = vld [vmem:[#allocation22_spill] sm:$0xff] }
0x1c23   :  { %vm4703_vm9 = vcmp.ge.f32.partialorder %v4639_v33, 0.0  ;;  %v5925_v58 = vpop.f32.mrb[107].mxu1  ;;  %v3807_v19 = vadd.f32 %v9562_v43, %v3674_v18 }
0x1c24   :  { %vm4704_vm10 = vcmp.ge.f32.partialorder %v4640_v15, 0.0  ;;  %v4768_v63 = vmul.f32 0.01, %v4640_v15  ;;  %v4671_v24 = vadd.f32 %v5923_v29, %v3869_v40  ;;  %v5815_v41 = vpop.f32.mrb[108].mxu0  ;;  %v5926_v22 = vadd.f32 %v5925_v58, %v5924_v51 }
0x1c25   :  { %v5816_v50 = vpop.f32.mrb[109].mxu0  ;;  %v9251_v61 = vsel %vm4703_vm9, %v4639_v33, %v4767_v36  ;;  %v3808_v29 = vadd.f32 %v9565_v14, %v3679_v48  ;;  %v9566_v36 = vld [vmem:[#allocation21_spill] sm:$0xff] }
0x1c26   :  { %9563 = vst [vmem:[#allocation19_spill] sm:$0xff] %v9251_v61  ;;  %v9253_v1 = vsel %vm4704_vm10, %v4640_v15, %v4768_v63  ;;  %v5817_v8 = vadd.f32 %v5816_v50, %v5815_v41  ;;  %v5818_v30 = vpop.f32.mrb[110].mxu0  ;;  %v4672_v55 = vadd.f32 %v5926_v22, %v3870_v57  ;;  %v4799_v58 = vmul.f32 0.01, %v4671_v24 }
0x1c27   :  { %9564 = vst [vmem:[#allocation24_spill] sm:$0xff] %v9253_v1  ;;  %v5819_v2 = vpop.f32.mrb[111].mxu0  ;;  %vm4735_vm7 = vcmp.ge.f32.partialorder %v4671_v24, 0.0  ;;  %v3871_v15 = vadd.f32 %v9566_v36, %v3674_v18 }
0x1c28   :  { %v4641_v51 = vadd.f32 %v5817_v8, %v3807_v19  ;;  %v5820_v0 = vadd.f32 %v5819_v2, %v5818_v30  ;;  %v5927_v10 = vpop.f32.mrb[108].mxu1  ;;  %vm4736_vm11 = vcmp.ge.f32.partialorder %v4672_v55, 0.0  ;;  %v4800_v43 = vmul.f32 0.01, %v4672_v55  ;;  %v9567_v2 = vld [vmem:[#allocation25_spill] sm:$0xff] }
0x1c29   :  { %v5928_v33 = vpop.f32.mrb[109].mxu1  ;;  %v9261_v52 = vsel %vm4735_vm7, %v4671_v24, %v4799_v58  ;;  %v3872_v14 = vadd.f32 %v9567_v2, %v3679_v48 }
0x1c2a   :  { %v4769_v63 = vmul.f32 0.01, %v4641_v51  ;;  %v4642_v41 = vadd.f32 %v5820_v0, %v3808_v29  ;;  %v5929_v50 = vadd.f32 %v5928_v33, %v5927_v10  ;;  %v5930_v57 = vpop.f32.mrb[110].mxu1  ;;  %v9259_v22 = vsel %vm4736_vm11, %v4672_v55, %v4800_v43  ;;  %v9568_v29 = vld [vmem:[#allocation32_spill] sm:$0xff] }
0x1c2b   :  { %vm4705_vm3 = vcmp.ge.f32.partialorder %v4641_v51, 0.0  ;;  %v5931_v40 = vpop.f32.mrb[111].mxu1  ;;  %v3809_v10 = vadd.f32 %v9079_v31, %v9568_v29 }
0x1c2c   :  { %vm4706_vm12 = vcmp.ge.f32.partialorder %v4642_v41, 0.0  ;;  %v4770_v19 = vmul.f32 0.01, %v4642_v41  ;;  %v4673_v8 = vadd.f32 %v5929_v50, %v3871_v15  ;;  %v5821_v30 = vpop.f32.mrb[112].mxu0  ;;  %v5932_v61 = vadd.f32 %v5931_v40, %v5930_v57  ;;  %v9571_v40 = vld [vmem:[#allocation36_spill] sm:$0xff] }
0x1c2d   :  { %v5822_v1 = vpop.f32.mrb[113].mxu0  ;;  %v9268_v55 = vsel %vm4705_vm3, %v4641_v51, %v4769_v63  ;;  %v3810_v15 = vadd.f32 %v9081_v54, %v9571_v40 }
0x1c2e   :  { %9569 = vst [vmem:[#allocation28_spill] sm:$0xff] %v9268_v55  ;;  %v9270_v0 = vsel %vm4706_vm12, %v4642_v41, %v4770_v19  ;;  %v5823_v24 = vadd.f32 %v5822_v1, %v5821_v30  ;;  %v5824_v58 = vpop.f32.mrb[114].mxu0  ;;  %v4801_v43 = vmul.f32 0.01, %v4673_v8  ;;  %v4674_v33 = vadd.f32 %v5932_v61, %v3872_v14  ;;  %v9572_v41 = vld [vmem:[#allocation31_spill] sm:$0xff] }
0x1c2f   :  { %9570 = vst [vmem:[#allocation23_spill] sm:$0xff] %v9270_v0  ;;  %v5825_v36 = vpop.f32.mrb[115].mxu0  ;;  %vm4737_vm13 = vcmp.ge.f32.partialorder %v4673_v8, 0.0  ;;  %v3873_v1 = vadd.f32 %v9079_v31, %v9572_v41  ;;  %v9573_v19 = vld [vmem:[#allocation35_spill] sm:$0xff] }
0x1c30   :  { %v4643_v50 = vadd.f32 %v5823_v24, %v3809_v10  ;;  %v5826_v57 = vadd.f32 %v5825_v36, %v5824_v58  ;;  %v5933_v2 = vpop.f32.mrb[112].mxu1  ;;  %vm4738_vm14 = vcmp.ge.f32.partialorder %v4674_v33, 0.0  ;;  %v4802_v51 = vmul.f32 0.01, %v4674_v33 }
0x1c31   :  { %v5934_v63 = vpop.f32.mrb[113].mxu1  ;;  %v3874_v61 = vadd.f32 %v9081_v54, %v9573_v19  ;;  %v9280_v48 = vsel %vm4737_vm13, %v4673_v8, %v4801_v43  ;;  %v9576_v54 = vld [vmem:[#allocation34_spill] sm:$0xff]  ;;  %v9577_v8 = vld [vmem:[#allocation29_spill] sm:$0xff] }
0x1c32   :  { %v4644_v30 = vadd.f32 %v5826_v57, %v3810_v15  ;;  %v5935_v14 = vadd.f32 %v5934_v63, %v5933_v2  ;;  %v5936_v29 = vpop.f32.mrb[114].mxu1  ;;  %9574 = vst [vmem:[#allocation27_spill] sm:$0xff] %v9280_v48  ;;  %v9282_v18 = vsel %vm4738_vm14, %v4674_v33, %v4802_v51  ;;  %vm4707_vm15 = vcmp.ge.f32.partialorder %v4643_v50, 0.0  ;;  %v9578_v48 = vld [vmem:[#allocation33_spill] sm:$0xff] }
0x1c33   :  { %9575 = vst [vmem:[#allocation22_spill] sm:$0xff] %v9282_v18  ;;  %v4771_v10 = vmul.f32 0.01, %v4643_v50  ;;  %v5937_v24 = vpop.f32.mrb[115].mxu1  ;;  %v3812_v15 = vadd.f32 %v9576_v54, %v9085_v17  ;;  %v3811_v43 = vadd.f32 %v9577_v8, %v9083_v4  ;;  %v3876_v8 = vadd.f32 %v9578_v48, %v9085_v17 }
0x1c34   :  { %vm4708_vm0 = vcmp.ge.f32.partialorder %v4644_v30, 0.0  ;;  %v4772_v58 = vmul.f32 0.01, %v4644_v30  ;;  %v4675_v36 = vadd.f32 %v5935_v14, %v3873_v1  ;;  %v5938_v40 = vadd.f32 %v5937_v24, %v5936_v29  ;;  %v5827_v55 = vpop.f32.mrb[116].mxu0 }
0x1c35   :  { %v5828_v0 = vpop.f32.mrb[117].mxu0  ;;  %v4835_v41 = vsel %vm4707_vm15, %v4643_v50, %v4771_v10  ;;  %v9580_v17 = vpack.c.bf16 %v9115_v34, %v9113_v60 }
0x1c36   :  { %v4676_v33 = vadd.f32 %v5938_v40, %v3874_v61  ;;  %v5829_v57 = vadd.f32 %v5828_v0, %v5827_v55  ;;  %v5830_v2 = vpop.f32.mrb[118].mxu0  ;;  %vm4739_vm1 = vcmp.ge.f32.partialorder %v4675_v36, 0.0  ;;  %v4803_v51 = vmul.f32 0.01, %v4675_v36  ;;  %v9579_v55 = vld [vmem:[#allocation30_spill] sm:$0xff] }
0x1c37   :  { %v5831_v63 = vpop.f32.mrb[119].mxu0  ;;  %v4836_v1 = vsel %vm4708_vm0, %v4644_v30, %v4772_v58  ;;  %v3875_v0 = vadd.f32 %v9579_v55, %v9083_v4 }
0x1c38   :  { %vm4740_vm4 = vcmp.ge.f32.partialorder %v4676_v33, 0.0  ;;  %v4804_v19 = vmul.f32 0.01, %v4676_v33  ;;  %v4645_v14 = vadd.f32 %v5829_v57, %v3811_v43  ;;  %v5832_v29 = vadd.f32 %v5831_v63, %v5830_v2  ;;  %v5939_v24 = vpop.f32.mrb[116].mxu1  ;;  %v9581_v2 = vld [vmem:[#allocation44_spill] sm:$0xff] }
0x1c39   :  { %v5940_v31 = vpop.f32.mrb[117].mxu1  ;;  %v4899_v54 = vpack.c.bf16 %v4836_v1, %v4835_v41  ;;  %v4867_v10 = vsel %vm4739_vm1, %v4675_v36, %v4803_v51  ;;  %v3814_v63 = vadd.f32 %v9091_v59, %v9581_v2  ;;  %v9582_v41 = vld [vmem:[#allocation39_spill] sm:$0xff] }
0x1c3a   :  { %v4646_v61 = vadd.f32 %v5832_v29, %v3812_v15  ;;  %v5941_v40 = vadd.f32 %v5940_v31, %v5939_v24  ;;  %v5942_v18 = vpop.f32.mrb[118].mxu1  ;;  %vm4709_vm5 = vcmp.ge.f32.partialorder %v4645_v14, 0.0  ;;  %v4773_v50 = vmul.f32 0.01, %v4645_v14 }
0x1c3b   :  { %5981 = vmatprep.subr.bf16.mxu0 %v4899_v54  ;;  %v5943_v30 = vpop.f32.mrb[119].mxu1  ;;  %v4868_v58 = vsel %vm4740_vm4, %v4676_v33, %v4804_v19  ;;  %v3813_v1 = vadd.f32 %v9089_v28, %v9582_v41  ;;  %v9583_v54 = vpack.c.bf16 %v9126_v42, %v9128_v7  ;;  %v9587_v41 = vld [vmem:[#allocation41_spill] sm:$0xff] }
0x1c3c   :  { %vm4710_vm8 = vcmp.ge.f32.partialorder %v4646_v61, 0.0  ;;  %v4774_v43 = vmul.f32 0.01, %v4646_v61  ;;  %v4677_v57 = vadd.f32 %v5941_v40, %v3875_v0  ;;  %5982 = vmatpush3.bf16.msra.mxu0 %v9580_v17  ;;  %v5944_v48 = vadd.f32 %v5943_v30, %v5942_v18  ;;  %v5833_v4 = vpop.f32.mrb[120].mxu0  ;;  %v9584_v30 = vld [vmem:[#allocation43_spill] sm:$0xff] }
0x1c3d   :  { %v5834_v15 = vpop.f32.mrb[121].mxu0  ;;  %v5020_v31 = vpack.c.bf16 %v4868_v58, %v4867_v10  ;;  %v4837_v60 = vsel %vm4709_vm5, %v4645_v14, %v4773_v50  ;;  %v3878_v10 = vadd.f32 %v9091_v59, %v9584_v30  ;;  %v9585_v58 = vld [vmem:[#allocation40_spill] sm:$0xff]  ;;  %v9586_v59 = vpack.c.bf16 %v9138_v12, %v9136_v56  ;;  %v9590_v30 = vld [vmem:[#allocation42_spill] sm:$0xff] }
0x1c3e   :  { %v4678_v36 = vadd.f32 %v5944_v48, %v3876_v8  ;;  %v5835_v51 = vadd.f32 %v5834_v15, %v5833_v4  ;;  %v5836_v33 = vpop.f32.mrb[122].mxu0  ;;  %vm4741_vm9 = vcmp.ge.f32.partialorder %v4677_v57, 0.0  ;;  %v4805_v19 = vmul.f32 0.01, %v4677_v57 }
0x1c3f   :  { %6021 = vmatprep.subr.bf16.mxu1 %v5020_v31  ;;  %v5837_v29 = vpop.f32.mrb[123].mxu0  ;;  %v4838_v34 = vsel %vm4710_vm8, %v4646_v61, %v4774_v43  ;;  %v3877_v17 = vadd.f32 %v9089_v28, %v9585_v58  ;;  %v9591_v58 = vld [vmem:[#allocation38_spill] sm:$0xff] }
0x1c40   :  { %vm4742_vm10 = vcmp.ge.f32.partialorder %v4678_v36, 0.0  ;;  %v4806_v18 = vmul.f32 0.01, %v4678_v36  ;;  %v4647_v24 = vadd.f32 %v5835_v51, %v3813_v1  ;;  %6022 = vmatpush3.bf16.msra.mxu1 %v9583_v54  ;;  %v5838_v55 = vadd.f32 %v5837_v29, %v5836_v33  ;;  %v5945_v0 = vpop.f32.mrb[120].mxu1  ;;  %v9588_v51 = vld [vmem:[#allocation37_spill] sm:$0xff] }
0x1c41   :  { %v5946_v8 = vpop.f32.mrb[121].mxu1  ;;  %v4900_v40 = vpack.c.bf16 %v4838_v34, %v4837_v60  ;;  %v4869_v42 = vsel %vm4741_vm9, %v4677_v57, %v4805_v19  ;;  %v3816_v1 = vadd.f32 %v9587_v41, %v9100_v20  ;;  %v3815_v33 = vadd.f32 %v9588_v51, %v9097_v13 }
0x1c42   :  { %v4648_v14 = vadd.f32 %v5838_v55, %v3814_v63  ;;  %v5947_v50 = vadd.f32 %v5946_v8, %v5945_v0  ;;  %v5948_v61 = vpop.f32.mrb[122].mxu1  ;;  %vm4711_vm7 = vcmp.ge.f32.partialorder %v4647_v24, 0.0  ;;  %v4775_v43 = vmul.f32 0.01, %v4647_v24 }
0x1c43   :  { %5983 = vmatprep.subr.bf16.mxu0 %v4900_v40  ;;  %v5949_v48 = vpop.f32.mrb[123].mxu1  ;;  %v4870_v7 = vsel %vm4742_vm10, %v4678_v36, %v4806_v18  ;;  %v9589_v54 = vpack.c.bf16 %v9150_v9, %v9152_v35 }
0x1c44   :  { %vm4712_vm11 = vcmp.ge.f32.partialorder %v4648_v14, 0.0  ;;  %v4776_v4 = vmul.f32 0.01, %v4648_v14  ;;  %v4679_v15 = vadd.f32 %v5947_v50, %v3877_v17  ;;  %5984 = vmatpush3.bf16.msra.mxu0 %v9586_v59  ;;  %v5950_v31 = vadd.f32 %v5949_v48, %v5948_v61  ;;  %v5839_v28 = vpop.f32.mrb[124].mxu0 }
0x1c45   :  { %v5840_v2 = vpop.f32.mrb[125].mxu0  ;;  %v5021_v63 = vpack.c.bf16 %v4870_v7, %v4869_v42  ;;  %v4839_v56 = vsel %vm4711_vm7, %v4647_v24, %v4775_v43  ;;  %v3879_v17 = vadd.f32 %v9591_v58, %v9097_v13 }
0x1c46   :  { %v4680_v57 = vadd.f32 %v5950_v31, %v3878_v10  ;;  %v5841_v19 = vadd.f32 %v5840_v2, %v5839_v28  ;;  %v5842_v36 = vpop.f32.mrb[126].mxu0  ;;  %vm4743_vm3 = vcmp.ge.f32.partialorder %v4679_v15, 0.0  ;;  %v4807_v29 = vmul.f32 0.01, %v4679_v15  ;;  %v9593_v31 = vld [vmem:[#allocation52_spill] sm:$0xff]  ;;  %v9594_v2 = vld [vmem:[#allocation47_spill] sm:$0xff] }
0x1c47   :  { %6023 = vmatprep.subr.bf16.mxu1 %v5021_v63  ;;  %v5843_v60 = vpop.f32.mrb[127].mxu0  ;;  %v4840_v12 = vsel %vm4712_vm11, %v4648_v14, %v4776_v4  ;;  %v3880_v10 = vadd.f32 %v9590_v30, %v9100_v20  ;;  %v9592_v20 = vpack.c.bf16 %v9164_v11, %v9162_v32  ;;  %v3818_v28 = vadd.f32 %v9124_v46, %v9593_v31 }
0x1c48   :  { %vm4744_vm12 = vcmp.ge.f32.partialorder %v4680_v57, 0.0  ;;  %v4808_v34 = vmul.f32 0.01, %v4680_v57  ;;  %v4649_v18 = vadd.f32 %v5841_v19, %v3815_v33  ;;  %6024 = vmatpush3.bf16.msra.mxu1 %v9589_v54  ;;  %v5844_v55 = vadd.f32 %v5843_v60, %v5842_v36  ;;  %v5951_v0 = vpop.f32.mrb[124].mxu1 }
0x1c49   :  { %v5952_v8 = vpop.f32.mrb[125].mxu1  ;;  %v4901_v40 = vpack.c.bf16 %v4840_v12, %v4839_v56  ;;  %v4871_v9 = vsel %vm4743_vm3, %v4679_v15, %v4807_v29  ;;  %v3817_v63 = vadd.f32 %v9121_v23, %v9594_v2  ;;  %v9595_v36 = vpack.c.bf16 %v9176_v62, %v9178_v26 }
0x1c4a   :  { %v4650_v24 = vadd.f32 %v5844_v55, %v3816_v1  ;;  %v5953_v50 = vadd.f32 %v5952_v8, %v5951_v0  ;;  %v5954_v14 = vpop.f32.mrb[126].mxu1  ;;  %vm4713_vm13 = vcmp.ge.f32.partialorder %v4649_v18, 0.0  ;;  %v4777_v61 = vmul.f32 0.01, %v4649_v18  ;;  %v9597_v55 = vld [vmem:[#allocation48_spill] sm:$0xff] }
0x1c4b   :  { %5985 = vmatprep.subr.bf16.mxu0 %v4901_v40  ;;  %v5955_v43 = vpop.f32.mrb[127].mxu1  ;;  %v4872_v35 = vsel %vm4744_vm12, %v4680_v57, %v4808_v34  ;;  %v9596_v34 = vld [vmem:[#allocation51_spill] sm:$0xff]  ;;  %v3881_v0 = vadd.f32 %v9121_v23, %v9597_v55  ;;  %v9601_v31 = vpack.c.bf16 %v9202_v37, %v9204_v27 }
0x1c4c   :  { %vm4714_vm14 = vcmp.ge.f32.partialorder %v4650_v24, 0.0  ;;  %v4778_v48 = vmul.f32 0.01, %v4650_v24  ;;  %v4681_v42 = vadd.f32 %v5953_v50, %v3879_v17  ;;  %5986 = vmatpush3.bf16.msra.mxu0 %v9592_v20  ;;  %v5956_v7 = vadd.f32 %v5955_v43, %v5954_v14  ;;  %v5845_v13 = vpop.f32.mrb[128].mxu0 }
0x1c4d   :  { %v5846_v4 = vpop.f32.mrb[129].mxu0  ;;  %v5022_v59 = vpack.c.bf16 %v4872_v35, %v4871_v9  ;;  %v4841_v32 = vsel %vm4713_vm13, %v4649_v18, %v4777_v61  ;;  %v3882_v54 = vadd.f32 %v9124_v46, %v9596_v34  ;;  %v9598_v46 = vpack.c.bf16 %v9190_v6, %v9188_v45  ;;  %v9599_v61 = vld [vmem:[#allocation49_spill] sm:$0xff] }
0x1c4e   :  { %v4682_v15 = vadd.f32 %v5956_v7, %v3880_v10  ;;  %v5847_v41 = vadd.f32 %v5846_v4, %v5845_v13  ;;  %v5848_v1 = vpop.f32.mrb[130].mxu0  ;;  %vm4745_vm15 = vcmp.ge.f32.partialorder %v4681_v42, 0.0  ;;  %v4809_v51 = vmul.f32 0.01, %v4681_v42  ;;  %v9600_v9 = vld [vmem:[#allocation45_spill] sm:$0xff] }
0x1c4f   :  { %6025 = vmatprep.subr.bf16.mxu1 %v5022_v59  ;;  %v5849_v33 = vpop.f32.mrb[131].mxu0  ;;  %v4842_v11 = vsel %vm4714_vm14, %v4650_v24, %v4778_v48  ;;  %v3820_v43 = vadd.f32 %v9599_v61, %v9166_v44  ;;  %v3819_v35 = vadd.f32 %v9600_v9, %v9156_v5 }
0x1c50   :  { %vm4746_vm0 = vcmp.ge.f32.partialorder %v4682_v15, 0.0  ;;  %v4810_v57 = vmul.f32 0.01, %v4682_v15  ;;  %v4651_v19 = vadd.f32 %v5847_v41, %v3817_v63  ;;  %6026 = vmatpush3.bf16.msra.mxu1 %v9595_v36  ;;  %v5850_v29 = vadd.f32 %v5849_v33, %v5848_v1  ;;  %v5957_v60 = vpop.f32.mrb[128].mxu1  ;;  %v9602_v41 = vld [vmem:[#allocation50_spill] sm:$0xff] }
0x1c51   :  { %v5958_v56 = vpop.f32.mrb[129].mxu1  ;;  %v4902_v12 = vpack.c.bf16 %v4842_v11, %v4841_v32  ;;  %v4873_v62 = vsel %vm4745_vm15, %v4681_v42, %v4809_v51  ;;  %v3884_v1 = vadd.f32 %v9602_v41, %v9166_v44  ;;  %v9603_v51 = vld [vmem:[#allocation46_spill] sm:$0xff]  ;;  %v9604_v44 = vpack.c.bf16 %v9214_v21, %v9212_v38  ;;  %v9615_v41 = vld [vmem:[#allocation53_spill] sm:$0xff] }
0x1c52   :  { %v4652_v18 = vadd.f32 %v5850_v29, %v3818_v28  ;;  %v5959_v8 = vadd.f32 %v5958_v56, %v5957_v60  ;;  %v5960_v40 = vpop.f32.mrb[130].mxu1  ;;  %vm4715_vm1 = vcmp.ge.f32.partialorder %v4651_v19, 0.0  ;;  %v4779_v30 = vmul.f32 0.01, %v4651_v19 }
0x1c53   :  { %5987 = vmatprep.subr.bf16.mxu0 %v4902_v12  ;;  %v5961_v10 = vpop.f32.mrb[131].mxu1  ;;  %v4874_v26 = vsel %vm4746_vm0, %v4682_v15, %v4810_v57  ;;  %v3883_v33 = vadd.f32 %v9603_v51, %v9156_v5 }
0x1c54   :  { %vm4716_vm4 = vcmp.ge.f32.partialorder %v4652_v18, 0.0  ;;  %v4780_v58 = vmul.f32 0.01, %v4652_v18  ;;  %v4683_v17 = vadd.f32 %v5959_v8, %v3881_v0  ;;  %5988 = vmatpush3.bf16.msra.mxu0 %v9598_v46  ;;  %v5962_v24 = vadd.f32 %v5961_v10, %v5960_v40  ;;  %v5851_v23 = vpop.f32.mrb[132].mxu0  ;;  %v9606_v0 = vld [vmem:[#allocation55_spill] sm:$0xff] }
0x1c55   :  { %v5852_v50 = vpop.f32.mrb[133].mxu0  ;;  %v5023_v14 = vpack.c.bf16 %v4874_v26, %v4873_v62  ;;  %v4843_v45 = vsel %vm4715_vm1, %v4651_v19, %v4779_v30 }
0x1c56   :  { %v4684_v48 = vadd.f32 %v5962_v24, %v3882_v54  ;;  %v5853_v42 = vadd.f32 %v5852_v50, %v5851_v23  ;;  %v5854_v20 = vpop.f32.mrb[134].mxu0  ;;  %vm4747_vm5 = vcmp.ge.f32.partialorder %v4683_v17, 0.0  ;;  %v4811_v7 = vmul.f32 0.01, %v4683_v17  ;;  %v9605_v54 = vld [vmem:[#allocation60_spill] sm:$0xff] }
0x1c57   :  { %6027 = vmatprep.subr.bf16.mxu1 %v5023_v14  ;;  %v5855_v13 = vpop.f32.mrb[135].mxu0  ;;  %v4844_v6 = vsel %vm4716_vm4, %v4652_v18, %v4780_v58  ;;  %v3822_v55 = vadd.f32 %v9200_v25, %v9605_v54  ;;  %v3821_v18 = vadd.f32 %v9196_v16, %v9606_v0  ;;  %v9608_v14 = vld [vmem:[#allocation59_spill] sm:$0xff] }
0x1c58   :  { %vm4748_vm8 = vcmp.ge.f32.partialorder %v4684_v48, 0.0  ;;  %v4812_v4 = vmul.f32 0.01, %v4684_v48  ;;  %v4653_v59 = vadd.f32 %v5853_v42, %v3819_v35  ;;  %6028 = vmatpush3.bf16.msra.mxu1 %v9601_v31  ;;  %v5856_v28 = vadd.f32 %v5855_v13, %v5854_v20  ;;  %v5963_v2 = vpop.f32.mrb[132].mxu1 }
0x1c59   :  { %v5964_v63 = vpop.f32.mrb[133].mxu1  ;;  %v4903_v15 = vpack.c.bf16 %v4844_v6, %v4843_v45  ;;  %v4875_v37 = vsel %vm4747_vm5, %v4683_v17, %v4811_v7  ;;  %v9607_v17 = vpack.c.bf16 %v9222_v47, %v9224_v39  ;;  %v3886_v61 = vadd.f32 %v9200_v25, %v9608_v14  ;;  %v9610_v6 = vld [vmem:[#allocation20_spill] sm:$0xff] }
0x1c5a   :  { %v4654_v32 = vadd.f32 %v5856_v28, %v3820_v43  ;;  %v5965_v11 = vadd.f32 %v5964_v63, %v5963_v2  ;;  %v5966_v57 = vpop.f32.mrb[134].mxu1  ;;  %vm4717_vm9 = vcmp.ge.f32.partialorder %v4653_v59, 0.0  ;;  %v4781_v19 = vmul.f32 0.01, %v4653_v59  ;;  %v9609_v43 = vld [vmem:[#allocation56_spill] sm:$0xff]  ;;  %v9612_v28 = vld [vmem:[#allocation17_spill] sm:$0xff] }
0x1c5b   :  { %5989 = vmatprep.subr.bf16.mxu0 %v4903_v15  ;;  %v5967_v36 = vpop.f32.mrb[135].mxu1  ;;  %v4876_v27 = vsel %vm4748_vm8, %v4684_v48, %v4812_v4  ;;  %v3885_v9 = vadd.f32 %v9196_v16, %v9609_v43  ;;  %v9611_v25 = vpack.c.bf16 %v9235_v53, %v9610_v6  ;;  %v9613_v2 = vld [vmem:[#allocation57_spill] sm:$0xff]  ;;  %v9614_v15 = vld [vmem:[#allocation18_spill] sm:$0xff]  ;;  %v7274_v43 = vld [vmem:[%s9480_s12] ss:$8 sps:$4 sm:$0xff]  }
0x1c5c   :  { %vm4718_vm10 = vcmp.ge.f32.partialorder %v4654_v32, 0.0  ;;  %v4782_v29 = vmul.f32 0.01, %v4654_v32  ;;  %v4685_v60 = vadd.f32 %v5965_v11, %v3883_v33  ;;  %5990 = vmatpush3.bf16.msra.mxu0 %v9604_v44  ;;  %v5968_v56 = vadd.f32 %v5967_v36, %v5966_v57  ;;  %v5857_v5 = vpop.f32.mrb[136].mxu0  ;;  %v7280_v6 = vld [vmem:[%s9480_s12 + $0x24] ss:$8 sps:$4 sm:$0xff]  }
0x1c5d   :  { %v5858_v12 = vpop.f32.mrb[137].mxu0  ;;  %v5024_v34 = vpack.c.bf16 %v4876_v27, %v4875_v37  ;;  %v4845_v38 = vsel %vm4717_vm9, %v4653_v59, %v4781_v19  ;;  %v3824_v63 = vadd.f32 %v9613_v2, %v9612_v28  ;;  %v9616_v27 = vpack.c.bf16 %v9243_v49, %v9245_v3 }
0x1c5e   :  { %v4686_v8 = vadd.f32 %v5968_v56, %v3884_v1  ;;  %v5859_v40 = vadd.f32 %v5858_v12, %v5857_v5  ;;  %v5860_v30 = vpop.f32.mrb[138].mxu0  ;;  %vm4749_vm7 = vcmp.ge.f32.partialorder %v4685_v60, 0.0  ;;  %v4813_v10 = vmul.f32 0.01, %v4685_v60  ;;  %v9617_v5 = vld [vmem:[#allocation54_spill] sm:$0xff] }
0x1c5f   :  { %6029 = vmatprep.subr.bf16.mxu1 %v5024_v34  ;;  %v5861_v62 = vpop.f32.mrb[139].mxu0  ;;  %v4846_v21 = vsel %vm4718_vm10, %v4654_v32, %v4782_v29  ;;  %v3823_v1 = vadd.f32 %v9615_v41, %v9614_v15  ;;  %v3887_v12 = vadd.f32 %v9617_v5, %v9614_v15  ;;  %v5104_v15 = vpop.permute.xlu0 %5103 }
0x1c60   :  { %vm4750_vm11 = vcmp.ge.f32.partialorder %v4686_v8, 0.0  ;;  %v4814_v26 = vmul.f32 0.01, %v4686_v8  ;;  %v4655_v58 = vadd.f32 %v5859_v40, %v3821_v18  ;;  %6030 = vmatpush3.bf16.msra.mxu1 %v9607_v17  ;;  %v5862_v46 = vadd.f32 %v5861_v62, %v5860_v30  ;;  %v5969_v24 = vpop.f32.mrb[136].mxu1  ;;  %v9618_v18 = vld [vmem:[#allocation58_spill] sm:$0xff]  ;;  %v9619_v62 = vld [vmem:[#allocation24_spill] sm:$0xff] }
0x1c61   :  { %v5970_v23 = vpop.f32.mrb[137].mxu1  ;;  %v4904_v50 = vpack.c.bf16 %v4846_v21, %v4845_v38  ;;  %v4877_v39 = vsel %vm4749_vm7, %v4685_v60, %v4813_v10  ;;  %v9620_v38 = vld [vmem:[#allocation19_spill] sm:$0xff] }
0x1c62   :  { %v4656_v35 = vadd.f32 %v5862_v46, %v3822_v55  ;;  %v5971_v48 = vadd.f32 %v5970_v23, %v5969_v24  ;;  %v5972_v42 = vpop.f32.mrb[138].mxu1  ;;  %vm4719_vm3 = vcmp.ge.f32.partialorder %v4655_v58, 0.0  ;;  %v4783_v20 = vmul.f32 0.01, %v4655_v58 }
0x1c63   :  { %5991 = vmatprep.subr.bf16.mxu0 %v4904_v50  ;;  %v5973_v7 = vpop.f32.mrb[139].mxu1  ;;  %v4878_v47 = vsel %vm4750_vm11, %v4686_v8, %v4814_v26  ;;  %v3888_v8 = vadd.f32 %v9618_v18, %v9612_v28  ;;  %v9621_v21 = vpack.c.bf16 %v9619_v62, %v9620_v38 }
0x1c64   :  { %vm4720_vm12 = vcmp.ge.f32.partialorder %v4656_v35, 0.0  ;;  %v4784_v13 = vmul.f32 0.01, %v4656_v35  ;;  %v4687_v45 = vadd.f32 %v5971_v48, %v3885_v9  ;;  %5992 = vmatpush3.bf16.msra.mxu0 %v9611_v25  ;;  %v5974_v4 = vadd.f32 %v5973_v7, %v5972_v42  ;;  %v5863_v16 = vpop.f32.mrb[140].mxu0  ;;  %v9623_v9 = vld [vmem:[#allocation23_spill] sm:$0xff] }
0x1c65   :  { %v5864_v59 = vpop.f32.mrb[141].mxu0  ;;  %v5025_v31 = vpack.c.bf16 %v4878_v47, %v4877_v39  ;;  %v4847_v53 = vsel %vm4719_vm3, %v4655_v58, %v4783_v20  ;;  %v7277_v7 = vld [vmem:[%s9480_s12 + $0x14] ss:$8 sps:$4 sm:$0xff]   ;;  %v9626_v47 = vmov 0.0|0.0   ;;  %v7282_v25 = vld [vmem:[%s9480_s12 + $0x20] ss:$8 sps:$4 sm:$0xff]  }
0x1c66   :  { %v4688_v51 = vadd.f32 %v5974_v4, %v3886_v61  ;;  %v5865_v33 = vadd.f32 %v5864_v59, %v5863_v16  ;;  %v5866_v32 = vpop.f32.mrb[142].mxu0  ;;  %vm4751_vm13 = vcmp.ge.f32.partialorder %v4687_v45, 0.0  ;;  %v4815_v11 = vmul.f32 0.01, %v4687_v45  ;;  %v7283_v4 = vld [vmem:[%s9480_s12 + $0x34] ss:$8 sps:$4 sm:$0xff]  }
0x1c67   :  { %6031 = vmatprep.subr.bf16.mxu1 %v5025_v31  ;;  %v5867_v57 = vpop.f32.mrb[143].mxu0  ;;  %v4848_v19 = vsel %vm4720_vm12, %v4656_v35, %v4784_v13  ;;  %v9622_v61 = vpack.c.bf16 %v9259_v22, %v9261_v52  ;;  %v9624_v35 = vld [vmem:[#allocation28_spill] sm:$0xff]  ;;  %v9627_v52 = vld [vmem:[#allocation22_spill] sm:$0xff]  ;;  %v9628_v22 = vld [vmem:[#allocation27_spill] sm:$0xff]  ;;  %v9630_v59 = vmov 0.0  }
0x1c68   :  { %vm4752_vm14 = vcmp.ge.f32.partialorder %v4688_v51, 0.0  ;;  %v4816_v36 = vmul.f32 0.01, %v4688_v51  ;;  %v4657_v37 = vadd.f32 %v5865_v33, %v3823_v1  ;;  %6032 = vmatpush3.bf16.msra.mxu1 %v9616_v27  ;;  %v5868_v29 = vadd.f32 %v5867_v57, %v5866_v32  ;;  %v5975_v60 = vpop.f32.mrb[140].mxu1  ;;  %v7285_v16 = vld [vmem:[%s9480_s12 + $0x30] ss:$8 sps:$4 sm:$0xff]   ;;  %v5109_v32 = vpop.permute.xlu1 %5108 }
0x1c69   :  { %v5976_v44 = vpop.f32.mrb[141].mxu1  ;;  %v4905_v56 = vpack.c.bf16 %v4848_v19, %v4847_v53  ;;  %v4879_v49 = vsel %vm4751_vm13, %v4687_v45, %v4815_v11  ;;  %v9625_v48 = vpack.c.bf16 %v9623_v9, %v9624_v35  ;;  %v9629_v13 = vpack.c.bf16 %v9627_v52, %v9628_v22  ;;  %v7279_v45 = vld [vmem:[%s9480_s12 + $0x10] ss:$8 sps:$4 sm:$0xff]  }
0x1c6a   :  { %v4785_v34 = vmul.f32 0.01, %v4657_v37  ;;  %v4658_v54 = vadd.f32 %v5868_v29, %v3824_v63  ;;  %v5977_v55 = vadd.f32 %v5976_v44, %v5975_v60  ;;  %v5978_v0 = vpop.f32.mrb[142].mxu1  ;;  %vm4721_vm15 = vcmp.ge.f32.partialorder %v4657_v37, 0.0 }
0x1c6b   :  { %5993 = vmatprep.subr.bf16.mxu0 %v4905_v56  ;;  %v5979_v40 = vpop.f32.mrb[143].mxu1  ;;  %v4880_v3 = vsel %vm4752_vm14, %v4688_v51, %v4816_v36 }
0x1c6c   :  { %vm4722_vm0 = vcmp.ge.f32.partialorder %v4658_v54, 0.0  ;;  %v4786_v30 = vmul.f32 0.01, %v4658_v54  ;;  %v4689_v10 = vadd.f32 %v5977_v55, %v3887_v12  ;;  %5994 = vmatpush3.bf16.msra.mxu0 %v9621_v21  ;;  %v5980_v26 = vadd.f32 %v5979_v40, %v5978_v0  ;;  %v5114_v55 = vpop.permute.xlu0 %5113 }
0x1c6d   :  { %v5026_v58 = vpack.c.bf16 %v4880_v3, %v4879_v49  ;;  %v4849_v24 = vsel %vm4721_vm15, %v4657_v37, %v4785_v34 }
0x1c6e   :  { %v4817_v17 = vmul.f32 0.01, %v4689_v10  ;;  %v4690_v46 = vadd.f32 %v5980_v26, %v3888_v8  ;;  %v4850_v23 = vsel %vm4722_vm0, %v4658_v54, %v4786_v30  ;;  %vm4753_vm1 = vcmp.ge.f32.partialorder %v4689_v10, 0.0 }
0x1c6f   :  { %6033 = vmatprep.subr.bf16.mxu1 %v5026_v58  ;;  %v4906_v50 = vpack.c.bf16 %v4850_v23, %v4849_v24 }
0x1c70   :  { %vm4754_vm4 = vcmp.ge.f32.partialorder %v4690_v46, 0.0  ;;  %v4818_v14 = vmul.f32 0.01, %v4690_v46  ;;  %6034 = vmatpush3.bf16.msra.mxu1 %v9622_v61  ;;  %v4881_v42 = vsel %vm4753_vm1, %v4689_v10, %v4817_v17  ;;  %v5119_v10 = vpop.permute.xlu1 %5118 }
0x1c71   :  { %5995 = vmatprep.subr.bf16.mxu0 %v4906_v50 }
0x1c72   :  { %5996 = vmatpush3.bf16.msra.mxu0 %v9625_v48  ;;  %v4882_v20 = vsel %vm4754_vm4, %v4690_v46, %v4818_v14 }
0x1c73   :  { %v5027_v39 = vpack.c.bf16 %v4882_v20, %v4881_v42  ;;  %6777 = vmatprep.subr.bf16.mxu0 %v9626_v47 }
0x1c75   :  { %4980 = vmatmul.mubr.bf16.vlgmr.msra.gmra.mrb[144].mxu0 %v7274_v43  ;;  %6035 = vmatprep.subr.bf16.mxu1 %v5027_v39  ;;  %v5124_v39 = vpop.permute.xlu0 %5123 }
0x1c76   :  { %6036 = vmatpush3.bf16.msra.mxu1 %v9629_v13  ;;  %4987 = vmatprep.mubr.bf16.mxu0 %v7277_v7 }
0x1c77   :  { %6789 = vmatprep.subr.bf16.mxu1 %v9626_v47 }
0x1c79   :  { %5061 = vmatmul.mubr.bf16.vlgmr.msra.gmra.mrb[144].mxu1 %v7274_v43 }
0x1c7a   :  { %5068 = vmatprep.mubr.bf16.mxu1 %v7277_v7 }
0x1c7d   :  { %4988 = vmatmul.mubr.bf16.gmra.mrb[148].mxu0 %v7279_v45 }
0x1c7e   :  { %4995 = vmatprep.mubr.bf16.mxu0 %v7280_v6 }
0x1c81   :  { %5069 = vmatmul.mubr.bf16.gmra.mrb[148].mxu1 %v7279_v45 }
0x1c82   :  { %5076 = vmatprep.mubr.bf16.mxu1 %v7280_v6 }
0x1c85   :  { %4996 = vmatmul.mubr.bf16.gmra.mrb[152].mxu0 %v7282_v25 }
0x1c86   :  { %5003 = vmatprep.mubr.bf16.mxu0 %v7283_v4 }
0x1c89   :  { %5077 = vmatmul.mubr.bf16.gmra.mrb[152].mxu1 %v7282_v25 }
0x1c8a   :  { %5084 = vmatprep.mubr.bf16.mxu1 %v7283_v4 }
0x1c8d   :  { %5004 = vmatmul.mubr.bf16.gmra.mrb[156].mxu0 %v7285_v16 }
0x1c8e   :  { %6533 = vmatprep.mubr.msk.f32.mxu0 %vm7462_vm6, %v9630_v59 }
0x1c91   :  { %5085 = vmatmul.mubr.bf16.gmra.mrb[156].mxu1 %v7285_v16  ;;  %v5129_v16 = vpop.permute.xlu1 %5128 }
0x1c92   :  { %6552 = vmatprep.mubr.msk.f32.mxu1 %vm7462_vm6, %v9630_v59 }
0x1d48   :  { %v5997_v31 = vpop.f32.mrb[144].mxu0 }
0x1d49   :  { %v5998_v28 = vpop.f32.mrb[145].mxu0 }
0x1d4a   :  { %v5999_v2 = vadd.f32 %v5998_v28, %v5997_v31  ;;  %v6000_v63 = vpop.f32.mrb[146].mxu0 }
0x1d4b   :  { %v6001_v41 = vpop.f32.mrb[147].mxu0 }
0x1d4c   :  { %v5141_v1 = vadd.f32 %v5999_v2, %v5104_v15  ;;  %v6002_v51 = vadd.f32 %v6001_v41, %v6000_v63  ;;  %v6037_v33 = vpop.f32.mrb[144].mxu1 }
0x1d4d   :  { %v6038_v11 = vpop.f32.mrb[145].mxu1 }
0x1d4e   :  { %v5173_v57 = vmul.f32 0.01, %v5141_v1  ;;  %v5142_v53 = vadd.f32 %v6002_v51, %v5109_v32  ;;  %v6039_v19 = vadd.f32 %v6038_v11, %v6037_v33  ;;  %v6040_v36 = vpop.f32.mrb[146].mxu1  ;;  %vm5157_vm5 = vcmp.ge.f32.partialorder %v5141_v1, 0.0 }
0x1d4f   :  { %v6041_v37 = vpop.f32.mrb[147].mxu1 }
0x1d50   :  { %vm5158_vm8 = vcmp.ge.f32.partialorder %v5142_v53, 0.0  ;;  %v5174_v27 = vmul.f32 0.01, %v5142_v53  ;;  %v5149_v29 = vadd.f32 %v6039_v19, %v5104_v15  ;;  %v6003_v60 = vpop.f32.mrb[148].mxu0  ;;  %v6042_v44 = vadd.f32 %v6041_v37, %v6040_v36 }
0x1d51   :  { %v6004_v56 = vpop.f32.mrb[149].mxu0  ;;  %v5189_v5 = vsel %vm5157_vm5, %v5141_v1, %v5173_v57 }
0x1d52   :  { %v5190_v12 = vsel %vm5158_vm8, %v5142_v53, %v5174_v27  ;;  %v6005_v34 = vadd.f32 %v6004_v56, %v6003_v60  ;;  %v6006_v54 = vpop.f32.mrb[150].mxu0  ;;  %v5150_v0 = vadd.f32 %v6042_v44, %v5109_v32  ;;  %v5181_v40 = vmul.f32 0.01, %v5149_v29  ;;  %v5134_v60 = vpop.permute.xlu0 %5133 }
0x1d53   :  { %v6007_v18 = vpop.f32.mrb[151].mxu0  ;;  %v6778_v8 = vpack.c.bf16 %v5190_v12, %v5189_v5  ;;  %vm5165_vm6 = vcmp.ge.f32.partialorder %v5149_v29, 0.0  ;;  %vm5357_vm8 = vcmask 320512  }
0x1d54   :  { %v5143_v49 = vadd.f32 %v6005_v34, %v5114_v55  ;;  %v6008_v3 = vadd.f32 %v6007_v18, %v6006_v54  ;;  %v6043_v30 = vpop.f32.mrb[148].mxu1  ;;  %vm5166_vm9 = vcmp.ge.f32.partialorder %v5150_v0, 0.0  ;;  %v5182_v62 = vmul.f32 0.01, %v5150_v0 }
0x1d55   :  { %v6044_v38 = vpop.f32.mrb[149].mxu1  ;;  %6779 = vmatpush3.bf16.msra.mxu0 %v6778_v8  ;;  %v5197_v23 = vsel %vm5165_vm6, %v5149_v29, %v5181_v40 }
0x1d56   :  { %v5175_v21 = vmul.f32 0.01, %v5143_v49  ;;  %v5144_v26 = vadd.f32 %v6008_v3, %v5119_v10  ;;  %v6045_v58 = vadd.f32 %v6044_v38, %v6043_v30  ;;  %v6046_v17 = vpop.f32.mrb[150].mxu1  ;;  %6780 = vmatprep.subr.bf16.mxu0 %v9626_v47  ;;  %v5198_v46 = vsel %vm5166_vm9, %v5150_v0, %v5182_v62  ;;  %v5139_v0 = vpop.permute.xlu1 %5138 }
0x1d57   :  { %vm5159_vm10 = vcmp.ge.f32.partialorder %v5143_v49, 0.0  ;;  %v6047_v24 = vpop.f32.mrb[151].mxu1  ;;  %v6790_v35 = vpack.c.bf16 %v5198_v46, %v5197_v23 }
0x1d58   :  { %vm5160_vm7 = vcmp.ge.f32.partialorder %v5144_v26, 0.0  ;;  %v5176_v50 = vmul.f32 0.01, %v5144_v26  ;;  %v5151_v14 = vadd.f32 %v6045_v58, %v5114_v55  ;;  %v6009_v61 = vpop.f32.mrb[152].mxu0  ;;  %v6048_v43 = vadd.f32 %v6047_v24, %v6046_v17 }
0x1d59   :  { %v6010_v9 = vpop.f32.mrb[153].mxu0  ;;  %v5191_v48 = vsel %vm5159_vm10, %v5143_v49, %v5175_v21  ;;  %6791 = vmatpush3.bf16.msra.mxu1 %v6790_v35 }
0x1d5a   :  { %v5192_v42 = vsel %vm5160_vm7, %v5144_v26, %v5176_v50  ;;  %v6011_v20 = vadd.f32 %v6010_v9, %v6009_v61  ;;  %v6012_v7 = vpop.f32.mrb[154].mxu0  ;;  %v5152_v52 = vadd.f32 %v6048_v43, %v5119_v10  ;;  %v5183_v45 = vmul.f32 0.01, %v5151_v14  ;;  %6792 = vmatprep.subr.bf16.mxu1 %v9626_v47  ;;  %v5205_v43 = vld [vmem:[%s9482_s14] sm:$0x3]  ;;  %s7412_s14 = scalar_lea.vmem %s5366_s10, 64 }
0x1d5b   :  { %v6013_v22 = vpop.f32.mrb[155].mxu0  ;;  %v6781_v13 = vpack.c.bf16 %v5192_v42, %v5191_v48  ;;  %vm5167_vm11 = vcmp.ge.f32.partialorder %v5151_v14, 0.0  ;;  %v5353_v42 = vpop.permute.xlu0 %5352  ;;  %p7413_p12 = scmp.ne.s32.totalorder %s5366_s10, %s7412_s14  ;;  %p7418_p0 = scmp.lt.s32.totalorder %s7412_s14, %s7412_s14 }
0x1d5c   :  { %v5145_v6 = vadd.f32 %v6011_v20, %v5124_v39  ;;  %v6014_v25 = vadd.f32 %v6013_v22, %v6012_v7  ;;  %v6049_v4 = vpop.f32.mrb[152].mxu1  ;;  %vm5168_vm3 = vcmp.ge.f32.partialorder %v5152_v52, 0.0  ;;  %v5184_v59 = vmul.f32 0.01, %v5152_v52 }
0x1d5d   :  { %v6050_v31 = vpop.f32.mrb[153].mxu1  ;;  %6782 = vmatpush3.bf16.msra.mxu0 %v6781_v13  ;;  %v5199_v51 = vsel %vm5167_vm11, %v5151_v14, %v5183_v45  ;;  %p7419_p1 = por %p7418_p0, %p7417_p13 }
0x1d5e   :  { %v5177_v28 = vmul.f32 0.01, %v5145_v6  ;;  %v5146_v2 = vadd.f32 %v6014_v25, %v5129_v16  ;;  %v6051_v63 = vadd.f32 %v6050_v31, %v6049_v4  ;;  %v6052_v15 = vpop.f32.mrb[154].mxu1  ;;  %6783 = vmatprep.subr.bf16.mxu0 %v9626_v47  ;;  %v5200_v41 = vsel %vm5168_vm3, %v5152_v52, %v5184_v59 }
0x1d5f   :  { %vm5161_vm12 = vcmp.ge.f32.partialorder %v5145_v6, 0.0  ;;  %v6053_v1 = vpop.f32.mrb[155].mxu1  ;;  %v6793_v19 = vpack.c.bf16 %v5200_v41, %v5199_v51  ;;  %p7420_p2 = pnand %p7419_p1, %p7413_p12 }
0x1d60   :  { %vm5162_vm13 = vcmp.ge.f32.partialorder %v5146_v2, 0.0  ;;  %v5178_v33 = vmul.f32 0.01, %v5146_v2  ;;  %v5153_v32 = vadd.f32 %v6051_v63, %v5124_v39  ;;  %v6015_v11 = vpop.f32.mrb[156].mxu0  ;;  %v6054_v57 = vadd.f32 %v6053_v1, %v6052_v15 }
0x1d61   :  { %v6016_v53 = vpop.f32.mrb[157].mxu0  ;;  %v5193_v36 = vsel %vm5161_vm12, %v5145_v6, %v5177_v28  ;;  %6794 = vmatpush3.bf16.msra.mxu1 %v6793_v19 }
0x1d62   :  { %v5194_v37 = vsel %vm5162_vm13, %v5146_v2, %v5178_v33  ;;  %v6017_v27 = vadd.f32 %v6016_v53, %v6015_v11  ;;  %v6018_v29 = vpop.f32.mrb[158].mxu0  ;;  %v5154_v44 = vadd.f32 %v6054_v57, %v5129_v16  ;;  %v5185_v12 = vmul.f32 0.01, %v5153_v32  ;;  %6795 = vmatprep.subr.bf16.mxu1 %v9626_v47 }
0x1d63   :  { %v6019_v56 = vpop.f32.mrb[159].mxu0  ;;  %v6784_v5 = vpack.c.bf16 %v5194_v37, %v5193_v36  ;;  %vm5169_vm14 = vcmp.ge.f32.partialorder %v5153_v32, 0.0 }
0x1d64   :  { %v5147_v34 = vadd.f32 %v6017_v27, %v5134_v60  ;;  %v6020_v54 = vadd.f32 %v6019_v56, %v6018_v29  ;;  %v6055_v55 = vpop.f32.mrb[156].mxu1  ;;  %vm5170_vm15 = vcmp.ge.f32.partialorder %v5154_v44, 0.0  ;;  %v5186_v18 = vmul.f32 0.01, %v5154_v44 }
0x1d65   :  { %v6056_v8 = vpop.f32.mrb[157].mxu1  ;;  %6785 = vmatpush3.bf16.msra.mxu0 %v6784_v5  ;;  %v5201_v38 = vsel %vm5169_vm14, %v5153_v32, %v5185_v12 }
0x1d66   :  { %v5179_v40 = vmul.f32 0.01, %v5147_v34  ;;  %v5148_v49 = vadd.f32 %v6020_v54, %v5139_v0  ;;  %v6057_v3 = vadd.f32 %v6056_v8, %v6055_v55  ;;  %v6058_v30 = vpop.f32.mrb[158].mxu1  ;;  %6786 = vmatprep.subr.bf16.mxu0 %v9626_v47  ;;  %v5202_v10 = vsel %vm5170_vm15, %v5154_v44, %v5186_v18 }
0x1d67   :  { %vm5163_vm0 = vcmp.ge.f32.partialorder %v5147_v34, 0.0  ;;  %v6059_v62 = vpop.f32.mrb[159].mxu1  ;;  %v6796_v17 = vpack.c.bf16 %v5202_v10, %v5201_v38 }
0x1d68   :  { %vm5164_vm1 = vcmp.ge.f32.partialorder %v5148_v49, 0.0  ;;  %v5180_v21 = vmul.f32 0.01, %v5148_v49  ;;  %v5155_v26 = vadd.f32 %v6057_v3, %v5134_v60  ;;  %v6060_v58 = vadd.f32 %v6059_v62, %v6058_v30 }
0x1d69   :  { %v5195_v46 = vsel %vm5163_vm0, %v5147_v34, %v5179_v40  ;;  %6797 = vmatpush3.bf16.msra.mxu1 %v6796_v17 }
0x1d6a   :  { %v5196_v24 = vsel %vm5164_vm1, %v5148_v49, %v5180_v21  ;;  %v5187_v23 = vmul.f32 0.01, %v5155_v26  ;;  %v5156_v50 = vadd.f32 %v6060_v58, %v5139_v0  ;;  %vm5171_vm4 = vcmp.ge.f32.partialorder %v5155_v26, 0.0  ;;  %6798 = vmatprep.subr.bf16.mxu1 %v9626_v47 }
0x1d6b   :  { %v6787_v14 = vpack.c.bf16 %v5196_v24, %v5195_v46 }
0x1d6c   :  { %vm5172_vm5 = vcmp.ge.f32.partialorder %v5156_v50, 0.0  ;;  %v5188_v61 = vmul.f32 0.01, %v5156_v50  ;;  %v5203_v9 = vsel %vm5171_vm4, %v5155_v26, %v5187_v23 }
0x1d6d   :  { %6788 = vmatpush3.bf16.msra.mxu0 %v6787_v14 }
0x1d6e   :  { %v5204_v35 = vsel %vm5172_vm5, %v5156_v50, %v5188_v61 }
0x1d6f   :  { %v6799_v48 = vpack.c.bf16 %v5204_v35, %v5203_v9 }
0x1d70   :  { %6534 = vmatmul.mubr.msk.f32.vlgmr.msra.gmra.mrb[160].mxu0 %vm2689_vm2, %v5205_v43 }
0x1d71   :  { %6800 = vmatpush3.bf16.msra.mxu1 %v6799_v48 }
0x1d74   :  { %6553 = vmatmul.mubr.msk.f32.vlgmr.msra.gmra.mrb[160].mxu1 %vm2689_vm2, %v5205_v43 }
0x1e43   :  { %v5275_v20 = vpop.f32.mrb[160].mxu0 }
0x1e44   :  { %v5355_v7 = vadd.f32 %v5353_v42, %v5275_v20  ;;  %v6535_v47 = vpop.f32.mrb[161].mxu0 }
0x1e46   :  { %5358 = vst.msk [vmem:[#allocation12] sm:$0x3] %vm5357_vm8, %v5355_v7 }
0x1e47   :  { %v5345_v39 = vpop.f32.mrb[160].mxu1 }
0x1e48   :  { %v5356_v52 = vadd.f32 %v5353_v42, %v5345_v39  ;;  %v6554_v22 = vpop.f32.mrb[161].mxu1 }
0x1e4a   :  { %5359 = vst.msk [vmem:[#allocation12 + $0x2] sm:$0x3] %vm5357_vm8, %v5356_v52 }
0x1e4b   :  { %7423 = shalt.err (!%p7420_p2)
}
0x1e4c   :  { %s7424_s4 = scalar_lea.hbm %s9484_s16, 64 }
0x1e4d   :  { %p7425_p3 = scmp.ne.s32.totalorder %s9484_s16, %s7424_s4  ;;  %p7428_p4 = scmp.lt.u32.totalorder %s7424_s4, %s9484_s16 }
0x1e4f   :  { %p7430_p5 = pnand %p7428_p4, %p7425_p3 }
0x1e51   :  { %7433 = shalt.err (!%p7430_p5)
}
0x1e52   :  { %s7476_s8 = smov 32   ;;  %s7477_s18 = smov 2  }
0x1e53   :  { %5371 = dma.vmem_to_hbm [thread:$0]  %s5366_s10, 64, %s9484_s16, [#allocation5], %s7476_s8, %s7476_s8, %s7477_s18  }
0x1e54   :  { %7440 = dma.done.wait [#allocation5], 64  }
0x1e55   :  { %7441 = vsyncadd [#allocation5], 4294967232 }
0x1e56   :  { %5375 = vsyncpa [#allocation4], 1 }
0x1e57   :  { %5376 = vsyncpa [#allocation7], 1 }
0x1e58   :  { %5377 = vsyncpa [#allocation10], 1 }
0x1e59   :  { %5378 = vsyncpa [#allocation5], 1 }

</bundles_post_ra>
